<compile_context>
chip_gen: v7x
topology: tpu7x:2x2x1
jax: 0.10.0
libtpu: 0.0.40
codegen_flags: <defaults>
</compile_context>

<pallas_src>
import functools
import math

import jax
import jax.numpy as jnp
from jax import lax
from jax.experimental import pallas as pl
from jax.experimental.pallas import tpu as pltpu

# small demo sizes consistent with the module (input_dim, hidden_dim scaled down)
INPUT_DIM = 64
HIDDEN_DIM = 32
NUM_LAYERS = 2
BATCH = 2
SEQ = 8

# fused hidden slab (2H) and each gate group padded to a multiple of 128 lanes so every
# per-step gate slice is a whole-vreg selection.
GPAD = ((2 * HIDDEN_DIM + 127) // 128) * 128

_VMEM = pl.BlockSpec(memory_space=pltpu.MemorySpace.VMEM)


# ----------------------------------------------------------------------------
# Single fused encoder kernel
# ----------------------------------------------------------------------------
def _encoder_kernel(x_ref,
                    wih0_ref, whh0_ref, bih0_ref, bhh0_ref,
                    wih1_ref, whh1_ref, bih1_ref, bhh1_ref,
                    gamma_ref, beta_ref, w1_ref, b1_ref, w2_ref,
                    out_ref,
                    gi_scr, y_scr,
                    *, seq_len, batch, hidden):
    # x_ref:   (B, T, Din)                batch-first input (no wrapper transpose)
    # wih*:    (Din|GPAD, 3*GPAD)         fused + padded input->gate weights
    # whh*:    (GPAD, 3*GPAD)             fused block-diagonal hidden->gate weights
    # bih*/bhh*: (1, 3*GPAD)              fused + padded biases (pad lanes zero)
    # gamma/beta: (1, 1, GPAD)   w1: (GPAD, H)   b1: (1, H)   w2: (1, H)
    # out_ref: (B, GPAD)                  valid lanes [0:2H), pad lanes zero
    # gi_scr:  (T, B, 3*GPAD)   y_scr: (T, B, GPAD)
    H = hidden
    T = seq_len
    B = batch
    GP = y_scr.shape[-1]                 # padded hidden-slab / gate-group width
    GW = 3 * GP

    # lane masks, built once and reused by both layers
    gcol = lax.broadcasted_iota(jnp.int32, (1, GW), 1)
    gate_fwd_mask = (gcol % GP) < H                      # fwd-direction lanes, gate slab
    ycol = lax.broadcasted_iota(jnp.int32, (1, GP), 1)
    y_fwd_mask = ycol < H                                # h_f lanes, hidden slab
    vcol = lax.broadcasted_iota(jnp.int32, (1, 1, GP), 2)
    y_valid_mask = vcol < 2 * H                          # non-padding lanes

    def merge_time_pairs(ref, mask):
        # ref[t] <- where(mask, ref[t], ref[T-1-t]) for all t, as in-place pair swaps.
        for t in range(T // 2):
            u = T - 1 - t
            a = ref[t]
            b = ref[u]
            ref[t] = jnp.where(mask, a, b)
            ref[u] = jnp.where(mask, b, a)

    def run_layer(load_x, wih_ref, whh_ref, bih_ref, bhh_ref):
        # hoisted input projection gi[t] = x[t] @ W_ih + b_ih (off the serial path)
        for t in range(T):
            gi_scr[t] = (jnp.dot(load_x(t), wih_ref[...],
                                 preferred_element_type=jnp.float32) + bih_ref[...])
        # pre-merge fwd/bwd time order so the recurrence does no per-step select
        merge_time_pairs(gi_scr, gate_fwd_mask)

        whh = whh_ref[...]
        bhh = jnp.broadcast_to(bhh_ref[...], (B, GW))    # broadcast hoisted out of loop

        def step(i, h):
            gi = gi_scr[i]                                             # aligned (B, 3GP)
            gh = jnp.dot(h, whh, preferred_element_type=jnp.float32) + bhh
            r = jax.nn.sigmoid(gi[:, 0:GP] + gh[:, 0:GP])
            z = jax.nn.sigmoid(gi[:, GP:2 * GP] + gh[:, GP:2 * GP])
            n = jnp.tanh(gi[:, 2 * GP:3 * GP] + r * gh[:, 2 * GP:3 * GP])
            h_new = (1.0 - z) * n + z * h                              # pad lanes stay 0
            y_scr[i] = h_new                                           # one aligned store
            return h_new

        lax.fori_loop(0, T, step, jnp.zeros((B, GP), jnp.float32), unroll=True)
        # re-time-align the backward half: y[t] = [h_f(t) | h_b(t) | 0]
        merge_time_pairs(y_scr, y_fwd_mask)

    run_layer(lambda t: x_ref[:, t, :], wih0_ref, whh0_ref, bih0_ref, bhh0_ref)
    run_layer(lambda t: y_scr[t],       wih1_ref, whh1_ref, bih1_ref, bhh1_ref)

    # LayerNorm over the 2H valid lanes (pad lanes masked / kept at zero)
    y = y_scr[...]                                                     # (T, B, GP)
    inv_dim = 1.0 / (2 * H)
    mean = jnp.sum(y, axis=-1, keepdims=True) * inv_dim
    d = jnp.where(y_valid_mask, y - mean, 0.0)
    var = jnp.sum(d * d, axis=-1, keepdims=True) * inv_dim
    yn = d * lax.rsqrt(var + 1e-5) * gamma_ref[...] + beta_ref[...]    # pad lanes -> 0

    # attention scores: (2H -> H) projection on the MXU, 1-wide head as a VPU reduce
    scores = []
    for t in range(T):
        hid = jnp.tanh(jnp.dot(yn[t], w1_ref[...],
                               preferred_element_type=jnp.float32) + b1_ref[...])
        scores.append(jnp.sum(hid * w2_ref[...], axis=-1, keepdims=True))     # (B, 1)

    # softmax over time with a per-batch max, fused with the weighted sum
    m = scores[0]
    for t in range(1, T):
        m = jnp.maximum(m, scores[t])
    num = jnp.zeros((B, GP), jnp.float32)
    den = jnp.zeros((B, 1), jnp.float32)
    for t in range(T):
        e = jnp.exp(scores[t] - m)
        num = num + e * yn[t]
        den = den + e
    out_ref[...] = num / den                       # (B, GP); pad lanes remain zero


# ----------------------------------------------------------------------------
# Weight fusion (per-direction PyTorch layout -> fused/padded kernel layout)
# ----------------------------------------------------------------------------
def _fuse_gate_cols(a_f, a_b, H, GP):
    # a_f/a_b: (rows, 3H), gate columns [r|z|n]; per group emit [fwd | bwd | zero pad].
    rows = a_f.shape[0]
    pad = jnp.zeros((rows, GP - 2 * H), jnp.float32)
    groups = []
    for g in range(3):
        groups.append(jnp.concatenate(
            [a_f[:, g * H:(g + 1) * H], a_b[:, g * H:(g + 1) * H], pad], axis=1))
    return jnp.concatenate(groups, axis=1)                     # (rows, 3*GP)


def _fuse_layer(p_f, p_b, H, in_rows, GP):
    wih = _fuse_gate_cols(p_f["wih_t"], p_b["wih_t"], H, GP)   # (in_dim, 3GP)
    in_dim = wih.shape[0]
    if in_rows > in_dim:
        wih = jnp.concatenate(
            [wih, jnp.zeros((in_rows - in_dim, 3 * GP), jnp.float32)], axis=0)
    # hidden->gates: block-diagonal over the fused [h_f | h_b | pad] slab per gate group
    zer = jnp.zeros((H, H), jnp.float32)
    groups = []
    for g in range(3):
        wf = p_f["whh_t"][:, g * H:(g + 1) * H]
        wb = p_b["whh_t"][:, g * H:(g + 1) * H]
        blk = jnp.concatenate([jnp.concatenate([wf, zer], axis=1),
                               jnp.concatenate([zer, wb], axis=1)], axis=0)    # (2H, 2H)
        blk = jnp.concatenate([blk, jnp.zeros((2 * H, GP - 2 * H), jnp.float32)], axis=1)
        groups.append(blk)
    whh = jnp.concatenate(groups, axis=1)                                      # (2H, 3GP)
    whh = jnp.concatenate([whh, jnp.zeros((GP - 2 * H, 3 * GP), jnp.float32)], axis=0)
    bih = _fuse_gate_cols(p_f["b_ih"].reshape(1, 3 * H),
                          p_b["b_ih"].reshape(1, 3 * H), H, GP)
    bhh = _fuse_gate_cols(p_f["b_hh"].reshape(1, 3 * H),
                          p_b["b_hh"].reshape(1, 3 * H), H, GP)
    return {"wih": wih, "whh": whh, "bih": bih, "bhh": bhh}


def fuse_params(params):
    """Fold per-direction weights into the fused/padded kernel layout (call once)."""
    H = HIDDEN_DIM
    GP = GPAD
    assert len(params["gru"]) == 2, "kernel is specialized for num_layers=2"
    l0 = _fuse_layer(params["gru"][0][0], params["gru"][0][1], H, in_rows=INPUT_DIM, GP=GP)
    l1 = _fuse_layer(params["gru"][1][0], params["gru"][1][1], H, in_rows=GP, GP=GP)
    pad = jnp.zeros((GP - 2 * H,), jnp.float32)
    gamma = jnp.concatenate([params["norm"]["gamma"], pad]).reshape(1, 1, GP)
    beta = jnp.concatenate([params["norm"]["beta"], pad]).reshape(1, 1, GP)
    w1 = jnp.concatenate([params["attn"]["w1"],
                          jnp.zeros((GP - 2 * H, H), jnp.float32)], axis=0)    # (GP, H)
    # attn's final scalar bias b2 is dropped in-kernel (softmax is shift-invariant).
    return {"l0": l0, "l1": l1, "gamma": gamma, "beta": beta, "w1": w1,
            "b1": params["attn"]["b1"].reshape(1, H),
            "w2": params["attn"]["w2"].reshape(1, H)}


# ----------------------------------------------------------------------------
# Full forward (single pallas_call)
# ----------------------------------------------------------------------------
def sequence_encoder_forward(x, fused):
    if x.ndim == 4:
        x = jnp.squeeze(x, axis=1)                 # matches x.squeeze(1)
    x = x.astype(jnp.float32)
    B, T, _ = x.shape
    H = HIDDEN_DIM
    GP = GPAD

    kernel = functools.partial(_encoder_kernel, seq_len=T, batch=B, hidden=H)
    out = pl.pallas_call(
        kernel,
        out_shape=jax.ShapeDtypeStruct((B, GP), jnp.float32),
        in_specs=[_VMEM] * 14,
        out_specs=_VMEM,
        scratch_shapes=[
            pltpu.VMEM((T, B, 3 * GP), jnp.float32),   # merged gate pre-activations
            pltpu.VMEM((T, B, GP), jnp.float32),       # per-layer outputs / merged y
        ],
        compiler_params=pltpu.CompilerParams(vmem_limit_bytes=32 * 1024 * 1024),
    )(x,
      fused["l0"]["wih"], fused["l0"]["whh"], fused["l0"]["bih"], fused["l0"]["bhh"],
      fused["l1"]["wih"], fused["l1"]["whh"], fused["l1"]["bih"], fused["l1"]["bhh"],
      fused["gamma"], fused["beta"], fused["w1"], fused["b1"], fused["w2"])
    return out[:, :2 * H]


# ----------------------------------------------------------------------------
# Deterministic parameter init (shapes mirror nn.GRU / nn.LayerNorm / nn.Linear)
# ----------------------------------------------------------------------------
def init_params(key):
    H = HIDDEN_DIM
    keys = iter(jax.random.split(key, 64))

    def uni(shape, scale):
        return jax.random.uniform(next(keys), shape, jnp.float32, -scale, scale)

    gru = []
    in_dim = INPUT_DIM
    s = 1.0 / math.sqrt(H)
    for _ in range(NUM_LAYERS):
        dirs = []
        for _ in range(2):  # forward, backward
            dirs.append({
                "wih_t": uni((in_dim, 3 * H), s),   # W_ih^T (Din, 3H), gate cols [r|z|n]
                "whh_t": uni((H, 3 * H), s),        # W_hh^T (H, 3H)
                "b_ih": uni((3 * H,), s),
                "b_hh": uni((3 * H,), s),
            })
        gru.append(dirs)
        in_dim = 2 * H

    norm = {"gamma": jnp.ones((2 * H,), jnp.float32),
            "beta": jnp.zeros((2 * H,), jnp.float32)}
    attn = {"w1": uni((2 * H, H), 1.0 / math.sqrt(2 * H)),
            "b1": uni((H,), 1.0 / math.sqrt(2 * H)),
            "w2": uni((H, 1), 1.0 / math.sqrt(H)),
            "b2": uni((1,), 1.0 / math.sqrt(H))}
    return {"gru": gru, "norm": norm, "attn": attn}


# ----------------------------------------------------------------------------
# Pure-JAX reference (same math, per-direction) for a sanity check
# ----------------------------------------------------------------------------
def reference_forward(x, params):
    if x.ndim == 4:
        x = jnp.squeeze(x, axis=1)
    h_in = x.astype(jnp.float32)                  # (B, T, D)
    H = HIDDEN_DIM
    for layer in params["gru"]:
        outs = []
        for d, p in enumerate(layer):
            reverse = (d == 1)
            b, t, _ = h_in.shape
            h = jnp.zeros((b, H), jnp.float32)
            out_t = [None] * t
            order = range(t - 1, -1, -1) if reverse else range(t)
            for ti in order:
                xt = h_in[:, ti, :]
                gi = xt @ p["wih_t"] + p["b_ih"]
                gh = h @ p["whh_t"] + p["b_hh"]
                r = jax.nn.sigmoid(gi[:, :H] + gh[:, :H])
                z = jax.nn.sigmoid(gi[:, H:2 * H] + gh[:, H:2 * H])
                n = jnp.tanh(gi[:, 2 * H:] + r * gh[:, 2 * H:])
                h = (1.0 - z) * n + z * h
                out_t[ti] = h
            outs.append(jnp.stack(out_t, axis=1))
        h_in = jnp.concatenate(outs, axis=-1)
    y = h_in
    mean = jnp.mean(y, -1, keepdims=True)
    var = jnp.mean((y - mean) ** 2, -1, keepdims=True)
    yn = (y - mean) / jnp.sqrt(var + 1e-5)
    yn = yn * params["norm"]["gamma"] + params["norm"]["beta"]
    s = jnp.tanh(yn @ params["attn"]["w1"] + params["attn"]["b1"]) @ params["attn"]["w2"]
    s = s + params["attn"]["b2"]
    w = jax.nn.softmax(s, axis=1)
    return jnp.sum(yn * w, axis=1)


if __name__ == "__main__":
    key = jax.random.PRNGKey(0)
    pkey, xkey = jax.random.split(key)
    params = init_params(pkey)
    fused = fuse_params(params)        # weight fusion hoisted out of the per-call path

    # (B, 1, T, D) exercises the 4-D squeeze(1) path of the module.
    x = jax.random.normal(xkey, (BATCH, 1, SEQ, INPUT_DIM), jnp.float32)

    out = jax.block_until_ready(sequence_encoder_forward(x, fused))
    assert out.shape == (BATCH, 2 * HIDDEN_DIM)

    ref = jax.block_until_ready(reference_forward(x, params))
    assert jnp.allclose(out, ref, atol=1e-3, rtol=1e-3), float(jnp.max(jnp.abs(out - ref)))

    print("KERNEL_OK")
</pallas_src>

<mosaic_0001>
module attributes {stable_mosaic.version = 11 : i64} {
  func.func @_encoder_kernel(%arg0: memref<2x8x64xf32, #tpu.memory_space<vmem>>, %arg1: memref<64x384xf32, #tpu.memory_space<vmem>>, %arg2: memref<128x384xf32, #tpu.memory_space<vmem>>, %arg3: memref<1x384xf32, #tpu.memory_space<vmem>>, %arg4: memref<1x384xf32, #tpu.memory_space<vmem>>, %arg5: memref<128x384xf32, #tpu.memory_space<vmem>>, %arg6: memref<128x384xf32, #tpu.memory_space<vmem>>, %arg7: memref<1x384xf32, #tpu.memory_space<vmem>>, %arg8: memref<1x384xf32, #tpu.memory_space<vmem>>, %arg9: memref<1x1x128xf32, #tpu.memory_space<vmem>>, %arg10: memref<1x1x128xf32, #tpu.memory_space<vmem>>, %arg11: memref<128x32xf32, #tpu.memory_space<vmem>>, %arg12: memref<1x32xf32, #tpu.memory_space<vmem>>, %arg13: memref<1x32xf32, #tpu.memory_space<vmem>>, %arg14: memref<2x128xf32, #tpu.memory_space<vmem>>, %arg15: memref<8x2x384xf32, #tpu.memory_space<vmem>>, %arg16: memref<8x2x128xf32, #tpu.memory_space<vmem>>) attributes {dimension_semantics = [], scalar_prefetch = 0 : i64, scratch_operands = 2 : i64, tpu.core_type = #tpu.core_type<tc>} {
    %0 = tpu.iota {dimensions = array<i32: 1>} : vector<1x384xi32>
    %c128_i32 = arith.constant 128 : i32
    %c0_i32 = arith.constant 0 : i32
    %1 = arith.cmpi eq, %c128_i32, %c0_i32 : i32
    %c1_i32 = arith.constant 1 : i32
    %2 = arith.select %1, %c1_i32, %c128_i32 : i32
    %3 = vector.broadcast %2 : i32 to vector<1x384xi32>
    %4 = arith.remsi %0, %3 : vector<1x384xi32>
    %c0_i32_0 = arith.constant 0 : i32
    %5 = vector.broadcast %c0_i32_0 : i32 to vector<1x384xi32>
    %6 = arith.cmpi ne, %4, %5 : vector<1x384xi32>
    %c0_i32_1 = arith.constant 0 : i32
    %7 = vector.broadcast %c0_i32_1 : i32 to vector<1x384xi32>
    %8 = arith.cmpi slt, %4, %7 : vector<1x384xi32>
    %c0_i32_2 = arith.constant 0 : i32
    %9 = arith.cmpi slt, %2, %c0_i32_2 : i32
    %10 = vector.broadcast %9 : i1 to vector<1x384xi1>
    %11 = vector.broadcast %10 : vector<1x384xi1> to vector<1x384xi1>
    %12 = arith.xori %8, %11 : vector<1x384xi1>
    %13 = arith.andi %12, %6 : vector<1x384xi1>
    %14 = vector.broadcast %2 : i32 to vector<1x384xi32>
    %15 = arith.addi %4, %14 : vector<1x384xi32>
    %16 = arith.select %13, %15, %4 : vector<1x384xi1>, vector<1x384xi32>
    %c32_i32 = arith.constant 32 : i32
    %17 = vector.broadcast %c32_i32 : i32 to vector<1x384xi32>
    %18 = arith.cmpi slt, %16, %17 : vector<1x384xi32>
    %19 = tpu.iota {dimensions = array<i32: 1>} : vector<1x128xi32>
    %c32_i32_3 = arith.constant 32 : i32
    %20 = vector.broadcast %c32_i32_3 : i32 to vector<1x128xi32>
    %21 = arith.cmpi slt, %19, %20 : vector<1x128xi32>
    %22 = tpu.iota {dimensions = array<i32: 2>} : vector<1x1x128xi32>
    %c64_i32 = arith.constant 64 : i32
    %23 = vector.broadcast %c64_i32 : i32 to vector<1x1x128xi32>
    %24 = arith.cmpi slt, %22, %23 : vector<1x1x128xi32>
    %c0 = arith.constant 0 : index
    %c0_4 = arith.constant 0 : index
    %c0_5 = arith.constant 0 : index
    %25 = vector.load %arg0[%c0, %c0_4, %c0_5] : memref<2x8x64xf32, #tpu.memory_space<vmem>>, vector<2x1x64xf32>
    %26 = vector.shape_cast %25 : vector<2x1x64xf32> to vector<2x64xf32>
    %c0_6 = arith.constant 0 : index
    %c0_7 = arith.constant 0 : index
    %27 = vector.load %arg1[%c0_6, %c0_7] : memref<64x384xf32, #tpu.memory_space<vmem>>, vector<64x384xf32>
    %cst = arith.constant dense<0.000000e+00> : vector<2x384xf32>
    %28 = tpu.matmul %26, %27, %cst {dimension_numbers = #tpu.dot_dimension_numbers<[1], [0], [0], [1], [0, 0, 1, 1], [], []>} : vector<2x64xf32>, vector<64x384xf32>, vector<2x384xf32> -> vector<2x384xf32>
    %c0_8 = arith.constant 0 : index
    %c0_9 = arith.constant 0 : index
    %29 = vector.load %arg3[%c0_8, %c0_9] : memref<1x384xf32, #tpu.memory_space<vmem>>, vector<1x384xf32>
    %30 = vector.broadcast %29 : vector<1x384xf32> to vector<2x384xf32>
    %31 = arith.addf %28, %30 : vector<2x384xf32>
    %c0_10 = arith.constant 0 : index
    %c0_11 = arith.constant 0 : index
    %c0_12 = arith.constant 0 : index
    %32 = vector.load %arg15[%c0_10, %c0_11, %c0_12] : memref<8x2x384xf32, #tpu.memory_space<vmem>>, vector<1x2x384xf32>
    %33 = vector.shape_cast %32 : vector<1x2x384xf32> to vector<2x384xf32>
    %34 = vector.shape_cast %31 : vector<2x384xf32> to vector<1x2x384xf32>
    tpu.vector_store %arg15[%c0_10, %c0_11, %c0_12], %34 {strides = array<i32>} : memref<8x2x384xf32, #tpu.memory_space<vmem>>, vector<1x2x384xf32>,
    %c0_13 = arith.constant 0 : index
    %c1 = arith.constant 1 : index
    %c0_14 = arith.constant 0 : index
    %35 = vector.load %arg0[%c0_13, %c1, %c0_14] : memref<2x8x64xf32, #tpu.memory_space<vmem>>, vector<2x1x64xf32>
    %36 = vector.shape_cast %35 : vector<2x1x64xf32> to vector<2x64xf32>
    %c0_15 = arith.constant 0 : index
    %c0_16 = arith.constant 0 : index
    %37 = vector.load %arg1[%c0_15, %c0_16] : memref<64x384xf32, #tpu.memory_space<vmem>>, vector<64x384xf32>
    %cst_17 = arith.constant dense<0.000000e+00> : vector<2x384xf32>
    %38 = tpu.matmul %36, %37, %cst_17 {dimension_numbers = #tpu.dot_dimension_numbers<[1], [0], [0], [1], [0, 0, 1, 1], [], []>} : vector<2x64xf32>, vector<64x384xf32>, vector<2x384xf32> -> vector<2x384xf32>
    %c0_18 = arith.constant 0 : index
    %c0_19 = arith.constant 0 : index
    %39 = vector.load %arg3[%c0_18, %c0_19] : memref<1x384xf32, #tpu.memory_space<vmem>>, vector<1x384xf32>
    %40 = vector.broadcast %39 : vector<1x384xf32> to vector<2x384xf32>
    %41 = arith.addf %38, %40 : vector<2x384xf32>
    %c1_20 = arith.constant 1 : index
    %c0_21 = arith.constant 0 : index
    %c0_22 = arith.constant 0 : index
    %42 = vector.load %arg15[%c1_20, %c0_21, %c0_22] : memref<8x2x384xf32, #tpu.memory_space<vmem>>, vector<1x2x384xf32>
    %43 = vector.shape_cast %42 : vector<1x2x384xf32> to vector<2x384xf32>
    %44 = vector.shape_cast %41 : vector<2x384xf32> to vector<1x2x384xf32>
    tpu.vector_store %arg15[%c1_20, %c0_21, %c0_22], %44 {strides = array<i32>} : memref<8x2x384xf32, #tpu.memory_space<vmem>>, vector<1x2x384xf32>,
    %c0_23 = arith.constant 0 : index
    %c2 = arith.constant 2 : index
    %c0_24 = arith.constant 0 : index
    %45 = vector.load %arg0[%c0_23, %c2, %c0_24] : memref<2x8x64xf32, #tpu.memory_space<vmem>>, vector<2x1x64xf32>
    %46 = vector.shape_cast %45 : vector<2x1x64xf32> to vector<2x64xf32>
    %c0_25 = arith.constant 0 : index
    %c0_26 = arith.constant 0 : index
    %47 = vector.load %arg1[%c0_25, %c0_26] : memref<64x384xf32, #tpu.memory_space<vmem>>, vector<64x384xf32>
    %cst_27 = arith.constant dense<0.000000e+00> : vector<2x384xf32>
    %48 = tpu.matmul %46, %47, %cst_27 {dimension_numbers = #tpu.dot_dimension_numbers<[1], [0], [0], [1], [0, 0, 1, 1], [], []>} : vector<2x64xf32>, vector<64x384xf32>, vector<2x384xf32> -> vector<2x384xf32>
    %c0_28 = arith.constant 0 : index
    %c0_29 = arith.constant 0 : index
    %49 = vector.load %arg3[%c0_28, %c0_29] : memref<1x384xf32, #tpu.memory_space<vmem>>, vector<1x384xf32>
    %50 = vector.broadcast %49 : vector<1x384xf32> to vector<2x384xf32>
    %51 = arith.addf %48, %50 : vector<2x384xf32>
    %c2_30 = arith.constant 2 : index
    %c0_31 = arith.constant 0 : index
    %c0_32 = arith.constant 0 : index
    %52 = vector.load %arg15[%c2_30, %c0_31, %c0_32] : memref<8x2x384xf32, #tpu.memory_space<vmem>>, vector<1x2x384xf32>
    %53 = vector.shape_cast %52 : vector<1x2x384xf32> to vector<2x384xf32>
    %54 = vector.shape_cast %51 : vector<2x384xf32> to vector<1x2x384xf32>
    tpu.vector_store %arg15[%c2_30, %c0_31, %c0_32], %54 {strides = array<i32>} : memref<8x2x384xf32, #tpu.memory_space<vmem>>, vector<1x2x384xf32>,
    %c0_33 = arith.constant 0 : index
    %c3 = arith.constant 3 : index
    %c0_34 = arith.constant 0 : index
    %55 = vector.load %arg0[%c0_33, %c3, %c0_34] : memref<2x8x64xf32, #tpu.memory_space<vmem>>, vector<2x1x64xf32>
    %56 = vector.shape_cast %55 : vector<2x1x64xf32> to vector<2x64xf32>
    %c0_35 = arith.constant 0 : index
    %c0_36 = arith.constant 0 : index
    %57 = vector.load %arg1[%c0_35, %c0_36] : memref<64x384xf32, #tpu.memory_space<vmem>>, vector<64x384xf32>
    %cst_37 = arith.constant dense<0.000000e+00> : vector<2x384xf32>
    %58 = tpu.matmul %56, %57, %cst_37 {dimension_numbers = #tpu.dot_dimension_numbers<[1], [0], [0], [1], [0, 0, 1, 1], [], []>} : vector<2x64xf32>, vector<64x384xf32>, vector<2x384xf32> -> vector<2x384xf32>
    %c0_38 = arith.constant 0 : index
    %c0_39 = arith.constant 0 : index
    %59 = vector.load %arg3[%c0_38, %c0_39] : memref<1x384xf32, #tpu.memory_space<vmem>>, vector<1x384xf32>
    %60 = vector.broadcast %59 : vector<1x384xf32> to vector<2x384xf32>
    %61 = arith.addf %58, %60 : vector<2x384xf32>
    %c3_40 = arith.constant 3 : index
    %c0_41 = arith.constant 0 : index
    %c0_42 = arith.constant 0 : index
    %62 = vector.load %arg15[%c3_40, %c0_41, %c0_42] : memref<8x2x384xf32, #tpu.memory_space<vmem>>, vector<1x2x384xf32>
    %63 = vector.shape_cast %62 : vector<1x2x384xf32> to vector<2x384xf32>
    %64 = vector.shape_cast %61 : vector<2x384xf32> to vector<1x2x384xf32>
    tpu.vector_store %arg15[%c3_40, %c0_41, %c0_42], %64 {strides = array<i32>} : memref<8x2x384xf32, #tpu.memory_space<vmem>>, vector<1x2x384xf32>,
    %c0_43 = arith.constant 0 : index
    %c4 = arith.constant 4 : index
    %c0_44 = arith.constant 0 : index
    %65 = vector.load %arg0[%c0_43, %c4, %c0_44] : memref<2x8x64xf32, #tpu.memory_space<vmem>>, vector<2x1x64xf32>
    %66 = vector.shape_cast %65 : vector<2x1x64xf32> to vector<2x64xf32>
    %c0_45 = arith.constant 0 : index
    %c0_46 = arith.constant 0 : index
    %67 = vector.load %arg1[%c0_45, %c0_46] : memref<64x384xf32, #tpu.memory_space<vmem>>, vector<64x384xf32>
    %cst_47 = arith.constant dense<0.000000e+00> : vector<2x384xf32>
    %68 = tpu.matmul %66, %67, %cst_47 {dimension_numbers = #tpu.dot_dimension_numbers<[1], [0], [0], [1], [0, 0, 1, 1], [], []>} : vector<2x64xf32>, vector<64x384xf32>, vector<2x384xf32> -> vector<2x384xf32>
    %c0_48 = arith.constant 0 : index
    %c0_49 = arith.constant 0 : index
    %69 = vector.load %arg3[%c0_48, %c0_49] : memref<1x384xf32, #tpu.memory_space<vmem>>, vector<1x384xf32>
    %70 = vector.broadcast %69 : vector<1x384xf32> to vector<2x384xf32>
    %71 = arith.addf %68, %70 : vector<2x384xf32>
    %c4_50 = arith.constant 4 : index
    %c0_51 = arith.constant 0 : index
    %c0_52 = arith.constant 0 : index
    %72 = vector.load %arg15[%c4_50, %c0_51, %c0_52] : memref<8x2x384xf32, #tpu.memory_space<vmem>>, vector<1x2x384xf32>
    %73 = vector.shape_cast %72 : vector<1x2x384xf32> to vector<2x384xf32>
    %74 = vector.shape_cast %71 : vector<2x384xf32> to vector<1x2x384xf32>
    tpu.vector_store %arg15[%c4_50, %c0_51, %c0_52], %74 {strides = array<i32>} : memref<8x2x384xf32, #tpu.memory_space<vmem>>, vector<1x2x384xf32>,
    %c0_53 = arith.constant 0 : index
    %c5 = arith.constant 5 : index
    %c0_54 = arith.constant 0 : index
    %75 = vector.load %arg0[%c0_53, %c5, %c0_54] : memref<2x8x64xf32, #tpu.memory_space<vmem>>, vector<2x1x64xf32>
    %76 = vector.shape_cast %75 : vector<2x1x64xf32> to vector<2x64xf32>
    %c0_55 = arith.constant 0 : index
    %c0_56 = arith.constant 0 : index
    %77 = vector.load %arg1[%c0_55, %c0_56] : memref<64x384xf32, #tpu.memory_space<vmem>>, vector<64x384xf32>
    %cst_57 = arith.constant dense<0.000000e+00> : vector<2x384xf32>
    %78 = tpu.matmul %76, %77, %cst_57 {dimension_numbers = #tpu.dot_dimension_numbers<[1], [0], [0], [1], [0, 0, 1, 1], [], []>} : vector<2x64xf32>, vector<64x384xf32>, vector<2x384xf32> -> vector<2x384xf32>
    %c0_58 = arith.constant 0 : index
    %c0_59 = arith.constant 0 : index
    %79 = vector.load %arg3[%c0_58, %c0_59] : memref<1x384xf32, #tpu.memory_space<vmem>>, vector<1x384xf32>
    %80 = vector.broadcast %79 : vector<1x384xf32> to vector<2x384xf32>
    %81 = arith.addf %78, %80 : vector<2x384xf32>
    %c5_60 = arith.constant 5 : index
    %c0_61 = arith.constant 0 : index
    %c0_62 = arith.constant 0 : index
    %82 = vector.load %arg15[%c5_60, %c0_61, %c0_62] : memref<8x2x384xf32, #tpu.memory_space<vmem>>, vector<1x2x384xf32>
    %83 = vector.shape_cast %82 : vector<1x2x384xf32> to vector<2x384xf32>
    %84 = vector.shape_cast %81 : vector<2x384xf32> to vector<1x2x384xf32>
    tpu.vector_store %arg15[%c5_60, %c0_61, %c0_62], %84 {strides = array<i32>} : memref<8x2x384xf32, #tpu.memory_space<vmem>>, vector<1x2x384xf32>,
    %c0_63 = arith.constant 0 : index
    %c6 = arith.constant 6 : index
    %c0_64 = arith.constant 0 : index
    %85 = vector.load %arg0[%c0_63, %c6, %c0_64] : memref<2x8x64xf32, #tpu.memory_space<vmem>>, vector<2x1x64xf32>
    %86 = vector.shape_cast %85 : vector<2x1x64xf32> to vector<2x64xf32>
    %c0_65 = arith.constant 0 : index
    %c0_66 = arith.constant 0 : index
    %87 = vector.load %arg1[%c0_65, %c0_66] : memref<64x384xf32, #tpu.memory_space<vmem>>, vector<64x384xf32>
    %cst_67 = arith.constant dense<0.000000e+00> : vector<2x384xf32>
    %88 = tpu.matmul %86, %87, %cst_67 {dimension_numbers = #tpu.dot_dimension_numbers<[1], [0], [0], [1], [0, 0, 1, 1], [], []>} : vector<2x64xf32>, vector<64x384xf32>, vector<2x384xf32> -> vector<2x384xf32>
    %c0_68 = arith.constant 0 : index
    %c0_69 = arith.constant 0 : index
    %89 = vector.load %arg3[%c0_68, %c0_69] : memref<1x384xf32, #tpu.memory_space<vmem>>, vector<1x384xf32>
    %90 = vector.broadcast %89 : vector<1x384xf32> to vector<2x384xf32>
    %91 = arith.addf %88, %90 : vector<2x384xf32>
    %c6_70 = arith.constant 6 : index
    %c0_71 = arith.constant 0 : index
    %c0_72 = arith.constant 0 : index
    %92 = vector.load %arg15[%c6_70, %c0_71, %c0_72] : memref<8x2x384xf32, #tpu.memory_space<vmem>>, vector<1x2x384xf32>
    %93 = vector.shape_cast %92 : vector<1x2x384xf32> to vector<2x384xf32>
    %94 = vector.shape_cast %91 : vector<2x384xf32> to vector<1x2x384xf32>
    tpu.vector_store %arg15[%c6_70, %c0_71, %c0_72], %94 {strides = array<i32>} : memref<8x2x384xf32, #tpu.memory_space<vmem>>, vector<1x2x384xf32>,
    %c0_73 = arith.constant 0 : index
    %c7 = arith.constant 7 : index
    %c0_74 = arith.constant 0 : index
    %95 = vector.load %arg0[%c0_73, %c7, %c0_74] : memref<2x8x64xf32, #tpu.memory_space<vmem>>, vector<2x1x64xf32>
    %96 = vector.shape_cast %95 : vector<2x1x64xf32> to vector<2x64xf32>
    %c0_75 = arith.constant 0 : index
    %c0_76 = arith.constant 0 : index
    %97 = vector.load %arg1[%c0_75, %c0_76] : memref<64x384xf32, #tpu.memory_space<vmem>>, vector<64x384xf32>
    %cst_77 = arith.constant dense<0.000000e+00> : vector<2x384xf32>
    %98 = tpu.matmul %96, %97, %cst_77 {dimension_numbers = #tpu.dot_dimension_numbers<[1], [0], [0], [1], [0, 0, 1, 1], [], []>} : vector<2x64xf32>, vector<64x384xf32>, vector<2x384xf32> -> vector<2x384xf32>
    %c0_78 = arith.constant 0 : index
    %c0_79 = arith.constant 0 : index
    %99 = vector.load %arg3[%c0_78, %c0_79] : memref<1x384xf32, #tpu.memory_space<vmem>>, vector<1x384xf32>
    %100 = vector.broadcast %99 : vector<1x384xf32> to vector<2x384xf32>
    %101 = arith.addf %98, %100 : vector<2x384xf32>
    %c7_80 = arith.constant 7 : index
    %c0_81 = arith.constant 0 : index
    %c0_82 = arith.constant 0 : index
    %102 = vector.load %arg15[%c7_80, %c0_81, %c0_82] : memref<8x2x384xf32, #tpu.memory_space<vmem>>, vector<1x2x384xf32>
    %103 = vector.shape_cast %102 : vector<1x2x384xf32> to vector<2x384xf32>
    %104 = vector.shape_cast %101 : vector<2x384xf32> to vector<1x2x384xf32>
    tpu.vector_store %arg15[%c7_80, %c0_81, %c0_82], %104 {strides = array<i32>} : memref<8x2x384xf32, #tpu.memory_space<vmem>>, vector<1x2x384xf32>,
    %c0_83 = arith.constant 0 : index
    %c0_84 = arith.constant 0 : index
    %c0_85 = arith.constant 0 : index
    %105 = vector.load %arg15[%c0_83, %c0_84, %c0_85] : memref<8x2x384xf32, #tpu.memory_space<vmem>>, vector<1x2x384xf32>
    %106 = vector.shape_cast %105 : vector<1x2x384xf32> to vector<2x384xf32>
    %c7_86 = arith.constant 7 : index
    %c0_87 = arith.constant 0 : index
    %c0_88 = arith.constant 0 : index
    %107 = vector.load %arg15[%c7_86, %c0_87, %c0_88] : memref<8x2x384xf32, #tpu.memory_space<vmem>>, vector<1x2x384xf32>
    %108 = vector.shape_cast %107 : vector<1x2x384xf32> to vector<2x384xf32>
    %109 = vector.shape_cast %18 : vector<1x384xi1> to vector<1x384xi1>
    %110 = vector.broadcast %109 : vector<1x384xi1> to vector<2x384xi1>
    %111 = arith.select %110, %106, %108 : vector<2x384xi1>, vector<2x384xf32>
    %c0_89 = arith.constant 0 : index
    %c0_90 = arith.constant 0 : index
    %c0_91 = arith.constant 0 : index
    %112 = vector.load %arg15[%c0_89, %c0_90, %c0_91] : memref<8x2x384xf32, #tpu.memory_space<vmem>>, vector<1x2x384xf32>
    %113 = vector.shape_cast %112 : vector<1x2x384xf32> to vector<2x384xf32>
    %114 = vector.shape_cast %111 : vector<2x384xf32> to vector<1x2x384xf32>
    tpu.vector_store %arg15[%c0_89, %c0_90, %c0_91], %114 {strides = array<i32>} : memref<8x2x384xf32, #tpu.memory_space<vmem>>, vector<1x2x384xf32>,
    %115 = vector.shape_cast %18 : vector<1x384xi1> to vector<1x384xi1>
    %116 = vector.broadcast %115 : vector<1x384xi1> to vector<2x384xi1>
    %117 = arith.select %116, %108, %106 : vector<2x384xi1>, vector<2x384xf32>
    %c7_92 = arith.constant 7 : index
    %c0_93 = arith.constant 0 : index
    %c0_94 = arith.constant 0 : index
    %118 = vector.load %arg15[%c7_92, %c0_93, %c0_94] : memref<8x2x384xf32, #tpu.memory_space<vmem>>, vector<1x2x384xf32>
    %119 = vector.shape_cast %118 : vector<1x2x384xf32> to vector<2x384xf32>
    %120 = vector.shape_cast %117 : vector<2x384xf32> to vector<1x2x384xf32>
    tpu.vector_store %arg15[%c7_92, %c0_93, %c0_94], %120 {strides = array<i32>} : memref<8x2x384xf32, #tpu.memory_space<vmem>>, vector<1x2x384xf32>,
    %c1_95 = arith.constant 1 : index
    %c0_96 = arith.constant 0 : index
    %c0_97 = arith.constant 0 : index
    %121 = vector.load %arg15[%c1_95, %c0_96, %c0_97] : memref<8x2x384xf32, #tpu.memory_space<vmem>>, vector<1x2x384xf32>
    %122 = vector.shape_cast %121 : vector<1x2x384xf32> to vector<2x384xf32>
    %c6_98 = arith.constant 6 : index
    %c0_99 = arith.constant 0 : index
    %c0_100 = arith.constant 0 : index
    %123 = vector.load %arg15[%c6_98, %c0_99, %c0_100] : memref<8x2x384xf32, #tpu.memory_space<vmem>>, vector<1x2x384xf32>
    %124 = vector.shape_cast %123 : vector<1x2x384xf32> to vector<2x384xf32>
    %125 = vector.shape_cast %18 : vector<1x384xi1> to vector<1x384xi1>
    %126 = vector.broadcast %125 : vector<1x384xi1> to vector<2x384xi1>
    %127 = arith.select %126, %122, %124 : vector<2x384xi1>, vector<2x384xf32>
    %c1_101 = arith.constant 1 : index
    %c0_102 = arith.constant 0 : index
    %c0_103 = arith.constant 0 : index
    %128 = vector.load %arg15[%c1_101, %c0_102, %c0_103] : memref<8x2x384xf32, #tpu.memory_space<vmem>>, vector<1x2x384xf32>
    %129 = vector.shape_cast %128 : vector<1x2x384xf32> to vector<2x384xf32>
    %130 = vector.shape_cast %127 : vector<2x384xf32> to vector<1x2x384xf32>
    tpu.vector_store %arg15[%c1_101, %c0_102, %c0_103], %130 {strides = array<i32>} : memref<8x2x384xf32, #tpu.memory_space<vmem>>, vector<1x2x384xf32>,
    %131 = vector.shape_cast %18 : vector<1x384xi1> to vector<1x384xi1>
    %132 = vector.broadcast %131 : vector<1x384xi1> to vector<2x384xi1>
    %133 = arith.select %132, %124, %122 : vector<2x384xi1>, vector<2x384xf32>
    %c6_104 = arith.constant 6 : index
    %c0_105 = arith.constant 0 : index
    %c0_106 = arith.constant 0 : index
    %134 = vector.load %arg15[%c6_104, %c0_105, %c0_106] : memref<8x2x384xf32, #tpu.memory_space<vmem>>, vector<1x2x384xf32>
    %135 = vector.shape_cast %134 : vector<1x2x384xf32> to vector<2x384xf32>
    %136 = vector.shape_cast %133 : vector<2x384xf32> to vector<1x2x384xf32>
    tpu.vector_store %arg15[%c6_104, %c0_105, %c0_106], %136 {strides = array<i32>} : memref<8x2x384xf32, #tpu.memory_space<vmem>>, vector<1x2x384xf32>,
    %c2_107 = arith.constant 2 : index
    %c0_108 = arith.constant 0 : index
    %c0_109 = arith.constant 0 : index
    %137 = vector.load %arg15[%c2_107, %c0_108, %c0_109] : memref<8x2x384xf32, #tpu.memory_space<vmem>>, vector<1x2x384xf32>
    %138 = vector.shape_cast %137 : vector<1x2x384xf32> to vector<2x384xf32>
    %c5_110 = arith.constant 5 : index
    %c0_111 = arith.constant 0 : index
    %c0_112 = arith.constant 0 : index
    %139 = vector.load %arg15[%c5_110, %c0_111, %c0_112] : memref<8x2x384xf32, #tpu.memory_space<vmem>>, vector<1x2x384xf32>
    %140 = vector.shape_cast %139 : vector<1x2x384xf32> to vector<2x384xf32>
    %141 = vector.shape_cast %18 : vector<1x384xi1> to vector<1x384xi1>
    %142 = vector.broadcast %141 : vector<1x384xi1> to vector<2x384xi1>
    %143 = arith.select %142, %138, %140 : vector<2x384xi1>, vector<2x384xf32>
    %c2_113 = arith.constant 2 : index
    %c0_114 = arith.constant 0 : index
    %c0_115 = arith.constant 0 : index
    %144 = vector.load %arg15[%c2_113, %c0_114, %c0_115] : memref<8x2x384xf32, #tpu.memory_space<vmem>>, vector<1x2x384xf32>
    %145 = vector.shape_cast %144 : vector<1x2x384xf32> to vector<2x384xf32>
    %146 = vector.shape_cast %143 : vector<2x384xf32> to vector<1x2x384xf32>
    tpu.vector_store %arg15[%c2_113, %c0_114, %c0_115], %146 {strides = array<i32>} : memref<8x2x384xf32, #tpu.memory_space<vmem>>, vector<1x2x384xf32>,
    %147 = vector.shape_cast %18 : vector<1x384xi1> to vector<1x384xi1>
    %148 = vector.broadcast %147 : vector<1x384xi1> to vector<2x384xi1>
    %149 = arith.select %148, %140, %138 : vector<2x384xi1>, vector<2x384xf32>
    %c5_116 = arith.constant 5 : index
    %c0_117 = arith.constant 0 : index
    %c0_118 = arith.constant 0 : index
    %150 = vector.load %arg15[%c5_116, %c0_117, %c0_118] : memref<8x2x384xf32, #tpu.memory_space<vmem>>, vector<1x2x384xf32>
    %151 = vector.shape_cast %150 : vector<1x2x384xf32> to vector<2x384xf32>
    %152 = vector.shape_cast %149 : vector<2x384xf32> to vector<1x2x384xf32>
    tpu.vector_store %arg15[%c5_116, %c0_117, %c0_118], %152 {strides = array<i32>} : memref<8x2x384xf32, #tpu.memory_space<vmem>>, vector<1x2x384xf32>,
    %c3_119 = arith.constant 3 : index
    %c0_120 = arith.constant 0 : index
    %c0_121 = arith.constant 0 : index
    %153 = vector.load %arg15[%c3_119, %c0_120, %c0_121] : memref<8x2x384xf32, #tpu.memory_space<vmem>>, vector<1x2x384xf32>
    %154 = vector.shape_cast %153 : vector<1x2x384xf32> to vector<2x384xf32>
    %c4_122 = arith.constant 4 : index
    %c0_123 = arith.constant 0 : index
    %c0_124 = arith.constant 0 : index
    %155 = vector.load %arg15[%c4_122, %c0_123, %c0_124] : memref<8x2x384xf32, #tpu.memory_space<vmem>>, vector<1x2x384xf32>
    %156 = vector.shape_cast %155 : vector<1x2x384xf32> to vector<2x384xf32>
    %157 = vector.shape_cast %18 : vector<1x384xi1> to vector<1x384xi1>
    %158 = vector.broadcast %157 : vector<1x384xi1> to vector<2x384xi1>
    %159 = arith.select %158, %154, %156 : vector<2x384xi1>, vector<2x384xf32>
    %c3_125 = arith.constant 3 : index
    %c0_126 = arith.constant 0 : index
    %c0_127 = arith.constant 0 : index
    %160 = vector.load %arg15[%c3_125, %c0_126, %c0_127] : memref<8x2x384xf32, #tpu.memory_space<vmem>>, vector<1x2x384xf32>
    %161 = vector.shape_cast %160 : vector<1x2x384xf32> to vector<2x384xf32>
    %162 = vector.shape_cast %159 : vector<2x384xf32> to vector<1x2x384xf32>
    tpu.vector_store %arg15[%c3_125, %c0_126, %c0_127], %162 {strides = array<i32>} : memref<8x2x384xf32, #tpu.memory_space<vmem>>, vector<1x2x384xf32>,
    %163 = vector.shape_cast %18 : vector<1x384xi1> to vector<1x384xi1>
    %164 = vector.broadcast %163 : vector<1x384xi1> to vector<2x384xi1>
    %165 = arith.select %164, %156, %154 : vector<2x384xi1>, vector<2x384xf32>
    %c4_128 = arith.constant 4 : index
    %c0_129 = arith.constant 0 : index
    %c0_130 = arith.constant 0 : index
    %166 = vector.load %arg15[%c4_128, %c0_129, %c0_130] : memref<8x2x384xf32, #tpu.memory_space<vmem>>, vector<1x2x384xf32>
    %167 = vector.shape_cast %166 : vector<1x2x384xf32> to vector<2x384xf32>
    %168 = vector.shape_cast %165 : vector<2x384xf32> to vector<1x2x384xf32>
    tpu.vector_store %arg15[%c4_128, %c0_129, %c0_130], %168 {strides = array<i32>} : memref<8x2x384xf32, #tpu.memory_space<vmem>>, vector<1x2x384xf32>,
    %c0_131 = arith.constant 0 : index
    %c0_132 = arith.constant 0 : index
    %169 = vector.load %arg2[%c0_131, %c0_132] : memref<128x384xf32, #tpu.memory_space<vmem>>, vector<128x384xf32>
    %c0_133 = arith.constant 0 : index
    %c0_134 = arith.constant 0 : index
    %170 = vector.load %arg4[%c0_133, %c0_134] : memref<1x384xf32, #tpu.memory_space<vmem>>, vector<1x384xf32>
    %171 = vector.shape_cast %170 : vector<1x384xf32> to vector<1x384xf32>
    %172 = vector.broadcast %171 : vector<1x384xf32> to vector<2x384xf32>
    %cst_135 = arith.constant 0.000000e+00 : f32
    %173 = vector.broadcast %cst_135 : f32 to vector<2x128xf32>
    %c0_i32_136 = arith.constant 0 : i32
    %174 = arith.index_cast %c0_i32_136 : i32 to index
    %c0_137 = arith.constant 0 : index
    %c0_138 = arith.constant 0 : index
    %175 = vector.load %arg15[%174, %c0_137, %c0_138] : memref<8x2x384xf32, #tpu.memory_space<vmem>>, vector<1x2x384xf32>
    %176 = vector.shape_cast %175 : vector<1x2x384xf32> to vector<2x384xf32>
    %cst_139 = arith.constant dense<0.000000e+00> : vector<2x384xf32>
    %177 = tpu.matmul %173, %169, %cst_139 {dimension_numbers = #tpu.dot_dimension_numbers<[1], [0], [0], [1], [0, 0, 1, 1], [], []>} : vector<2x128xf32>, vector<128x384xf32>, vector<2x384xf32> -> vector<2x384xf32>
    %178 = arith.addf %177, %172 : vector<2x384xf32>
    %179 = vector.extract_strided_slice %176 {offsets = [0, 0], sizes = [2, 128], strides = [1, 1]} : vector<2x384xf32> to vector<2x128xf32>
    %180 = vector.extract_strided_slice %178 {offsets = [0, 0], sizes = [2, 128], strides = [1, 1]} : vector<2x384xf32> to vector<2x128xf32>
    %181 = arith.addf %179, %180 : vector<2x128xf32>
    %182 = arith.negf %181 : vector<2x128xf32>
    %183 = math.exp %182 : vector<2x128xf32>
    %cst_140 = arith.constant 1.000000e+00 : f32
    %184 = vector.broadcast %cst_140 : f32 to vector<2x128xf32>
    %185 = arith.addf %184, %183 : vector<2x128xf32>
    %186 = arith.divf %184, %185 : vector<2x128xf32>
    %187 = vector.extract_strided_slice %176 {offsets = [0, 128], sizes = [2, 128], strides = [1, 1]} : vector<2x384xf32> to vector<2x128xf32>
    %188 = vector.extract_strided_slice %178 {offsets = [0, 128], sizes = [2, 128], strides = [1, 1]} : vector<2x384xf32> to vector<2x128xf32>
    %189 = arith.addf %187, %188 : vector<2x128xf32>
    %190 = arith.negf %189 : vector<2x128xf32>
    %191 = math.exp %190 : vector<2x128xf32>
    %cst_141 = arith.constant 1.000000e+00 : f32
    %192 = vector.broadcast %cst_141 : f32 to vector<2x128xf32>
    %193 = arith.addf %192, %191 : vector<2x128xf32>
    %194 = arith.divf %192, %193 : vector<2x128xf32>
    %195 = vector.extract_strided_slice %176 {offsets = [0, 256], sizes = [2, 128], strides = [1, 1]} : vector<2x384xf32> to vector<2x128xf32>
    %196 = vector.extract_strided_slice %178 {offsets = [0, 256], sizes = [2, 128], strides = [1, 1]} : vector<2x384xf32> to vector<2x128xf32>
    %197 = arith.mulf %186, %196 : vector<2x128xf32>
    %198 = arith.addf %195, %197 : vector<2x128xf32>
    %199 = math.tanh %198 : vector<2x128xf32>
    %cst_142 = arith.constant 1.000000e+00 : f32
    %200 = vector.broadcast %cst_142 : f32 to vector<2x128xf32>
    %201 = arith.subf %200, %194 : vector<2x128xf32>
    %202 = arith.mulf %201, %199 : vector<2x128xf32>
    %203 = arith.mulf %194, %173 : vector<2x128xf32>
    %204 = arith.addf %202, %203 : vector<2x128xf32>
    %205 = arith.index_cast %c0_i32_136 : i32 to index
    %c0_143 = arith.constant 0 : index
    %c0_144 = arith.constant 0 : index
    %206 = vector.load %arg16[%205, %c0_143, %c0_144] : memref<8x2x128xf32, #tpu.memory_space<vmem>>, vector<1x2x128xf32>
    %207 = vector.shape_cast %206 : vector<1x2x128xf32> to vector<2x128xf32>
    %208 = vector.shape_cast %204 : vector<2x128xf32> to vector<1x2x128xf32>
    tpu.vector_store %arg16[%205, %c0_143, %c0_144], %208 {strides = array<i32>} : memref<8x2x128xf32, #tpu.memory_space<vmem>>, vector<1x2x128xf32>,
    %c1_i32_145 = arith.constant 1 : i32
    %209 = arith.index_cast %c1_i32_145 : i32 to index
    %c0_146 = arith.constant 0 : index
    %c0_147 = arith.constant 0 : index
    %210 = vector.load %arg15[%209, %c0_146, %c0_147] : memref<8x2x384xf32, #tpu.memory_space<vmem>>, vector<1x2x384xf32>
    %211 = vector.shape_cast %210 : vector<1x2x384xf32> to vector<2x384xf32>
    %cst_148 = arith.constant dense<0.000000e+00> : vector<2x384xf32>
    %212 = tpu.matmul %204, %169, %cst_148 {dimension_numbers = #tpu.dot_dimension_numbers<[1], [0], [0], [1], [0, 0, 1, 1], [], []>} : vector<2x128xf32>, vector<128x384xf32>, vector<2x384xf32> -> vector<2x384xf32>
    %213 = arith.addf %212, %172 : vector<2x384xf32>
    %214 = vector.extract_strided_slice %211 {offsets = [0, 0], sizes = [2, 128], strides = [1, 1]} : vector<2x384xf32> to vector<2x128xf32>
    %215 = vector.extract_strided_slice %213 {offsets = [0, 0], sizes = [2, 128], strides = [1, 1]} : vector<2x384xf32> to vector<2x128xf32>
    %216 = arith.addf %214, %215 : vector<2x128xf32>
    %217 = arith.negf %216 : vector<2x128xf32>
    %218 = math.exp %217 : vector<2x128xf32>
    %cst_149 = arith.constant 1.000000e+00 : f32
    %219 = vector.broadcast %cst_149 : f32 to vector<2x128xf32>
    %220 = arith.addf %219, %218 : vector<2x128xf32>
    %221 = arith.divf %219, %220 : vector<2x128xf32>
    %222 = vector.extract_strided_slice %211 {offsets = [0, 128], sizes = [2, 128], strides = [1, 1]} : vector<2x384xf32> to vector<2x128xf32>
    %223 = vector.extract_strided_slice %213 {offsets = [0, 128], sizes = [2, 128], strides = [1, 1]} : vector<2x384xf32> to vector<2x128xf32>
    %224 = arith.addf %222, %223 : vector<2x128xf32>
    %225 = arith.negf %224 : vector<2x128xf32>
    %226 = math.exp %225 : vector<2x128xf32>
    %cst_150 = arith.constant 1.000000e+00 : f32
    %227 = vector.broadcast %cst_150 : f32 to vector<2x128xf32>
    %228 = arith.addf %227, %226 : vector<2x128xf32>
    %229 = arith.divf %227, %228 : vector<2x128xf32>
    %230 = vector.extract_strided_slice %211 {offsets = [0, 256], sizes = [2, 128], strides = [1, 1]} : vector<2x384xf32> to vector<2x128xf32>
    %231 = vector.extract_strided_slice %213 {offsets = [0, 256], sizes = [2, 128], strides = [1, 1]} : vector<2x384xf32> to vector<2x128xf32>
    %232 = arith.mulf %221, %231 : vector<2x128xf32>
    %233 = arith.addf %230, %232 : vector<2x128xf32>
    %234 = math.tanh %233 : vector<2x128xf32>
    %cst_151 = arith.constant 1.000000e+00 : f32
    %235 = vector.broadcast %cst_151 : f32 to vector<2x128xf32>
    %236 = arith.subf %235, %229 : vector<2x128xf32>
    %237 = arith.mulf %236, %234 : vector<2x128xf32>
    %238 = arith.mulf %229, %204 : vector<2x128xf32>
    %239 = arith.addf %237, %238 : vector<2x128xf32>
    %240 = arith.index_cast %c1_i32_145 : i32 to index
    %c0_152 = arith.constant 0 : index
    %c0_153 = arith.constant 0 : index
    %241 = vector.load %arg16[%240, %c0_152, %c0_153] : memref<8x2x128xf32, #tpu.memory_space<vmem>>, vector<1x2x128xf32>
    %242 = vector.shape_cast %241 : vector<1x2x128xf32> to vector<2x128xf32>
    %243 = vector.shape_cast %239 : vector<2x128xf32> to vector<1x2x128xf32>
    tpu.vector_store %arg16[%240, %c0_152, %c0_153], %243 {strides = array<i32>} : memref<8x2x128xf32, #tpu.memory_space<vmem>>, vector<1x2x128xf32>,
    %c2_i32 = arith.constant 2 : i32
    %244 = arith.index_cast %c2_i32 : i32 to index
    %c0_154 = arith.constant 0 : index
    %c0_155 = arith.constant 0 : index
    %245 = vector.load %arg15[%244, %c0_154, %c0_155] : memref<8x2x384xf32, #tpu.memory_space<vmem>>, vector<1x2x384xf32>
    %246 = vector.shape_cast %245 : vector<1x2x384xf32> to vector<2x384xf32>
    %cst_156 = arith.constant dense<0.000000e+00> : vector<2x384xf32>
    %247 = tpu.matmul %239, %169, %cst_156 {dimension_numbers = #tpu.dot_dimension_numbers<[1], [0], [0], [1], [0, 0, 1, 1], [], []>} : vector<2x128xf32>, vector<128x384xf32>, vector<2x384xf32> -> vector<2x384xf32>
    %248 = arith.addf %247, %172 : vector<2x384xf32>
    %249 = vector.extract_strided_slice %246 {offsets = [0, 0], sizes = [2, 128], strides = [1, 1]} : vector<2x384xf32> to vector<2x128xf32>
    %250 = vector.extract_strided_slice %248 {offsets = [0, 0], sizes = [2, 128], strides = [1, 1]} : vector<2x384xf32> to vector<2x128xf32>
    %251 = arith.addf %249, %250 : vector<2x128xf32>
    %252 = arith.negf %251 : vector<2x128xf32>
    %253 = math.exp %252 : vector<2x128xf32>
    %cst_157 = arith.constant 1.000000e+00 : f32
    %254 = vector.broadcast %cst_157 : f32 to vector<2x128xf32>
    %255 = arith.addf %254, %253 : vector<2x128xf32>
    %256 = arith.divf %254, %255 : vector<2x128xf32>
    %257 = vector.extract_strided_slice %246 {offsets = [0, 128], sizes = [2, 128], strides = [1, 1]} : vector<2x384xf32> to vector<2x128xf32>
    %258 = vector.extract_strided_slice %248 {offsets = [0, 128], sizes = [2, 128], strides = [1, 1]} : vector<2x384xf32> to vector<2x128xf32>
    %259 = arith.addf %257, %258 : vector<2x128xf32>
    %260 = arith.negf %259 : vector<2x128xf32>
    %261 = math.exp %260 : vector<2x128xf32>
    %cst_158 = arith.constant 1.000000e+00 : f32
    %262 = vector.broadcast %cst_158 : f32 to vector<2x128xf32>
    %263 = arith.addf %262, %261 : vector<2x128xf32>
    %264 = arith.divf %262, %263 : vector<2x128xf32>
    %265 = vector.extract_strided_slice %246 {offsets = [0, 256], sizes = [2, 128], strides = [1, 1]} : vector<2x384xf32> to vector<2x128xf32>
    %266 = vector.extract_strided_slice %248 {offsets = [0, 256], sizes = [2, 128], strides = [1, 1]} : vector<2x384xf32> to vector<2x128xf32>
    %267 = arith.mulf %256, %266 : vector<2x128xf32>
    %268 = arith.addf %265, %267 : vector<2x128xf32>
    %269 = math.tanh %268 : vector<2x128xf32>
    %cst_159 = arith.constant 1.000000e+00 : f32
    %270 = vector.broadcast %cst_159 : f32 to vector<2x128xf32>
    %271 = arith.subf %270, %264 : vector<2x128xf32>
    %272 = arith.mulf %271, %269 : vector<2x128xf32>
    %273 = arith.mulf %264, %239 : vector<2x128xf32>
    %274 = arith.addf %272, %273 : vector<2x128xf32>
    %275 = arith.index_cast %c2_i32 : i32 to index
    %c0_160 = arith.constant 0 : index
    %c0_161 = arith.constant 0 : index
    %276 = vector.load %arg16[%275, %c0_160, %c0_161] : memref<8x2x128xf32, #tpu.memory_space<vmem>>, vector<1x2x128xf32>
    %277 = vector.shape_cast %276 : vector<1x2x128xf32> to vector<2x128xf32>
    %278 = vector.shape_cast %274 : vector<2x128xf32> to vector<1x2x128xf32>
    tpu.vector_store %arg16[%275, %c0_160, %c0_161], %278 {strides = array<i32>} : memref<8x2x128xf32, #tpu.memory_space<vmem>>, vector<1x2x128xf32>,
    %c3_i32 = arith.constant 3 : i32
    %279 = arith.index_cast %c3_i32 : i32 to index
    %c0_162 = arith.constant 0 : index
    %c0_163 = arith.constant 0 : index
    %280 = vector.load %arg15[%279, %c0_162, %c0_163] : memref<8x2x384xf32, #tpu.memory_space<vmem>>, vector<1x2x384xf32>
    %281 = vector.shape_cast %280 : vector<1x2x384xf32> to vector<2x384xf32>
    %cst_164 = arith.constant dense<0.000000e+00> : vector<2x384xf32>
    %282 = tpu.matmul %274, %169, %cst_164 {dimension_numbers = #tpu.dot_dimension_numbers<[1], [0], [0], [1], [0, 0, 1, 1], [], []>} : vector<2x128xf32>, vector<128x384xf32>, vector<2x384xf32> -> vector<2x384xf32>
    %283 = arith.addf %282, %172 : vector<2x384xf32>
    %284 = vector.extract_strided_slice %281 {offsets = [0, 0], sizes = [2, 128], strides = [1, 1]} : vector<2x384xf32> to vector<2x128xf32>
    %285 = vector.extract_strided_slice %283 {offsets = [0, 0], sizes = [2, 128], strides = [1, 1]} : vector<2x384xf32> to vector<2x128xf32>
    %286 = arith.addf %284, %285 : vector<2x128xf32>
    %287 = arith.negf %286 : vector<2x128xf32>
    %288 = math.exp %287 : vector<2x128xf32>
    %cst_165 = arith.constant 1.000000e+00 : f32
    %289 = vector.broadcast %cst_165 : f32 to vector<2x128xf32>
    %290 = arith.addf %289, %288 : vector<2x128xf32>
    %291 = arith.divf %289, %290 : vector<2x128xf32>
    %292 = vector.extract_strided_slice %281 {offsets = [0, 128], sizes = [2, 128], strides = [1, 1]} : vector<2x384xf32> to vector<2x128xf32>
    %293 = vector.extract_strided_slice %283 {offsets = [0, 128], sizes = [2, 128], strides = [1, 1]} : vector<2x384xf32> to vector<2x128xf32>
    %294 = arith.addf %292, %293 : vector<2x128xf32>
    %295 = arith.negf %294 : vector<2x128xf32>
    %296 = math.exp %295 : vector<2x128xf32>
    %cst_166 = arith.constant 1.000000e+00 : f32
    %297 = vector.broadcast %cst_166 : f32 to vector<2x128xf32>
    %298 = arith.addf %297, %296 : vector<2x128xf32>
    %299 = arith.divf %297, %298 : vector<2x128xf32>
    %300 = vector.extract_strided_slice %281 {offsets = [0, 256], sizes = [2, 128], strides = [1, 1]} : vector<2x384xf32> to vector<2x128xf32>
    %301 = vector.extract_strided_slice %283 {offsets = [0, 256], sizes = [2, 128], strides = [1, 1]} : vector<2x384xf32> to vector<2x128xf32>
    %302 = arith.mulf %291, %301 : vector<2x128xf32>
    %303 = arith.addf %300, %302 : vector<2x128xf32>
    %304 = math.tanh %303 : vector<2x128xf32>
    %cst_167 = arith.constant 1.000000e+00 : f32
    %305 = vector.broadcast %cst_167 : f32 to vector<2x128xf32>
    %306 = arith.subf %305, %299 : vector<2x128xf32>
    %307 = arith.mulf %306, %304 : vector<2x128xf32>
    %308 = arith.mulf %299, %274 : vector<2x128xf32>
    %309 = arith.addf %307, %308 : vector<2x128xf32>
    %310 = arith.index_cast %c3_i32 : i32 to index
    %c0_168 = arith.constant 0 : index
    %c0_169 = arith.constant 0 : index
    %311 = vector.load %arg16[%310, %c0_168, %c0_169] : memref<8x2x128xf32, #tpu.memory_space<vmem>>, vector<1x2x128xf32>
    %312 = vector.shape_cast %311 : vector<1x2x128xf32> to vector<2x128xf32>
    %313 = vector.shape_cast %309 : vector<2x128xf32> to vector<1x2x128xf32>
    tpu.vector_store %arg16[%310, %c0_168, %c0_169], %313 {strides = array<i32>} : memref<8x2x128xf32, #tpu.memory_space<vmem>>, vector<1x2x128xf32>,
    %c4_i32 = arith.constant 4 : i32
    %314 = arith.index_cast %c4_i32 : i32 to index
    %c0_170 = arith.constant 0 : index
    %c0_171 = arith.constant 0 : index
    %315 = vector.load %arg15[%314, %c0_170, %c0_171] : memref<8x2x384xf32, #tpu.memory_space<vmem>>, vector<1x2x384xf32>
    %316 = vector.shape_cast %315 : vector<1x2x384xf32> to vector<2x384xf32>
    %cst_172 = arith.constant dense<0.000000e+00> : vector<2x384xf32>
    %317 = tpu.matmul %309, %169, %cst_172 {dimension_numbers = #tpu.dot_dimension_numbers<[1], [0], [0], [1], [0, 0, 1, 1], [], []>} : vector<2x128xf32>, vector<128x384xf32>, vector<2x384xf32> -> vector<2x384xf32>
    %318 = arith.addf %317, %172 : vector<2x384xf32>
    %319 = vector.extract_strided_slice %316 {offsets = [0, 0], sizes = [2, 128], strides = [1, 1]} : vector<2x384xf32> to vector<2x128xf32>
    %320 = vector.extract_strided_slice %318 {offsets = [0, 0], sizes = [2, 128], strides = [1, 1]} : vector<2x384xf32> to vector<2x128xf32>
    %321 = arith.addf %319, %320 : vector<2x128xf32>
    %322 = arith.negf %321 : vector<2x128xf32>
    %323 = math.exp %322 : vector<2x128xf32>
    %cst_173 = arith.constant 1.000000e+00 : f32
    %324 = vector.broadcast %cst_173 : f32 to vector<2x128xf32>
    %325 = arith.addf %324, %323 : vector<2x128xf32>
    %326 = arith.divf %324, %325 : vector<2x128xf32>
    %327 = vector.extract_strided_slice %316 {offsets = [0, 128], sizes = [2, 128], strides = [1, 1]} : vector<2x384xf32> to vector<2x128xf32>
    %328 = vector.extract_strided_slice %318 {offsets = [0, 128], sizes = [2, 128], strides = [1, 1]} : vector<2x384xf32> to vector<2x128xf32>
    %329 = arith.addf %327, %328 : vector<2x128xf32>
    %330 = arith.negf %329 : vector<2x128xf32>
    %331 = math.exp %330 : vector<2x128xf32>
    %cst_174 = arith.constant 1.000000e+00 : f32
    %332 = vector.broadcast %cst_174 : f32 to vector<2x128xf32>
    %333 = arith.addf %332, %331 : vector<2x128xf32>
    %334 = arith.divf %332, %333 : vector<2x128xf32>
    %335 = vector.extract_strided_slice %316 {offsets = [0, 256], sizes = [2, 128], strides = [1, 1]} : vector<2x384xf32> to vector<2x128xf32>
    %336 = vector.extract_strided_slice %318 {offsets = [0, 256], sizes = [2, 128], strides = [1, 1]} : vector<2x384xf32> to vector<2x128xf32>
    %337 = arith.mulf %326, %336 : vector<2x128xf32>
    %338 = arith.addf %335, %337 : vector<2x128xf32>
    %339 = math.tanh %338 : vector<2x128xf32>
    %cst_175 = arith.constant 1.000000e+00 : f32
    %340 = vector.broadcast %cst_175 : f32 to vector<2x128xf32>
    %341 = arith.subf %340, %334 : vector<2x128xf32>
    %342 = arith.mulf %341, %339 : vector<2x128xf32>
    %343 = arith.mulf %334, %309 : vector<2x128xf32>
    %344 = arith.addf %342, %343 : vector<2x128xf32>
    %345 = arith.index_cast %c4_i32 : i32 to index
    %c0_176 = arith.constant 0 : index
    %c0_177 = arith.constant 0 : index
    %346 = vector.load %arg16[%345, %c0_176, %c0_177] : memref<8x2x128xf32, #tpu.memory_space<vmem>>, vector<1x2x128xf32>
    %347 = vector.shape_cast %346 : vector<1x2x128xf32> to vector<2x128xf32>
    %348 = vector.shape_cast %344 : vector<2x128xf32> to vector<1x2x128xf32>
    tpu.vector_store %arg16[%345, %c0_176, %c0_177], %348 {strides = array<i32>} : memref<8x2x128xf32, #tpu.memory_space<vmem>>, vector<1x2x128xf32>,
    %c5_i32 = arith.constant 5 : i32
    %349 = arith.index_cast %c5_i32 : i32 to index
    %c0_178 = arith.constant 0 : index
    %c0_179 = arith.constant 0 : index
    %350 = vector.load %arg15[%349, %c0_178, %c0_179] : memref<8x2x384xf32, #tpu.memory_space<vmem>>, vector<1x2x384xf32>
    %351 = vector.shape_cast %350 : vector<1x2x384xf32> to vector<2x384xf32>
    %cst_180 = arith.constant dense<0.000000e+00> : vector<2x384xf32>
    %352 = tpu.matmul %344, %169, %cst_180 {dimension_numbers = #tpu.dot_dimension_numbers<[1], [0], [0], [1], [0, 0, 1, 1], [], []>} : vector<2x128xf32>, vector<128x384xf32>, vector<2x384xf32> -> vector<2x384xf32>
    %353 = arith.addf %352, %172 : vector<2x384xf32>
    %354 = vector.extract_strided_slice %351 {offsets = [0, 0], sizes = [2, 128], strides = [1, 1]} : vector<2x384xf32> to vector<2x128xf32>
    %355 = vector.extract_strided_slice %353 {offsets = [0, 0], sizes = [2, 128], strides = [1, 1]} : vector<2x384xf32> to vector<2x128xf32>
    %356 = arith.addf %354, %355 : vector<2x128xf32>
    %357 = arith.negf %356 : vector<2x128xf32>
    %358 = math.exp %357 : vector<2x128xf32>
    %cst_181 = arith.constant 1.000000e+00 : f32
    %359 = vector.broadcast %cst_181 : f32 to vector<2x128xf32>
    %360 = arith.addf %359, %358 : vector<2x128xf32>
    %361 = arith.divf %359, %360 : vector<2x128xf32>
    %362 = vector.extract_strided_slice %351 {offsets = [0, 128], sizes = [2, 128], strides = [1, 1]} : vector<2x384xf32> to vector<2x128xf32>
    %363 = vector.extract_strided_slice %353 {offsets = [0, 128], sizes = [2, 128], strides = [1, 1]} : vector<2x384xf32> to vector<2x128xf32>
    %364 = arith.addf %362, %363 : vector<2x128xf32>
    %365 = arith.negf %364 : vector<2x128xf32>
    %366 = math.exp %365 : vector<2x128xf32>
    %cst_182 = arith.constant 1.000000e+00 : f32
    %367 = vector.broadcast %cst_182 : f32 to vector<2x128xf32>
    %368 = arith.addf %367, %366 : vector<2x128xf32>
    %369 = arith.divf %367, %368 : vector<2x128xf32>
    %370 = vector.extract_strided_slice %351 {offsets = [0, 256], sizes = [2, 128], strides = [1, 1]} : vector<2x384xf32> to vector<2x128xf32>
    %371 = vector.extract_strided_slice %353 {offsets = [0, 256], sizes = [2, 128], strides = [1, 1]} : vector<2x384xf32> to vector<2x128xf32>
    %372 = arith.mulf %361, %371 : vector<2x128xf32>
    %373 = arith.addf %370, %372 : vector<2x128xf32>
    %374 = math.tanh %373 : vector<2x128xf32>
    %cst_183 = arith.constant 1.000000e+00 : f32
    %375 = vector.broadcast %cst_183 : f32 to vector<2x128xf32>
    %376 = arith.subf %375, %369 : vector<2x128xf32>
    %377 = arith.mulf %376, %374 : vector<2x128xf32>
    %378 = arith.mulf %369, %344 : vector<2x128xf32>
    %379 = arith.addf %377, %378 : vector<2x128xf32>
    %380 = arith.index_cast %c5_i32 : i32 to index
    %c0_184 = arith.constant 0 : index
    %c0_185 = arith.constant 0 : index
    %381 = vector.load %arg16[%380, %c0_184, %c0_185] : memref<8x2x128xf32, #tpu.memory_space<vmem>>, vector<1x2x128xf32>
    %382 = vector.shape_cast %381 : vector<1x2x128xf32> to vector<2x128xf32>
    %383 = vector.shape_cast %379 : vector<2x128xf32> to vector<1x2x128xf32>
    tpu.vector_store %arg16[%380, %c0_184, %c0_185], %383 {strides = array<i32>} : memref<8x2x128xf32, #tpu.memory_space<vmem>>, vector<1x2x128xf32>,
    %c6_i32 = arith.constant 6 : i32
    %384 = arith.index_cast %c6_i32 : i32 to index
    %c0_186 = arith.constant 0 : index
    %c0_187 = arith.constant 0 : index
    %385 = vector.load %arg15[%384, %c0_186, %c0_187] : memref<8x2x384xf32, #tpu.memory_space<vmem>>, vector<1x2x384xf32>
    %386 = vector.shape_cast %385 : vector<1x2x384xf32> to vector<2x384xf32>
    %cst_188 = arith.constant dense<0.000000e+00> : vector<2x384xf32>
    %387 = tpu.matmul %379, %169, %cst_188 {dimension_numbers = #tpu.dot_dimension_numbers<[1], [0], [0], [1], [0, 0, 1, 1], [], []>} : vector<2x128xf32>, vector<128x384xf32>, vector<2x384xf32> -> vector<2x384xf32>
    %388 = arith.addf %387, %172 : vector<2x384xf32>
    %389 = vector.extract_strided_slice %386 {offsets = [0, 0], sizes = [2, 128], strides = [1, 1]} : vector<2x384xf32> to vector<2x128xf32>
    %390 = vector.extract_strided_slice %388 {offsets = [0, 0], sizes = [2, 128], strides = [1, 1]} : vector<2x384xf32> to vector<2x128xf32>
    %391 = arith.addf %389, %390 : vector<2x128xf32>
    %392 = arith.negf %391 : vector<2x128xf32>
    %393 = math.exp %392 : vector<2x128xf32>
    %cst_189 = arith.constant 1.000000e+00 : f32
    %394 = vector.broadcast %cst_189 : f32 to vector<2x128xf32>
    %395 = arith.addf %394, %393 : vector<2x128xf32>
    %396 = arith.divf %394, %395 : vector<2x128xf32>
    %397 = vector.extract_strided_slice %386 {offsets = [0, 128], sizes = [2, 128], strides = [1, 1]} : vector<2x384xf32> to vector<2x128xf32>
    %398 = vector.extract_strided_slice %388 {offsets = [0, 128], sizes = [2, 128], strides = [1, 1]} : vector<2x384xf32> to vector<2x128xf32>
    %399 = arith.addf %397, %398 : vector<2x128xf32>
    %400 = arith.negf %399 : vector<2x128xf32>
    %401 = math.exp %400 : vector<2x128xf32>
    %cst_190 = arith.constant 1.000000e+00 : f32
    %402 = vector.broadcast %cst_190 : f32 to vector<2x128xf32>
    %403 = arith.addf %402, %401 : vector<2x128xf32>
    %404 = arith.divf %402, %403 : vector<2x128xf32>
    %405 = vector.extract_strided_slice %386 {offsets = [0, 256], sizes = [2, 128], strides = [1, 1]} : vector<2x384xf32> to vector<2x128xf32>
    %406 = vector.extract_strided_slice %388 {offsets = [0, 256], sizes = [2, 128], strides = [1, 1]} : vector<2x384xf32> to vector<2x128xf32>
    %407 = arith.mulf %396, %406 : vector<2x128xf32>
    %408 = arith.addf %405, %407 : vector<2x128xf32>
    %409 = math.tanh %408 : vector<2x128xf32>
    %cst_191 = arith.constant 1.000000e+00 : f32
    %410 = vector.broadcast %cst_191 : f32 to vector<2x128xf32>
    %411 = arith.subf %410, %404 : vector<2x128xf32>
    %412 = arith.mulf %411, %409 : vector<2x128xf32>
    %413 = arith.mulf %404, %379 : vector<2x128xf32>
    %414 = arith.addf %412, %413 : vector<2x128xf32>
    %415 = arith.index_cast %c6_i32 : i32 to index
    %c0_192 = arith.constant 0 : index
    %c0_193 = arith.constant 0 : index
    %416 = vector.load %arg16[%415, %c0_192, %c0_193] : memref<8x2x128xf32, #tpu.memory_space<vmem>>, vector<1x2x128xf32>
    %417 = vector.shape_cast %416 : vector<1x2x128xf32> to vector<2x128xf32>
    %418 = vector.shape_cast %414 : vector<2x128xf32> to vector<1x2x128xf32>
    tpu.vector_store %arg16[%415, %c0_192, %c0_193], %418 {strides = array<i32>} : memref<8x2x128xf32, #tpu.memory_space<vmem>>, vector<1x2x128xf32>,
    %c7_i32 = arith.constant 7 : i32
    %419 = arith.index_cast %c7_i32 : i32 to index
    %c0_194 = arith.constant 0 : index
    %c0_195 = arith.constant 0 : index
    %420 = vector.load %arg15[%419, %c0_194, %c0_195] : memref<8x2x384xf32, #tpu.memory_space<vmem>>, vector<1x2x384xf32>
    %421 = vector.shape_cast %420 : vector<1x2x384xf32> to vector<2x384xf32>
    %cst_196 = arith.constant dense<0.000000e+00> : vector<2x384xf32>
    %422 = tpu.matmul %414, %169, %cst_196 {dimension_numbers = #tpu.dot_dimension_numbers<[1], [0], [0], [1], [0, 0, 1, 1], [], []>} : vector<2x128xf32>, vector<128x384xf32>, vector<2x384xf32> -> vector<2x384xf32>
    %423 = arith.addf %422, %172 : vector<2x384xf32>
    %424 = vector.extract_strided_slice %421 {offsets = [0, 0], sizes = [2, 128], strides = [1, 1]} : vector<2x384xf32> to vector<2x128xf32>
    %425 = vector.extract_strided_slice %423 {offsets = [0, 0], sizes = [2, 128], strides = [1, 1]} : vector<2x384xf32> to vector<2x128xf32>
    %426 = arith.addf %424, %425 : vector<2x128xf32>
    %427 = arith.negf %426 : vector<2x128xf32>
    %428 = math.exp %427 : vector<2x128xf32>
    %cst_197 = arith.constant 1.000000e+00 : f32
    %429 = vector.broadcast %cst_197 : f32 to vector<2x128xf32>
    %430 = arith.addf %429, %428 : vector<2x128xf32>
    %431 = arith.divf %429, %430 : vector<2x128xf32>
    %432 = vector.extract_strided_slice %421 {offsets = [0, 128], sizes = [2, 128], strides = [1, 1]} : vector<2x384xf32> to vector<2x128xf32>
    %433 = vector.extract_strided_slice %423 {offsets = [0, 128], sizes = [2, 128], strides = [1, 1]} : vector<2x384xf32> to vector<2x128xf32>
    %434 = arith.addf %432, %433 : vector<2x128xf32>
    %435 = arith.negf %434 : vector<2x128xf32>
    %436 = math.exp %435 : vector<2x128xf32>
    %cst_198 = arith.constant 1.000000e+00 : f32
    %437 = vector.broadcast %cst_198 : f32 to vector<2x128xf32>
    %438 = arith.addf %437, %436 : vector<2x128xf32>
    %439 = arith.divf %437, %438 : vector<2x128xf32>
    %440 = vector.extract_strided_slice %421 {offsets = [0, 256], sizes = [2, 128], strides = [1, 1]} : vector<2x384xf32> to vector<2x128xf32>
    %441 = vector.extract_strided_slice %423 {offsets = [0, 256], sizes = [2, 128], strides = [1, 1]} : vector<2x384xf32> to vector<2x128xf32>
    %442 = arith.mulf %431, %441 : vector<2x128xf32>
    %443 = arith.addf %440, %442 : vector<2x128xf32>
    %444 = math.tanh %443 : vector<2x128xf32>
    %cst_199 = arith.constant 1.000000e+00 : f32
    %445 = vector.broadcast %cst_199 : f32 to vector<2x128xf32>
    %446 = arith.subf %445, %439 : vector<2x128xf32>
    %447 = arith.mulf %446, %444 : vector<2x128xf32>
    %448 = arith.mulf %439, %414 : vector<2x128xf32>
    %449 = arith.addf %447, %448 : vector<2x128xf32>
    %450 = arith.index_cast %c7_i32 : i32 to index
    %c0_200 = arith.constant 0 : index
    %c0_201 = arith.constant 0 : index
    %451 = vector.load %arg16[%450, %c0_200, %c0_201] : memref<8x2x128xf32, #tpu.memory_space<vmem>>, vector<1x2x128xf32>
    %452 = vector.shape_cast %451 : vector<1x2x128xf32> to vector<2x128xf32>
    %453 = vector.shape_cast %449 : vector<2x128xf32> to vector<1x2x128xf32>
    tpu.vector_store %arg16[%450, %c0_200, %c0_201], %453 {strides = array<i32>} : memref<8x2x128xf32, #tpu.memory_space<vmem>>, vector<1x2x128xf32>,
    %c8_i32 = arith.constant 8 : i32
    %c0_202 = arith.constant 0 : index
    %c0_203 = arith.constant 0 : index
    %c0_204 = arith.constant 0 : index
    %454 = vector.load %arg16[%c0_202, %c0_203, %c0_204] : memref<8x2x128xf32, #tpu.memory_space<vmem>>, vector<1x2x128xf32>
    %455 = vector.shape_cast %454 : vector<1x2x128xf32> to vector<2x128xf32>
    %c7_205 = arith.constant 7 : index
    %c0_206 = arith.constant 0 : index
    %c0_207 = arith.constant 0 : index
    %456 = vector.load %arg16[%c7_205, %c0_206, %c0_207] : memref<8x2x128xf32, #tpu.memory_space<vmem>>, vector<1x2x128xf32>
    %457 = vector.shape_cast %456 : vector<1x2x128xf32> to vector<2x128xf32>
    %458 = vector.shape_cast %21 : vector<1x128xi1> to vector<1x128xi1>
    %459 = vector.broadcast %458 : vector<1x128xi1> to vector<2x128xi1>
    %460 = arith.select %459, %455, %457 : vector<2x128xi1>, vector<2x128xf32>
    %c0_208 = arith.constant 0 : index
    %c0_209 = arith.constant 0 : index
    %c0_210 = arith.constant 0 : index
    %461 = vector.load %arg16[%c0_208, %c0_209, %c0_210] : memref<8x2x128xf32, #tpu.memory_space<vmem>>, vector<1x2x128xf32>
    %462 = vector.shape_cast %461 : vector<1x2x128xf32> to vector<2x128xf32>
    %463 = vector.shape_cast %460 : vector<2x128xf32> to vector<1x2x128xf32>
    tpu.vector_store %arg16[%c0_208, %c0_209, %c0_210], %463 {strides = array<i32>} : memref<8x2x128xf32, #tpu.memory_space<vmem>>, vector<1x2x128xf32>,
    %464 = vector.shape_cast %21 : vector<1x128xi1> to vector<1x128xi1>
    %465 = vector.broadcast %464 : vector<1x128xi1> to vector<2x128xi1>
    %466 = arith.select %465, %457, %455 : vector<2x128xi1>, vector<2x128xf32>
    %c7_211 = arith.constant 7 : index
    %c0_212 = arith.constant 0 : index
    %c0_213 = arith.constant 0 : index
    %467 = vector.load %arg16[%c7_211, %c0_212, %c0_213] : memref<8x2x128xf32, #tpu.memory_space<vmem>>, vector<1x2x128xf32>
    %468 = vector.shape_cast %467 : vector<1x2x128xf32> to vector<2x128xf32>
    %469 = vector.shape_cast %466 : vector<2x128xf32> to vector<1x2x128xf32>
    tpu.vector_store %arg16[%c7_211, %c0_212, %c0_213], %469 {strides = array<i32>} : memref<8x2x128xf32, #tpu.memory_space<vmem>>, vector<1x2x128xf32>,
    %c1_214 = arith.constant 1 : index
    %c0_215 = arith.constant 0 : index
    %c0_216 = arith.constant 0 : index
    %470 = vector.load %arg16[%c1_214, %c0_215, %c0_216] : memref<8x2x128xf32, #tpu.memory_space<vmem>>, vector<1x2x128xf32>
    %471 = vector.shape_cast %470 : vector<1x2x128xf32> to vector<2x128xf32>
    %c6_217 = arith.constant 6 : index
    %c0_218 = arith.constant 0 : index
    %c0_219 = arith.constant 0 : index
    %472 = vector.load %arg16[%c6_217, %c0_218, %c0_219] : memref<8x2x128xf32, #tpu.memory_space<vmem>>, vector<1x2x128xf32>
    %473 = vector.shape_cast %472 : vector<1x2x128xf32> to vector<2x128xf32>
    %474 = vector.shape_cast %21 : vector<1x128xi1> to vector<1x128xi1>
    %475 = vector.broadcast %474 : vector<1x128xi1> to vector<2x128xi1>
    %476 = arith.select %475, %471, %473 : vector<2x128xi1>, vector<2x128xf32>
    %c1_220 = arith.constant 1 : index
    %c0_221 = arith.constant 0 : index
    %c0_222 = arith.constant 0 : index
    %477 = vector.load %arg16[%c1_220, %c0_221, %c0_222] : memref<8x2x128xf32, #tpu.memory_space<vmem>>, vector<1x2x128xf32>
    %478 = vector.shape_cast %477 : vector<1x2x128xf32> to vector<2x128xf32>
    %479 = vector.shape_cast %476 : vector<2x128xf32> to vector<1x2x128xf32>
    tpu.vector_store %arg16[%c1_220, %c0_221, %c0_222], %479 {strides = array<i32>} : memref<8x2x128xf32, #tpu.memory_space<vmem>>, vector<1x2x128xf32>,
    %480 = vector.shape_cast %21 : vector<1x128xi1> to vector<1x128xi1>
    %481 = vector.broadcast %480 : vector<1x128xi1> to vector<2x128xi1>
    %482 = arith.select %481, %473, %471 : vector<2x128xi1>, vector<2x128xf32>
    %c6_223 = arith.constant 6 : index
    %c0_224 = arith.constant 0 : index
    %c0_225 = arith.constant 0 : index
    %483 = vector.load %arg16[%c6_223, %c0_224, %c0_225] : memref<8x2x128xf32, #tpu.memory_space<vmem>>, vector<1x2x128xf32>
    %484 = vector.shape_cast %483 : vector<1x2x128xf32> to vector<2x128xf32>
    %485 = vector.shape_cast %482 : vector<2x128xf32> to vector<1x2x128xf32>
    tpu.vector_store %arg16[%c6_223, %c0_224, %c0_225], %485 {strides = array<i32>} : memref<8x2x128xf32, #tpu.memory_space<vmem>>, vector<1x2x128xf32>,
    %c2_226 = arith.constant 2 : index
    %c0_227 = arith.constant 0 : index
    %c0_228 = arith.constant 0 : index
    %486 = vector.load %arg16[%c2_226, %c0_227, %c0_228] : memref<8x2x128xf32, #tpu.memory_space<vmem>>, vector<1x2x128xf32>
    %487 = vector.shape_cast %486 : vector<1x2x128xf32> to vector<2x128xf32>
    %c5_229 = arith.constant 5 : index
    %c0_230 = arith.constant 0 : index
    %c0_231 = arith.constant 0 : index
    %488 = vector.load %arg16[%c5_229, %c0_230, %c0_231] : memref<8x2x128xf32, #tpu.memory_space<vmem>>, vector<1x2x128xf32>
    %489 = vector.shape_cast %488 : vector<1x2x128xf32> to vector<2x128xf32>
    %490 = vector.shape_cast %21 : vector<1x128xi1> to vector<1x128xi1>
    %491 = vector.broadcast %490 : vector<1x128xi1> to vector<2x128xi1>
    %492 = arith.select %491, %487, %489 : vector<2x128xi1>, vector<2x128xf32>
    %c2_232 = arith.constant 2 : index
    %c0_233 = arith.constant 0 : index
    %c0_234 = arith.constant 0 : index
    %493 = vector.load %arg16[%c2_232, %c0_233, %c0_234] : memref<8x2x128xf32, #tpu.memory_space<vmem>>, vector<1x2x128xf32>
    %494 = vector.shape_cast %493 : vector<1x2x128xf32> to vector<2x128xf32>
    %495 = vector.shape_cast %492 : vector<2x128xf32> to vector<1x2x128xf32>
    tpu.vector_store %arg16[%c2_232, %c0_233, %c0_234], %495 {strides = array<i32>} : memref<8x2x128xf32, #tpu.memory_space<vmem>>, vector<1x2x128xf32>,
    %496 = vector.shape_cast %21 : vector<1x128xi1> to vector<1x128xi1>
    %497 = vector.broadcast %496 : vector<1x128xi1> to vector<2x128xi1>
    %498 = arith.select %497, %489, %487 : vector<2x128xi1>, vector<2x128xf32>
    %c5_235 = arith.constant 5 : index
    %c0_236 = arith.constant 0 : index
    %c0_237 = arith.constant 0 : index
    %499 = vector.load %arg16[%c5_235, %c0_236, %c0_237] : memref<8x2x128xf32, #tpu.memory_space<vmem>>, vector<1x2x128xf32>
    %500 = vector.shape_cast %499 : vector<1x2x128xf32> to vector<2x128xf32>
    %501 = vector.shape_cast %498 : vector<2x128xf32> to vector<1x2x128xf32>
    tpu.vector_store %arg16[%c5_235, %c0_236, %c0_237], %501 {strides = array<i32>} : memref<8x2x128xf32, #tpu.memory_space<vmem>>, vector<1x2x128xf32>,
    %c3_238 = arith.constant 3 : index
    %c0_239 = arith.constant 0 : index
    %c0_240 = arith.constant 0 : index
    %502 = vector.load %arg16[%c3_238, %c0_239, %c0_240] : memref<8x2x128xf32, #tpu.memory_space<vmem>>, vector<1x2x128xf32>
    %503 = vector.shape_cast %502 : vector<1x2x128xf32> to vector<2x128xf32>
    %c4_241 = arith.constant 4 : index
    %c0_242 = arith.constant 0 : index
    %c0_243 = arith.constant 0 : index
    %504 = vector.load %arg16[%c4_241, %c0_242, %c0_243] : memref<8x2x128xf32, #tpu.memory_space<vmem>>, vector<1x2x128xf32>
    %505 = vector.shape_cast %504 : vector<1x2x128xf32> to vector<2x128xf32>
    %506 = vector.shape_cast %21 : vector<1x128xi1> to vector<1x128xi1>
    %507 = vector.broadcast %506 : vector<1x128xi1> to vector<2x128xi1>
    %508 = arith.select %507, %503, %505 : vector<2x128xi1>, vector<2x128xf32>
    %c3_244 = arith.constant 3 : index
    %c0_245 = arith.constant 0 : index
    %c0_246 = arith.constant 0 : index
    %509 = vector.load %arg16[%c3_244, %c0_245, %c0_246] : memref<8x2x128xf32, #tpu.memory_space<vmem>>, vector<1x2x128xf32>
    %510 = vector.shape_cast %509 : vector<1x2x128xf32> to vector<2x128xf32>
    %511 = vector.shape_cast %508 : vector<2x128xf32> to vector<1x2x128xf32>
    tpu.vector_store %arg16[%c3_244, %c0_245, %c0_246], %511 {strides = array<i32>} : memref<8x2x128xf32, #tpu.memory_space<vmem>>, vector<1x2x128xf32>,
    %512 = vector.shape_cast %21 : vector<1x128xi1> to vector<1x128xi1>
    %513 = vector.broadcast %512 : vector<1x128xi1> to vector<2x128xi1>
    %514 = arith.select %513, %505, %503 : vector<2x128xi1>, vector<2x128xf32>
    %c4_247 = arith.constant 4 : index
    %c0_248 = arith.constant 0 : index
    %c0_249 = arith.constant 0 : index
    %515 = vector.load %arg16[%c4_247, %c0_248, %c0_249] : memref<8x2x128xf32, #tpu.memory_space<vmem>>, vector<1x2x128xf32>
    %516 = vector.shape_cast %515 : vector<1x2x128xf32> to vector<2x128xf32>
    %517 = vector.shape_cast %514 : vector<2x128xf32> to vector<1x2x128xf32>
    tpu.vector_store %arg16[%c4_247, %c0_248, %c0_249], %517 {strides = array<i32>} : memref<8x2x128xf32, #tpu.memory_space<vmem>>, vector<1x2x128xf32>,
    %c0_250 = arith.constant 0 : index
    %c0_251 = arith.constant 0 : index
    %c0_252 = arith.constant 0 : index
    %518 = vector.load %arg16[%c0_250, %c0_251, %c0_252] : memref<8x2x128xf32, #tpu.memory_space<vmem>>, vector<1x2x128xf32>
    %519 = vector.shape_cast %518 : vector<1x2x128xf32> to vector<2x128xf32>
    %c0_253 = arith.constant 0 : index
    %c0_254 = arith.constant 0 : index
    %520 = vector.load %arg5[%c0_253, %c0_254] : memref<128x384xf32, #tpu.memory_space<vmem>>, vector<128x384xf32>
    %cst_255 = arith.constant dense<0.000000e+00> : vector<2x384xf32>
    %521 = tpu.matmul %519, %520, %cst_255 {dimension_numbers = #tpu.dot_dimension_numbers<[1], [0], [0], [1], [0, 0, 1, 1], [], []>} : vector<2x128xf32>, vector<128x384xf32>, vector<2x384xf32> -> vector<2x384xf32>
    %c0_256 = arith.constant 0 : index
    %c0_257 = arith.constant 0 : index
    %522 = vector.load %arg7[%c0_256, %c0_257] : memref<1x384xf32, #tpu.memory_space<vmem>>, vector<1x384xf32>
    %523 = vector.broadcast %522 : vector<1x384xf32> to vector<2x384xf32>
    %524 = arith.addf %521, %523 : vector<2x384xf32>
    %c0_258 = arith.constant 0 : index
    %c0_259 = arith.constant 0 : index
    %c0_260 = arith.constant 0 : index
    %525 = vector.load %arg15[%c0_258, %c0_259, %c0_260] : memref<8x2x384xf32, #tpu.memory_space<vmem>>, vector<1x2x384xf32>
    %526 = vector.shape_cast %525 : vector<1x2x384xf32> to vector<2x384xf32>
    %527 = vector.shape_cast %524 : vector<2x384xf32> to vector<1x2x384xf32>
    tpu.vector_store %arg15[%c0_258, %c0_259, %c0_260], %527 {strides = array<i32>} : memref<8x2x384xf32, #tpu.memory_space<vmem>>, vector<1x2x384xf32>,
    %c1_261 = arith.constant 1 : index
    %c0_262 = arith.constant 0 : index
    %c0_263 = arith.constant 0 : index
    %528 = vector.load %arg16[%c1_261, %c0_262, %c0_263] : memref<8x2x128xf32, #tpu.memory_space<vmem>>, vector<1x2x128xf32>
    %529 = vector.shape_cast %528 : vector<1x2x128xf32> to vector<2x128xf32>
    %c0_264 = arith.constant 0 : index
    %c0_265 = arith.constant 0 : index
    %530 = vector.load %arg5[%c0_264, %c0_265] : memref<128x384xf32, #tpu.memory_space<vmem>>, vector<128x384xf32>
    %cst_266 = arith.constant dense<0.000000e+00> : vector<2x384xf32>
    %531 = tpu.matmul %529, %530, %cst_266 {dimension_numbers = #tpu.dot_dimension_numbers<[1], [0], [0], [1], [0, 0, 1, 1], [], []>} : vector<2x128xf32>, vector<128x384xf32>, vector<2x384xf32> -> vector<2x384xf32>
    %c0_267 = arith.constant 0 : index
    %c0_268 = arith.constant 0 : index
    %532 = vector.load %arg7[%c0_267, %c0_268] : memref<1x384xf32, #tpu.memory_space<vmem>>, vector<1x384xf32>
    %533 = vector.broadcast %532 : vector<1x384xf32> to vector<2x384xf32>
    %534 = arith.addf %531, %533 : vector<2x384xf32>
    %c1_269 = arith.constant 1 : index
    %c0_270 = arith.constant 0 : index
    %c0_271 = arith.constant 0 : index
    %535 = vector.load %arg15[%c1_269, %c0_270, %c0_271] : memref<8x2x384xf32, #tpu.memory_space<vmem>>, vector<1x2x384xf32>
    %536 = vector.shape_cast %535 : vector<1x2x384xf32> to vector<2x384xf32>
    %537 = vector.shape_cast %534 : vector<2x384xf32> to vector<1x2x384xf32>
    tpu.vector_store %arg15[%c1_269, %c0_270, %c0_271], %537 {strides = array<i32>} : memref<8x2x384xf32, #tpu.memory_space<vmem>>, vector<1x2x384xf32>,
    %c2_272 = arith.constant 2 : index
    %c0_273 = arith.constant 0 : index
    %c0_274 = arith.constant 0 : index
    %538 = vector.load %arg16[%c2_272, %c0_273, %c0_274] : memref<8x2x128xf32, #tpu.memory_space<vmem>>, vector<1x2x128xf32>
    %539 = vector.shape_cast %538 : vector<1x2x128xf32> to vector<2x128xf32>
    %c0_275 = arith.constant 0 : index
    %c0_276 = arith.constant 0 : index
    %540 = vector.load %arg5[%c0_275, %c0_276] : memref<128x384xf32, #tpu.memory_space<vmem>>, vector<128x384xf32>
    %cst_277 = arith.constant dense<0.000000e+00> : vector<2x384xf32>
    %541 = tpu.matmul %539, %540, %cst_277 {dimension_numbers = #tpu.dot_dimension_numbers<[1], [0], [0], [1], [0, 0, 1, 1], [], []>} : vector<2x128xf32>, vector<128x384xf32>, vector<2x384xf32> -> vector<2x384xf32>
    %c0_278 = arith.constant 0 : index
    %c0_279 = arith.constant 0 : index
    %542 = vector.load %arg7[%c0_278, %c0_279] : memref<1x384xf32, #tpu.memory_space<vmem>>, vector<1x384xf32>
    %543 = vector.broadcast %542 : vector<1x384xf32> to vector<2x384xf32>
    %544 = arith.addf %541, %543 : vector<2x384xf32>
    %c2_280 = arith.constant 2 : index
    %c0_281 = arith.constant 0 : index
    %c0_282 = arith.constant 0 : index
    %545 = vector.load %arg15[%c2_280, %c0_281, %c0_282] : memref<8x2x384xf32, #tpu.memory_space<vmem>>, vector<1x2x384xf32>
    %546 = vector.shape_cast %545 : vector<1x2x384xf32> to vector<2x384xf32>
    %547 = vector.shape_cast %544 : vector<2x384xf32> to vector<1x2x384xf32>
    tpu.vector_store %arg15[%c2_280, %c0_281, %c0_282], %547 {strides = array<i32>} : memref<8x2x384xf32, #tpu.memory_space<vmem>>, vector<1x2x384xf32>,
    %c3_283 = arith.constant 3 : index
    %c0_284 = arith.constant 0 : index
    %c0_285 = arith.constant 0 : index
    %548 = vector.load %arg16[%c3_283, %c0_284, %c0_285] : memref<8x2x128xf32, #tpu.memory_space<vmem>>, vector<1x2x128xf32>
    %549 = vector.shape_cast %548 : vector<1x2x128xf32> to vector<2x128xf32>
    %c0_286 = arith.constant 0 : index
    %c0_287 = arith.constant 0 : index
    %550 = vector.load %arg5[%c0_286, %c0_287] : memref<128x384xf32, #tpu.memory_space<vmem>>, vector<128x384xf32>
    %cst_288 = arith.constant dense<0.000000e+00> : vector<2x384xf32>
    %551 = tpu.matmul %549, %550, %cst_288 {dimension_numbers = #tpu.dot_dimension_numbers<[1], [0], [0], [1], [0, 0, 1, 1], [], []>} : vector<2x128xf32>, vector<128x384xf32>, vector<2x384xf32> -> vector<2x384xf32>
    %c0_289 = arith.constant 0 : index
    %c0_290 = arith.constant 0 : index
    %552 = vector.load %arg7[%c0_289, %c0_290] : memref<1x384xf32, #tpu.memory_space<vmem>>, vector<1x384xf32>
    %553 = vector.broadcast %552 : vector<1x384xf32> to vector<2x384xf32>
    %554 = arith.addf %551, %553 : vector<2x384xf32>
    %c3_291 = arith.constant 3 : index
    %c0_292 = arith.constant 0 : index
    %c0_293 = arith.constant 0 : index
    %555 = vector.load %arg15[%c3_291, %c0_292, %c0_293] : memref<8x2x384xf32, #tpu.memory_space<vmem>>, vector<1x2x384xf32>
    %556 = vector.shape_cast %555 : vector<1x2x384xf32> to vector<2x384xf32>
    %557 = vector.shape_cast %554 : vector<2x384xf32> to vector<1x2x384xf32>
    tpu.vector_store %arg15[%c3_291, %c0_292, %c0_293], %557 {strides = array<i32>} : memref<8x2x384xf32, #tpu.memory_space<vmem>>, vector<1x2x384xf32>,
    %c4_294 = arith.constant 4 : index
    %c0_295 = arith.constant 0 : index
    %c0_296 = arith.constant 0 : index
    %558 = vector.load %arg16[%c4_294, %c0_295, %c0_296] : memref<8x2x128xf32, #tpu.memory_space<vmem>>, vector<1x2x128xf32>
    %559 = vector.shape_cast %558 : vector<1x2x128xf32> to vector<2x128xf32>
    %c0_297 = arith.constant 0 : index
    %c0_298 = arith.constant 0 : index
    %560 = vector.load %arg5[%c0_297, %c0_298] : memref<128x384xf32, #tpu.memory_space<vmem>>, vector<128x384xf32>
    %cst_299 = arith.constant dense<0.000000e+00> : vector<2x384xf32>
    %561 = tpu.matmul %559, %560, %cst_299 {dimension_numbers = #tpu.dot_dimension_numbers<[1], [0], [0], [1], [0, 0, 1, 1], [], []>} : vector<2x128xf32>, vector<128x384xf32>, vector<2x384xf32> -> vector<2x384xf32>
    %c0_300 = arith.constant 0 : index
    %c0_301 = arith.constant 0 : index
    %562 = vector.load %arg7[%c0_300, %c0_301] : memref<1x384xf32, #tpu.memory_space<vmem>>, vector<1x384xf32>
    %563 = vector.broadcast %562 : vector<1x384xf32> to vector<2x384xf32>
    %564 = arith.addf %561, %563 : vector<2x384xf32>
    %c4_302 = arith.constant 4 : index
    %c0_303 = arith.constant 0 : index
    %c0_304 = arith.constant 0 : index
    %565 = vector.load %arg15[%c4_302, %c0_303, %c0_304] : memref<8x2x384xf32, #tpu.memory_space<vmem>>, vector<1x2x384xf32>
    %566 = vector.shape_cast %565 : vector<1x2x384xf32> to vector<2x384xf32>
    %567 = vector.shape_cast %564 : vector<2x384xf32> to vector<1x2x384xf32>
    tpu.vector_store %arg15[%c4_302, %c0_303, %c0_304], %567 {strides = array<i32>} : memref<8x2x384xf32, #tpu.memory_space<vmem>>, vector<1x2x384xf32>,
    %c5_305 = arith.constant 5 : index
    %c0_306 = arith.constant 0 : index
    %c0_307 = arith.constant 0 : index
    %568 = vector.load %arg16[%c5_305, %c0_306, %c0_307] : memref<8x2x128xf32, #tpu.memory_space<vmem>>, vector<1x2x128xf32>
    %569 = vector.shape_cast %568 : vector<1x2x128xf32> to vector<2x128xf32>
    %c0_308 = arith.constant 0 : index
    %c0_309 = arith.constant 0 : index
    %570 = vector.load %arg5[%c0_308, %c0_309] : memref<128x384xf32, #tpu.memory_space<vmem>>, vector<128x384xf32>
    %cst_310 = arith.constant dense<0.000000e+00> : vector<2x384xf32>
    %571 = tpu.matmul %569, %570, %cst_310 {dimension_numbers = #tpu.dot_dimension_numbers<[1], [0], [0], [1], [0, 0, 1, 1], [], []>} : vector<2x128xf32>, vector<128x384xf32>, vector<2x384xf32> -> vector<2x384xf32>
    %c0_311 = arith.constant 0 : index
    %c0_312 = arith.constant 0 : index
    %572 = vector.load %arg7[%c0_311, %c0_312] : memref<1x384xf32, #tpu.memory_space<vmem>>, vector<1x384xf32>
    %573 = vector.broadcast %572 : vector<1x384xf32> to vector<2x384xf32>
    %574 = arith.addf %571, %573 : vector<2x384xf32>
    %c5_313 = arith.constant 5 : index
    %c0_314 = arith.constant 0 : index
    %c0_315 = arith.constant 0 : index
    %575 = vector.load %arg15[%c5_313, %c0_314, %c0_315] : memref<8x2x384xf32, #tpu.memory_space<vmem>>, vector<1x2x384xf32>
    %576 = vector.shape_cast %575 : vector<1x2x384xf32> to vector<2x384xf32>
    %577 = vector.shape_cast %574 : vector<2x384xf32> to vector<1x2x384xf32>
    tpu.vector_store %arg15[%c5_313, %c0_314, %c0_315], %577 {strides = array<i32>} : memref<8x2x384xf32, #tpu.memory_space<vmem>>, vector<1x2x384xf32>,
    %c6_316 = arith.constant 6 : index
    %c0_317 = arith.constant 0 : index
    %c0_318 = arith.constant 0 : index
    %578 = vector.load %arg16[%c6_316, %c0_317, %c0_318] : memref<8x2x128xf32, #tpu.memory_space<vmem>>, vector<1x2x128xf32>
    %579 = vector.shape_cast %578 : vector<1x2x128xf32> to vector<2x128xf32>
    %c0_319 = arith.constant 0 : index
    %c0_320 = arith.constant 0 : index
    %580 = vector.load %arg5[%c0_319, %c0_320] : memref<128x384xf32, #tpu.memory_space<vmem>>, vector<128x384xf32>
    %cst_321 = arith.constant dense<0.000000e+00> : vector<2x384xf32>
    %581 = tpu.matmul %579, %580, %cst_321 {dimension_numbers = #tpu.dot_dimension_numbers<[1], [0], [0], [1], [0, 0, 1, 1], [], []>} : vector<2x128xf32>, vector<128x384xf32>, vector<2x384xf32> -> vector<2x384xf32>
    %c0_322 = arith.constant 0 : index
    %c0_323 = arith.constant 0 : index
    %582 = vector.load %arg7[%c0_322, %c0_323] : memref<1x384xf32, #tpu.memory_space<vmem>>, vector<1x384xf32>
    %583 = vector.broadcast %582 : vector<1x384xf32> to vector<2x384xf32>
    %584 = arith.addf %581, %583 : vector<2x384xf32>
    %c6_324 = arith.constant 6 : index
    %c0_325 = arith.constant 0 : index
    %c0_326 = arith.constant 0 : index
    %585 = vector.load %arg15[%c6_324, %c0_325, %c0_326] : memref<8x2x384xf32, #tpu.memory_space<vmem>>, vector<1x2x384xf32>
    %586 = vector.shape_cast %585 : vector<1x2x384xf32> to vector<2x384xf32>
    %587 = vector.shape_cast %584 : vector<2x384xf32> to vector<1x2x384xf32>
    tpu.vector_store %arg15[%c6_324, %c0_325, %c0_326], %587 {strides = array<i32>} : memref<8x2x384xf32, #tpu.memory_space<vmem>>, vector<1x2x384xf32>,
    %c7_327 = arith.constant 7 : index
    %c0_328 = arith.constant 0 : index
    %c0_329 = arith.constant 0 : index
    %588 = vector.load %arg16[%c7_327, %c0_328, %c0_329] : memref<8x2x128xf32, #tpu.memory_space<vmem>>, vector<1x2x128xf32>
    %589 = vector.shape_cast %588 : vector<1x2x128xf32> to vector<2x128xf32>
    %c0_330 = arith.constant 0 : index
    %c0_331 = arith.constant 0 : index
    %590 = vector.load %arg5[%c0_330, %c0_331] : memref<128x384xf32, #tpu.memory_space<vmem>>, vector<128x384xf32>
    %cst_332 = arith.constant dense<0.000000e+00> : vector<2x384xf32>
    %591 = tpu.matmul %589, %590, %cst_332 {dimension_numbers = #tpu.dot_dimension_numbers<[1], [0], [0], [1], [0, 0, 1, 1], [], []>} : vector<2x128xf32>, vector<128x384xf32>, vector<2x384xf32> -> vector<2x384xf32>
    %c0_333 = arith.constant 0 : index
    %c0_334 = arith.constant 0 : index
    %592 = vector.load %arg7[%c0_333, %c0_334] : memref<1x384xf32, #tpu.memory_space<vmem>>, vector<1x384xf32>
    %593 = vector.broadcast %592 : vector<1x384xf32> to vector<2x384xf32>
    %594 = arith.addf %591, %593 : vector<2x384xf32>
    %c7_335 = arith.constant 7 : index
    %c0_336 = arith.constant 0 : index
    %c0_337 = arith.constant 0 : index
    %595 = vector.load %arg15[%c7_335, %c0_336, %c0_337] : memref<8x2x384xf32, #tpu.memory_space<vmem>>, vector<1x2x384xf32>
    %596 = vector.shape_cast %595 : vector<1x2x384xf32> to vector<2x384xf32>
    %597 = vector.shape_cast %594 : vector<2x384xf32> to vector<1x2x384xf32>
    tpu.vector_store %arg15[%c7_335, %c0_336, %c0_337], %597 {strides = array<i32>} : memref<8x2x384xf32, #tpu.memory_space<vmem>>, vector<1x2x384xf32>,
    %c0_338 = arith.constant 0 : index
    %c0_339 = arith.constant 0 : index
    %c0_340 = arith.constant 0 : index
    %598 = vector.load %arg15[%c0_338, %c0_339, %c0_340] : memref<8x2x384xf32, #tpu.memory_space<vmem>>, vector<1x2x384xf32>
    %599 = vector.shape_cast %598 : vector<1x2x384xf32> to vector<2x384xf32>
    %c7_341 = arith.constant 7 : index
    %c0_342 = arith.constant 0 : index
    %c0_343 = arith.constant 0 : index
    %600 = vector.load %arg15[%c7_341, %c0_342, %c0_343] : memref<8x2x384xf32, #tpu.memory_space<vmem>>, vector<1x2x384xf32>
    %601 = vector.shape_cast %600 : vector<1x2x384xf32> to vector<2x384xf32>
    %602 = vector.shape_cast %18 : vector<1x384xi1> to vector<1x384xi1>
    %603 = vector.broadcast %602 : vector<1x384xi1> to vector<2x384xi1>
    %604 = arith.select %603, %599, %601 : vector<2x384xi1>, vector<2x384xf32>
    %c0_344 = arith.constant 0 : index
    %c0_345 = arith.constant 0 : index
    %c0_346 = arith.constant 0 : index
    %605 = vector.load %arg15[%c0_344, %c0_345, %c0_346] : memref<8x2x384xf32, #tpu.memory_space<vmem>>, vector<1x2x384xf32>
    %606 = vector.shape_cast %605 : vector<1x2x384xf32> to vector<2x384xf32>
    %607 = vector.shape_cast %604 : vector<2x384xf32> to vector<1x2x384xf32>
    tpu.vector_store %arg15[%c0_344, %c0_345, %c0_346], %607 {strides = array<i32>} : memref<8x2x384xf32, #tpu.memory_space<vmem>>, vector<1x2x384xf32>,
    %608 = vector.shape_cast %18 : vector<1x384xi1> to vector<1x384xi1>
    %609 = vector.broadcast %608 : vector<1x384xi1> to vector<2x384xi1>
    %610 = arith.select %609, %601, %599 : vector<2x384xi1>, vector<2x384xf32>
    %c7_347 = arith.constant 7 : index
    %c0_348 = arith.constant 0 : index
    %c0_349 = arith.constant 0 : index
    %611 = vector.load %arg15[%c7_347, %c0_348, %c0_349] : memref<8x2x384xf32, #tpu.memory_space<vmem>>, vector<1x2x384xf32>
    %612 = vector.shape_cast %611 : vector<1x2x384xf32> to vector<2x384xf32>
    %613 = vector.shape_cast %610 : vector<2x384xf32> to vector<1x2x384xf32>
    tpu.vector_store %arg15[%c7_347, %c0_348, %c0_349], %613 {strides = array<i32>} : memref<8x2x384xf32, #tpu.memory_space<vmem>>, vector<1x2x384xf32>,
    %c1_350 = arith.constant 1 : index
    %c0_351 = arith.constant 0 : index
    %c0_352 = arith.constant 0 : index
    %614 = vector.load %arg15[%c1_350, %c0_351, %c0_352] : memref<8x2x384xf32, #tpu.memory_space<vmem>>, vector<1x2x384xf32>
    %615 = vector.shape_cast %614 : vector<1x2x384xf32> to vector<2x384xf32>
    %c6_353 = arith.constant 6 : index
    %c0_354 = arith.constant 0 : index
    %c0_355 = arith.constant 0 : index
    %616 = vector.load %arg15[%c6_353, %c0_354, %c0_355] : memref<8x2x384xf32, #tpu.memory_space<vmem>>, vector<1x2x384xf32>
    %617 = vector.shape_cast %616 : vector<1x2x384xf32> to vector<2x384xf32>
    %618 = vector.shape_cast %18 : vector<1x384xi1> to vector<1x384xi1>
    %619 = vector.broadcast %618 : vector<1x384xi1> to vector<2x384xi1>
    %620 = arith.select %619, %615, %617 : vector<2x384xi1>, vector<2x384xf32>
    %c1_356 = arith.constant 1 : index
    %c0_357 = arith.constant 0 : index
    %c0_358 = arith.constant 0 : index
    %621 = vector.load %arg15[%c1_356, %c0_357, %c0_358] : memref<8x2x384xf32, #tpu.memory_space<vmem>>, vector<1x2x384xf32>
    %622 = vector.shape_cast %621 : vector<1x2x384xf32> to vector<2x384xf32>
    %623 = vector.shape_cast %620 : vector<2x384xf32> to vector<1x2x384xf32>
    tpu.vector_store %arg15[%c1_356, %c0_357, %c0_358], %623 {strides = array<i32>} : memref<8x2x384xf32, #tpu.memory_space<vmem>>, vector<1x2x384xf32>,
    %624 = vector.shape_cast %18 : vector<1x384xi1> to vector<1x384xi1>
    %625 = vector.broadcast %624 : vector<1x384xi1> to vector<2x384xi1>
    %626 = arith.select %625, %617, %615 : vector<2x384xi1>, vector<2x384xf32>
    %c6_359 = arith.constant 6 : index
    %c0_360 = arith.constant 0 : index
    %c0_361 = arith.constant 0 : index
    %627 = vector.load %arg15[%c6_359, %c0_360, %c0_361] : memref<8x2x384xf32, #tpu.memory_space<vmem>>, vector<1x2x384xf32>
    %628 = vector.shape_cast %627 : vector<1x2x384xf32> to vector<2x384xf32>
    %629 = vector.shape_cast %626 : vector<2x384xf32> to vector<1x2x384xf32>
    tpu.vector_store %arg15[%c6_359, %c0_360, %c0_361], %629 {strides = array<i32>} : memref<8x2x384xf32, #tpu.memory_space<vmem>>, vector<1x2x384xf32>,
    %c2_362 = arith.constant 2 : index
    %c0_363 = arith.constant 0 : index
    %c0_364 = arith.constant 0 : index
    %630 = vector.load %arg15[%c2_362, %c0_363, %c0_364] : memref<8x2x384xf32, #tpu.memory_space<vmem>>, vector<1x2x384xf32>
    %631 = vector.shape_cast %630 : vector<1x2x384xf32> to vector<2x384xf32>
    %c5_365 = arith.constant 5 : index
    %c0_366 = arith.constant 0 : index
    %c0_367 = arith.constant 0 : index
    %632 = vector.load %arg15[%c5_365, %c0_366, %c0_367] : memref<8x2x384xf32, #tpu.memory_space<vmem>>, vector<1x2x384xf32>
    %633 = vector.shape_cast %632 : vector<1x2x384xf32> to vector<2x384xf32>
    %634 = vector.shape_cast %18 : vector<1x384xi1> to vector<1x384xi1>
    %635 = vector.broadcast %634 : vector<1x384xi1> to vector<2x384xi1>
    %636 = arith.select %635, %631, %633 : vector<2x384xi1>, vector<2x384xf32>
    %c2_368 = arith.constant 2 : index
    %c0_369 = arith.constant 0 : index
    %c0_370 = arith.constant 0 : index
    %637 = vector.load %arg15[%c2_368, %c0_369, %c0_370] : memref<8x2x384xf32, #tpu.memory_space<vmem>>, vector<1x2x384xf32>
    %638 = vector.shape_cast %637 : vector<1x2x384xf32> to vector<2x384xf32>
    %639 = vector.shape_cast %636 : vector<2x384xf32> to vector<1x2x384xf32>
    tpu.vector_store %arg15[%c2_368, %c0_369, %c0_370], %639 {strides = array<i32>} : memref<8x2x384xf32, #tpu.memory_space<vmem>>, vector<1x2x384xf32>,
    %640 = vector.shape_cast %18 : vector<1x384xi1> to vector<1x384xi1>
    %641 = vector.broadcast %640 : vector<1x384xi1> to vector<2x384xi1>
    %642 = arith.select %641, %633, %631 : vector<2x384xi1>, vector<2x384xf32>
    %c5_371 = arith.constant 5 : index
    %c0_372 = arith.constant 0 : index
    %c0_373 = arith.constant 0 : index
    %643 = vector.load %arg15[%c5_371, %c0_372, %c0_373] : memref<8x2x384xf32, #tpu.memory_space<vmem>>, vector<1x2x384xf32>
    %644 = vector.shape_cast %643 : vector<1x2x384xf32> to vector<2x384xf32>
    %645 = vector.shape_cast %642 : vector<2x384xf32> to vector<1x2x384xf32>
    tpu.vector_store %arg15[%c5_371, %c0_372, %c0_373], %645 {strides = array<i32>} : memref<8x2x384xf32, #tpu.memory_space<vmem>>, vector<1x2x384xf32>,
    %c3_374 = arith.constant 3 : index
    %c0_375 = arith.constant 0 : index
    %c0_376 = arith.constant 0 : index
    %646 = vector.load %arg15[%c3_374, %c0_375, %c0_376] : memref<8x2x384xf32, #tpu.memory_space<vmem>>, vector<1x2x384xf32>
    %647 = vector.shape_cast %646 : vector<1x2x384xf32> to vector<2x384xf32>
    %c4_377 = arith.constant 4 : index
    %c0_378 = arith.constant 0 : index
    %c0_379 = arith.constant 0 : index
    %648 = vector.load %arg15[%c4_377, %c0_378, %c0_379] : memref<8x2x384xf32, #tpu.memory_space<vmem>>, vector<1x2x384xf32>
    %649 = vector.shape_cast %648 : vector<1x2x384xf32> to vector<2x384xf32>
    %650 = vector.shape_cast %18 : vector<1x384xi1> to vector<1x384xi1>
    %651 = vector.broadcast %650 : vector<1x384xi1> to vector<2x384xi1>
    %652 = arith.select %651, %647, %649 : vector<2x384xi1>, vector<2x384xf32>
    %c3_380 = arith.constant 3 : index
    %c0_381 = arith.constant 0 : index
    %c0_382 = arith.constant 0 : index
    %653 = vector.load %arg15[%c3_380, %c0_381, %c0_382] : memref<8x2x384xf32, #tpu.memory_space<vmem>>, vector<1x2x384xf32>
    %654 = vector.shape_cast %653 : vector<1x2x384xf32> to vector<2x384xf32>
    %655 = vector.shape_cast %652 : vector<2x384xf32> to vector<1x2x384xf32>
    tpu.vector_store %arg15[%c3_380, %c0_381, %c0_382], %655 {strides = array<i32>} : memref<8x2x384xf32, #tpu.memory_space<vmem>>, vector<1x2x384xf32>,
    %656 = vector.shape_cast %18 : vector<1x384xi1> to vector<1x384xi1>
    %657 = vector.broadcast %656 : vector<1x384xi1> to vector<2x384xi1>
    %658 = arith.select %657, %649, %647 : vector<2x384xi1>, vector<2x384xf32>
    %c4_383 = arith.constant 4 : index
    %c0_384 = arith.constant 0 : index
    %c0_385 = arith.constant 0 : index
    %659 = vector.load %arg15[%c4_383, %c0_384, %c0_385] : memref<8x2x384xf32, #tpu.memory_space<vmem>>, vector<1x2x384xf32>
    %660 = vector.shape_cast %659 : vector<1x2x384xf32> to vector<2x384xf32>
    %661 = vector.shape_cast %658 : vector<2x384xf32> to vector<1x2x384xf32>
    tpu.vector_store %arg15[%c4_383, %c0_384, %c0_385], %661 {strides = array<i32>} : memref<8x2x384xf32, #tpu.memory_space<vmem>>, vector<1x2x384xf32>,
    %c0_386 = arith.constant 0 : index
    %c0_387 = arith.constant 0 : index
    %662 = vector.load %arg6[%c0_386, %c0_387] : memref<128x384xf32, #tpu.memory_space<vmem>>, vector<128x384xf32>
    %c0_388 = arith.constant 0 : index
    %c0_389 = arith.constant 0 : index
    %663 = vector.load %arg8[%c0_388, %c0_389] : memref<1x384xf32, #tpu.memory_space<vmem>>, vector<1x384xf32>
    %664 = vector.shape_cast %663 : vector<1x384xf32> to vector<1x384xf32>
    %665 = vector.broadcast %664 : vector<1x384xf32> to vector<2x384xf32>
    %cst_390 = arith.constant 0.000000e+00 : f32
    %666 = vector.broadcast %cst_390 : f32 to vector<2x128xf32>
    %c0_i32_391 = arith.constant 0 : i32
    %667 = arith.index_cast %c0_i32_391 : i32 to index
    %c0_392 = arith.constant 0 : index
    %c0_393 = arith.constant 0 : index
    %668 = vector.load %arg15[%667, %c0_392, %c0_393] : memref<8x2x384xf32, #tpu.memory_space<vmem>>, vector<1x2x384xf32>
    %669 = vector.shape_cast %668 : vector<1x2x384xf32> to vector<2x384xf32>
    %cst_394 = arith.constant dense<0.000000e+00> : vector<2x384xf32>
    %670 = tpu.matmul %666, %662, %cst_394 {dimension_numbers = #tpu.dot_dimension_numbers<[1], [0], [0], [1], [0, 0, 1, 1], [], []>} : vector<2x128xf32>, vector<128x384xf32>, vector<2x384xf32> -> vector<2x384xf32>
    %671 = arith.addf %670, %665 : vector<2x384xf32>
    %672 = vector.extract_strided_slice %669 {offsets = [0, 0], sizes = [2, 128], strides = [1, 1]} : vector<2x384xf32> to vector<2x128xf32>
    %673 = vector.extract_strided_slice %671 {offsets = [0, 0], sizes = [2, 128], strides = [1, 1]} : vector<2x384xf32> to vector<2x128xf32>
    %674 = arith.addf %672, %673 : vector<2x128xf32>
    %675 = arith.negf %674 : vector<2x128xf32>
    %676 = math.exp %675 : vector<2x128xf32>
    %cst_395 = arith.constant 1.000000e+00 : f32
    %677 = vector.broadcast %cst_395 : f32 to vector<2x128xf32>
    %678 = arith.addf %677, %676 : vector<2x128xf32>
    %679 = arith.divf %677, %678 : vector<2x128xf32>
    %680 = vector.extract_strided_slice %669 {offsets = [0, 128], sizes = [2, 128], strides = [1, 1]} : vector<2x384xf32> to vector<2x128xf32>
    %681 = vector.extract_strided_slice %671 {offsets = [0, 128], sizes = [2, 128], strides = [1, 1]} : vector<2x384xf32> to vector<2x128xf32>
    %682 = arith.addf %680, %681 : vector<2x128xf32>
    %683 = arith.negf %682 : vector<2x128xf32>
    %684 = math.exp %683 : vector<2x128xf32>
    %cst_396 = arith.constant 1.000000e+00 : f32
    %685 = vector.broadcast %cst_396 : f32 to vector<2x128xf32>
    %686 = arith.addf %685, %684 : vector<2x128xf32>
    %687 = arith.divf %685, %686 : vector<2x128xf32>
    %688 = vector.extract_strided_slice %669 {offsets = [0, 256], sizes = [2, 128], strides = [1, 1]} : vector<2x384xf32> to vector<2x128xf32>
    %689 = vector.extract_strided_slice %671 {offsets = [0, 256], sizes = [2, 128], strides = [1, 1]} : vector<2x384xf32> to vector<2x128xf32>
    %690 = arith.mulf %679, %689 : vector<2x128xf32>
    %691 = arith.addf %688, %690 : vector<2x128xf32>
    %692 = math.tanh %691 : vector<2x128xf32>
    %cst_397 = arith.constant 1.000000e+00 : f32
    %693 = vector.broadcast %cst_397 : f32 to vector<2x128xf32>
    %694 = arith.subf %693, %687 : vector<2x128xf32>
    %695 = arith.mulf %694, %692 : vector<2x128xf32>
    %696 = arith.mulf %687, %666 : vector<2x128xf32>
    %697 = arith.addf %695, %696 : vector<2x128xf32>
    %698 = arith.index_cast %c0_i32_391 : i32 to index
    %c0_398 = arith.constant 0 : index
    %c0_399 = arith.constant 0 : index
    %699 = vector.load %arg16[%698, %c0_398, %c0_399] : memref<8x2x128xf32, #tpu.memory_space<vmem>>, vector<1x2x128xf32>
    %700 = vector.shape_cast %699 : vector<1x2x128xf32> to vector<2x128xf32>
    %701 = vector.shape_cast %697 : vector<2x128xf32> to vector<1x2x128xf32>
    tpu.vector_store %arg16[%698, %c0_398, %c0_399], %701 {strides = array<i32>} : memref<8x2x128xf32, #tpu.memory_space<vmem>>, vector<1x2x128xf32>,
    %c1_i32_400 = arith.constant 1 : i32
    %702 = arith.index_cast %c1_i32_400 : i32 to index
    %c0_401 = arith.constant 0 : index
    %c0_402 = arith.constant 0 : index
    %703 = vector.load %arg15[%702, %c0_401, %c0_402] : memref<8x2x384xf32, #tpu.memory_space<vmem>>, vector<1x2x384xf32>
    %704 = vector.shape_cast %703 : vector<1x2x384xf32> to vector<2x384xf32>
    %cst_403 = arith.constant dense<0.000000e+00> : vector<2x384xf32>
    %705 = tpu.matmul %697, %662, %cst_403 {dimension_numbers = #tpu.dot_dimension_numbers<[1], [0], [0], [1], [0, 0, 1, 1], [], []>} : vector<2x128xf32>, vector<128x384xf32>, vector<2x384xf32> -> vector<2x384xf32>
    %706 = arith.addf %705, %665 : vector<2x384xf32>
    %707 = vector.extract_strided_slice %704 {offsets = [0, 0], sizes = [2, 128], strides = [1, 1]} : vector<2x384xf32> to vector<2x128xf32>
    %708 = vector.extract_strided_slice %706 {offsets = [0, 0], sizes = [2, 128], strides = [1, 1]} : vector<2x384xf32> to vector<2x128xf32>
    %709 = arith.addf %707, %708 : vector<2x128xf32>
    %710 = arith.negf %709 : vector<2x128xf32>
    %711 = math.exp %710 : vector<2x128xf32>
    %cst_404 = arith.constant 1.000000e+00 : f32
    %712 = vector.broadcast %cst_404 : f32 to vector<2x128xf32>
    %713 = arith.addf %712, %711 : vector<2x128xf32>
    %714 = arith.divf %712, %713 : vector<2x128xf32>
    %715 = vector.extract_strided_slice %704 {offsets = [0, 128], sizes = [2, 128], strides = [1, 1]} : vector<2x384xf32> to vector<2x128xf32>
    %716 = vector.extract_strided_slice %706 {offsets = [0, 128], sizes = [2, 128], strides = [1, 1]} : vector<2x384xf32> to vector<2x128xf32>
    %717 = arith.addf %715, %716 : vector<2x128xf32>
    %718 = arith.negf %717 : vector<2x128xf32>
    %719 = math.exp %718 : vector<2x128xf32>
    %cst_405 = arith.constant 1.000000e+00 : f32
    %720 = vector.broadcast %cst_405 : f32 to vector<2x128xf32>
    %721 = arith.addf %720, %719 : vector<2x128xf32>
    %722 = arith.divf %720, %721 : vector<2x128xf32>
    %723 = vector.extract_strided_slice %704 {offsets = [0, 256], sizes = [2, 128], strides = [1, 1]} : vector<2x384xf32> to vector<2x128xf32>
    %724 = vector.extract_strided_slice %706 {offsets = [0, 256], sizes = [2, 128], strides = [1, 1]} : vector<2x384xf32> to vector<2x128xf32>
    %725 = arith.mulf %714, %724 : vector<2x128xf32>
    %726 = arith.addf %723, %725 : vector<2x128xf32>
    %727 = math.tanh %726 : vector<2x128xf32>
    %cst_406 = arith.constant 1.000000e+00 : f32
    %728 = vector.broadcast %cst_406 : f32 to vector<2x128xf32>
    %729 = arith.subf %728, %722 : vector<2x128xf32>
    %730 = arith.mulf %729, %727 : vector<2x128xf32>
    %731 = arith.mulf %722, %697 : vector<2x128xf32>
    %732 = arith.addf %730, %731 : vector<2x128xf32>
    %733 = arith.index_cast %c1_i32_400 : i32 to index
    %c0_407 = arith.constant 0 : index
    %c0_408 = arith.constant 0 : index
    %734 = vector.load %arg16[%733, %c0_407, %c0_408] : memref<8x2x128xf32, #tpu.memory_space<vmem>>, vector<1x2x128xf32>
    %735 = vector.shape_cast %734 : vector<1x2x128xf32> to vector<2x128xf32>
    %736 = vector.shape_cast %732 : vector<2x128xf32> to vector<1x2x128xf32>
    tpu.vector_store %arg16[%733, %c0_407, %c0_408], %736 {strides = array<i32>} : memref<8x2x128xf32, #tpu.memory_space<vmem>>, vector<1x2x128xf32>,
    %c2_i32_409 = arith.constant 2 : i32
    %737 = arith.index_cast %c2_i32_409 : i32 to index
    %c0_410 = arith.constant 0 : index
    %c0_411 = arith.constant 0 : index
    %738 = vector.load %arg15[%737, %c0_410, %c0_411] : memref<8x2x384xf32, #tpu.memory_space<vmem>>, vector<1x2x384xf32>
    %739 = vector.shape_cast %738 : vector<1x2x384xf32> to vector<2x384xf32>
    %cst_412 = arith.constant dense<0.000000e+00> : vector<2x384xf32>
    %740 = tpu.matmul %732, %662, %cst_412 {dimension_numbers = #tpu.dot_dimension_numbers<[1], [0], [0], [1], [0, 0, 1, 1], [], []>} : vector<2x128xf32>, vector<128x384xf32>, vector<2x384xf32> -> vector<2x384xf32>
    %741 = arith.addf %740, %665 : vector<2x384xf32>
    %742 = vector.extract_strided_slice %739 {offsets = [0, 0], sizes = [2, 128], strides = [1, 1]} : vector<2x384xf32> to vector<2x128xf32>
    %743 = vector.extract_strided_slice %741 {offsets = [0, 0], sizes = [2, 128], strides = [1, 1]} : vector<2x384xf32> to vector<2x128xf32>
    %744 = arith.addf %742, %743 : vector<2x128xf32>
    %745 = arith.negf %744 : vector<2x128xf32>
    %746 = math.exp %745 : vector<2x128xf32>
    %cst_413 = arith.constant 1.000000e+00 : f32
    %747 = vector.broadcast %cst_413 : f32 to vector<2x128xf32>
    %748 = arith.addf %747, %746 : vector<2x128xf32>
    %749 = arith.divf %747, %748 : vector<2x128xf32>
    %750 = vector.extract_strided_slice %739 {offsets = [0, 128], sizes = [2, 128], strides = [1, 1]} : vector<2x384xf32> to vector<2x128xf32>
    %751 = vector.extract_strided_slice %741 {offsets = [0, 128], sizes = [2, 128], strides = [1, 1]} : vector<2x384xf32> to vector<2x128xf32>
    %752 = arith.addf %750, %751 : vector<2x128xf32>
    %753 = arith.negf %752 : vector<2x128xf32>
    %754 = math.exp %753 : vector<2x128xf32>
    %cst_414 = arith.constant 1.000000e+00 : f32
    %755 = vector.broadcast %cst_414 : f32 to vector<2x128xf32>
    %756 = arith.addf %755, %754 : vector<2x128xf32>
    %757 = arith.divf %755, %756 : vector<2x128xf32>
    %758 = vector.extract_strided_slice %739 {offsets = [0, 256], sizes = [2, 128], strides = [1, 1]} : vector<2x384xf32> to vector<2x128xf32>
    %759 = vector.extract_strided_slice %741 {offsets = [0, 256], sizes = [2, 128], strides = [1, 1]} : vector<2x384xf32> to vector<2x128xf32>
    %760 = arith.mulf %749, %759 : vector<2x128xf32>
    %761 = arith.addf %758, %760 : vector<2x128xf32>
    %762 = math.tanh %761 : vector<2x128xf32>
    %cst_415 = arith.constant 1.000000e+00 : f32
    %763 = vector.broadcast %cst_415 : f32 to vector<2x128xf32>
    %764 = arith.subf %763, %757 : vector<2x128xf32>
    %765 = arith.mulf %764, %762 : vector<2x128xf32>
    %766 = arith.mulf %757, %732 : vector<2x128xf32>
    %767 = arith.addf %765, %766 : vector<2x128xf32>
    %768 = arith.index_cast %c2_i32_409 : i32 to index
    %c0_416 = arith.constant 0 : index
    %c0_417 = arith.constant 0 : index
    %769 = vector.load %arg16[%768, %c0_416, %c0_417] : memref<8x2x128xf32, #tpu.memory_space<vmem>>, vector<1x2x128xf32>
    %770 = vector.shape_cast %769 : vector<1x2x128xf32> to vector<2x128xf32>
    %771 = vector.shape_cast %767 : vector<2x128xf32> to vector<1x2x128xf32>
    tpu.vector_store %arg16[%768, %c0_416, %c0_417], %771 {strides = array<i32>} : memref<8x2x128xf32, #tpu.memory_space<vmem>>, vector<1x2x128xf32>,
    %c3_i32_418 = arith.constant 3 : i32
    %772 = arith.index_cast %c3_i32_418 : i32 to index
    %c0_419 = arith.constant 0 : index
    %c0_420 = arith.constant 0 : index
    %773 = vector.load %arg15[%772, %c0_419, %c0_420] : memref<8x2x384xf32, #tpu.memory_space<vmem>>, vector<1x2x384xf32>
    %774 = vector.shape_cast %773 : vector<1x2x384xf32> to vector<2x384xf32>
    %cst_421 = arith.constant dense<0.000000e+00> : vector<2x384xf32>
    %775 = tpu.matmul %767, %662, %cst_421 {dimension_numbers = #tpu.dot_dimension_numbers<[1], [0], [0], [1], [0, 0, 1, 1], [], []>} : vector<2x128xf32>, vector<128x384xf32>, vector<2x384xf32> -> vector<2x384xf32>
    %776 = arith.addf %775, %665 : vector<2x384xf32>
    %777 = vector.extract_strided_slice %774 {offsets = [0, 0], sizes = [2, 128], strides = [1, 1]} : vector<2x384xf32> to vector<2x128xf32>
    %778 = vector.extract_strided_slice %776 {offsets = [0, 0], sizes = [2, 128], strides = [1, 1]} : vector<2x384xf32> to vector<2x128xf32>
    %779 = arith.addf %777, %778 : vector<2x128xf32>
    %780 = arith.negf %779 : vector<2x128xf32>
    %781 = math.exp %780 : vector<2x128xf32>
    %cst_422 = arith.constant 1.000000e+00 : f32
    %782 = vector.broadcast %cst_422 : f32 to vector<2x128xf32>
    %783 = arith.addf %782, %781 : vector<2x128xf32>
    %784 = arith.divf %782, %783 : vector<2x128xf32>
    %785 = vector.extract_strided_slice %774 {offsets = [0, 128], sizes = [2, 128], strides = [1, 1]} : vector<2x384xf32> to vector<2x128xf32>
    %786 = vector.extract_strided_slice %776 {offsets = [0, 128], sizes = [2, 128], strides = [1, 1]} : vector<2x384xf32> to vector<2x128xf32>
    %787 = arith.addf %785, %786 : vector<2x128xf32>
    %788 = arith.negf %787 : vector<2x128xf32>
    %789 = math.exp %788 : vector<2x128xf32>
    %cst_423 = arith.constant 1.000000e+00 : f32
    %790 = vector.broadcast %cst_423 : f32 to vector<2x128xf32>
    %791 = arith.addf %790, %789 : vector<2x128xf32>
    %792 = arith.divf %790, %791 : vector<2x128xf32>
    %793 = vector.extract_strided_slice %774 {offsets = [0, 256], sizes = [2, 128], strides = [1, 1]} : vector<2x384xf32> to vector<2x128xf32>
    %794 = vector.extract_strided_slice %776 {offsets = [0, 256], sizes = [2, 128], strides = [1, 1]} : vector<2x384xf32> to vector<2x128xf32>
    %795 = arith.mulf %784, %794 : vector<2x128xf32>
    %796 = arith.addf %793, %795 : vector<2x128xf32>
    %797 = math.tanh %796 : vector<2x128xf32>
    %cst_424 = arith.constant 1.000000e+00 : f32
    %798 = vector.broadcast %cst_424 : f32 to vector<2x128xf32>
    %799 = arith.subf %798, %792 : vector<2x128xf32>
    %800 = arith.mulf %799, %797 : vector<2x128xf32>
    %801 = arith.mulf %792, %767 : vector<2x128xf32>
    %802 = arith.addf %800, %801 : vector<2x128xf32>
    %803 = arith.index_cast %c3_i32_418 : i32 to index
    %c0_425 = arith.constant 0 : index
    %c0_426 = arith.constant 0 : index
    %804 = vector.load %arg16[%803, %c0_425, %c0_426] : memref<8x2x128xf32, #tpu.memory_space<vmem>>, vector<1x2x128xf32>
    %805 = vector.shape_cast %804 : vector<1x2x128xf32> to vector<2x128xf32>
    %806 = vector.shape_cast %802 : vector<2x128xf32> to vector<1x2x128xf32>
    tpu.vector_store %arg16[%803, %c0_425, %c0_426], %806 {strides = array<i32>} : memref<8x2x128xf32, #tpu.memory_space<vmem>>, vector<1x2x128xf32>,
    %c4_i32_427 = arith.constant 4 : i32
    %807 = arith.index_cast %c4_i32_427 : i32 to index
    %c0_428 = arith.constant 0 : index
    %c0_429 = arith.constant 0 : index
    %808 = vector.load %arg15[%807, %c0_428, %c0_429] : memref<8x2x384xf32, #tpu.memory_space<vmem>>, vector<1x2x384xf32>
    %809 = vector.shape_cast %808 : vector<1x2x384xf32> to vector<2x384xf32>
    %cst_430 = arith.constant dense<0.000000e+00> : vector<2x384xf32>
    %810 = tpu.matmul %802, %662, %cst_430 {dimension_numbers = #tpu.dot_dimension_numbers<[1], [0], [0], [1], [0, 0, 1, 1], [], []>} : vector<2x128xf32>, vector<128x384xf32>, vector<2x384xf32> -> vector<2x384xf32>
    %811 = arith.addf %810, %665 : vector<2x384xf32>
    %812 = vector.extract_strided_slice %809 {offsets = [0, 0], sizes = [2, 128], strides = [1, 1]} : vector<2x384xf32> to vector<2x128xf32>
    %813 = vector.extract_strided_slice %811 {offsets = [0, 0], sizes = [2, 128], strides = [1, 1]} : vector<2x384xf32> to vector<2x128xf32>
    %814 = arith.addf %812, %813 : vector<2x128xf32>
    %815 = arith.negf %814 : vector<2x128xf32>
    %816 = math.exp %815 : vector<2x128xf32>
    %cst_431 = arith.constant 1.000000e+00 : f32
    %817 = vector.broadcast %cst_431 : f32 to vector<2x128xf32>
    %818 = arith.addf %817, %816 : vector<2x128xf32>
    %819 = arith.divf %817, %818 : vector<2x128xf32>
    %820 = vector.extract_strided_slice %809 {offsets = [0, 128], sizes = [2, 128], strides = [1, 1]} : vector<2x384xf32> to vector<2x128xf32>
    %821 = vector.extract_strided_slice %811 {offsets = [0, 128], sizes = [2, 128], strides = [1, 1]} : vector<2x384xf32> to vector<2x128xf32>
    %822 = arith.addf %820, %821 : vector<2x128xf32>
    %823 = arith.negf %822 : vector<2x128xf32>
    %824 = math.exp %823 : vector<2x128xf32>
    %cst_432 = arith.constant 1.000000e+00 : f32
    %825 = vector.broadcast %cst_432 : f32 to vector<2x128xf32>
    %826 = arith.addf %825, %824 : vector<2x128xf32>
    %827 = arith.divf %825, %826 : vector<2x128xf32>
    %828 = vector.extract_strided_slice %809 {offsets = [0, 256], sizes = [2, 128], strides = [1, 1]} : vector<2x384xf32> to vector<2x128xf32>
    %829 = vector.extract_strided_slice %811 {offsets = [0, 256], sizes = [2, 128], strides = [1, 1]} : vector<2x384xf32> to vector<2x128xf32>
    %830 = arith.mulf %819, %829 : vector<2x128xf32>
    %831 = arith.addf %828, %830 : vector<2x128xf32>
    %832 = math.tanh %831 : vector<2x128xf32>
    %cst_433 = arith.constant 1.000000e+00 : f32
    %833 = vector.broadcast %cst_433 : f32 to vector<2x128xf32>
    %834 = arith.subf %833, %827 : vector<2x128xf32>
    %835 = arith.mulf %834, %832 : vector<2x128xf32>
    %836 = arith.mulf %827, %802 : vector<2x128xf32>
    %837 = arith.addf %835, %836 : vector<2x128xf32>
    %838 = arith.index_cast %c4_i32_427 : i32 to index
    %c0_434 = arith.constant 0 : index
    %c0_435 = arith.constant 0 : index
    %839 = vector.load %arg16[%838, %c0_434, %c0_435] : memref<8x2x128xf32, #tpu.memory_space<vmem>>, vector<1x2x128xf32>
    %840 = vector.shape_cast %839 : vector<1x2x128xf32> to vector<2x128xf32>
    %841 = vector.shape_cast %837 : vector<2x128xf32> to vector<1x2x128xf32>
    tpu.vector_store %arg16[%838, %c0_434, %c0_435], %841 {strides = array<i32>} : memref<8x2x128xf32, #tpu.memory_space<vmem>>, vector<1x2x128xf32>,
    %c5_i32_436 = arith.constant 5 : i32
    %842 = arith.index_cast %c5_i32_436 : i32 to index
    %c0_437 = arith.constant 0 : index
    %c0_438 = arith.constant 0 : index
    %843 = vector.load %arg15[%842, %c0_437, %c0_438] : memref<8x2x384xf32, #tpu.memory_space<vmem>>, vector<1x2x384xf32>
    %844 = vector.shape_cast %843 : vector<1x2x384xf32> to vector<2x384xf32>
    %cst_439 = arith.constant dense<0.000000e+00> : vector<2x384xf32>
    %845 = tpu.matmul %837, %662, %cst_439 {dimension_numbers = #tpu.dot_dimension_numbers<[1], [0], [0], [1], [0, 0, 1, 1], [], []>} : vector<2x128xf32>, vector<128x384xf32>, vector<2x384xf32> -> vector<2x384xf32>
    %846 = arith.addf %845, %665 : vector<2x384xf32>
    %847 = vector.extract_strided_slice %844 {offsets = [0, 0], sizes = [2, 128], strides = [1, 1]} : vector<2x384xf32> to vector<2x128xf32>
    %848 = vector.extract_strided_slice %846 {offsets = [0, 0], sizes = [2, 128], strides = [1, 1]} : vector<2x384xf32> to vector<2x128xf32>
    %849 = arith.addf %847, %848 : vector<2x128xf32>
    %850 = arith.negf %849 : vector<2x128xf32>
    %851 = math.exp %850 : vector<2x128xf32>
    %cst_440 = arith.constant 1.000000e+00 : f32
    %852 = vector.broadcast %cst_440 : f32 to vector<2x128xf32>
    %853 = arith.addf %852, %851 : vector<2x128xf32>
    %854 = arith.divf %852, %853 : vector<2x128xf32>
    %855 = vector.extract_strided_slice %844 {offsets = [0, 128], sizes = [2, 128], strides = [1, 1]} : vector<2x384xf32> to vector<2x128xf32>
    %856 = vector.extract_strided_slice %846 {offsets = [0, 128], sizes = [2, 128], strides = [1, 1]} : vector<2x384xf32> to vector<2x128xf32>
    %857 = arith.addf %855, %856 : vector<2x128xf32>
    %858 = arith.negf %857 : vector<2x128xf32>
    %859 = math.exp %858 : vector<2x128xf32>
    %cst_441 = arith.constant 1.000000e+00 : f32
    %860 = vector.broadcast %cst_441 : f32 to vector<2x128xf32>
    %861 = arith.addf %860, %859 : vector<2x128xf32>
    %862 = arith.divf %860, %861 : vector<2x128xf32>
    %863 = vector.extract_strided_slice %844 {offsets = [0, 256], sizes = [2, 128], strides = [1, 1]} : vector<2x384xf32> to vector<2x128xf32>
    %864 = vector.extract_strided_slice %846 {offsets = [0, 256], sizes = [2, 128], strides = [1, 1]} : vector<2x384xf32> to vector<2x128xf32>
    %865 = arith.mulf %854, %864 : vector<2x128xf32>
    %866 = arith.addf %863, %865 : vector<2x128xf32>
    %867 = math.tanh %866 : vector<2x128xf32>
    %cst_442 = arith.constant 1.000000e+00 : f32
    %868 = vector.broadcast %cst_442 : f32 to vector<2x128xf32>
    %869 = arith.subf %868, %862 : vector<2x128xf32>
    %870 = arith.mulf %869, %867 : vector<2x128xf32>
    %871 = arith.mulf %862, %837 : vector<2x128xf32>
    %872 = arith.addf %870, %871 : vector<2x128xf32>
    %873 = arith.index_cast %c5_i32_436 : i32 to index
    %c0_443 = arith.constant 0 : index
    %c0_444 = arith.constant 0 : index
    %874 = vector.load %arg16[%873, %c0_443, %c0_444] : memref<8x2x128xf32, #tpu.memory_space<vmem>>, vector<1x2x128xf32>
    %875 = vector.shape_cast %874 : vector<1x2x128xf32> to vector<2x128xf32>
    %876 = vector.shape_cast %872 : vector<2x128xf32> to vector<1x2x128xf32>
    tpu.vector_store %arg16[%873, %c0_443, %c0_444], %876 {strides = array<i32>} : memref<8x2x128xf32, #tpu.memory_space<vmem>>, vector<1x2x128xf32>,
    %c6_i32_445 = arith.constant 6 : i32
    %877 = arith.index_cast %c6_i32_445 : i32 to index
    %c0_446 = arith.constant 0 : index
    %c0_447 = arith.constant 0 : index
    %878 = vector.load %arg15[%877, %c0_446, %c0_447] : memref<8x2x384xf32, #tpu.memory_space<vmem>>, vector<1x2x384xf32>
    %879 = vector.shape_cast %878 : vector<1x2x384xf32> to vector<2x384xf32>
    %cst_448 = arith.constant dense<0.000000e+00> : vector<2x384xf32>
    %880 = tpu.matmul %872, %662, %cst_448 {dimension_numbers = #tpu.dot_dimension_numbers<[1], [0], [0], [1], [0, 0, 1, 1], [], []>} : vector<2x128xf32>, vector<128x384xf32>, vector<2x384xf32> -> vector<2x384xf32>
    %881 = arith.addf %880, %665 : vector<2x384xf32>
    %882 = vector.extract_strided_slice %879 {offsets = [0, 0], sizes = [2, 128], strides = [1, 1]} : vector<2x384xf32> to vector<2x128xf32>
    %883 = vector.extract_strided_slice %881 {offsets = [0, 0], sizes = [2, 128], strides = [1, 1]} : vector<2x384xf32> to vector<2x128xf32>
    %884 = arith.addf %882, %883 : vector<2x128xf32>
    %885 = arith.negf %884 : vector<2x128xf32>
    %886 = math.exp %885 : vector<2x128xf32>
    %cst_449 = arith.constant 1.000000e+00 : f32
    %887 = vector.broadcast %cst_449 : f32 to vector<2x128xf32>
    %888 = arith.addf %887, %886 : vector<2x128xf32>
    %889 = arith.divf %887, %888 : vector<2x128xf32>
    %890 = vector.extract_strided_slice %879 {offsets = [0, 128], sizes = [2, 128], strides = [1, 1]} : vector<2x384xf32> to vector<2x128xf32>
    %891 = vector.extract_strided_slice %881 {offsets = [0, 128], sizes = [2, 128], strides = [1, 1]} : vector<2x384xf32> to vector<2x128xf32>
    %892 = arith.addf %890, %891 : vector<2x128xf32>
    %893 = arith.negf %892 : vector<2x128xf32>
    %894 = math.exp %893 : vector<2x128xf32>
    %cst_450 = arith.constant 1.000000e+00 : f32
    %895 = vector.broadcast %cst_450 : f32 to vector<2x128xf32>
    %896 = arith.addf %895, %894 : vector<2x128xf32>
    %897 = arith.divf %895, %896 : vector<2x128xf32>
    %898 = vector.extract_strided_slice %879 {offsets = [0, 256], sizes = [2, 128], strides = [1, 1]} : vector<2x384xf32> to vector<2x128xf32>
    %899 = vector.extract_strided_slice %881 {offsets = [0, 256], sizes = [2, 128], strides = [1, 1]} : vector<2x384xf32> to vector<2x128xf32>
    %900 = arith.mulf %889, %899 : vector<2x128xf32>
    %901 = arith.addf %898, %900 : vector<2x128xf32>
    %902 = math.tanh %901 : vector<2x128xf32>
    %cst_451 = arith.constant 1.000000e+00 : f32
    %903 = vector.broadcast %cst_451 : f32 to vector<2x128xf32>
    %904 = arith.subf %903, %897 : vector<2x128xf32>
    %905 = arith.mulf %904, %902 : vector<2x128xf32>
    %906 = arith.mulf %897, %872 : vector<2x128xf32>
    %907 = arith.addf %905, %906 : vector<2x128xf32>
    %908 = arith.index_cast %c6_i32_445 : i32 to index
    %c0_452 = arith.constant 0 : index
    %c0_453 = arith.constant 0 : index
    %909 = vector.load %arg16[%908, %c0_452, %c0_453] : memref<8x2x128xf32, #tpu.memory_space<vmem>>, vector<1x2x128xf32>
    %910 = vector.shape_cast %909 : vector<1x2x128xf32> to vector<2x128xf32>
    %911 = vector.shape_cast %907 : vector<2x128xf32> to vector<1x2x128xf32>
    tpu.vector_store %arg16[%908, %c0_452, %c0_453], %911 {strides = array<i32>} : memref<8x2x128xf32, #tpu.memory_space<vmem>>, vector<1x2x128xf32>,
    %c7_i32_454 = arith.constant 7 : i32
    %912 = arith.index_cast %c7_i32_454 : i32 to index
    %c0_455 = arith.constant 0 : index
    %c0_456 = arith.constant 0 : index
    %913 = vector.load %arg15[%912, %c0_455, %c0_456] : memref<8x2x384xf32, #tpu.memory_space<vmem>>, vector<1x2x384xf32>
    %914 = vector.shape_cast %913 : vector<1x2x384xf32> to vector<2x384xf32>
    %cst_457 = arith.constant dense<0.000000e+00> : vector<2x384xf32>
    %915 = tpu.matmul %907, %662, %cst_457 {dimension_numbers = #tpu.dot_dimension_numbers<[1], [0], [0], [1], [0, 0, 1, 1], [], []>} : vector<2x128xf32>, vector<128x384xf32>, vector<2x384xf32> -> vector<2x384xf32>
    %916 = arith.addf %915, %665 : vector<2x384xf32>
    %917 = vector.extract_strided_slice %914 {offsets = [0, 0], sizes = [2, 128], strides = [1, 1]} : vector<2x384xf32> to vector<2x128xf32>
    %918 = vector.extract_strided_slice %916 {offsets = [0, 0], sizes = [2, 128], strides = [1, 1]} : vector<2x384xf32> to vector<2x128xf32>
    %919 = arith.addf %917, %918 : vector<2x128xf32>
    %920 = arith.negf %919 : vector<2x128xf32>
    %921 = math.exp %920 : vector<2x128xf32>
    %cst_458 = arith.constant 1.000000e+00 : f32
    %922 = vector.broadcast %cst_458 : f32 to vector<2x128xf32>
    %923 = arith.addf %922, %921 : vector<2x128xf32>
    %924 = arith.divf %922, %923 : vector<2x128xf32>
    %925 = vector.extract_strided_slice %914 {offsets = [0, 128], sizes = [2, 128], strides = [1, 1]} : vector<2x384xf32> to vector<2x128xf32>
    %926 = vector.extract_strided_slice %916 {offsets = [0, 128], sizes = [2, 128], strides = [1, 1]} : vector<2x384xf32> to vector<2x128xf32>
    %927 = arith.addf %925, %926 : vector<2x128xf32>
    %928 = arith.negf %927 : vector<2x128xf32>
    %929 = math.exp %928 : vector<2x128xf32>
    %cst_459 = arith.constant 1.000000e+00 : f32
    %930 = vector.broadcast %cst_459 : f32 to vector<2x128xf32>
    %931 = arith.addf %930, %929 : vector<2x128xf32>
    %932 = arith.divf %930, %931 : vector<2x128xf32>
    %933 = vector.extract_strided_slice %914 {offsets = [0, 256], sizes = [2, 128], strides = [1, 1]} : vector<2x384xf32> to vector<2x128xf32>
    %934 = vector.extract_strided_slice %916 {offsets = [0, 256], sizes = [2, 128], strides = [1, 1]} : vector<2x384xf32> to vector<2x128xf32>
    %935 = arith.mulf %924, %934 : vector<2x128xf32>
    %936 = arith.addf %933, %935 : vector<2x128xf32>
    %937 = math.tanh %936 : vector<2x128xf32>
    %cst_460 = arith.constant 1.000000e+00 : f32
    %938 = vector.broadcast %cst_460 : f32 to vector<2x128xf32>
    %939 = arith.subf %938, %932 : vector<2x128xf32>
    %940 = arith.mulf %939, %937 : vector<2x128xf32>
    %941 = arith.mulf %932, %907 : vector<2x128xf32>
    %942 = arith.addf %940, %941 : vector<2x128xf32>
    %943 = arith.index_cast %c7_i32_454 : i32 to index
    %c0_461 = arith.constant 0 : index
    %c0_462 = arith.constant 0 : index
    %944 = vector.load %arg16[%943, %c0_461, %c0_462] : memref<8x2x128xf32, #tpu.memory_space<vmem>>, vector<1x2x128xf32>
    %945 = vector.shape_cast %944 : vector<1x2x128xf32> to vector<2x128xf32>
    %946 = vector.shape_cast %942 : vector<2x128xf32> to vector<1x2x128xf32>
    tpu.vector_store %arg16[%943, %c0_461, %c0_462], %946 {strides = array<i32>} : memref<8x2x128xf32, #tpu.memory_space<vmem>>, vector<1x2x128xf32>,
    %c8_i32_463 = arith.constant 8 : i32
    %c0_464 = arith.constant 0 : index
    %c0_465 = arith.constant 0 : index
    %c0_466 = arith.constant 0 : index
    %947 = vector.load %arg16[%c0_464, %c0_465, %c0_466] : memref<8x2x128xf32, #tpu.memory_space<vmem>>, vector<1x2x128xf32>
    %948 = vector.shape_cast %947 : vector<1x2x128xf32> to vector<2x128xf32>
    %c7_467 = arith.constant 7 : index
    %c0_468 = arith.constant 0 : index
    %c0_469 = arith.constant 0 : index
    %949 = vector.load %arg16[%c7_467, %c0_468, %c0_469] : memref<8x2x128xf32, #tpu.memory_space<vmem>>, vector<1x2x128xf32>
    %950 = vector.shape_cast %949 : vector<1x2x128xf32> to vector<2x128xf32>
    %951 = vector.shape_cast %21 : vector<1x128xi1> to vector<1x128xi1>
    %952 = vector.broadcast %951 : vector<1x128xi1> to vector<2x128xi1>
    %953 = arith.select %952, %948, %950 : vector<2x128xi1>, vector<2x128xf32>
    %c0_470 = arith.constant 0 : index
    %c0_471 = arith.constant 0 : index
    %c0_472 = arith.constant 0 : index
    %954 = vector.load %arg16[%c0_470, %c0_471, %c0_472] : memref<8x2x128xf32, #tpu.memory_space<vmem>>, vector<1x2x128xf32>
    %955 = vector.shape_cast %954 : vector<1x2x128xf32> to vector<2x128xf32>
    %956 = vector.shape_cast %953 : vector<2x128xf32> to vector<1x2x128xf32>
    tpu.vector_store %arg16[%c0_470, %c0_471, %c0_472], %956 {strides = array<i32>} : memref<8x2x128xf32, #tpu.memory_space<vmem>>, vector<1x2x128xf32>,
    %957 = vector.shape_cast %21 : vector<1x128xi1> to vector<1x128xi1>
    %958 = vector.broadcast %957 : vector<1x128xi1> to vector<2x128xi1>
    %959 = arith.select %958, %950, %948 : vector<2x128xi1>, vector<2x128xf32>
    %c7_473 = arith.constant 7 : index
    %c0_474 = arith.constant 0 : index
    %c0_475 = arith.constant 0 : index
    %960 = vector.load %arg16[%c7_473, %c0_474, %c0_475] : memref<8x2x128xf32, #tpu.memory_space<vmem>>, vector<1x2x128xf32>
    %961 = vector.shape_cast %960 : vector<1x2x128xf32> to vector<2x128xf32>
    %962 = vector.shape_cast %959 : vector<2x128xf32> to vector<1x2x128xf32>
    tpu.vector_store %arg16[%c7_473, %c0_474, %c0_475], %962 {strides = array<i32>} : memref<8x2x128xf32, #tpu.memory_space<vmem>>, vector<1x2x128xf32>,
    %c1_476 = arith.constant 1 : index
    %c0_477 = arith.constant 0 : index
    %c0_478 = arith.constant 0 : index
    %963 = vector.load %arg16[%c1_476, %c0_477, %c0_478] : memref<8x2x128xf32, #tpu.memory_space<vmem>>, vector<1x2x128xf32>
    %964 = vector.shape_cast %963 : vector<1x2x128xf32> to vector<2x128xf32>
    %c6_479 = arith.constant 6 : index
    %c0_480 = arith.constant 0 : index
    %c0_481 = arith.constant 0 : index
    %965 = vector.load %arg16[%c6_479, %c0_480, %c0_481] : memref<8x2x128xf32, #tpu.memory_space<vmem>>, vector<1x2x128xf32>
    %966 = vector.shape_cast %965 : vector<1x2x128xf32> to vector<2x128xf32>
    %967 = vector.shape_cast %21 : vector<1x128xi1> to vector<1x128xi1>
    %968 = vector.broadcast %967 : vector<1x128xi1> to vector<2x128xi1>
    %969 = arith.select %968, %964, %966 : vector<2x128xi1>, vector<2x128xf32>
    %c1_482 = arith.constant 1 : index
    %c0_483 = arith.constant 0 : index
    %c0_484 = arith.constant 0 : index
    %970 = vector.load %arg16[%c1_482, %c0_483, %c0_484] : memref<8x2x128xf32, #tpu.memory_space<vmem>>, vector<1x2x128xf32>
    %971 = vector.shape_cast %970 : vector<1x2x128xf32> to vector<2x128xf32>
    %972 = vector.shape_cast %969 : vector<2x128xf32> to vector<1x2x128xf32>
    tpu.vector_store %arg16[%c1_482, %c0_483, %c0_484], %972 {strides = array<i32>} : memref<8x2x128xf32, #tpu.memory_space<vmem>>, vector<1x2x128xf32>,
    %973 = vector.shape_cast %21 : vector<1x128xi1> to vector<1x128xi1>
    %974 = vector.broadcast %973 : vector<1x128xi1> to vector<2x128xi1>
    %975 = arith.select %974, %966, %964 : vector<2x128xi1>, vector<2x128xf32>
    %c6_485 = arith.constant 6 : index
    %c0_486 = arith.constant 0 : index
    %c0_487 = arith.constant 0 : index
    %976 = vector.load %arg16[%c6_485, %c0_486, %c0_487] : memref<8x2x128xf32, #tpu.memory_space<vmem>>, vector<1x2x128xf32>
    %977 = vector.shape_cast %976 : vector<1x2x128xf32> to vector<2x128xf32>
    %978 = vector.shape_cast %975 : vector<2x128xf32> to vector<1x2x128xf32>
    tpu.vector_store %arg16[%c6_485, %c0_486, %c0_487], %978 {strides = array<i32>} : memref<8x2x128xf32, #tpu.memory_space<vmem>>, vector<1x2x128xf32>,
    %c2_488 = arith.constant 2 : index
    %c0_489 = arith.constant 0 : index
    %c0_490 = arith.constant 0 : index
    %979 = vector.load %arg16[%c2_488, %c0_489, %c0_490] : memref<8x2x128xf32, #tpu.memory_space<vmem>>, vector<1x2x128xf32>
    %980 = vector.shape_cast %979 : vector<1x2x128xf32> to vector<2x128xf32>
    %c5_491 = arith.constant 5 : index
    %c0_492 = arith.constant 0 : index
    %c0_493 = arith.constant 0 : index
    %981 = vector.load %arg16[%c5_491, %c0_492, %c0_493] : memref<8x2x128xf32, #tpu.memory_space<vmem>>, vector<1x2x128xf32>
    %982 = vector.shape_cast %981 : vector<1x2x128xf32> to vector<2x128xf32>
    %983 = vector.shape_cast %21 : vector<1x128xi1> to vector<1x128xi1>
    %984 = vector.broadcast %983 : vector<1x128xi1> to vector<2x128xi1>
    %985 = arith.select %984, %980, %982 : vector<2x128xi1>, vector<2x128xf32>
    %c2_494 = arith.constant 2 : index
    %c0_495 = arith.constant 0 : index
    %c0_496 = arith.constant 0 : index
    %986 = vector.load %arg16[%c2_494, %c0_495, %c0_496] : memref<8x2x128xf32, #tpu.memory_space<vmem>>, vector<1x2x128xf32>
    %987 = vector.shape_cast %986 : vector<1x2x128xf32> to vector<2x128xf32>
    %988 = vector.shape_cast %985 : vector<2x128xf32> to vector<1x2x128xf32>
    tpu.vector_store %arg16[%c2_494, %c0_495, %c0_496], %988 {strides = array<i32>} : memref<8x2x128xf32, #tpu.memory_space<vmem>>, vector<1x2x128xf32>,
    %989 = vector.shape_cast %21 : vector<1x128xi1> to vector<1x128xi1>
    %990 = vector.broadcast %989 : vector<1x128xi1> to vector<2x128xi1>
    %991 = arith.select %990, %982, %980 : vector<2x128xi1>, vector<2x128xf32>
    %c5_497 = arith.constant 5 : index
    %c0_498 = arith.constant 0 : index
    %c0_499 = arith.constant 0 : index
    %992 = vector.load %arg16[%c5_497, %c0_498, %c0_499] : memref<8x2x128xf32, #tpu.memory_space<vmem>>, vector<1x2x128xf32>
    %993 = vector.shape_cast %992 : vector<1x2x128xf32> to vector<2x128xf32>
    %994 = vector.shape_cast %991 : vector<2x128xf32> to vector<1x2x128xf32>
    tpu.vector_store %arg16[%c5_497, %c0_498, %c0_499], %994 {strides = array<i32>} : memref<8x2x128xf32, #tpu.memory_space<vmem>>, vector<1x2x128xf32>,
    %c3_500 = arith.constant 3 : index
    %c0_501 = arith.constant 0 : index
    %c0_502 = arith.constant 0 : index
    %995 = vector.load %arg16[%c3_500, %c0_501, %c0_502] : memref<8x2x128xf32, #tpu.memory_space<vmem>>, vector<1x2x128xf32>
    %996 = vector.shape_cast %995 : vector<1x2x128xf32> to vector<2x128xf32>
    %c4_503 = arith.constant 4 : index
    %c0_504 = arith.constant 0 : index
    %c0_505 = arith.constant 0 : index
    %997 = vector.load %arg16[%c4_503, %c0_504, %c0_505] : memref<8x2x128xf32, #tpu.memory_space<vmem>>, vector<1x2x128xf32>
    %998 = vector.shape_cast %997 : vector<1x2x128xf32> to vector<2x128xf32>
    %999 = vector.shape_cast %21 : vector<1x128xi1> to vector<1x128xi1>
    %1000 = vector.broadcast %999 : vector<1x128xi1> to vector<2x128xi1>
    %1001 = arith.select %1000, %996, %998 : vector<2x128xi1>, vector<2x128xf32>
    %c3_506 = arith.constant 3 : index
    %c0_507 = arith.constant 0 : index
    %c0_508 = arith.constant 0 : index
    %1002 = vector.load %arg16[%c3_506, %c0_507, %c0_508] : memref<8x2x128xf32, #tpu.memory_space<vmem>>, vector<1x2x128xf32>
    %1003 = vector.shape_cast %1002 : vector<1x2x128xf32> to vector<2x128xf32>
    %1004 = vector.shape_cast %1001 : vector<2x128xf32> to vector<1x2x128xf32>
    tpu.vector_store %arg16[%c3_506, %c0_507, %c0_508], %1004 {strides = array<i32>} : memref<8x2x128xf32, #tpu.memory_space<vmem>>, vector<1x2x128xf32>,
    %1005 = vector.shape_cast %21 : vector<1x128xi1> to vector<1x128xi1>
    %1006 = vector.broadcast %1005 : vector<1x128xi1> to vector<2x128xi1>
    %1007 = arith.select %1006, %998, %996 : vector<2x128xi1>, vector<2x128xf32>
    %c4_509 = arith.constant 4 : index
    %c0_510 = arith.constant 0 : index
    %c0_511 = arith.constant 0 : index
    %1008 = vector.load %arg16[%c4_509, %c0_510, %c0_511] : memref<8x2x128xf32, #tpu.memory_space<vmem>>, vector<1x2x128xf32>
    %1009 = vector.shape_cast %1008 : vector<1x2x128xf32> to vector<2x128xf32>
    %1010 = vector.shape_cast %1007 : vector<2x128xf32> to vector<1x2x128xf32>
    tpu.vector_store %arg16[%c4_509, %c0_510, %c0_511], %1010 {strides = array<i32>} : memref<8x2x128xf32, #tpu.memory_space<vmem>>, vector<1x2x128xf32>,
    %c0_512 = arith.constant 0 : index
    %c0_513 = arith.constant 0 : index
    %c0_514 = arith.constant 0 : index
    %1011 = vector.load %arg16[%c0_512, %c0_513, %c0_514] : memref<8x2x128xf32, #tpu.memory_space<vmem>>, vector<8x2x128xf32>
    %cst_515 = arith.constant dense<0.000000e+00> : vector<8x2xf32>
    %1012 = vector.multi_reduction <add>, %1011, %cst_515 [2] : vector<8x2x128xf32> to vector<8x2xf32>
    %1013 = vector.shape_cast %1012 : vector<8x2xf32> to vector<8x2x1xf32>
    %cst_516 = arith.constant 1.562500e-02 : f32
    %1014 = vector.broadcast %cst_516 : f32 to vector<8x2x1xf32>
    %1015 = arith.mulf %1013, %1014 : vector<8x2x1xf32>
    %1016 = vector.broadcast %1015 : vector<8x2x1xf32> to vector<8x2x128xf32>
    %1017 = arith.subf %1011, %1016 : vector<8x2x128xf32>
    %cst_517 = arith.constant 0.000000e+00 : f32
    %1018 = vector.shape_cast %24 : vector<1x1x128xi1> to vector<1x1x128xi1>
    %1019 = vector.broadcast %1018 : vector<1x1x128xi1> to vector<8x2x128xi1>
    %1020 = vector.broadcast %cst_517 : f32 to vector<8x2x128xf32>
    %1021 = arith.select %1019, %1017, %1020 : vector<8x2x128xi1>, vector<8x2x128xf32>
    %1022 = arith.mulf %1021, %1021 : vector<8x2x128xf32>
    %cst_518 = arith.constant dense<0.000000e+00> : vector<8x2xf32>
    %1023 = vector.multi_reduction <add>, %1022, %cst_518 [2] : vector<8x2x128xf32> to vector<8x2xf32>
    %1024 = vector.shape_cast %1023 : vector<8x2xf32> to vector<8x2x1xf32>
    %cst_519 = arith.constant 1.562500e-02 : f32
    %1025 = vector.broadcast %cst_519 : f32 to vector<8x2x1xf32>
    %1026 = arith.mulf %1024, %1025 : vector<8x2x1xf32>
    %cst_520 = arith.constant 9.99999974E-6 : f32
    %1027 = vector.broadcast %cst_520 : f32 to vector<8x2x1xf32>
    %1028 = arith.addf %1026, %1027 : vector<8x2x1xf32>
    %1029 = math.rsqrt %1028 : vector<8x2x1xf32>
    %1030 = vector.broadcast %1029 : vector<8x2x1xf32> to vector<8x2x128xf32>
    %1031 = arith.mulf %1021, %1030 : vector<8x2x128xf32>
    %c0_521 = arith.constant 0 : index
    %c0_522 = arith.constant 0 : index
    %c0_523 = arith.constant 0 : index
    %1032 = vector.load %arg9[%c0_521, %c0_522, %c0_523] : memref<1x1x128xf32, #tpu.memory_space<vmem>>, vector<1x1x128xf32>
    %1033 = vector.broadcast %1032 : vector<1x1x128xf32> to vector<8x2x128xf32>
    %1034 = arith.mulf %1031, %1033 : vector<8x2x128xf32>
    %c0_524 = arith.constant 0 : index
    %c0_525 = arith.constant 0 : index
    %c0_526 = arith.constant 0 : index
    %1035 = vector.load %arg10[%c0_524, %c0_525, %c0_526] : memref<1x1x128xf32, #tpu.memory_space<vmem>>, vector<1x1x128xf32>
    %1036 = vector.broadcast %1035 : vector<1x1x128xf32> to vector<8x2x128xf32>
    %1037 = arith.addf %1034, %1036 : vector<8x2x128xf32>
    %1038 = vector.extract_strided_slice %1037 {offsets = [0, 0, 0], sizes = [1, 2, 128], strides = [1, 1, 1]} : vector<8x2x128xf32> to vector<1x2x128xf32>
    %1039 = vector.shape_cast %1038 : vector<1x2x128xf32> to vector<2x128xf32>
    %c0_527 = arith.constant 0 : index
    %c0_528 = arith.constant 0 : index
    %1040 = vector.load %arg11[%c0_527, %c0_528] : memref<128x32xf32, #tpu.memory_space<vmem>>, vector<128x32xf32>
    %cst_529 = arith.constant dense<0.000000e+00> : vector<2x32xf32>
    %1041 = tpu.matmul %1039, %1040, %cst_529 {dimension_numbers = #tpu.dot_dimension_numbers<[1], [0], [0], [1], [0, 0, 1, 1], [], []>} : vector<2x128xf32>, vector<128x32xf32>, vector<2x32xf32> -> vector<2x32xf32>
    %c0_530 = arith.constant 0 : index
    %c0_531 = arith.constant 0 : index
    %1042 = vector.load %arg12[%c0_530, %c0_531] : memref<1x32xf32, #tpu.memory_space<vmem>>, vector<1x32xf32>
    %1043 = vector.broadcast %1042 : vector<1x32xf32> to vector<2x32xf32>
    %1044 = arith.addf %1041, %1043 : vector<2x32xf32>
    %1045 = math.tanh %1044 : vector<2x32xf32>
    %c0_532 = arith.constant 0 : index
    %c0_533 = arith.constant 0 : index
    %1046 = vector.load %arg13[%c0_532, %c0_533] : memref<1x32xf32, #tpu.memory_space<vmem>>, vector<1x32xf32>
    %1047 = vector.broadcast %1046 : vector<1x32xf32> to vector<2x32xf32>
    %1048 = arith.mulf %1045, %1047 : vector<2x32xf32>
    %cst_534 = arith.constant dense<0.000000e+00> : vector<2xf32>
    %1049 = vector.multi_reduction <add>, %1048, %cst_534 [1] : vector<2x32xf32> to vector<2xf32>
    %1050 = vector.shape_cast %1049 : vector<2xf32> to vector<2x1xf32>
    %1051 = vector.extract_strided_slice %1037 {offsets = [1, 0, 0], sizes = [1, 2, 128], strides = [1, 1, 1]} : vector<8x2x128xf32> to vector<1x2x128xf32>
    %1052 = vector.shape_cast %1051 : vector<1x2x128xf32> to vector<2x128xf32>
    %c0_535 = arith.constant 0 : index
    %c0_536 = arith.constant 0 : index
    %1053 = vector.load %arg11[%c0_535, %c0_536] : memref<128x32xf32, #tpu.memory_space<vmem>>, vector<128x32xf32>
    %cst_537 = arith.constant dense<0.000000e+00> : vector<2x32xf32>
    %1054 = tpu.matmul %1052, %1053, %cst_537 {dimension_numbers = #tpu.dot_dimension_numbers<[1], [0], [0], [1], [0, 0, 1, 1], [], []>} : vector<2x128xf32>, vector<128x32xf32>, vector<2x32xf32> -> vector<2x32xf32>
    %c0_538 = arith.constant 0 : index
    %c0_539 = arith.constant 0 : index
    %1055 = vector.load %arg12[%c0_538, %c0_539] : memref<1x32xf32, #tpu.memory_space<vmem>>, vector<1x32xf32>
    %1056 = vector.broadcast %1055 : vector<1x32xf32> to vector<2x32xf32>
    %1057 = arith.addf %1054, %1056 : vector<2x32xf32>
    %1058 = math.tanh %1057 : vector<2x32xf32>
    %c0_540 = arith.constant 0 : index
    %c0_541 = arith.constant 0 : index
    %1059 = vector.load %arg13[%c0_540, %c0_541] : memref<1x32xf32, #tpu.memory_space<vmem>>, vector<1x32xf32>
    %1060 = vector.broadcast %1059 : vector<1x32xf32> to vector<2x32xf32>
    %1061 = arith.mulf %1058, %1060 : vector<2x32xf32>
    %cst_542 = arith.constant dense<0.000000e+00> : vector<2xf32>
    %1062 = vector.multi_reduction <add>, %1061, %cst_542 [1] : vector<2x32xf32> to vector<2xf32>
    %1063 = vector.shape_cast %1062 : vector<2xf32> to vector<2x1xf32>
    %1064 = vector.extract_strided_slice %1037 {offsets = [2, 0, 0], sizes = [1, 2, 128], strides = [1, 1, 1]} : vector<8x2x128xf32> to vector<1x2x128xf32>
    %1065 = vector.shape_cast %1064 : vector<1x2x128xf32> to vector<2x128xf32>
    %c0_543 = arith.constant 0 : index
    %c0_544 = arith.constant 0 : index
    %1066 = vector.load %arg11[%c0_543, %c0_544] : memref<128x32xf32, #tpu.memory_space<vmem>>, vector<128x32xf32>
    %cst_545 = arith.constant dense<0.000000e+00> : vector<2x32xf32>
    %1067 = tpu.matmul %1065, %1066, %cst_545 {dimension_numbers = #tpu.dot_dimension_numbers<[1], [0], [0], [1], [0, 0, 1, 1], [], []>} : vector<2x128xf32>, vector<128x32xf32>, vector<2x32xf32> -> vector<2x32xf32>
    %c0_546 = arith.constant 0 : index
    %c0_547 = arith.constant 0 : index
    %1068 = vector.load %arg12[%c0_546, %c0_547] : memref<1x32xf32, #tpu.memory_space<vmem>>, vector<1x32xf32>
    %1069 = vector.broadcast %1068 : vector<1x32xf32> to vector<2x32xf32>
    %1070 = arith.addf %1067, %1069 : vector<2x32xf32>
    %1071 = math.tanh %1070 : vector<2x32xf32>
    %c0_548 = arith.constant 0 : index
    %c0_549 = arith.constant 0 : index
    %1072 = vector.load %arg13[%c0_548, %c0_549] : memref<1x32xf32, #tpu.memory_space<vmem>>, vector<1x32xf32>
    %1073 = vector.broadcast %1072 : vector<1x32xf32> to vector<2x32xf32>
    %1074 = arith.mulf %1071, %1073 : vector<2x32xf32>
    %cst_550 = arith.constant dense<0.000000e+00> : vector<2xf32>
    %1075 = vector.multi_reduction <add>, %1074, %cst_550 [1] : vector<2x32xf32> to vector<2xf32>
    %1076 = vector.shape_cast %1075 : vector<2xf32> to vector<2x1xf32>
    %1077 = vector.extract_strided_slice %1037 {offsets = [3, 0, 0], sizes = [1, 2, 128], strides = [1, 1, 1]} : vector<8x2x128xf32> to vector<1x2x128xf32>
    %1078 = vector.shape_cast %1077 : vector<1x2x128xf32> to vector<2x128xf32>
    %c0_551 = arith.constant 0 : index
    %c0_552 = arith.constant 0 : index
    %1079 = vector.load %arg11[%c0_551, %c0_552] : memref<128x32xf32, #tpu.memory_space<vmem>>, vector<128x32xf32>
    %cst_553 = arith.constant dense<0.000000e+00> : vector<2x32xf32>
    %1080 = tpu.matmul %1078, %1079, %cst_553 {dimension_numbers = #tpu.dot_dimension_numbers<[1], [0], [0], [1], [0, 0, 1, 1], [], []>} : vector<2x128xf32>, vector<128x32xf32>, vector<2x32xf32> -> vector<2x32xf32>
    %c0_554 = arith.constant 0 : index
    %c0_555 = arith.constant 0 : index
    %1081 = vector.load %arg12[%c0_554, %c0_555] : memref<1x32xf32, #tpu.memory_space<vmem>>, vector<1x32xf32>
    %1082 = vector.broadcast %1081 : vector<1x32xf32> to vector<2x32xf32>
    %1083 = arith.addf %1080, %1082 : vector<2x32xf32>
    %1084 = math.tanh %1083 : vector<2x32xf32>
    %c0_556 = arith.constant 0 : index
    %c0_557 = arith.constant 0 : index
    %1085 = vector.load %arg13[%c0_556, %c0_557] : memref<1x32xf32, #tpu.memory_space<vmem>>, vector<1x32xf32>
    %1086 = vector.broadcast %1085 : vector<1x32xf32> to vector<2x32xf32>
    %1087 = arith.mulf %1084, %1086 : vector<2x32xf32>
    %cst_558 = arith.constant dense<0.000000e+00> : vector<2xf32>
    %1088 = vector.multi_reduction <add>, %1087, %cst_558 [1] : vector<2x32xf32> to vector<2xf32>
    %1089 = vector.shape_cast %1088 : vector<2xf32> to vector<2x1xf32>
    %1090 = vector.extract_strided_slice %1037 {offsets = [4, 0, 0], sizes = [1, 2, 128], strides = [1, 1, 1]} : vector<8x2x128xf32> to vector<1x2x128xf32>
    %1091 = vector.shape_cast %1090 : vector<1x2x128xf32> to vector<2x128xf32>
    %c0_559 = arith.constant 0 : index
    %c0_560 = arith.constant 0 : index
    %1092 = vector.load %arg11[%c0_559, %c0_560] : memref<128x32xf32, #tpu.memory_space<vmem>>, vector<128x32xf32>
    %cst_561 = arith.constant dense<0.000000e+00> : vector<2x32xf32>
    %1093 = tpu.matmul %1091, %1092, %cst_561 {dimension_numbers = #tpu.dot_dimension_numbers<[1], [0], [0], [1], [0, 0, 1, 1], [], []>} : vector<2x128xf32>, vector<128x32xf32>, vector<2x32xf32> -> vector<2x32xf32>
    %c0_562 = arith.constant 0 : index
    %c0_563 = arith.constant 0 : index
    %1094 = vector.load %arg12[%c0_562, %c0_563] : memref<1x32xf32, #tpu.memory_space<vmem>>, vector<1x32xf32>
    %1095 = vector.broadcast %1094 : vector<1x32xf32> to vector<2x32xf32>
    %1096 = arith.addf %1093, %1095 : vector<2x32xf32>
    %1097 = math.tanh %1096 : vector<2x32xf32>
    %c0_564 = arith.constant 0 : index
    %c0_565 = arith.constant 0 : index
    %1098 = vector.load %arg13[%c0_564, %c0_565] : memref<1x32xf32, #tpu.memory_space<vmem>>, vector<1x32xf32>
    %1099 = vector.broadcast %1098 : vector<1x32xf32> to vector<2x32xf32>
    %1100 = arith.mulf %1097, %1099 : vector<2x32xf32>
    %cst_566 = arith.constant dense<0.000000e+00> : vector<2xf32>
    %1101 = vector.multi_reduction <add>, %1100, %cst_566 [1] : vector<2x32xf32> to vector<2xf32>
    %1102 = vector.shape_cast %1101 : vector<2xf32> to vector<2x1xf32>
    %1103 = vector.extract_strided_slice %1037 {offsets = [5, 0, 0], sizes = [1, 2, 128], strides = [1, 1, 1]} : vector<8x2x128xf32> to vector<1x2x128xf32>
    %1104 = vector.shape_cast %1103 : vector<1x2x128xf32> to vector<2x128xf32>
    %c0_567 = arith.constant 0 : index
    %c0_568 = arith.constant 0 : index
    %1105 = vector.load %arg11[%c0_567, %c0_568] : memref<128x32xf32, #tpu.memory_space<vmem>>, vector<128x32xf32>
    %cst_569 = arith.constant dense<0.000000e+00> : vector<2x32xf32>
    %1106 = tpu.matmul %1104, %1105, %cst_569 {dimension_numbers = #tpu.dot_dimension_numbers<[1], [0], [0], [1], [0, 0, 1, 1], [], []>} : vector<2x128xf32>, vector<128x32xf32>, vector<2x32xf32> -> vector<2x32xf32>
    %c0_570 = arith.constant 0 : index
    %c0_571 = arith.constant 0 : index
    %1107 = vector.load %arg12[%c0_570, %c0_571] : memref<1x32xf32, #tpu.memory_space<vmem>>, vector<1x32xf32>
    %1108 = vector.broadcast %1107 : vector<1x32xf32> to vector<2x32xf32>
    %1109 = arith.addf %1106, %1108 : vector<2x32xf32>
    %1110 = math.tanh %1109 : vector<2x32xf32>
    %c0_572 = arith.constant 0 : index
    %c0_573 = arith.constant 0 : index
    %1111 = vector.load %arg13[%c0_572, %c0_573] : memref<1x32xf32, #tpu.memory_space<vmem>>, vector<1x32xf32>
    %1112 = vector.broadcast %1111 : vector<1x32xf32> to vector<2x32xf32>
    %1113 = arith.mulf %1110, %1112 : vector<2x32xf32>
    %cst_574 = arith.constant dense<0.000000e+00> : vector<2xf32>
    %1114 = vector.multi_reduction <add>, %1113, %cst_574 [1] : vector<2x32xf32> to vector<2xf32>
    %1115 = vector.shape_cast %1114 : vector<2xf32> to vector<2x1xf32>
    %1116 = vector.extract_strided_slice %1037 {offsets = [6, 0, 0], sizes = [1, 2, 128], strides = [1, 1, 1]} : vector<8x2x128xf32> to vector<1x2x128xf32>
    %1117 = vector.shape_cast %1116 : vector<1x2x128xf32> to vector<2x128xf32>
    %c0_575 = arith.constant 0 : index
    %c0_576 = arith.constant 0 : index
    %1118 = vector.load %arg11[%c0_575, %c0_576] : memref<128x32xf32, #tpu.memory_space<vmem>>, vector<128x32xf32>
    %cst_577 = arith.constant dense<0.000000e+00> : vector<2x32xf32>
    %1119 = tpu.matmul %1117, %1118, %cst_577 {dimension_numbers = #tpu.dot_dimension_numbers<[1], [0], [0], [1], [0, 0, 1, 1], [], []>} : vector<2x128xf32>, vector<128x32xf32>, vector<2x32xf32> -> vector<2x32xf32>
    %c0_578 = arith.constant 0 : index
    %c0_579 = arith.constant 0 : index
    %1120 = vector.load %arg12[%c0_578, %c0_579] : memref<1x32xf32, #tpu.memory_space<vmem>>, vector<1x32xf32>
    %1121 = vector.broadcast %1120 : vector<1x32xf32> to vector<2x32xf32>
    %1122 = arith.addf %1119, %1121 : vector<2x32xf32>
    %1123 = math.tanh %1122 : vector<2x32xf32>
    %c0_580 = arith.constant 0 : index
    %c0_581 = arith.constant 0 : index
    %1124 = vector.load %arg13[%c0_580, %c0_581] : memref<1x32xf32, #tpu.memory_space<vmem>>, vector<1x32xf32>
    %1125 = vector.broadcast %1124 : vector<1x32xf32> to vector<2x32xf32>
    %1126 = arith.mulf %1123, %1125 : vector<2x32xf32>
    %cst_582 = arith.constant dense<0.000000e+00> : vector<2xf32>
    %1127 = vector.multi_reduction <add>, %1126, %cst_582 [1] : vector<2x32xf32> to vector<2xf32>
    %1128 = vector.shape_cast %1127 : vector<2xf32> to vector<2x1xf32>
    %1129 = vector.extract_strided_slice %1037 {offsets = [7, 0, 0], sizes = [1, 2, 128], strides = [1, 1, 1]} : vector<8x2x128xf32> to vector<1x2x128xf32>
    %1130 = vector.shape_cast %1129 : vector<1x2x128xf32> to vector<2x128xf32>
    %c0_583 = arith.constant 0 : index
    %c0_584 = arith.constant 0 : index
    %1131 = vector.load %arg11[%c0_583, %c0_584] : memref<128x32xf32, #tpu.memory_space<vmem>>, vector<128x32xf32>
    %cst_585 = arith.constant dense<0.000000e+00> : vector<2x32xf32>
    %1132 = tpu.matmul %1130, %1131, %cst_585 {dimension_numbers = #tpu.dot_dimension_numbers<[1], [0], [0], [1], [0, 0, 1, 1], [], []>} : vector<2x128xf32>, vector<128x32xf32>, vector<2x32xf32> -> vector<2x32xf32>
    %c0_586 = arith.constant 0 : index
    %c0_587 = arith.constant 0 : index
    %1133 = vector.load %arg12[%c0_586, %c0_587] : memref<1x32xf32, #tpu.memory_space<vmem>>, vector<1x32xf32>
    %1134 = vector.broadcast %1133 : vector<1x32xf32> to vector<2x32xf32>
    %1135 = arith.addf %1132, %1134 : vector<2x32xf32>
    %1136 = math.tanh %1135 : vector<2x32xf32>
    %c0_588 = arith.constant 0 : index
    %c0_589 = arith.constant 0 : index
    %1137 = vector.load %arg13[%c0_588, %c0_589] : memref<1x32xf32, #tpu.memory_space<vmem>>, vector<1x32xf32>
    %1138 = vector.broadcast %1137 : vector<1x32xf32> to vector<2x32xf32>
    %1139 = arith.mulf %1136, %1138 : vector<2x32xf32>
    %cst_590 = arith.constant dense<0.000000e+00> : vector<2xf32>
    %1140 = vector.multi_reduction <add>, %1139, %cst_590 [1] : vector<2x32xf32> to vector<2xf32>
    %1141 = vector.shape_cast %1140 : vector<2xf32> to vector<2x1xf32>
    %1142 = arith.maximumf %1050, %1063 : vector<2x1xf32>
    %1143 = arith.maximumf %1142, %1076 : vector<2x1xf32>
    %1144 = arith.maximumf %1143, %1089 : vector<2x1xf32>
    %1145 = arith.maximumf %1144, %1102 : vector<2x1xf32>
    %1146 = arith.maximumf %1145, %1115 : vector<2x1xf32>
    %1147 = arith.maximumf %1146, %1128 : vector<2x1xf32>
    %1148 = arith.maximumf %1147, %1141 : vector<2x1xf32>
    %cst_591 = arith.constant 0.000000e+00 : f32
    %1149 = vector.broadcast %cst_591 : f32 to vector<2x128xf32>
    %cst_592 = arith.constant 0.000000e+00 : f32
    %1150 = vector.broadcast %cst_592 : f32 to vector<2x1xf32>
    %1151 = arith.subf %1050, %1148 : vector<2x1xf32>
    %1152 = math.exp %1151 : vector<2x1xf32>
    %1153 = vector.extract_strided_slice %1037 {offsets = [0, 0, 0], sizes = [1, 2, 128], strides = [1, 1, 1]} : vector<8x2x128xf32> to vector<1x2x128xf32>
    %1154 = vector.shape_cast %1153 : vector<1x2x128xf32> to vector<2x128xf32>
    %1155 = vector.broadcast %1152 : vector<2x1xf32> to vector<2x128xf32>
    %1156 = arith.mulf %1155, %1154 : vector<2x128xf32>
    %1157 = arith.addf %1149, %1156 : vector<2x128xf32>
    %1158 = arith.addf %1150, %1152 : vector<2x1xf32>
    %1159 = arith.subf %1063, %1148 : vector<2x1xf32>
    %1160 = math.exp %1159 : vector<2x1xf32>
    %1161 = vector.extract_strided_slice %1037 {offsets = [1, 0, 0], sizes = [1, 2, 128], strides = [1, 1, 1]} : vector<8x2x128xf32> to vector<1x2x128xf32>
    %1162 = vector.shape_cast %1161 : vector<1x2x128xf32> to vector<2x128xf32>
    %1163 = vector.broadcast %1160 : vector<2x1xf32> to vector<2x128xf32>
    %1164 = arith.mulf %1163, %1162 : vector<2x128xf32>
    %1165 = arith.addf %1157, %1164 : vector<2x128xf32>
    %1166 = arith.addf %1158, %1160 : vector<2x1xf32>
    %1167 = arith.subf %1076, %1148 : vector<2x1xf32>
    %1168 = math.exp %1167 : vector<2x1xf32>
    %1169 = vector.extract_strided_slice %1037 {offsets = [2, 0, 0], sizes = [1, 2, 128], strides = [1, 1, 1]} : vector<8x2x128xf32> to vector<1x2x128xf32>
    %1170 = vector.shape_cast %1169 : vector<1x2x128xf32> to vector<2x128xf32>
    %1171 = vector.broadcast %1168 : vector<2x1xf32> to vector<2x128xf32>
    %1172 = arith.mulf %1171, %1170 : vector<2x128xf32>
    %1173 = arith.addf %1165, %1172 : vector<2x128xf32>
    %1174 = arith.addf %1166, %1168 : vector<2x1xf32>
    %1175 = arith.subf %1089, %1148 : vector<2x1xf32>
    %1176 = math.exp %1175 : vector<2x1xf32>
    %1177 = vector.extract_strided_slice %1037 {offsets = [3, 0, 0], sizes = [1, 2, 128], strides = [1, 1, 1]} : vector<8x2x128xf32> to vector<1x2x128xf32>
    %1178 = vector.shape_cast %1177 : vector<1x2x128xf32> to vector<2x128xf32>
    %1179 = vector.broadcast %1176 : vector<2x1xf32> to vector<2x128xf32>
    %1180 = arith.mulf %1179, %1178 : vector<2x128xf32>
    %1181 = arith.addf %1173, %1180 : vector<2x128xf32>
    %1182 = arith.addf %1174, %1176 : vector<2x1xf32>
    %1183 = arith.subf %1102, %1148 : vector<2x1xf32>
    %1184 = math.exp %1183 : vector<2x1xf32>
    %1185 = vector.extract_strided_slice %1037 {offsets = [4, 0, 0], sizes = [1, 2, 128], strides = [1, 1, 1]} : vector<8x2x128xf32> to vector<1x2x128xf32>
    %1186 = vector.shape_cast %1185 : vector<1x2x128xf32> to vector<2x128xf32>
    %1187 = vector.broadcast %1184 : vector<2x1xf32> to vector<2x128xf32>
    %1188 = arith.mulf %1187, %1186 : vector<2x128xf32>
    %1189 = arith.addf %1181, %1188 : vector<2x128xf32>
    %1190 = arith.addf %1182, %1184 : vector<2x1xf32>
    %1191 = arith.subf %1115, %1148 : vector<2x1xf32>
    %1192 = math.exp %1191 : vector<2x1xf32>
    %1193 = vector.extract_strided_slice %1037 {offsets = [5, 0, 0], sizes = [1, 2, 128], strides = [1, 1, 1]} : vector<8x2x128xf32> to vector<1x2x128xf32>
    %1194 = vector.shape_cast %1193 : vector<1x2x128xf32> to vector<2x128xf32>
    %1195 = vector.broadcast %1192 : vector<2x1xf32> to vector<2x128xf32>
    %1196 = arith.mulf %1195, %1194 : vector<2x128xf32>
    %1197 = arith.addf %1189, %1196 : vector<2x128xf32>
    %1198 = arith.addf %1190, %1192 : vector<2x1xf32>
    %1199 = arith.subf %1128, %1148 : vector<2x1xf32>
    %1200 = math.exp %1199 : vector<2x1xf32>
    %1201 = vector.extract_strided_slice %1037 {offsets = [6, 0, 0], sizes = [1, 2, 128], strides = [1, 1, 1]} : vector<8x2x128xf32> to vector<1x2x128xf32>
    %1202 = vector.shape_cast %1201 : vector<1x2x128xf32> to vector<2x128xf32>
    %1203 = vector.broadcast %1200 : vector<2x1xf32> to vector<2x128xf32>
    %1204 = arith.mulf %1203, %1202 : vector<2x128xf32>
    %1205 = arith.addf %1197, %1204 : vector<2x128xf32>
    %1206 = arith.addf %1198, %1200 : vector<2x1xf32>
    %1207 = arith.subf %1141, %1148 : vector<2x1xf32>
    %1208 = math.exp %1207 : vector<2x1xf32>
    %1209 = vector.extract_strided_slice %1037 {offsets = [7, 0, 0], sizes = [1, 2, 128], strides = [1, 1, 1]} : vector<8x2x128xf32> to vector<1x2x128xf32>
    %1210 = vector.shape_cast %1209 : vector<1x2x128xf32> to vector<2x128xf32>
    %1211 = vector.broadcast %1208 : vector<2x1xf32> to vector<2x128xf32>
    %1212 = arith.mulf %1211, %1210 : vector<2x128xf32>
    %1213 = arith.addf %1205, %1212 : vector<2x128xf32>
    %1214 = arith.addf %1206, %1208 : vector<2x1xf32>
    %1215 = vector.broadcast %1214 : vector<2x1xf32> to vector<2x128xf32>
    %1216 = arith.divf %1213, %1215 : vector<2x128xf32>
    %c0_593 = arith.constant 0 : index
    %c0_594 = arith.constant 0 : index
    %1217 = vector.load %arg14[%c0_593, %c0_594] : memref<2x128xf32, #tpu.memory_space<vmem>>, vector<2x128xf32>
    tpu.vector_store %arg14[%c0_593, %c0_594], %1216 {strides = array<i32>} : memref<2x128xf32, #tpu.memory_space<vmem>>, vector<2x128xf32>,
    return
  }
}

</mosaic_0001>

<bundles_post_ra>
// kernel: tpu_custom_call.1
= control target key start
LH: loop header
LB: loop body
LE: loop exit
PB: predicated region body
PF: predicated region fallthrough
CT: control target
= control target key end

     0   :  { %19 = vsyncpa [#allocation5], 0  ;;  %s14522_s0 = inlined_call_operand.vmem [shape: f32[2,8,64], index: 0, kind: input, shape index: {}]   ;;  %s14523_s1 = inlined_call_operand.hbm [shape: f32[64,384], index: 1, kind: input, shape index: {}]   ;;  %s14524_s2 = inlined_call_operand.hbm [shape: f32[128,384], index: 2, kind: input, shape index: {}]   ;;  %s14525_s3 = inlined_call_operand.vmem [shape: f32[1,384], index: 3, kind: input, shape index: {}]   ;;  %s14526_s4 = inlined_call_operand.vmem [shape: f32[1,384], index: 4, kind: input, shape index: {}]   ;;  %s14527_s5 = inlined_call_operand.hbm [shape: f32[128,384], index: 5, kind: input, shape index: {}]   ;;  %s14528_s6 = inlined_call_operand.hbm [shape: f32[128,384], index: 6, kind: input, shape index: {}]   ;;  %s14529_s7 = inlined_call_operand.vmem [shape: f32[1,384], index: 7, kind: input, shape index: {}]   ;;  %s14530_s8 = inlined_call_operand.vmem [shape: f32[1,384], index: 8, kind: input, shape index: {}]   ;;  %s14531_s9 = inlined_call_operand.vmem [shape: f32[1,1,128], index: 9, kind: input, shape index: {}]   ;;  %s14532_s10 = inlined_call_operand.vmem [shape: f32[1,1,128], index: 10, kind: input, shape index: {}]   ;;  %s14533_s11 = inlined_call_operand.vmem [shape: f32[128,32], index: 11, kind: input, shape index: {}]   ;;  %s14534_s12 = inlined_call_operand.vmem [shape: f32[1,32], index: 12, kind: input, shape index: {}]   ;;  %s14535_s13 = inlined_call_operand.vmem [shape: f32[1,32], index: 13, kind: input, shape index: {}]   ;;  %s14536_s14 = inlined_call_operand.hbm [shape: f32[2,128], index: 14, kind: output, shape index: {}]  }
   0x1   :  { %20 = vsyncpa [#allocation8], 0 }
   0x2   :  { %21 = vsyncpa [#allocation11], 0 }
   0x3   :  { %22 = vsyncpa [#allocation6], 0  ;;  %s12200_s29 = smov [#allocation7]   ;;  %s12201_s15 = smov [#allocation4]  }
   0x4   :  { %s42_s30 = sshll.u32 %s12200_s29, 4  ;;  %s30_s16 = sshll.u32 %s12201_s15, 4  ;;  %s43_s30 = int_to_ptr.vmem [resolvable:$true] %s42_s30  ;;  %s12286_s16 = int_to_ptr.vmem [resolvable:$true] %s30_s16 }
   0x5   :  { %s12082_s19 = scalar_lea.hbm %s14524_s2, 6144 }
   0x6   :  { %p12083_p0 = scmp.ne.s32.totalorder %s14524_s2, %s12082_s19  ;;  %p12086_p1 = scmp.lt.u32.totalorder %s12082_s19, %s14524_s2 }
   0x8   :  { %p12088_p2 = pnand %p12086_p1, %p12083_p0 }
   0xa   :  { %12091 = shalt.err (!%p12088_p2)
}
   0xb   :  { %s12092_s24 = scalar_lea.vmem %s43_s30, 6144  ;;  %p12097_p4 = scmp.lt.s32.totalorder %s43_s30, %s43_s30 }
   0xc   :  { %p12093_p3 = scmp.ne.s32.totalorder %s43_s30, %s12092_s24  ;;  %p12098_p5 = scmp.lt.s32.totalorder %s12092_s24, %s12092_s24 }
   0xe   :  { %p12099_p6 = por %p12098_p5, %p12097_p4 }
  0x10   :  { %p12100_p7 = pnand %p12099_p6, %p12093_p3 }
  0x12   :  { %12103 = shalt.err (!%p12100_p7)
}
  0x13   :  { %s12202_s25 = smov 384   ;;  %s12203_s26 = smov 24  }
  0x14   :  { %48 = dma.hbm_to_vmem [thread:$0]  %s14524_s2, 6144, %s43_s30, [#allocation8], %s12202_s25, %s12202_s25, %s12203_s26  }
  0x15   :  { %s12104_s17 = scalar_lea.hbm %s14523_s1, 3072 }
  0x16   :  { %p12105_p8 = scmp.ne.s32.totalorder %s14523_s1, %s12104_s17  ;;  %p12108_p9 = scmp.lt.u32.totalorder %s12104_s17, %s14523_s1 }
  0x18   :  { %p12110_p10 = pnand %p12108_p9, %p12105_p8 }
  0x1a   :  { %12113 = shalt.err (!%p12110_p10)
}
  0x1b   :  { %s12114_s22 = scalar_lea.vmem %s12286_s16, 3072  ;;  %p12119_p12 = scmp.lt.s32.totalorder %s12286_s16, %s12286_s16 }
  0x1c   :  { %p12115_p11 = scmp.ne.s32.totalorder %s12286_s16, %s12114_s22  ;;  %p12120_p13 = scmp.lt.s32.totalorder %s12114_s22, %s12114_s22 }
  0x1e   :  { %p12121_p0 = por %p12120_p13, %p12119_p12 }
  0x20   :  { %p12122_p1 = pnand %p12121_p0, %p12115_p11 }
  0x22   :  { %12125 = shalt.err (!%p12122_p1)
}
  0x23   :  { %36 = dma.hbm_to_vmem [thread:$0]  %s14523_s1, 3072, %s12286_s16, [#allocation5], %s12202_s25, %s12202_s25, %s12203_s26  }
  0x24   :  { %s12204_s23 = smov [#allocation9]   ;;  %s12205_s27 = smov [#allocation10]  }
  0x25   :  { %s58_s24 = sshll.u32 %s12204_s23, 4  ;;  %s70_s28 = sshll.u32 %s12205_s27, 4  ;;  %s59_s24 = int_to_ptr.vmem [resolvable:$true] %s58_s24  ;;  %s12323_s28 = int_to_ptr.vmem [resolvable:$true] %s70_s28 }
  0x26   :  { %s12126_s17 = scalar_lea.hbm %s14527_s5, 6144 }
  0x27   :  { %p12127_p2 = scmp.ne.s32.totalorder %s14527_s5, %s12126_s17  ;;  %p12130_p3 = scmp.lt.u32.totalorder %s12126_s17, %s14527_s5 }
  0x29   :  { %p12132_p4 = pnand %p12130_p3, %p12127_p2 }
  0x2b   :  { %12135 = shalt.err (!%p12132_p4)
}
  0x2c   :  { %s12136_s1 = scalar_lea.vmem %s59_s24, 6144  ;;  %p12141_p6 = scmp.lt.s32.totalorder %s59_s24, %s59_s24 }
  0x2d   :  { %p12137_p5 = scmp.ne.s32.totalorder %s59_s24, %s12136_s1  ;;  %p12142_p7 = scmp.lt.s32.totalorder %s12136_s1, %s12136_s1 }
  0x2f   :  { %p12143_p8 = por %p12142_p7, %p12141_p6 }
  0x31   :  { %p12144_p9 = pnand %p12143_p8, %p12137_p5 }
  0x33   :  { %12147 = shalt.err (!%p12144_p9)
}
  0x34   :  { %64 = dma.hbm_to_vmem [thread:$0]  %s14527_s5, 6144, %s59_s24, [#allocation8], %s12202_s25, %s12202_s25, %s12203_s26  }
  0x35   :  { %s12148_s23 = scalar_lea.hbm %s14528_s6, 6144 }
  0x36   :  { %p12149_p10 = scmp.ne.s32.totalorder %s14528_s6, %s12148_s23  ;;  %p12152_p11 = scmp.lt.u32.totalorder %s12148_s23, %s14528_s6 }
  0x38   :  { %p12154_p12 = pnand %p12152_p11, %p12149_p10 }
  0x3a   :  { %12157 = shalt.err (!%p12154_p12)
}
  0x3b   :  { %s12158_s18 = scalar_lea.vmem %s12323_s28, 6144  ;;  %p12163_p0 = scmp.lt.s32.totalorder %s12323_s28, %s12323_s28 }
  0x3c   :  { %p12159_p13 = scmp.ne.s32.totalorder %s12323_s28, %s12158_s18  ;;  %p12164_p1 = scmp.lt.s32.totalorder %s12158_s18, %s12158_s18 }
  0x3e   :  { %p12165_p2 = por %p12164_p1, %p12163_p0 }
  0x40   :  { %p12166_p3 = pnand %p12165_p2, %p12159_p13 }
  0x42   :  { %12169 = shalt.err (!%p12166_p3)
}
  0x43   :  { %76 = dma.hbm_to_vmem [thread:$0]  %s14528_s6, 6144, %s12323_s28, [#allocation11], %s12202_s25, %s12202_s25, %s12203_s26  }
  0x44   :  { %12192 = dma.done.wait [#allocation5], 3072  }
  0x45   :  { %12193 = vsyncadd [#allocation5], 4294964224 }
  0x46   :  { %12194 = dma.done.wait [#allocation8], 12288  }
  0x47   :  { %12195 = vsyncadd [#allocation8], 4294955008 }
  0x48   :  { %12196 = dma.done.wait [#allocation11], 6144  }
  0x49   :  { %12197 = vsyncadd [#allocation11], 4294961152  ;;  %v12206_v0 = vmov 0.0|0.0   ;;  %v12207_v1 = vmov 0.0   ;;  %vm12208_vm0 = vmmov 0   ;;  %v151_v2 = vld [vmem:[#allocation4 + $0x8] sm:$0xff] }
  0x4a   :  { %10101 = vmatprep.subr.bf16.mxu1 %v12206_v0  ;;  %263 = vmatprep.mubr.f32.mxu0 %v12207_v1  ;;  %v154_v3 = vld [vmem:[#allocation4 + $0x20] sm:$0xff]  ;;  %v153_v6 = vld [vmem:[#allocation4 + $0x18] sm:$0xff]  ;;  %v152_v7 = vld [vmem:[#allocation4 + $0x10] sm:$0xff]  ;;  %vm194_vm1 = vcmask 1041409   ;;  %vm196_vm2 = vcmask 523264   ;;  %vm7294_vm6 = vcmask 1041408  }
  0x4b   :  { %8829 = vmatprep.mubr.msk.f32.mxu1 %vm12208_vm0, %v12207_v1  ;;  %v150_v4 = vld [vmem:[#allocation4] sm:$0xff]  ;;  %v12364_v5 = vpack.c.bf16 %v154_v3, %v151_v2  ;;  %v155_v8 = vld [vmem:[#allocation4 + $0x28] sm:$0xff]  ;;  %v157_v11 = vld [vmem:[#allocation4 + $0x38] sm:$0xff]  ;;  %vm7541_vm8 = vcmask 254976  }
  0x4c   :  { %v12366_v9 = vpack.c.bf16 %v153_v6, %v150_v4  ;;  %v12368_v10 = vpack.c.bf16 %v155_v8, %v152_v7  ;;  %v160_v12 = vld [vmem:[#allocation4 + $0x50] sm:$0xff]  ;;  %v159_v15 = vld [vmem:[#allocation4 + $0x48] sm:$0xff]  ;;  %v158_v16 = vld [vmem:[#allocation4 + $0x40] sm:$0xff] }
  0x4d   :  { %v156_v13 = vld [vmem:[#allocation4 + $0x30] sm:$0xff]  ;;  %10086 = vmatprep.subr.bf16.mxu0 %v12364_v5  ;;  %v12371_v14 = vpack.c.bf16 %v160_v12, %v157_v11  ;;  %v161_v17 = vld [vmem:[#allocation4 + $0x58] sm:$0xff]  ;;  %v163_v20 = vld [vmem:[#allocation4 + $0x68] sm:$0xff] }
  0x4e   :  { %10088 = vmatpush1.bf16.msra.mxu0 %v12366_v9  ;;  %10103 = vmatpush3.bf16.msra.mxu1 %v12368_v10  ;;  %v12375_v18 = vpack.c.bf16 %v159_v15, %v156_v13  ;;  %v12377_v19 = vpack.c.bf16 %v161_v17, %v158_v16  ;;  %v166_v21 = vld [vmem:[#allocation4 + $0x80] sm:$0xff]  ;;  %v165_v24 = vld [vmem:[#allocation4 + $0x78] sm:$0xff]  ;;  %v164_v25 = vld [vmem:[#allocation4 + $0x70] sm:$0xff] }
  0x4f   :  { %v162_v22 = vld [vmem:[#allocation4 + $0x60] sm:$0xff]  ;;  %10090 = vmatprep.subr.bf16.mxu0 %v12371_v14  ;;  %10104 = vmatprep.subr.bf16.mxu1 %v12206_v0  ;;  %v12381_v23 = vpack.c.bf16 %v166_v21, %v163_v20  ;;  %v167_v26 = vld [vmem:[#allocation4 + $0x88] sm:$0xff]  ;;  %v169_v27 = vld [vmem:[#allocation4 + $0x98] sm:$0xff] }
  0x50   :  { %v172_v28 = vld [vmem:[#allocation4 + $0xb0] sm:$0xff]  ;;  %v12385_v29 = vpack.c.bf16 %v165_v24, %v162_v22  ;;  %v12387_v30 = vpack.c.bf16 %v167_v26, %v164_v25  ;;  %v171_v32 = vld [vmem:[#allocation4 + $0xa8] sm:$0xff]  ;;  %v170_v34 = vld [vmem:[#allocation4 + $0xa0] sm:$0xff] }
  0x51   :  { %v168_v31 = vld [vmem:[#allocation4 + $0x90] sm:$0xff]  ;;  %v12391_v33 = vpack.c.bf16 %v172_v28, %v169_v27  ;;  %v173_v35 = vld [vmem:[#allocation4 + $0xb8] sm:$0xff]  ;;  %v149_v36 = vld [vmem:[%s14522_s0 + $0x8] sm:$0x1] }
  0x52   :  { %10092 = vmatpush1.bf16.msra.mxu0 %v12375_v18  ;;  %10106 = vmatpush3.bf16.msra.mxu1 %v12377_v19  ;;  %v12398_v37 = vpack.c.bf16 %v171_v32, %v168_v31  ;;  %v12400_v38 = vpack.c.bf16 %v173_v35, %v170_v34  ;;  %v193_v39 = vrot.slane %v149_v36, 7  ;;  %v148_v40 = vld [vmem:[%s14522_s0] sm:$0x1]  ;;  %v362_v42 = vld [vmem:[%s14522_s0 + $0x9] sm:$0x1]  ;;  %v2213_v12 = vld [vmem:[#allocation7 + $0x10] sm:$0xff] }
  0x53   :  { %10094 = vmatprep.subr.bf16.mxu0 %v12381_v23  ;;  %10107 = vmatprep.subr.bf16.mxu1 %v12206_v0  ;;  %v406_v43 = vrot.slane %v362_v42, 7  ;;  %v361_v44 = vld [vmem:[%s14522_s0 + $0x1] sm:$0x1]  ;;  %v574_v46 = vld [vmem:[%s14522_s0 + $0xa] sm:$0x1]  ;;  %v2221_v15 = vld [vmem:[#allocation7 + $0x50] sm:$0xff] }
  0x54   :  { %v195_v41 = vsel %vm194_vm1, %v193_v39, %v148_v40  ;;  %v618_v47 = vrot.slane %v574_v46, 7  ;;  %v573_v48 = vld [vmem:[%s14522_s0 + $0x2] sm:$0x1]  ;;  %v786_v50 = vld [vmem:[%s14522_s0 + $0xb] sm:$0x1]  ;;  %v2225_v31 = vld [vmem:[#allocation7 + $0x70] sm:$0xff] }
  0x55   :  { %v407_v45 = vsel %vm194_vm1, %v406_v43, %v361_v44  ;;  %v830_v51 = vrot.slane %v786_v50, 7  ;;  %v785_v52 = vld [vmem:[%s14522_s0 + $0x3] sm:$0x1]  ;;  %v998_v54 = vld [vmem:[%s14522_s0 + $0xc] sm:$0x1]  ;;  %v2233_v34 = vld [vmem:[#allocation7 + $0xb0] sm:$0xff] }
  0x56   :  { %10096 = vmatpush1.bf16.msra.mxu0 %v12385_v29  ;;  %10109 = vmatpush3.bf16.msra.mxu1 %v12387_v30  ;;  %v619_v49 = vsel %vm194_vm1, %v618_v47, %v573_v48  ;;  %v1042_v55 = vrot.slane %v998_v54, 7  ;;  %v997_v56 = vld [vmem:[%s14522_s0 + $0x4] sm:$0x1]  ;;  %v1210_v58 = vld [vmem:[%s14522_s0 + $0xd] sm:$0x1]  ;;  %v2229_v36 = vld [vmem:[#allocation7 + $0x90] sm:$0xff] }
  0x57   :  { %10098 = vmatprep.subr.bf16.mxu0 %v12391_v33  ;;  %10110 = vmatprep.subr.bf16.mxu1 %v12206_v0  ;;  %v831_v53 = vsel %vm194_vm1, %v830_v51, %v785_v52  ;;  %v1254_v59 = vrot.slane %v1210_v58, 7  ;;  %v1209_v60 = vld [vmem:[%s14522_s0 + $0x5] sm:$0x1]  ;;  %v1422_v62 = vld [vmem:[%s14522_s0 + $0xe] sm:$0x1]  ;;  %v2238_v48 = vld [vmem:[#allocation7 + $0xd8] sm:$0xff] }
  0x58   :  { %v1043_v57 = vsel %vm194_vm1, %v1042_v55, %v997_v56  ;;  %v1466_v63 = vrot.slane %v1422_v62, 7  ;;  %v1421_v2 = vld [vmem:[%s14522_s0 + $0x6] sm:$0x1]  ;;  %v1634_v4 = vld [vmem:[%s14522_s0 + $0xf] sm:$0x1]  ;;  %v2242_v51 = vld [vmem:[#allocation7 + $0xf8] sm:$0xff] }
  0x59   :  { %v1255_v61 = vsel %vm194_vm1, %v1254_v59, %v1209_v60  ;;  %v2215_v6 = vld [vmem:[#allocation7 + $0x20] sm:$0xff]  ;;  %v1678_v7 = vrot.slane %v1634_v4, 7  ;;  %v2216_v13 = vld [vmem:[#allocation7 + $0x28] sm:$0xff]  ;;  %v2245_v52 = vld [vmem:[#allocation7 + $0x110] sm:$0xff] }
  0x5a   :  { %10100 = vmatpush1.bf16.msra.mxu0 %v12398_v37  ;;  %10112 = vmatpush3.bf16.msra.mxu1 %v12400_v38  ;;  %v1467_v3 = vsel %vm194_vm1, %v1466_v63, %v1421_v2  ;;  %v2211_v8 = vld [vmem:[#allocation7] sm:$0xff]  ;;  %v2220_v21 = vld [vmem:[#allocation7 + $0x48] sm:$0xff]  ;;  %v2241_v54 = vld [vmem:[#allocation7 + $0xf0] sm:$0xff]  ;;  %v12658_v56 = vpack.c.bf16 %v2245_v52, %v2242_v51 }
  0x5b   :  { %10114 = vmatprep.subr.bf16.mxu0 %v12364_v5  ;;  %10129 = vmatprep.subr.bf16.mxu1 %v12206_v0  ;;  %v2219_v22 = vld [vmem:[#allocation7 + $0x40] sm:$0xff]  ;;  %v2224_v24 = vld [vmem:[#allocation7 + $0x68] sm:$0xff]  ;;  %v2246_v59 = vld [vmem:[#allocation7 + $0x118] sm:$0xff] }
  0x5c   :  { %v2227_v25 = vld [vmem:[#allocation7 + $0x80] sm:$0xff]  ;;  %v2228_v32 = vld [vmem:[#allocation7 + $0x88] sm:$0xff]  ;;  %v2250_v4 = vld [vmem:[#allocation7 + $0x138] sm:$0xff] }
  0x5d   :  { %8145 = vmatmul.mubr.msk.f32.vlgmr.msra.gmra.mrb[0].mxu0 %vm196_vm2, %v195_v41  ;;  %8830 = vmatmul.mubr.msk.f32.vlgmr.msra.gmra.mrb[0].mxu1 %vm196_vm2, %v195_v41  ;;  %v2223_v27 = vld [vmem:[#allocation7 + $0x60] sm:$0xff]  ;;  %v2232_v39 = vld [vmem:[#allocation7 + $0xa8] sm:$0xff]  ;;  %v2234_v41 = vld [vmem:[#allocation7 + $0xb8] sm:$0xff] }
  0x5e   :  { %10116 = vmatpush1.bf16.msra.mxu0 %v12366_v9  ;;  %10131 = vmatpush3.bf16.msra.mxu1 %v12368_v10  ;;  %v2231_v40 = vld [vmem:[#allocation7 + $0xa0] sm:$0xff]  ;;  %v2236_v42 = vld [vmem:[#allocation7 + $0xc8] sm:$0xff]  ;;  %v12642_v44 = vpack.c.bf16 %v2232_v39, %v2229_v36 }
  0x5f   :  { %10118 = vmatprep.subr.bf16.mxu0 %v12371_v14  ;;  %10132 = vmatprep.subr.bf16.mxu1 %v12206_v0  ;;  %v2239_v43 = vld [vmem:[#allocation7 + $0xe0] sm:$0xff]  ;;  %v12645_v46 = vpack.c.bf16 %v2234_v41, %v2231_v40  ;;  %v2240_v50 = vld [vmem:[#allocation7 + $0xe8] sm:$0xff] }
  0x60   :  { %474 = vmatprep.mubr.f32.mxu0 %v12207_v1  ;;  %8848 = vmatprep.mubr.msk.f32.mxu1 %vm12208_vm0, %v12207_v1  ;;  %v12648_v47 = vpack.c.bf16 %v2239_v43, %v2236_v42  ;;  %v2243_v58 = vld [vmem:[#allocation7 + $0x100] sm:$0xff]  ;;  %v2248_v60 = vld [vmem:[#allocation7 + $0x128] sm:$0xff] }
  0x61   :  { %v2247_v63 = vld [vmem:[#allocation7 + $0x120] sm:$0xff]  ;;  %v12665_v2 = vpack.c.bf16 %v2246_v59, %v2243_v58 }
  0x62   :  { %10120 = vmatpush1.bf16.msra.mxu0 %v12375_v18  ;;  %10134 = vmatpush3.bf16.msra.mxu1 %v12377_v19  ;;  %v387_v58 = vld [vmem:[%s14525_s3] sm:$0x7] }
  0x63   :  { %10122 = vmatprep.subr.bf16.mxu0 %v12381_v23  ;;  %10135 = vmatprep.subr.bf16.mxu1 %v12206_v0 }
  0x66   :  { %10124 = vmatpush1.bf16.msra.mxu0 %v12385_v29  ;;  %10137 = vmatpush3.bf16.msra.mxu1 %v12387_v30 }
  0x67   :  { %10126 = vmatprep.subr.bf16.mxu0 %v12391_v33  ;;  %10138 = vmatprep.subr.bf16.mxu1 %v12206_v0 }
  0x6a   :  { %10128 = vmatpush1.bf16.msra.mxu0 %v12398_v37  ;;  %10140 = vmatpush3.bf16.msra.mxu1 %v12400_v38 }
  0x6b   :  { %10142 = vmatprep.subr.bf16.mxu0 %v12364_v5  ;;  %10157 = vmatprep.subr.bf16.mxu1 %v12206_v0 }
  0x6d   :  { %8147 = vmatmul.mubr.msk.f32.vlgmr.msra.gmra.mrb[2].mxu0 %vm196_vm2, %v407_v45  ;;  %8849 = vmatmul.mubr.msk.f32.vlgmr.msra.gmra.mrb[2].mxu1 %vm196_vm2, %v407_v45  ;;  %v2235_v45 = vld [vmem:[#allocation7 + $0xc0] sm:$0xff] }
  0x6e   :  { %10144 = vmatpush1.bf16.msra.mxu0 %v12366_v9  ;;  %10159 = vmatpush3.bf16.msra.mxu1 %v12368_v10 }
  0x6f   :  { %10146 = vmatprep.subr.bf16.mxu0 %v12371_v14  ;;  %10160 = vmatprep.subr.bf16.mxu1 %v12206_v0 }
  0x70   :  { %686 = vmatprep.mubr.f32.mxu0 %v12207_v1  ;;  %8867 = vmatprep.mubr.msk.f32.mxu1 %vm12208_vm0, %v12207_v1 }
  0x72   :  { %10148 = vmatpush1.bf16.msra.mxu0 %v12375_v18  ;;  %10162 = vmatpush3.bf16.msra.mxu1 %v12377_v19 }
  0x73   :  { %10150 = vmatprep.subr.bf16.mxu0 %v12381_v23  ;;  %10163 = vmatprep.subr.bf16.mxu1 %v12206_v0 }
  0x76   :  { %10152 = vmatpush1.bf16.msra.mxu0 %v12385_v29  ;;  %10165 = vmatpush3.bf16.msra.mxu1 %v12387_v30 }
  0x77   :  { %10154 = vmatprep.subr.bf16.mxu0 %v12391_v33  ;;  %10166 = vmatprep.subr.bf16.mxu1 %v12206_v0 }
  0x7a   :  { %10156 = vmatpush1.bf16.msra.mxu0 %v12398_v37  ;;  %10168 = vmatpush3.bf16.msra.mxu1 %v12400_v38 }
  0x7b   :  { %10170 = vmatprep.subr.bf16.mxu0 %v12364_v5  ;;  %10185 = vmatprep.subr.bf16.mxu1 %v12206_v0 }
  0x7d   :  { %8149 = vmatmul.mubr.msk.f32.vlgmr.msra.gmra.mrb[4].mxu0 %vm196_vm2, %v619_v49  ;;  %8868 = vmatmul.mubr.msk.f32.vlgmr.msra.gmra.mrb[4].mxu1 %vm196_vm2, %v619_v49  ;;  %v2237_v49 = vld [vmem:[#allocation7 + $0xd0] sm:$0xff] }
  0x7e   :  { %10172 = vmatpush1.bf16.msra.mxu0 %v12366_v9  ;;  %10187 = vmatpush3.bf16.msra.mxu1 %v12368_v10  ;;  %v12655_v55 = vpack.c.bf16 %v2240_v50, %v2237_v49 }
  0x7f   :  { %10174 = vmatprep.subr.bf16.mxu0 %v12371_v14  ;;  %10188 = vmatprep.subr.bf16.mxu1 %v12206_v0 }
  0x80   :  { %898 = vmatprep.mubr.f32.mxu0 %v12207_v1  ;;  %8886 = vmatprep.mubr.msk.f32.mxu1 %vm12208_vm0, %v12207_v1 }
  0x82   :  { %10176 = vmatpush1.bf16.msra.mxu0 %v12375_v18  ;;  %10190 = vmatpush3.bf16.msra.mxu1 %v12377_v19 }
  0x83   :  { %10178 = vmatprep.subr.bf16.mxu0 %v12381_v23  ;;  %10191 = vmatprep.subr.bf16.mxu1 %v12206_v0 }
  0x86   :  { %10180 = vmatpush1.bf16.msra.mxu0 %v12385_v29  ;;  %10193 = vmatpush3.bf16.msra.mxu1 %v12387_v30 }
  0x87   :  { %10182 = vmatprep.subr.bf16.mxu0 %v12391_v33  ;;  %10194 = vmatprep.subr.bf16.mxu1 %v12206_v0 }
  0x8a   :  { %10184 = vmatpush1.bf16.msra.mxu0 %v12398_v37  ;;  %10196 = vmatpush3.bf16.msra.mxu1 %v12400_v38 }
  0x8b   :  { %10198 = vmatprep.subr.bf16.mxu0 %v12364_v5  ;;  %10213 = vmatprep.subr.bf16.mxu1 %v12206_v0 }
  0x8d   :  { %8151 = vmatmul.mubr.msk.f32.vlgmr.msra.gmra.mrb[6].mxu0 %vm196_vm2, %v831_v53  ;;  %8887 = vmatmul.mubr.msk.f32.vlgmr.msra.gmra.mrb[6].mxu1 %vm196_vm2, %v831_v53  ;;  %v12652_v53 = vpack.c.bf16 %v2238_v48, %v2235_v45 }
  0x8e   :  { %10200 = vmatpush1.bf16.msra.mxu0 %v12366_v9  ;;  %10215 = vmatpush3.bf16.msra.mxu1 %v12368_v10 }
  0x8f   :  { %10202 = vmatprep.subr.bf16.mxu0 %v12371_v14  ;;  %10216 = vmatprep.subr.bf16.mxu1 %v12206_v0 }
  0x90   :  { %1110 = vmatprep.mubr.f32.mxu0 %v12207_v1  ;;  %8905 = vmatprep.mubr.msk.f32.mxu1 %vm12208_vm0, %v12207_v1 }
  0x92   :  { %10204 = vmatpush1.bf16.msra.mxu0 %v12375_v18  ;;  %10218 = vmatpush3.bf16.msra.mxu1 %v12377_v19 }
  0x93   :  { %10206 = vmatprep.subr.bf16.mxu0 %v12381_v23  ;;  %10219 = vmatprep.subr.bf16.mxu1 %v12206_v0 }
  0x96   :  { %10208 = vmatpush1.bf16.msra.mxu0 %v12385_v29  ;;  %10221 = vmatpush3.bf16.msra.mxu1 %v12387_v30 }
  0x97   :  { %10210 = vmatprep.subr.bf16.mxu0 %v12391_v33  ;;  %10222 = vmatprep.subr.bf16.mxu1 %v12206_v0 }
  0x9a   :  { %10212 = vmatpush1.bf16.msra.mxu0 %v12398_v37  ;;  %10224 = vmatpush3.bf16.msra.mxu1 %v12400_v38 }
  0x9b   :  { %10226 = vmatprep.subr.bf16.mxu0 %v12364_v5  ;;  %10241 = vmatprep.subr.bf16.mxu1 %v12206_v0 }
  0x9d   :  { %8153 = vmatmul.mubr.msk.f32.vlgmr.msra.gmra.mrb[8].mxu0 %vm196_vm2, %v1043_v57  ;;  %8906 = vmatmul.mubr.msk.f32.vlgmr.msra.gmra.mrb[8].mxu1 %vm196_vm2, %v1043_v57  ;;  %v2244_v57 = vld [vmem:[#allocation7 + $0x108] sm:$0xff] }
  0x9e   :  { %10228 = vmatpush1.bf16.msra.mxu0 %v12366_v9  ;;  %10243 = vmatpush3.bf16.msra.mxu1 %v12368_v10  ;;  %v12662_v62 = vpack.c.bf16 %v2244_v57, %v2241_v54 }
  0x9f   :  { %10230 = vmatprep.subr.bf16.mxu0 %v12371_v14  ;;  %10244 = vmatprep.subr.bf16.mxu1 %v12206_v0 }
  0xa0   :  { %1322 = vmatprep.mubr.f32.mxu0 %v12207_v1  ;;  %8924 = vmatprep.mubr.msk.f32.mxu1 %vm12208_vm0, %v12207_v1 }
  0xa2   :  { %10232 = vmatpush1.bf16.msra.mxu0 %v12375_v18  ;;  %10246 = vmatpush3.bf16.msra.mxu1 %v12377_v19 }
  0xa3   :  { %10234 = vmatprep.subr.bf16.mxu0 %v12381_v23  ;;  %10247 = vmatprep.subr.bf16.mxu1 %v12206_v0 }
  0xa6   :  { %10236 = vmatpush1.bf16.msra.mxu0 %v12385_v29  ;;  %10249 = vmatpush3.bf16.msra.mxu1 %v12387_v30 }
  0xa7   :  { %10238 = vmatprep.subr.bf16.mxu0 %v12391_v33  ;;  %10250 = vmatprep.subr.bf16.mxu1 %v12206_v0 }
  0xaa   :  { %10240 = vmatpush1.bf16.msra.mxu0 %v12398_v37  ;;  %10252 = vmatpush3.bf16.msra.mxu1 %v12400_v38 }
  0xab   :  { %10254 = vmatprep.subr.bf16.mxu0 %v12364_v5  ;;  %10269 = vmatprep.subr.bf16.mxu1 %v12206_v0 }
  0xad   :  { %8155 = vmatmul.mubr.msk.f32.vlgmr.msra.gmra.mrb[10].mxu0 %vm196_vm2, %v1255_v61  ;;  %8925 = vmatmul.mubr.msk.f32.vlgmr.msra.gmra.mrb[10].mxu1 %vm196_vm2, %v1255_v61  ;;  %v2251_v61 = vld [vmem:[#allocation7 + $0x140] sm:$0xff] }
  0xae   :  { %10256 = vmatpush1.bf16.msra.mxu0 %v12366_v9  ;;  %10271 = vmatpush3.bf16.msra.mxu1 %v12368_v10 }
  0xaf   :  { %10258 = vmatprep.subr.bf16.mxu0 %v12371_v14  ;;  %10272 = vmatprep.subr.bf16.mxu1 %v12206_v0 }
  0xb0   :  { %1534 = vmatprep.mubr.f32.mxu0 %v12207_v1  ;;  %8943 = vmatprep.mubr.msk.f32.mxu1 %vm12208_vm0, %v12207_v1 }
  0xb2   :  { %10260 = vmatpush1.bf16.msra.mxu0 %v12375_v18  ;;  %10274 = vmatpush3.bf16.msra.mxu1 %v12377_v19 }
  0xb3   :  { %10262 = vmatprep.subr.bf16.mxu0 %v12381_v23  ;;  %10275 = vmatprep.subr.bf16.mxu1 %v12206_v0 }
  0xb6   :  { %10264 = vmatpush1.bf16.msra.mxu0 %v12385_v29  ;;  %10277 = vmatpush3.bf16.msra.mxu1 %v12387_v30 }
  0xb7   :  { %10266 = vmatprep.subr.bf16.mxu0 %v12391_v33  ;;  %10278 = vmatprep.subr.bf16.mxu1 %v12206_v0 }
  0xba   :  { %10268 = vmatpush1.bf16.msra.mxu0 %v12398_v37  ;;  %10280 = vmatpush3.bf16.msra.mxu1 %v12400_v38 }
  0xbb   :  { %10282 = vmatprep.subr.bf16.mxu0 %v12364_v5  ;;  %10297 = vmatprep.subr.bf16.mxu1 %v12206_v0  ;;  %v2212_v5 = vld [vmem:[#allocation7 + $0x8] sm:$0xff] }
  0xbc   :  { %v12603_v11 = vpack.c.bf16 %v2215_v6, %v2212_v5  ;;  %v2249_v5 = vld [vmem:[#allocation7 + $0x130] sm:$0xff]  ;;  %v2252_v6 = vld [vmem:[#allocation7 + $0x148] sm:$0xff] }
  0xbd   :  { %8157 = vmatmul.mubr.msk.f32.vlgmr.msra.gmra.mrb[12].mxu0 %vm196_vm2, %v1467_v3  ;;  %8944 = vmatmul.mubr.msk.f32.vlgmr.msra.gmra.mrb[12].mxu1 %vm196_vm2, %v1467_v3  ;;  %v12668_v3 = vpack.c.bf16 %v2251_v61, %v2248_v60 }
  0xbe   :  { %10284 = vmatpush1.bf16.msra.mxu0 %v12366_v9  ;;  %10299 = vmatpush3.bf16.msra.mxu1 %v12368_v10  ;;  %v2214_v9 = vld [vmem:[#allocation7 + $0x18] sm:$0xff]  ;;  %v1633_v10 = vld [vmem:[%s14522_s0 + $0x7] sm:$0x1] }
  0xbf   :  { %10286 = vmatprep.subr.bf16.mxu0 %v12371_v14  ;;  %10300 = vmatprep.subr.bf16.mxu1 %v12206_v0  ;;  %v2218_v14 = vld [vmem:[#allocation7 + $0x38] sm:$0xff]  ;;  %v1679_v16 = vsel %vm194_vm1, %v1678_v7, %v1633_v10  ;;  %v12608_v17 = vpack.c.bf16 %v2214_v9, %v2211_v8  ;;  %v2257_v8 = vld [vmem:[#allocation7 + $0x170] sm:$0xff]  ;;  %v12672_v9 = vpack.c.bf16 %v2250_v4, %v2247_v63 }
  0xc0   :  { %1746 = vmatprep.mubr.f32.mxu0 %v12207_v1  ;;  %8962 = vmatprep.mubr.msk.f32.mxu1 %vm12208_vm0, %v12207_v1  ;;  %v12613_v20 = vpack.c.bf16 %v2221_v15, %v2218_v14  ;;  %v2254_v7 = vld [vmem:[#allocation7 + $0x158] sm:$0xff]  ;;  %v2253_v10 = vld [vmem:[#allocation7 + $0x150] sm:$0xff]  ;;  %v2256_v14 = vld [vmem:[#allocation7 + $0x168] sm:$0xff] }
  0xc1   :  { %v2255_v15 = vld [vmem:[#allocation7 + $0x160] sm:$0xff] }
  0xc2   :  { %10288 = vmatpush1.bf16.msra.mxu0 %v12375_v18  ;;  %10302 = vmatpush3.bf16.msra.mxu1 %v12377_v19  ;;  %v2217_v18 = vld [vmem:[#allocation7 + $0x30] sm:$0xff]  ;;  %v12610_v19 = vpack.c.bf16 %v2216_v13, %v2213_v12  ;;  %v12675_v12 = vpack.c.bf16 %v2252_v6, %v2249_v5  ;;  %v12678_v13 = vpack.c.bf16 %v2257_v8, %v2254_v7 }
  0xc3   :  { %10290 = vmatprep.subr.bf16.mxu0 %v12381_v23  ;;  %10303 = vmatprep.subr.bf16.mxu1 %v12206_v0  ;;  %v2222_v23 = vld [vmem:[#allocation7 + $0x58] sm:$0xff]  ;;  %v12619_v26 = vpack.c.bf16 %v2220_v21, %v2217_v18  ;;  %v12682_v18 = vpack.c.bf16 %v2256_v14, %v2253_v10 }
  0xc4   :  { %v12622_v28 = vpack.c.bf16 %v2222_v23, %v2219_v22  ;;  %v103_v22 = vlaneseq }
  0xc6   :  { %10292 = vmatpush1.bf16.msra.mxu0 %v12385_v29  ;;  %10305 = vmatpush3.bf16.msra.mxu1 %v12387_v30  ;;  %v12625_v29 = vpack.c.bf16 %v2227_v25, %v2224_v24  ;;  %v2226_v30 = vld [vmem:[#allocation7 + $0x78] sm:$0xff]  ;;  %v177_v23 = vshrl.u32 %v103_v22, 7  ;;  %v12209_v24 = vmov 1983009808  }
  0xc7   :  { %10294 = vmatprep.subr.bf16.mxu0 %v12391_v33  ;;  %10306 = vmatprep.subr.bf16.mxu1 %v12206_v0  ;;  %v2230_v33 = vld [vmem:[#allocation7 + $0x98] sm:$0xff]  ;;  %v12632_v35 = vpack.c.bf16 %v2226_v30, %v2223_v27  ;;  %v345_v25 = vunpack.c.l.s4 %v12209_v24  ;;  %v599_v24 = vld [vmem:[%s14525_s3] sm:$0x7] }
  0xc8   :  { %v12731_v27 = vsub.s32 0, %v177_v23  ;;  %v12733_v30 = vsub.s32 2, %v177_v23 }
  0xca   :  { %10296 = vmatpush1.bf16.msra.mxu0 %v12398_v37  ;;  %10308 = vmatpush3.bf16.msra.mxu1 %v12400_v38  ;;  %v12635_v37 = vpack.c.bf16 %v2228_v32, %v2225_v31  ;;  %v12638_v38 = vpack.c.bf16 %v2233_v34, %v2230_v33  ;;  %v174_v31 = vld [vmem:[%s14525_s3] sm:$0x7]  ;;  %v12738_v32 = vsub.s32 1, %v177_v23  ;;  %v346_v33 = vunpack.c.0.s8 %v345_v25 }
  0xcb   :  { %10310 = vmatprep.subr.bf16.mxu0 %v12603_v11  ;;  %10341 = vmatprep.subr.bf16.mxu1 %v12206_v0  ;;  %v179_v34 = vrot.slane %v174_v31, %v12731_v27  ;;  %v187_v36 = vrot.slane %v174_v31, %v12733_v30  ;;  %v392_v59 = vrot.slane %v387_v58, %v12731_v27 }
  0xcc   :  { %v183_v39 = vrot.slane %v174_v31, %v12738_v32  ;;  %v12743_v41 = vsub.s32 %v346_v33, %v177_v23  ;;  %v400_v60 = vrot.slane %v387_v58, %v12733_v30  ;;  %v396_v61 = vrot.slane %v387_v58, %v12738_v32 }
  0xcd   :  { %8159 = vmatmul.mubr.msk.f32.vlgmr.msra.gmra.mrb[14].mxu0 %vm196_vm2, %v1679_v16  ;;  %8963 = vmatmul.mubr.msk.f32.vlgmr.msra.gmra.mrb[14].mxu1 %vm196_vm2, %v1679_v16  ;;  %v2258_v16 = vld [vmem:[#allocation7 + $0x178] sm:$0xff]  ;;  %v604_v25 = vrot.slane %v599_v24, %v12731_v27  ;;  %v612_v31 = vrot.slane %v599_v24, %v12733_v30  ;;  %v608_v33 = vrot.slane %v599_v24, %v12738_v32 }
  0xce   :  { %10312 = vmatpush1.bf16.msra.mxu0 %v12608_v17  ;;  %10343 = vmatpush3.bf16.msra.mxu1 %v12610_v19  ;;  %v12685_v21 = vpack.c.bf16 %v2258_v16, %v2255_v15 }
  0xcf   :  { %10314 = vmatprep.subr.bf16.mxu0 %v12613_v20  ;;  %2341 = vmatprep.mubr.f32.mxu0 %v12207_v1 }
  0xd0   :  { %10344 = vmatprep.subr.bf16.mxu1 %v12206_v0  ;;  %8997 = vmatprep.mubr.msk.f32.mxu1 %vm12208_vm0, %v12207_v1 }
  0xd2   :  { %10316 = vmatpush1.bf16.msra.mxu0 %v12619_v26  ;;  %10346 = vmatpush3.bf16.msra.mxu1 %v12622_v28 }
  0xd3   :  { %10318 = vmatprep.subr.bf16.mxu0 %v12625_v29  ;;  %10347 = vmatprep.subr.bf16.mxu1 %v12206_v0 }
  0xd6   :  { %10320 = vmatpush1.bf16.msra.mxu0 %v12632_v35  ;;  %10349 = vmatpush3.bf16.msra.mxu1 %v12635_v37 }
  0xd7   :  { %10322 = vmatprep.subr.bf16.mxu0 %v12638_v38  ;;  %10350 = vmatprep.subr.bf16.mxu1 %v12206_v0 }
  0xda   :  { %10324 = vmatpush1.bf16.msra.mxu0 %v12642_v44  ;;  %10352 = vmatpush3.bf16.msra.mxu1 %v12645_v46 }
  0xdb   :  { %10326 = vmatprep.subr.bf16.mxu0 %v12648_v47  ;;  %10353 = vmatprep.subr.bf16.mxu1 %v12206_v0 }
  0xde   :  { %10328 = vmatpush1.bf16.msra.mxu0 %v12652_v53  ;;  %10355 = vmatpush3.bf16.msra.mxu1 %v12655_v55 }
  0xdf   :  { %10330 = vmatprep.subr.bf16.mxu0 %v12658_v56  ;;  %10356 = vmatprep.subr.bf16.mxu1 %v12206_v0 }
  0xe2   :  { %10332 = vmatpush1.bf16.msra.mxu0 %v12662_v62  ;;  %10358 = vmatpush3.bf16.msra.mxu1 %v12665_v2 }
  0xe3   :  { %10334 = vmatprep.subr.bf16.mxu0 %v12668_v3  ;;  %10359 = vmatprep.subr.bf16.mxu1 %v12206_v0 }
  0xe6   :  { %10336 = vmatpush1.bf16.msra.mxu0 %v12672_v9  ;;  %10361 = vmatpush3.bf16.msra.mxu1 %v12675_v12 }
  0xe7   :  { %10338 = vmatprep.subr.bf16.mxu0 %v12678_v13  ;;  %10362 = vmatprep.subr.bf16.mxu1 %v12206_v0 }
  0xea   :  { %10340 = vmatpush1.bf16.msra.mxu0 %v12682_v18  ;;  %10364 = vmatpush3.bf16.msra.mxu1 %v12685_v21 }
  0xeb   :  { %10366 = vmatprep.subr.bf16.mxu0 %v12603_v11  ;;  %10397 = vmatprep.subr.bf16.mxu1 %v12206_v0 }
  0xed   :  { %2342 = vmatmul.mubr.f32.vlgmr.msra.gmra.mrb[16].mxu0 %v12207_v1  ;;  %8998 = vmatmul.mubr.f32.vlgmr.msra.gmra.mrb[16].mxu1 %v12207_v1 }
  0xee   :  { %10368 = vmatpush1.bf16.msra.mxu0 %v12608_v17  ;;  %10399 = vmatpush3.bf16.msra.mxu1 %v12610_v19 }
  0xef   :  { %10370 = vmatprep.subr.bf16.mxu0 %v12613_v20  ;;  %10400 = vmatprep.subr.bf16.mxu1 %v12206_v0 }
  0xf0   :  { %2510 = vmatprep.mubr.f32.mxu0 %v12207_v1  ;;  %9032 = vmatprep.mubr.msk.f32.mxu1 %vm12208_vm0, %v12207_v1 }
  0xf2   :  { %10372 = vmatpush1.bf16.msra.mxu0 %v12619_v26  ;;  %10402 = vmatpush3.bf16.msra.mxu1 %v12622_v28 }
  0xf3   :  { %10374 = vmatprep.subr.bf16.mxu0 %v12625_v29  ;;  %10403 = vmatprep.subr.bf16.mxu1 %v12206_v0 }
  0xf6   :  { %10376 = vmatpush1.bf16.msra.mxu0 %v12632_v35  ;;  %10405 = vmatpush3.bf16.msra.mxu1 %v12635_v37 }
  0xf7   :  { %10378 = vmatprep.subr.bf16.mxu0 %v12638_v38  ;;  %10406 = vmatprep.subr.bf16.mxu1 %v12206_v0 }
  0xfa   :  { %10380 = vmatpush1.bf16.msra.mxu0 %v12642_v44  ;;  %10408 = vmatpush3.bf16.msra.mxu1 %v12645_v46 }
  0xfb   :  { %10382 = vmatprep.subr.bf16.mxu0 %v12648_v47  ;;  %10409 = vmatprep.subr.bf16.mxu1 %v12206_v0 }
  0xfe   :  { %10384 = vmatpush1.bf16.msra.mxu0 %v12652_v53  ;;  %10411 = vmatpush3.bf16.msra.mxu1 %v12655_v55 }
  0xff   :  { %10386 = vmatprep.subr.bf16.mxu0 %v12658_v56  ;;  %10412 = vmatprep.subr.bf16.mxu1 %v12206_v0 }
 0x102   :  { %10388 = vmatpush1.bf16.msra.mxu0 %v12662_v62  ;;  %10414 = vmatpush3.bf16.msra.mxu1 %v12665_v2 }
 0x103   :  { %10390 = vmatprep.subr.bf16.mxu0 %v12668_v3  ;;  %10415 = vmatprep.subr.bf16.mxu1 %v12206_v0 }
 0x106   :  { %10392 = vmatpush1.bf16.msra.mxu0 %v12672_v9  ;;  %10417 = vmatpush3.bf16.msra.mxu1 %v12675_v12 }
 0x107   :  { %10394 = vmatprep.subr.bf16.mxu0 %v12678_v13  ;;  %10418 = vmatprep.subr.bf16.mxu1 %v12206_v0 }
 0x10a   :  { %10396 = vmatpush1.bf16.msra.mxu0 %v12682_v18  ;;  %10420 = vmatpush3.bf16.msra.mxu1 %v12685_v21 }
 0x10b   :  { %10422 = vmatprep.subr.bf16.mxu0 %v12603_v11  ;;  %10453 = vmatprep.subr.bf16.mxu1 %v12206_v0 }
 0x130   :  { %v265_v40 = vpop.f32.mrb[0].mxu0  ;;  %v336_v42 = vpop.f32.mrb[0].mxu1 }
 0x131   :  { %v266_v43 = vadd.f32 %v265_v40, %v179_v34  ;;  %v267_v45 = vpop.f32.mrb[1].mxu0  ;;  %v337_v48 = vadd.f32 %v336_v42, %v187_v36  ;;  %v8831_v49 = vpop.f32.mrb[1].mxu1 }
 0x132   :  { %v268_v50 = vadd.f32 %v267_v45, %v183_v39 }
 0x133   :  { %v357_v52 = vrot.slane %v337_v48, %v12743_v41 }
 0x134   :  { %v343_v51 = vcombine.low %v266_v43, %v268_v50 }
 0x136   :  { %v350_v54 = vrot.slane %v343_v51, %v12743_v41 }
 0x138   :  { %v358_v57 = vcombine.low %v350_v54, %v357_v52  ;;  %v811_v52 = vld [vmem:[%s14525_s3] sm:$0x7] }
 0x139   :  { %v816_v54 = vrot.slane %v811_v52, %v12731_v27  ;;  %v820_v58 = vrot.slane %v811_v52, %v12738_v32 }
 0x13a   :  { %360 = vst [vmem:[#allocation2] sm:$0x3f] %v358_v57  ;;  %v824_v57 = vrot.slane %v811_v52, %v12733_v30 }
 0x140   :  { %v476_v63 = vpop.f32.mrb[2].mxu0  ;;  %v547_v4 = vpop.f32.mrb[2].mxu1 }
 0x141   :  { %v477_v5 = vadd.f32 %v476_v63, %v392_v59  ;;  %v478_v6 = vpop.f32.mrb[3].mxu0  ;;  %v548_v7 = vadd.f32 %v547_v4, %v400_v60  ;;  %v8850_v8 = vpop.f32.mrb[3].mxu1 }
 0x142   :  { %v479_v10 = vadd.f32 %v478_v6, %v396_v61 }
 0x143   :  { %v568_v15 = vrot.slane %v548_v7, %v12743_v41 }
 0x144   :  { %v554_v14 = vcombine.low %v477_v5, %v479_v10 }
 0x146   :  { %v561_v16 = vrot.slane %v554_v14, %v12743_v41 }
 0x148   :  { %v569_v23 = vcombine.low %v561_v16, %v568_v15  ;;  %v1023_v15 = vld [vmem:[%s14525_s3] sm:$0x7] }
 0x149   :  { %v1028_v16 = vrot.slane %v1023_v15, %v12731_v27  ;;  %v1032_v24 = vrot.slane %v1023_v15, %v12738_v32 }
 0x14a   :  { %572 = vst [vmem:[#allocation2 + $0x6] sm:$0x3f] %v569_v23  ;;  %v1036_v23 = vrot.slane %v1023_v15, %v12733_v30 }
 0x150   :  { %v688_v34 = vpop.f32.mrb[4].mxu0  ;;  %v759_v36 = vpop.f32.mrb[4].mxu1 }
 0x151   :  { %v689_v39 = vadd.f32 %v688_v34, %v604_v25  ;;  %v690_v40 = vpop.f32.mrb[5].mxu0  ;;  %v760_v42 = vadd.f32 %v759_v36, %v612_v31  ;;  %v8869_v43 = vpop.f32.mrb[5].mxu1 }
 0x152   :  { %v691_v45 = vadd.f32 %v690_v40, %v608_v33 }
 0x153   :  { %v780_v49 = vrot.slane %v760_v42, %v12743_v41 }
 0x154   :  { %v766_v48 = vcombine.low %v689_v39, %v691_v45 }
 0x156   :  { %v773_v50 = vrot.slane %v766_v48, %v12743_v41  ;;  %v12780_v48 = vand.u32 127, %v103_v22 }
 0x158   :  { %v781_v51 = vcombine.low %v773_v50, %v780_v49  ;;  %v1235_v50 = vld [vmem:[%s14525_s3] sm:$0x7]  ;;  %v106_v52 = vadd.s32 256, %v12780_v48  ;;  %vm143_vm3 = vcmp.lt.s32.totalorder %v12780_v48, 32  ;;  %vm147_vm7 = vcmp.lt.s32.totalorder %v12780_v48, 64 }
 0x15a   :  { %784 = vst [vmem:[#allocation2 + $0xc] sm:$0x3f] %v781_v51  ;;  %v105_v51 = vadd.s32 128, %v12780_v48  ;;  %v125_v22 = vand.u32 127, %v106_v52  ;;  %v14333_v48 = vld [vmem:[%s14532_s10] ss:$0 sm:$0xff] }
 0x15c   :  { %vm12797_vm5 = vcmp.lt.s32.totalorder %v125_v22, 32 }
 0x160   :  { %v900_v59 = vpop.f32.mrb[6].mxu0  ;;  %v971_v60 = vpop.f32.mrb[6].mxu1 }
 0x161   :  { %v901_v61 = vadd.f32 %v900_v59, %v816_v54  ;;  %v902_v63 = vpop.f32.mrb[7].mxu0  ;;  %v972_v4 = vadd.f32 %v971_v60, %v824_v57  ;;  %v8888_v5 = vpop.f32.mrb[7].mxu1  ;;  %v1240_v57 = vrot.slane %v1235_v50, %v12731_v27  ;;  %v1244_v59 = vrot.slane %v1235_v50, %v12738_v32 }
 0x162   :  { %v903_v6 = vadd.f32 %v902_v63, %v820_v58  ;;  %v1248_v58 = vrot.slane %v1235_v50, %v12733_v30  ;;  %v118_v60 = vand.u32 127, %v105_v51 }
 0x163   :  { %v992_v8 = vrot.slane %v972_v4, %v12743_v41 }
 0x164   :  { %v978_v7 = vcombine.low %v901_v61, %v903_v6  ;;  %vm12793_vm4 = vcmp.lt.s32.totalorder %v118_v60, 32 }
 0x166   :  { %v985_v10 = vrot.slane %v978_v7, %v12743_v41 }
 0x168   :  { %v993_v14 = vcombine.low %v985_v10, %v992_v8 }
 0x16a   :  { %996 = vst [vmem:[#allocation2 + $0x12] sm:$0x3f] %v993_v14 }
 0x170   :  { %v1112_v25 = vpop.f32.mrb[8].mxu0  ;;  %v1183_v31 = vpop.f32.mrb[8].mxu1 }
 0x171   :  { %v1113_v33 = vadd.f32 %v1112_v25, %v1028_v16  ;;  %v1114_v34 = vpop.f32.mrb[9].mxu0  ;;  %v1184_v36 = vadd.f32 %v1183_v31, %v1036_v23  ;;  %v8907_v39 = vpop.f32.mrb[9].mxu1  ;;  %v2121_v54 = vld [vmem:[#allocation2 + $0x12] sm:$0x3f] }
 0x172   :  { %v1115_v40 = vadd.f32 %v1114_v34, %v1032_v24  ;;  %v2124_v61 = vcombine.high %v2121_v54, %v2121_v54  ;;  %v2131_v63 = vrot.slane %v2121_v54, %v12743_v41 }
 0x173   :  { %v1204_v43 = vrot.slane %v1184_v36, %v12743_v41 }
 0x174   :  { %v1190_v42 = vcombine.low %v1113_v33, %v1115_v40  ;;  %v2138_v31 = vrot.slane %v2124_v61, %v12743_v41  ;;  %v2139_v33 = vcombine.high %v2131_v63, %v2131_v63 }
 0x176   :  { %v1197_v45 = vrot.slane %v1190_v42, %v12743_v41 }
 0x178   :  { %v1205_v49 = vcombine.low %v1197_v45, %v1204_v43 }
 0x17a   :  { %1208 = vst [vmem:[#allocation2 + $0x18] sm:$0x3f] %v1205_v49 }
 0x180   :  { %v1324_v4 = vpop.f32.mrb[10].mxu0  ;;  %v1395_v5 = vpop.f32.mrb[10].mxu1 }
 0x181   :  { %v2122_v6 = vld [vmem:[#allocation2 + $0x18] sm:$0x3f]  ;;  %v1325_v7 = vadd.f32 %v1324_v4, %v1240_v57  ;;  %v1326_v8 = vpop.f32.mrb[11].mxu0  ;;  %v1396_v10 = vadd.f32 %v1395_v5, %v1248_v58  ;;  %v8926_v14 = vpop.f32.mrb[11].mxu1 }
 0x182   :  { %v2144_v15 = vcombine.high %v2122_v6, %v2122_v6  ;;  %v2151_v16 = vrot.slane %v2122_v6, %v12743_v41  ;;  %v1327_v23 = vadd.f32 %v1326_v8, %v1244_v59 }
 0x183   :  { %v1416_v43 = vrot.slane %v1396_v10, %v12743_v41 }
 0x184   :  { %v2158_v34 = vrot.slane %v2144_v15, %v12743_v41  ;;  %v2159_v36 = vcombine.high %v2151_v16, %v2151_v16  ;;  %v2163_v39 = vsel %vm143_vm3, %v2131_v63, %v2151_v16  ;;  %v2187_v40 = vsel %vm143_vm3, %v2151_v16, %v2131_v63  ;;  %v1447_v63 = vld [vmem:[%s14525_s3] sm:$0x7] }
 0x185   :  { %v1402_v42 = vcombine.low %v1325_v7, %v1327_v23  ;;  %v1452_v6 = vrot.slane %v1447_v63, %v12731_v27  ;;  %v2031_v7 = vld [vmem:[#allocation2 + $0xc] sm:$0x3f]  ;;  %v1456_v8 = vrot.slane %v1447_v63, %v12738_v32  ;;  %v1460_v10 = vrot.slane %v1447_v63, %v12733_v30 }
 0x186   :  { %v2164_v45 = vsel %vm12793_vm4, %v2139_v33, %v2159_v36  ;;  %v2165_v49 = vsel %vm12797_vm5, %v2138_v31, %v2158_v34  ;;  %v2188_v50 = vsel %vm12793_vm4, %v2159_v36, %v2139_v33  ;;  %v2189_v51 = vsel %vm12797_vm5, %v2158_v34, %v2138_v31 }
 0x187   :  { %v2169_v52 = vcombine.low %v2163_v39, %v2164_v45  ;;  %v2193_v54 = vcombine.low %v2187_v40, %v2188_v50  ;;  %v1409_v57 = vrot.slane %v1402_v42, %v12743_v41  ;;  %v2183_v59 = vrot.slane %v2165_v49, %v12743_v41 }
 0x188   :  { %v2207_v22 = vrot.slane %v2189_v51, %v12743_v41  ;;  %v2034_v16 = vcombine.high %v2031_v7, %v2031_v7  ;;  %v2041_v34 = vrot.slane %v2031_v7, %v12743_v41  ;;  %v1659_v7 = vld [vmem:[%s14525_s3] sm:$0x7] }
 0x189   :  { %v2176_v58 = vrot.slane %v2169_v52, %v12743_v41  ;;  %v2200_v60 = vrot.slane %v2193_v54, %v12743_v41  ;;  %v1417_v61 = vcombine.low %v1409_v57, %v1416_v43 }
 0x18a   :  { %v2048_v49 = vrot.slane %v2034_v16, %v12743_v41  ;;  %v2049_v50 = vcombine.high %v2041_v34, %v2041_v34 }
 0x18b   :  { %v2184_v4 = vcombine.low %v2176_v58, %v2183_v59  ;;  %v2208_v5 = vcombine.low %v2200_v60, %v2207_v22  ;;  %1420 = vst [vmem:[#allocation2 + $0x1e] sm:$0x3f] %v1417_v61 }
 0x18d   :  { %2186 = vst [vmem:[#allocation2 + $0x12] sm:$0x3f] %v2184_v4  ;;  %2210 = vst [vmem:[#allocation2 + $0x18] sm:$0x3f] %v2208_v5 }
 0x190   :  { %v1536_v14 = vpop.f32.mrb[12].mxu0  ;;  %v1607_v15 = vpop.f32.mrb[12].mxu1 }
 0x191   :  { %v1537_v23 = vadd.f32 %v1536_v14, %v1452_v6  ;;  %v1538_v31 = vpop.f32.mrb[13].mxu0  ;;  %v8945_v33 = vpop.f32.mrb[13].mxu1  ;;  %v1608_v39 = vadd.f32 %v1607_v15, %v1460_v10 }
 0x192   :  { %v1539_v36 = vadd.f32 %v1538_v31, %v1456_v8  ;;  %v2032_v40 = vld [vmem:[#allocation2 + $0x1e] sm:$0x3f]  ;;  %v1664_v31 = vrot.slane %v1659_v7, %v12731_v27  ;;  %v1941_v33 = vld [vmem:[#allocation2 + $0x6] sm:$0x3f] }
 0x193   :  { %v2054_v42 = vcombine.high %v2032_v40, %v2032_v40  ;;  %v2061_v43 = vrot.slane %v2032_v40, %v12743_v41  ;;  %v1628_v54 = vrot.slane %v1608_v39, %v12743_v41 }
 0x194   :  { %v1614_v45 = vcombine.low %v1537_v23, %v1539_v36  ;;  %v1672_v36 = vrot.slane %v1659_v7, %v12733_v30 }
 0x195   :  { %v2068_v51 = vrot.slane %v2054_v42, %v12743_v41  ;;  %v2069_v52 = vcombine.high %v2061_v43, %v2061_v43  ;;  %v2073_v57 = vsel %vm143_vm3, %v2041_v34, %v2061_v43  ;;  %v2097_v58 = vsel %vm143_vm3, %v2061_v43, %v2041_v34 }
 0x196   :  { %v1621_v59 = vrot.slane %v1614_v45, %v12743_v41  ;;  %v1668_v34 = vrot.slane %v1659_v7, %v12738_v32  ;;  %v1944_v42 = vcombine.high %v1941_v33, %v1941_v33 }
 0x197   :  { %v2074_v60 = vsel %vm12793_vm4, %v2049_v50, %v2069_v52  ;;  %v2075_v22 = vsel %vm12797_vm5, %v2048_v49, %v2068_v51  ;;  %v2098_v61 = vsel %vm12793_vm4, %v2069_v52, %v2049_v50  ;;  %v2099_v63 = vsel %vm12797_vm5, %v2068_v51, %v2048_v49 }
 0x198   :  { %v2079_v4 = vcombine.low %v2073_v57, %v2074_v60  ;;  %v2103_v5 = vcombine.low %v2097_v58, %v2098_v61  ;;  %v1629_v6 = vcombine.low %v1621_v59, %v1628_v54  ;;  %v2093_v10 = vrot.slane %v2075_v22, %v12743_v41 }
 0x199   :  { %v2117_v15 = vrot.slane %v2099_v63, %v12743_v41  ;;  %v1951_v50 = vrot.slane %v1941_v33, %v12743_v41  ;;  %v1958_v60 = vrot.slane %v1944_v42, %v12743_v41 }
 0x19a   :  { %v2086_v8 = vrot.slane %v2079_v4, %v12743_v41  ;;  %v2110_v14 = vrot.slane %v2103_v5, %v12743_v41  ;;  %1632 = vst [vmem:[#allocation2 + $0x24] sm:$0x3f] %v1629_v6 }
 0x19b   :  { %v1959_v22 = vcombine.high %v1951_v50, %v1951_v50 }
 0x19c   :  { %v2094_v16 = vcombine.low %v2086_v8, %v2093_v10  ;;  %v2118_v23 = vcombine.low %v2110_v14, %v2117_v15 }
 0x19e   :  { %2096 = vst [vmem:[#allocation2 + $0xc] sm:$0x3f] %v2094_v16  ;;  %2120 = vst [vmem:[#allocation2 + $0x1e] sm:$0x3f] %v2118_v23 }
 0x1a0   :  { %v1748_v39 = vpop.f32.mrb[14].mxu0  ;;  %v1819_v40 = vpop.f32.mrb[14].mxu1 }
 0x1a1   :  { %v1749_v43 = vadd.f32 %v1748_v39, %v1664_v31  ;;  %v1750_v45 = vpop.f32.mrb[15].mxu0  ;;  %v8964_v49 = vpop.f32.mrb[15].mxu1  ;;  %v1820_v52 = vadd.f32 %v1819_v40, %v1672_v36  ;;  %v1942_v54 = vld [vmem:[#allocation2 + $0x24] sm:$0x3f] }
 0x1a2   :  { %v1751_v51 = vadd.f32 %v1750_v45, %v1668_v34  ;;  %v1964_v57 = vcombine.high %v1942_v54, %v1942_v54  ;;  %v1971_v58 = vrot.slane %v1942_v54, %v12743_v41 }
 0x1a3   :  { %v1840_v4 = vrot.slane %v1820_v52, %v12743_v41 }
 0x1a4   :  { %v1826_v59 = vcombine.low %v1749_v43, %v1751_v51  ;;  %v1978_v61 = vrot.slane %v1964_v57, %v12743_v41  ;;  %v1979_v63 = vcombine.high %v1971_v58, %v1971_v58  ;;  %v1983_v5 = vsel %vm143_vm3, %v1951_v50, %v1971_v58  ;;  %v1845_v43 = vld [vmem:[#allocation2] sm:$0x3f] }
 0x1a5   :  { %v2007_v6 = vsel %vm143_vm3, %v1971_v58, %v1951_v50  ;;  %v1854_v45 = vcombine.high %v1845_v43, %v1845_v43  ;;  %v1861_v49 = vrot.slane %v1845_v43, %v12743_v41 }
 0x1a6   :  { %v1833_v7 = vrot.slane %v1826_v59, %v12743_v41  ;;  %v1984_v8 = vsel %vm12793_vm4, %v1959_v22, %v1979_v63  ;;  %v1985_v10 = vsel %vm12797_vm5, %v1958_v60, %v1978_v61  ;;  %v2008_v14 = vsel %vm12793_vm4, %v1979_v63, %v1959_v22 }
 0x1a7   :  { %v2009_v15 = vsel %vm12797_vm5, %v1978_v61, %v1958_v60  ;;  %v1989_v16 = vcombine.low %v1983_v5, %v1984_v8  ;;  %v2013_v23 = vcombine.low %v2007_v6, %v2008_v14  ;;  %v2003_v34 = vrot.slane %v1985_v10, %v12743_v41 }
 0x1a8   :  { %v1841_v31 = vcombine.low %v1833_v7, %v1840_v4  ;;  %v2027_v39 = vrot.slane %v2009_v15, %v12743_v41  ;;  %v1868_v54 = vrot.slane %v1854_v45, %v12743_v41  ;;  %v1869_v57 = vcombine.high %v1861_v49, %v1861_v49 }
 0x1a9   :  { %v1996_v33 = vrot.slane %v1989_v16, %v12743_v41  ;;  %v2020_v36 = vrot.slane %v2013_v23, %v12743_v41  ;;  %v2259_v16 = vld [vmem:[%s14526_s4] sm:$0x7] }
 0x1aa   :  { %1844 = vst [vmem:[#allocation2 + $0x2a] sm:$0x3f] %v1841_v31  ;;  %v12905_v43 = vrot.slane %v2259_v16, %v12738_v32 }
 0x1ab   :  { %v2004_v40 = vcombine.low %v1996_v33, %v2003_v34  ;;  %v2028_v42 = vcombine.low %v2020_v36, %v2027_v39  ;;  %v12901_v33 = vrot.slane %v2259_v16, %v12731_v27 }
 0x1ad   :  { %2006 = vst [vmem:[#allocation2 + $0x6] sm:$0x3f] %v2004_v40  ;;  %2030 = vst [vmem:[#allocation2 + $0x24] sm:$0x3f] %v2028_v42 }
 0x1b1   :  { %v1846_v50 = vld [vmem:[#allocation2 + $0x2a] sm:$0x3f] }
 0x1b2   :  { %v1874_v51 = vcombine.high %v1846_v50, %v1846_v50  ;;  %v1881_v52 = vrot.slane %v1846_v50, %v12743_v41 }
 0x1b4   :  { %v1888_v58 = vrot.slane %v1874_v51, %v12743_v41  ;;  %v1889_v59 = vcombine.high %v1881_v52, %v1881_v52  ;;  %v1893_v60 = vsel %vm143_vm3, %v1861_v49, %v1881_v52  ;;  %v1917_v22 = vsel %vm143_vm3, %v1881_v52, %v1861_v49 }
 0x1b6   :  { %v1894_v61 = vsel %vm12793_vm4, %v1869_v57, %v1889_v59  ;;  %v1895_v63 = vsel %vm12797_vm5, %v1868_v54, %v1888_v58  ;;  %v1918_v4 = vsel %vm12793_vm4, %v1889_v59, %v1869_v57  ;;  %v1919_v5 = vsel %vm12797_vm5, %v1888_v58, %v1868_v54 }
 0x1b7   :  { %v1899_v6 = vcombine.low %v1893_v60, %v1894_v61  ;;  %v1923_v7 = vcombine.low %v1917_v22, %v1918_v4  ;;  %v1913_v10 = vrot.slane %v1895_v63, %v12743_v41  ;;  %v1937_v15 = vrot.slane %v1919_v5, %v12743_v41 }
 0x1b8   :  { %v12909_v60 = vrot.slane %v2259_v16, %v12733_v30 }
 0x1b9   :  { %v1906_v8 = vrot.slane %v1899_v6, %v12743_v41  ;;  %v1930_v14 = vrot.slane %v1923_v7, %v12743_v41 }
 0x1bb   :  { %v1914_v23 = vcombine.low %v1906_v8, %v1913_v10  ;;  %v1938_v31 = vcombine.low %v1930_v14, %v1937_v15 }
 0x1bd   :  { %1916 = vst [vmem:[#allocation2] sm:$0x3f] %v1914_v23  ;;  %1940 = vst [vmem:[#allocation2 + $0x2a] sm:$0x3f] %v1938_v31 }
 0x1c0   :  { %v2343_v34 = vpop.f32.mrb[16].mxu0  ;;  %v2414_v36 = vpop.f32.mrb[16].mxu1 }
 0x1c1   :  { %v2345_v39 = vpop.f32.mrb[17].mxu0  ;;  %v8999_v40 = vpop.f32.mrb[17].mxu1  ;;  %v2344_v42 = vadd.f32 %v2343_v34, %v12901_v33  ;;  %v2415_v63 = vadd.f32 %v2414_v36, %v12909_v60  ;;  %v2445_v36 = vld [vmem:[#allocation2 + $0x6] sm:$0x3f] }
 0x1c2   :  { %v2346_v51 = vadd.f32 %v2345_v39, %v12905_v43 }
 0x1c4   :  { %v2276_v45 = vld [vmem:[#allocation2] sm:$0x3f] }
 0x1c5   :  { %v2418_v49 = vadd.f32 %v2344_v42, %v2276_v45  ;;  %v2426_v50 = vrot.slane %v2276_v45, 2  ;;  %v2436_v6 = vrot.slane %v2276_v45, 4 }
 0x1c7   :  { %v8161_v52 = vmul.f32 -1.442695, %v2418_v49  ;;  %v2428_v54 = vadd.f32 %v2426_v50, %v2346_v51  ;;  %v2595_v50 = vrot.slane %v2445_v36, 2 }
 0x1c9   :  { %11872 = vpow2.f32 %v8161_v52  ;;  %v8162_v57 = vmul.f32 -1.442695, %v2428_v54 }
 0x1cb   :  { %11874 = vpow2.f32 %v8162_v57 }
 0x1d3   :  { %v11873_v58 = vpop.eup %11872 }
 0x1d4   :  { %v2422_v59 = vadd.f32 1.0, %v11873_v58 }
 0x1d5   :  { %v11875_v22 = vpop.eup %11874 }
 0x1d6   :  { %11876 = vrcp.f32 %v2422_v59  ;;  %v2432_v61 = vadd.f32 1.0, %v11875_v22 }
 0x1d8   :  { %11878 = vrcp.f32 %v2432_v61 }
 0x1e0   :  { %v11877_v4 = vpop.eup %11876 }
 0x1e1   :  { %v2435_v5 = vmul.f32 %v11877_v4, %v2415_v63 }
 0x1e2   :  { %v11879_v8 = vpop.eup %11878 }
 0x1e3   :  { %v2438_v7 = vadd.f32 %v2436_v6, %v2435_v5  ;;  %v2440_v10 = vsub.f32 1.0, %v11879_v8  ;;  %v2442_v23 = vmul.f32 0.0, %v11879_v8  ;;  %v2605_v5 = vrot.slane %v2445_v36, 4 }
 0x1e5   :  { %11880 = vtanh.f32 %v2438_v7 }
 0x1ef   :  { %v11881_v14 = vpop.eup %11880 }
 0x1f0   :  { %v2441_v15 = vmul.f32 %v11881_v14, %v2440_v10 }
 0x1f2   :  { %v12912_v31 = vadd.f32 %v2442_v23, %v2441_v15 }
 0x1f4   :  { %2444 = vst [vmem:[#allocation3] sm:$0x3] %v12912_v31  ;;  %2511 = vmatmul.mubr.f32.vlgmr.msra.gmra.mrb[18].mxu0 %v12912_v31  ;;  %9033 = vmatmul.mubr.f32.vlgmr.msra.gmra.mrb[18].mxu1 %v12912_v31 }
 0x1f5   :  { %10424 = vmatpush1.bf16.msra.mxu0 %v12608_v17  ;;  %10455 = vmatpush3.bf16.msra.mxu1 %v12610_v19 }
 0x1f6   :  { %10426 = vmatprep.subr.bf16.mxu0 %v12613_v20  ;;  %10456 = vmatprep.subr.bf16.mxu1 %v12206_v0 }
 0x1f7   :  { %2680 = vmatprep.mubr.f32.mxu0 %v12207_v1  ;;  %9067 = vmatprep.mubr.msk.f32.mxu1 %vm12208_vm0, %v12207_v1 }
 0x1f9   :  { %10428 = vmatpush1.bf16.msra.mxu0 %v12619_v26  ;;  %10458 = vmatpush3.bf16.msra.mxu1 %v12622_v28 }
 0x1fa   :  { %10430 = vmatprep.subr.bf16.mxu0 %v12625_v29  ;;  %10459 = vmatprep.subr.bf16.mxu1 %v12206_v0 }
 0x1fd   :  { %10432 = vmatpush1.bf16.msra.mxu0 %v12632_v35  ;;  %10461 = vmatpush3.bf16.msra.mxu1 %v12635_v37 }
 0x1fe   :  { %10434 = vmatprep.subr.bf16.mxu0 %v12638_v38  ;;  %10462 = vmatprep.subr.bf16.mxu1 %v12206_v0 }
 0x201   :  { %10436 = vmatpush1.bf16.msra.mxu0 %v12642_v44  ;;  %10464 = vmatpush3.bf16.msra.mxu1 %v12645_v46 }
 0x202   :  { %10438 = vmatprep.subr.bf16.mxu0 %v12648_v47  ;;  %10465 = vmatprep.subr.bf16.mxu1 %v12206_v0 }
 0x205   :  { %10440 = vmatpush1.bf16.msra.mxu0 %v12652_v53  ;;  %10467 = vmatpush3.bf16.msra.mxu1 %v12655_v55 }
 0x206   :  { %10442 = vmatprep.subr.bf16.mxu0 %v12658_v56  ;;  %10468 = vmatprep.subr.bf16.mxu1 %v12206_v0 }
 0x209   :  { %10444 = vmatpush1.bf16.msra.mxu0 %v12662_v62  ;;  %10470 = vmatpush3.bf16.msra.mxu1 %v12665_v2 }
 0x20a   :  { %10446 = vmatprep.subr.bf16.mxu0 %v12668_v3  ;;  %10471 = vmatprep.subr.bf16.mxu1 %v12206_v0 }
 0x20d   :  { %10448 = vmatpush1.bf16.msra.mxu0 %v12672_v9  ;;  %10473 = vmatpush3.bf16.msra.mxu1 %v12675_v12 }
 0x20e   :  { %10450 = vmatprep.subr.bf16.mxu0 %v12678_v13  ;;  %10474 = vmatprep.subr.bf16.mxu1 %v12206_v0 }
 0x211   :  { %10452 = vmatpush1.bf16.msra.mxu0 %v12682_v18  ;;  %10476 = vmatpush3.bf16.msra.mxu1 %v12685_v21 }
 0x212   :  { %10478 = vmatprep.subr.bf16.mxu0 %v12603_v11  ;;  %10509 = vmatprep.subr.bf16.mxu1 %v12206_v0 }
 0x2c7   :  { %v2512_v16 = vpop.f32.mrb[18].mxu0  ;;  %v2583_v34 = vpop.f32.mrb[18].mxu1 }
 0x2c8   :  { %v2513_v39 = vadd.f32 %v2512_v16, %v12901_v33  ;;  %v2514_v40 = vpop.f32.mrb[19].mxu0  ;;  %v9034_v42 = vpop.f32.mrb[19].mxu1  ;;  %v2584_v61 = vadd.f32 %v2583_v34, %v12909_v60  ;;  %v2615_v34 = vld [vmem:[#allocation2 + $0xc] sm:$0x3f] }
 0x2c9   :  { %v2515_v45 = vadd.f32 %v2514_v40, %v12905_v43 }
 0x2ca   :  { %v2587_v49 = vadd.f32 %v2513_v39, %v2445_v36 }
 0x2cb   :  { %v2597_v52 = vadd.f32 %v2595_v50, %v2515_v45 }
 0x2cc   :  { %v8163_v51 = vmul.f32 -1.442695, %v2587_v49  ;;  %v2765_v49 = vrot.slane %v2615_v34, 2 }
 0x2cd   :  { %v8164_v54 = vmul.f32 -1.442695, %v2597_v52 }
 0x2ce   :  { %11882 = vpow2.f32 %v8163_v51 }
 0x2cf   :  { %11884 = vpow2.f32 %v8164_v54 }
 0x2d8   :  { %v11883_v57 = vpop.eup %11882 }
 0x2d9   :  { %v2591_v58 = vadd.f32 1.0, %v11883_v57  ;;  %v11885_v59 = vpop.eup %11884 }
 0x2da   :  { %v2601_v22 = vadd.f32 1.0, %v11885_v59 }
 0x2db   :  { %11886 = vrcp.f32 %v2591_v58 }
 0x2dc   :  { %11888 = vrcp.f32 %v2601_v22 }
 0x2e5   :  { %v11887_v63 = vpop.eup %11886 }
 0x2e6   :  { %v2604_v4 = vmul.f32 %v11887_v63, %v2584_v61  ;;  %v11889_v7 = vpop.eup %11888 }
 0x2e7   :  { %v2609_v8 = vsub.f32 1.0, %v11889_v7  ;;  %v2611_v15 = vmul.f32 %v11889_v7, %v12912_v31 }
 0x2e8   :  { %v2607_v6 = vadd.f32 %v2605_v5, %v2604_v4  ;;  %v2775_v4 = vrot.slane %v2615_v34, 4 }
 0x2ea   :  { %11890 = vtanh.f32 %v2607_v6 }
 0x2f4   :  { %v11891_v10 = vpop.eup %11890 }
 0x2f5   :  { %v2610_v14 = vmul.f32 %v11891_v10, %v2609_v8 }
 0x2f7   :  { %v12956_v23 = vadd.f32 %v2611_v15, %v2610_v14 }
 0x2f9   :  { %2614 = vst [vmem:[#allocation3 + $0x2] sm:$0x3] %v12956_v23  ;;  %2681 = vmatmul.mubr.f32.vlgmr.msra.gmra.mrb[20].mxu0 %v12956_v23  ;;  %9068 = vmatmul.mubr.f32.vlgmr.msra.gmra.mrb[20].mxu1 %v12956_v23 }
 0x2fa   :  { %10480 = vmatpush1.bf16.msra.mxu0 %v12608_v17  ;;  %10511 = vmatpush3.bf16.msra.mxu1 %v12610_v19 }
 0x2fb   :  { %10482 = vmatprep.subr.bf16.mxu0 %v12613_v20  ;;  %10512 = vmatprep.subr.bf16.mxu1 %v12206_v0 }
 0x2fc   :  { %2850 = vmatprep.mubr.f32.mxu0 %v12207_v1  ;;  %9102 = vmatprep.mubr.msk.f32.mxu1 %vm12208_vm0, %v12207_v1 }
 0x2fe   :  { %10484 = vmatpush1.bf16.msra.mxu0 %v12619_v26  ;;  %10514 = vmatpush3.bf16.msra.mxu1 %v12622_v28 }
 0x2ff   :  { %10486 = vmatprep.subr.bf16.mxu0 %v12625_v29  ;;  %10515 = vmatprep.subr.bf16.mxu1 %v12206_v0 }
 0x302   :  { %10488 = vmatpush1.bf16.msra.mxu0 %v12632_v35  ;;  %10517 = vmatpush3.bf16.msra.mxu1 %v12635_v37 }
 0x303   :  { %10490 = vmatprep.subr.bf16.mxu0 %v12638_v38  ;;  %10518 = vmatprep.subr.bf16.mxu1 %v12206_v0 }
 0x306   :  { %10492 = vmatpush1.bf16.msra.mxu0 %v12642_v44  ;;  %10520 = vmatpush3.bf16.msra.mxu1 %v12645_v46 }
 0x307   :  { %10494 = vmatprep.subr.bf16.mxu0 %v12648_v47  ;;  %10521 = vmatprep.subr.bf16.mxu1 %v12206_v0 }
 0x30a   :  { %10496 = vmatpush1.bf16.msra.mxu0 %v12652_v53  ;;  %10523 = vmatpush3.bf16.msra.mxu1 %v12655_v55 }
 0x30b   :  { %10498 = vmatprep.subr.bf16.mxu0 %v12658_v56  ;;  %10524 = vmatprep.subr.bf16.mxu1 %v12206_v0 }
 0x30e   :  { %10500 = vmatpush1.bf16.msra.mxu0 %v12662_v62  ;;  %10526 = vmatpush3.bf16.msra.mxu1 %v12665_v2 }
 0x30f   :  { %10502 = vmatprep.subr.bf16.mxu0 %v12668_v3  ;;  %10527 = vmatprep.subr.bf16.mxu1 %v12206_v0 }
 0x312   :  { %10504 = vmatpush1.bf16.msra.mxu0 %v12672_v9  ;;  %10529 = vmatpush3.bf16.msra.mxu1 %v12675_v12 }
 0x313   :  { %10506 = vmatprep.subr.bf16.mxu0 %v12678_v13  ;;  %10530 = vmatprep.subr.bf16.mxu1 %v12206_v0 }
 0x316   :  { %10508 = vmatpush1.bf16.msra.mxu0 %v12682_v18  ;;  %10532 = vmatpush3.bf16.msra.mxu1 %v12685_v21 }
 0x317   :  { %10534 = vmatprep.subr.bf16.mxu0 %v12603_v11  ;;  %10565 = vmatprep.subr.bf16.mxu1 %v12206_v0 }
 0x3cc   :  { %v2682_v31 = vpop.f32.mrb[20].mxu0  ;;  %v2753_v16 = vpop.f32.mrb[20].mxu1 }
 0x3cd   :  { %v2683_v36 = vadd.f32 %v2682_v31, %v12901_v33  ;;  %v2684_v39 = vpop.f32.mrb[21].mxu0  ;;  %v9069_v40 = vpop.f32.mrb[21].mxu1  ;;  %v2754_v22 = vadd.f32 %v2753_v16, %v12909_v60  ;;  %v2785_v16 = vld [vmem:[#allocation2 + $0x12] sm:$0x3f] }
 0x3ce   :  { %v2685_v42 = vadd.f32 %v2684_v39, %v12905_v43 }
 0x3cf   :  { %v2757_v45 = vadd.f32 %v2683_v36, %v2615_v34 }
 0x3d0   :  { %v2767_v51 = vadd.f32 %v2765_v49, %v2685_v42 }
 0x3d1   :  { %v8165_v50 = vmul.f32 -1.442695, %v2757_v45  ;;  %v2935_v45 = vrot.slane %v2785_v16, 2 }
 0x3d2   :  { %v8166_v52 = vmul.f32 -1.442695, %v2767_v51 }
 0x3d3   :  { %11892 = vpow2.f32 %v8165_v50 }
 0x3d4   :  { %11894 = vpow2.f32 %v8166_v52 }
 0x3dd   :  { %v11893_v54 = vpop.eup %11892 }
 0x3de   :  { %v2761_v57 = vadd.f32 1.0, %v11893_v54  ;;  %v11895_v58 = vpop.eup %11894 }
 0x3df   :  { %v2771_v59 = vadd.f32 1.0, %v11895_v58 }
 0x3e0   :  { %11896 = vrcp.f32 %v2761_v57 }
 0x3e1   :  { %11898 = vrcp.f32 %v2771_v59 }
 0x3ea   :  { %v11897_v61 = vpop.eup %11896 }
 0x3eb   :  { %v2774_v63 = vmul.f32 %v11897_v61, %v2754_v22  ;;  %v11899_v6 = vpop.eup %11898 }
 0x3ec   :  { %v2779_v7 = vsub.f32 1.0, %v11899_v6  ;;  %v2781_v14 = vmul.f32 %v11899_v6, %v12956_v23 }
 0x3ed   :  { %v2777_v5 = vadd.f32 %v2775_v4, %v2774_v63  ;;  %v2945_v63 = vrot.slane %v2785_v16, 4 }
 0x3ef   :  { %11900 = vtanh.f32 %v2777_v5 }
 0x3f9   :  { %v11901_v8 = vpop.eup %11900 }
 0x3fa   :  { %v2780_v10 = vmul.f32 %v11901_v8, %v2779_v7 }
 0x3fc   :  { %v13000_v15 = vadd.f32 %v2781_v14, %v2780_v10 }
 0x3fe   :  { %2784 = vst [vmem:[#allocation3 + $0x4] sm:$0x3] %v13000_v15  ;;  %2851 = vmatmul.mubr.f32.vlgmr.msra.gmra.mrb[22].mxu0 %v13000_v15  ;;  %9103 = vmatmul.mubr.f32.vlgmr.msra.gmra.mrb[22].mxu1 %v13000_v15 }
 0x3ff   :  { %10536 = vmatpush1.bf16.msra.mxu0 %v12608_v17  ;;  %10567 = vmatpush3.bf16.msra.mxu1 %v12610_v19 }
 0x400   :  { %10538 = vmatprep.subr.bf16.mxu0 %v12613_v20  ;;  %10568 = vmatprep.subr.bf16.mxu1 %v12206_v0 }
 0x401   :  { %3020 = vmatprep.mubr.f32.mxu0 %v12207_v1  ;;  %9137 = vmatprep.mubr.msk.f32.mxu1 %vm12208_vm0, %v12207_v1 }
 0x403   :  { %10540 = vmatpush1.bf16.msra.mxu0 %v12619_v26  ;;  %10570 = vmatpush3.bf16.msra.mxu1 %v12622_v28 }
 0x404   :  { %10542 = vmatprep.subr.bf16.mxu0 %v12625_v29  ;;  %10571 = vmatprep.subr.bf16.mxu1 %v12206_v0 }
 0x407   :  { %10544 = vmatpush1.bf16.msra.mxu0 %v12632_v35  ;;  %10573 = vmatpush3.bf16.msra.mxu1 %v12635_v37 }
 0x408   :  { %10546 = vmatprep.subr.bf16.mxu0 %v12638_v38  ;;  %10574 = vmatprep.subr.bf16.mxu1 %v12206_v0 }
 0x40b   :  { %10548 = vmatpush1.bf16.msra.mxu0 %v12642_v44  ;;  %10576 = vmatpush3.bf16.msra.mxu1 %v12645_v46 }
 0x40c   :  { %10550 = vmatprep.subr.bf16.mxu0 %v12648_v47  ;;  %10577 = vmatprep.subr.bf16.mxu1 %v12206_v0 }
 0x40f   :  { %10552 = vmatpush1.bf16.msra.mxu0 %v12652_v53  ;;  %10579 = vmatpush3.bf16.msra.mxu1 %v12655_v55 }
 0x410   :  { %10554 = vmatprep.subr.bf16.mxu0 %v12658_v56  ;;  %10580 = vmatprep.subr.bf16.mxu1 %v12206_v0 }
 0x413   :  { %10556 = vmatpush1.bf16.msra.mxu0 %v12662_v62  ;;  %10582 = vmatpush3.bf16.msra.mxu1 %v12665_v2 }
 0x414   :  { %10558 = vmatprep.subr.bf16.mxu0 %v12668_v3  ;;  %10583 = vmatprep.subr.bf16.mxu1 %v12206_v0 }
 0x417   :  { %10560 = vmatpush1.bf16.msra.mxu0 %v12672_v9  ;;  %10585 = vmatpush3.bf16.msra.mxu1 %v12675_v12 }
 0x418   :  { %10562 = vmatprep.subr.bf16.mxu0 %v12678_v13  ;;  %10586 = vmatprep.subr.bf16.mxu1 %v12206_v0 }
 0x41b   :  { %10564 = vmatpush1.bf16.msra.mxu0 %v12682_v18  ;;  %10588 = vmatpush3.bf16.msra.mxu1 %v12685_v21 }
 0x41c   :  { %10590 = vmatprep.subr.bf16.mxu0 %v12603_v11  ;;  %10621 = vmatprep.subr.bf16.mxu1 %v12206_v0 }
 0x4d1   :  { %v2852_v23 = vpop.f32.mrb[22].mxu0  ;;  %v2923_v31 = vpop.f32.mrb[22].mxu1 }
 0x4d2   :  { %v2853_v34 = vadd.f32 %v2852_v23, %v12901_v33  ;;  %v2854_v36 = vpop.f32.mrb[23].mxu0  ;;  %v9104_v39 = vpop.f32.mrb[23].mxu1  ;;  %v2924_v59 = vadd.f32 %v2923_v31, %v12909_v60  ;;  %v2955_v31 = vld [vmem:[#allocation2 + $0x18] sm:$0x3f] }
 0x4d3   :  { %v2855_v40 = vadd.f32 %v2854_v36, %v12905_v43 }
 0x4d4   :  { %v2927_v42 = vadd.f32 %v2853_v34, %v2785_v16 }
 0x4d5   :  { %v2937_v50 = vadd.f32 %v2935_v45, %v2855_v40 }
 0x4d6   :  { %v8167_v49 = vmul.f32 -1.442695, %v2927_v42  ;;  %v3105_v42 = vrot.slane %v2955_v31, 2 }
 0x4d7   :  { %v8168_v51 = vmul.f32 -1.442695, %v2937_v50 }
 0x4d8   :  { %11902 = vpow2.f32 %v8167_v49 }
 0x4d9   :  { %11904 = vpow2.f32 %v8168_v51 }
 0x4e2   :  { %v11903_v52 = vpop.eup %11902 }
 0x4e3   :  { %v2931_v54 = vadd.f32 1.0, %v11903_v52  ;;  %v11905_v57 = vpop.eup %11904 }
 0x4e4   :  { %v2941_v58 = vadd.f32 1.0, %v11905_v57 }
 0x4e5   :  { %11906 = vrcp.f32 %v2931_v54 }
 0x4e6   :  { %11908 = vrcp.f32 %v2941_v58 }
 0x4ef   :  { %v11907_v22 = vpop.eup %11906 }
 0x4f0   :  { %v2944_v61 = vmul.f32 %v11907_v22, %v2924_v59  ;;  %v11909_v5 = vpop.eup %11908 }
 0x4f1   :  { %v2949_v6 = vsub.f32 1.0, %v11909_v5  ;;  %v2951_v10 = vmul.f32 %v11909_v5, %v13000_v15 }
 0x4f2   :  { %v2947_v4 = vadd.f32 %v2945_v63, %v2944_v61  ;;  %v3115_v61 = vrot.slane %v2955_v31, 4 }
 0x4f4   :  { %11910 = vtanh.f32 %v2947_v4 }
 0x4fe   :  { %v11911_v7 = vpop.eup %11910 }
 0x4ff   :  { %v2950_v8 = vmul.f32 %v11911_v7, %v2949_v6 }
 0x501   :  { %v13044_v14 = vadd.f32 %v2951_v10, %v2950_v8 }
 0x503   :  { %2954 = vst [vmem:[#allocation3 + $0x6] sm:$0x3] %v13044_v14  ;;  %3021 = vmatmul.mubr.f32.vlgmr.msra.gmra.mrb[24].mxu0 %v13044_v14  ;;  %9138 = vmatmul.mubr.f32.vlgmr.msra.gmra.mrb[24].mxu1 %v13044_v14 }
 0x504   :  { %10592 = vmatpush1.bf16.msra.mxu0 %v12608_v17  ;;  %10623 = vmatpush3.bf16.msra.mxu1 %v12610_v19 }
 0x505   :  { %10594 = vmatprep.subr.bf16.mxu0 %v12613_v20  ;;  %10624 = vmatprep.subr.bf16.mxu1 %v12206_v0 }
 0x506   :  { %3190 = vmatprep.mubr.f32.mxu0 %v12207_v1  ;;  %9172 = vmatprep.mubr.msk.f32.mxu1 %vm12208_vm0, %v12207_v1 }
 0x508   :  { %10596 = vmatpush1.bf16.msra.mxu0 %v12619_v26  ;;  %10626 = vmatpush3.bf16.msra.mxu1 %v12622_v28 }
 0x509   :  { %10598 = vmatprep.subr.bf16.mxu0 %v12625_v29  ;;  %10627 = vmatprep.subr.bf16.mxu1 %v12206_v0 }
 0x50c   :  { %10600 = vmatpush1.bf16.msra.mxu0 %v12632_v35  ;;  %10629 = vmatpush3.bf16.msra.mxu1 %v12635_v37 }
 0x50d   :  { %10602 = vmatprep.subr.bf16.mxu0 %v12638_v38  ;;  %10630 = vmatprep.subr.bf16.mxu1 %v12206_v0 }
 0x510   :  { %10604 = vmatpush1.bf16.msra.mxu0 %v12642_v44  ;;  %10632 = vmatpush3.bf16.msra.mxu1 %v12645_v46 }
 0x511   :  { %10606 = vmatprep.subr.bf16.mxu0 %v12648_v47  ;;  %10633 = vmatprep.subr.bf16.mxu1 %v12206_v0 }
 0x514   :  { %10608 = vmatpush1.bf16.msra.mxu0 %v12652_v53  ;;  %10635 = vmatpush3.bf16.msra.mxu1 %v12655_v55 }
 0x515   :  { %10610 = vmatprep.subr.bf16.mxu0 %v12658_v56  ;;  %10636 = vmatprep.subr.bf16.mxu1 %v12206_v0 }
 0x518   :  { %10612 = vmatpush1.bf16.msra.mxu0 %v12662_v62  ;;  %10638 = vmatpush3.bf16.msra.mxu1 %v12665_v2 }
 0x519   :  { %10614 = vmatprep.subr.bf16.mxu0 %v12668_v3  ;;  %10639 = vmatprep.subr.bf16.mxu1 %v12206_v0 }
 0x51c   :  { %10616 = vmatpush1.bf16.msra.mxu0 %v12672_v9  ;;  %10641 = vmatpush3.bf16.msra.mxu1 %v12675_v12 }
 0x51d   :  { %10618 = vmatprep.subr.bf16.mxu0 %v12678_v13  ;;  %10642 = vmatprep.subr.bf16.mxu1 %v12206_v0 }
 0x520   :  { %10620 = vmatpush1.bf16.msra.mxu0 %v12682_v18  ;;  %10644 = vmatpush3.bf16.msra.mxu1 %v12685_v21 }
 0x521   :  { %10646 = vmatprep.subr.bf16.mxu0 %v12603_v11  ;;  %10677 = vmatprep.subr.bf16.mxu1 %v12206_v0 }
 0x5d6   :  { %v3022_v15 = vpop.f32.mrb[24].mxu0  ;;  %v3093_v23 = vpop.f32.mrb[24].mxu1 }
 0x5d7   :  { %v3023_v16 = vadd.f32 %v3022_v15, %v12901_v33  ;;  %v3024_v34 = vpop.f32.mrb[25].mxu0  ;;  %v9139_v36 = vpop.f32.mrb[25].mxu1  ;;  %v3094_v58 = vadd.f32 %v3093_v23, %v12909_v60 }
 0x5d8   :  { %v3025_v39 = vadd.f32 %v3024_v34, %v12905_v43  ;;  %v3125_v36 = vld [vmem:[#allocation2 + $0x1e] sm:$0x3f] }
 0x5d9   :  { %v3097_v40 = vadd.f32 %v3023_v16, %v2955_v31 }
 0x5da   :  { %v3107_v49 = vadd.f32 %v3105_v42, %v3025_v39 }
 0x5db   :  { %v8169_v45 = vmul.f32 -1.442695, %v3097_v40 }
 0x5dc   :  { %v8170_v50 = vmul.f32 -1.442695, %v3107_v49 }
 0x5dd   :  { %11912 = vpow2.f32 %v8169_v45 }
 0x5de   :  { %11914 = vpow2.f32 %v8170_v50  ;;  %v3275_v50 = vrot.slane %v3125_v36, 2 }
 0x5e7   :  { %v11913_v51 = vpop.eup %11912 }
 0x5e8   :  { %v3101_v52 = vadd.f32 1.0, %v11913_v51  ;;  %v11915_v54 = vpop.eup %11914 }
 0x5e9   :  { %v3111_v57 = vadd.f32 1.0, %v11915_v54 }
 0x5ea   :  { %11916 = vrcp.f32 %v3101_v52 }
 0x5eb   :  { %11918 = vrcp.f32 %v3111_v57 }
 0x5f4   :  { %v11917_v59 = vpop.eup %11916 }
 0x5f5   :  { %v3114_v22 = vmul.f32 %v11917_v59, %v3094_v58  ;;  %v11919_v4 = vpop.eup %11918 }
 0x5f6   :  { %v3119_v5 = vsub.f32 1.0, %v11919_v4  ;;  %v3121_v8 = vmul.f32 %v11919_v4, %v13044_v14  ;;  %v3655_v14 = vld [vmem:[#allocation3 + $0x6] sm:$0x3]  ;;  %v3285_v4 = vrot.slane %v3125_v36, 4 }
 0x5f7   :  { %v3117_v63 = vadd.f32 %v3115_v61, %v3114_v22 }
 0x5f9   :  { %11920 = vtanh.f32 %v3117_v63 }
 0x603   :  { %v11921_v6 = vpop.eup %11920 }
 0x604   :  { %v3120_v7 = vmul.f32 %v11921_v6, %v3119_v5 }
 0x606   :  { %v13088_v10 = vadd.f32 %v3121_v8, %v3120_v7 }
 0x608   :  { %3124 = vst [vmem:[#allocation3 + $0x8] sm:$0x3] %v13088_v10  ;;  %3191 = vmatmul.mubr.f32.vlgmr.msra.gmra.mrb[26].mxu0 %v13088_v10  ;;  %9173 = vmatmul.mubr.f32.vlgmr.msra.gmra.mrb[26].mxu1 %v13088_v10 }
 0x609   :  { %10648 = vmatpush1.bf16.msra.mxu0 %v12608_v17  ;;  %10679 = vmatpush3.bf16.msra.mxu1 %v12610_v19 }
 0x60a   :  { %10650 = vmatprep.subr.bf16.mxu0 %v12613_v20  ;;  %10680 = vmatprep.subr.bf16.mxu1 %v12206_v0 }
 0x60b   :  { %3360 = vmatprep.mubr.f32.mxu0 %v12207_v1  ;;  %9207 = vmatprep.mubr.msk.f32.mxu1 %vm12208_vm0, %v12207_v1 }
 0x60d   :  { %10652 = vmatpush1.bf16.msra.mxu0 %v12619_v26  ;;  %10682 = vmatpush3.bf16.msra.mxu1 %v12622_v28 }
 0x60e   :  { %10654 = vmatprep.subr.bf16.mxu0 %v12625_v29  ;;  %10683 = vmatprep.subr.bf16.mxu1 %v12206_v0 }
 0x60f   :  { %v3656_v15 = vld [vmem:[#allocation3 + $0x8] sm:$0x3] }
 0x610   :  { %v3657_v23 = vsel %vm143_vm3, %v3655_v14, %v3656_v15  ;;  %v3659_v31 = vsel %vm143_vm3, %v3656_v15, %v3655_v14 }
 0x611   :  { %3660 = vst [vmem:[#allocation3 + $0x8] sm:$0x3] %v3659_v31  ;;  %3658 = vst [vmem:[#allocation3 + $0x6] sm:$0x3] %v3657_v23  ;;  %10656 = vmatpush1.bf16.msra.mxu0 %v12632_v35  ;;  %10685 = vmatpush3.bf16.msra.mxu1 %v12635_v37 }
 0x612   :  { %10658 = vmatprep.subr.bf16.mxu0 %v12638_v38  ;;  %10686 = vmatprep.subr.bf16.mxu1 %v12206_v0 }
 0x615   :  { %10660 = vmatpush1.bf16.msra.mxu0 %v12642_v44  ;;  %10688 = vmatpush3.bf16.msra.mxu1 %v12645_v46 }
 0x616   :  { %10662 = vmatprep.subr.bf16.mxu0 %v12648_v47  ;;  %10689 = vmatprep.subr.bf16.mxu1 %v12206_v0 }
 0x619   :  { %10664 = vmatpush1.bf16.msra.mxu0 %v12652_v53  ;;  %10691 = vmatpush3.bf16.msra.mxu1 %v12655_v55 }
 0x61a   :  { %10666 = vmatprep.subr.bf16.mxu0 %v12658_v56  ;;  %10692 = vmatprep.subr.bf16.mxu1 %v12206_v0 }
 0x61d   :  { %10668 = vmatpush1.bf16.msra.mxu0 %v12662_v62  ;;  %10694 = vmatpush3.bf16.msra.mxu1 %v12665_v2 }
 0x61e   :  { %10670 = vmatprep.subr.bf16.mxu0 %v12668_v3  ;;  %10695 = vmatprep.subr.bf16.mxu1 %v12206_v0 }
 0x621   :  { %10672 = vmatpush1.bf16.msra.mxu0 %v12672_v9  ;;  %10697 = vmatpush3.bf16.msra.mxu1 %v12675_v12 }
 0x622   :  { %10674 = vmatprep.subr.bf16.mxu0 %v12678_v13  ;;  %10698 = vmatprep.subr.bf16.mxu1 %v12206_v0 }
 0x625   :  { %10676 = vmatpush1.bf16.msra.mxu0 %v12682_v18  ;;  %10700 = vmatpush3.bf16.msra.mxu1 %v12685_v21 }
 0x626   :  { %10702 = vmatprep.subr.bf16.mxu0 %v12603_v11  ;;  %10733 = vmatprep.subr.bf16.mxu1 %v12206_v0 }
 0x6db   :  { %v3192_v16 = vpop.f32.mrb[26].mxu0  ;;  %v3263_v34 = vpop.f32.mrb[26].mxu1 }
 0x6dc   :  { %v3193_v39 = vadd.f32 %v3192_v16, %v12901_v33  ;;  %v3194_v40 = vpop.f32.mrb[27].mxu0  ;;  %v9174_v42 = vpop.f32.mrb[27].mxu1  ;;  %v3264_v22 = vadd.f32 %v3263_v34, %v12909_v60 }
 0x6dd   :  { %v3195_v45 = vadd.f32 %v3194_v40, %v12905_v43 }
 0x6de   :  { %v3267_v49 = vadd.f32 %v3193_v39, %v3125_v36 }
 0x6df   :  { %v3277_v52 = vadd.f32 %v3275_v50, %v3195_v45  ;;  %v3643_v45 = vld [vmem:[#allocation3 + $0x2] sm:$0x3] }
 0x6e0   :  { %v8171_v51 = vmul.f32 -1.442695, %v3267_v49 }
 0x6e1   :  { %v8172_v54 = vmul.f32 -1.442695, %v3277_v52  ;;  %v3663_v52 = vld [vmem:[#allocation9 + $0x8] sm:$0xff] }
 0x6e2   :  { %11922 = vpow2.f32 %v8171_v51 }
 0x6e3   :  { %11924 = vpow2.f32 %v8172_v54  ;;  %v3666_v54 = vld [vmem:[#allocation9 + $0x20] sm:$0xff] }
 0x6ec   :  { %v11923_v57 = vpop.eup %11922 }
 0x6ed   :  { %v3271_v11 = vadd.f32 1.0, %v11923_v57  ;;  %v11925_v58 = vpop.eup %11924  ;;  %v13195_v57 = vpack.c.bf16 %v3666_v54, %v3663_v52  ;;  %v3697_v54 = vld [vmem:[#allocation9 + $0x118] sm:$0xff] }
 0x6ee   :  { %v3281_v59 = vadd.f32 1.0, %v11925_v58  ;;  %v3665_v58 = vld [vmem:[#allocation9 + $0x18] sm:$0xff] }
 0x6ef   :  { %11926 = vrcp.f32 %v3271_v11  ;;  %v3662_v11 = vld [vmem:[#allocation9] sm:$0xff] }
 0x6f0   :  { %11928 = vrcp.f32 %v3281_v59  ;;  %v3664_v59 = vld [vmem:[#allocation9 + $0x10] sm:$0xff] }
 0x6f9   :  { %v11927_v61 = vpop.eup %11926 }
 0x6fa   :  { %v3284_v63 = vmul.f32 %v11927_v61, %v3264_v22  ;;  %v11929_v6 = vpop.eup %11928  ;;  %v13197_v22 = vpack.c.bf16 %v3665_v58, %v3662_v11  ;;  %v3667_v61 = vld [vmem:[#allocation9 + $0x28] sm:$0xff] }
 0x6fb   :  { %v3289_v7 = vsub.f32 1.0, %v11929_v6  ;;  %v3291_v15 = vmul.f32 %v11929_v6, %v13088_v10  ;;  %v3699_v58 = vld [vmem:[#allocation9 + $0x128] sm:$0xff] }
 0x6fc   :  { %v3287_v5 = vadd.f32 %v3285_v4, %v3284_v63  ;;  %v13200_v63 = vpack.c.bf16 %v3667_v61, %v3664_v59  ;;  %v3669_v4 = vld [vmem:[#allocation9 + $0x38] sm:$0xff]  ;;  %v3702_v59 = vld [vmem:[#allocation9 + $0x140] sm:$0xff] }
 0x6fd   :  { %v13254_v61 = vpack.c.bf16 %v3702_v59, %v3699_v58 }
 0x6fe   :  { %11930 = vtanh.f32 %v3287_v5  ;;  %v3672_v5 = vld [vmem:[#allocation9 + $0x50] sm:$0xff] }
 0x6ff   :  { %v13204_v6 = vpack.c.bf16 %v3672_v5, %v3669_v4  ;;  %v3698_v4 = vld [vmem:[#allocation9 + $0x120] sm:$0xff]  ;;  %v3701_v5 = vld [vmem:[#allocation9 + $0x138] sm:$0xff] }
 0x708   :  { %v11931_v8 = vpop.eup %11930 }
 0x709   :  { %v3290_v14 = vmul.f32 %v11931_v8, %v3289_v7  ;;  %v3668_v7 = vld [vmem:[#allocation9 + $0x30] sm:$0xff]  ;;  %v3671_v8 = vld [vmem:[#allocation9 + $0x48] sm:$0xff] }
 0x70b   :  { %v13136_v23 = vadd.f32 %v3291_v15, %v3290_v14  ;;  %v3670_v14 = vld [vmem:[#allocation9 + $0x40] sm:$0xff]  ;;  %v13207_v15 = vpack.c.bf16 %v3671_v8, %v3668_v7  ;;  %v3700_v7 = vld [vmem:[#allocation9 + $0x130] sm:$0xff]  ;;  %v13257_v8 = vpack.c.bf16 %v3701_v5, %v3698_v4 }
 0x70d   :  { %3294 = vst [vmem:[#allocation3 + $0xa] sm:$0x3] %v13136_v23  ;;  %3361 = vmatmul.mubr.f32.vlgmr.msra.gmra.mrb[28].mxu0 %v13136_v23  ;;  %9208 = vmatmul.mubr.f32.vlgmr.msra.gmra.mrb[28].mxu1 %v13136_v23 }
 0x70e   :  { %10704 = vmatpush1.bf16.msra.mxu0 %v12608_v17  ;;  %10735 = vmatpush3.bf16.msra.mxu1 %v12610_v19  ;;  %v3649_v17 = vld [vmem:[#allocation3 + $0x4] sm:$0x3] }
 0x70f   :  { %10706 = vmatprep.subr.bf16.mxu0 %v12613_v20  ;;  %10736 = vmatprep.subr.bf16.mxu1 %v12206_v0 }
 0x710   :  { %3530 = vmatprep.mubr.f32.mxu0 %v12207_v1  ;;  %9242 = vmatprep.mubr.msk.f32.mxu1 %vm12208_vm0, %v12207_v1 }
 0x712   :  { %10708 = vmatpush1.bf16.msra.mxu0 %v12619_v26  ;;  %10738 = vmatpush3.bf16.msra.mxu1 %v12622_v28 }
 0x713   :  { %10710 = vmatprep.subr.bf16.mxu0 %v12625_v29  ;;  %10739 = vmatprep.subr.bf16.mxu1 %v12206_v0  ;;  %v3295_v29 = vld [vmem:[#allocation2 + $0x24] sm:$0x3f] }
 0x714   :  { %v3650_v10 = vld [vmem:[#allocation3 + $0xa] sm:$0x3] }
 0x715   :  { %v3651_v19 = vsel %vm143_vm3, %v3649_v17, %v3650_v10  ;;  %v3653_v20 = vsel %vm143_vm3, %v3650_v10, %v3649_v17  ;;  %v3675_v10 = vld [vmem:[#allocation9 + $0x68] sm:$0xff] }
 0x716   :  { %3654 = vst [vmem:[#allocation3 + $0xa] sm:$0x3] %v3653_v20  ;;  %3652 = vst [vmem:[#allocation3 + $0x4] sm:$0x3] %v3651_v19  ;;  %10712 = vmatpush1.bf16.msra.mxu0 %v12632_v35  ;;  %10741 = vmatpush3.bf16.msra.mxu1 %v12635_v37  ;;  %v3678_v19 = vld [vmem:[#allocation9 + $0x80] sm:$0xff] }
 0x717   :  { %10714 = vmatprep.subr.bf16.mxu0 %v12638_v38  ;;  %10742 = vmatprep.subr.bf16.mxu1 %v12206_v0  ;;  %v13214_v20 = vpack.c.bf16 %v3678_v19, %v3675_v10  ;;  %v3708_v10 = vld [vmem:[#allocation9 + $0x170] sm:$0xff] }
 0x71a   :  { %10716 = vmatpush1.bf16.msra.mxu0 %v12642_v44  ;;  %10744 = vmatpush3.bf16.msra.mxu1 %v12645_v46 }
 0x71b   :  { %10718 = vmatprep.subr.bf16.mxu0 %v12648_v47  ;;  %10745 = vmatprep.subr.bf16.mxu1 %v12206_v0  ;;  %v3445_v47 = vrot.slane %v3295_v29, 2 }
 0x71e   :  { %10720 = vmatpush1.bf16.msra.mxu0 %v12652_v53  ;;  %10747 = vmatpush3.bf16.msra.mxu1 %v12655_v55 }
 0x71f   :  { %10722 = vmatprep.subr.bf16.mxu0 %v12658_v56  ;;  %10748 = vmatprep.subr.bf16.mxu1 %v12206_v0 }
 0x722   :  { %10724 = vmatpush1.bf16.msra.mxu0 %v12662_v62  ;;  %10750 = vmatpush3.bf16.msra.mxu1 %v12665_v2 }
 0x723   :  { %10726 = vmatprep.subr.bf16.mxu0 %v12668_v3  ;;  %10751 = vmatprep.subr.bf16.mxu1 %v12206_v0 }
 0x726   :  { %10728 = vmatpush1.bf16.msra.mxu0 %v12672_v9  ;;  %10753 = vmatpush3.bf16.msra.mxu1 %v12675_v12 }
 0x727   :  { %10730 = vmatprep.subr.bf16.mxu0 %v12678_v13  ;;  %10754 = vmatprep.subr.bf16.mxu1 %v12206_v0 }
 0x72a   :  { %10732 = vmatpush1.bf16.msra.mxu0 %v12682_v18  ;;  %10756 = vmatpush3.bf16.msra.mxu1 %v12685_v21  ;;  %v3455_v21 = vrot.slane %v3295_v29, 4 }
 0x72b   :  { %10789 = vmatprep.subr.bf16.mxu1 %v12206_v0  ;;  %10758 = vmatprep.subr.bf16.mxu0 %v13195_v57 }
 0x7e0   :  { %v3362_v26 = vpop.f32.mrb[28].mxu0  ;;  %v3433_v28 = vpop.f32.mrb[28].mxu1 }
 0x7e1   :  { %v3363_v35 = vadd.f32 %v3362_v26, %v12901_v33  ;;  %v3364_v37 = vpop.f32.mrb[29].mxu0  ;;  %v9209_v38 = vpop.f32.mrb[29].mxu1  ;;  %v3434_v12 = vadd.f32 %v3433_v28, %v12909_v60  ;;  %v3674_v26 = vld [vmem:[#allocation9 + $0x60] sm:$0xff]  ;;  %v3677_v28 = vld [vmem:[#allocation9 + $0x78] sm:$0xff] }
 0x7e2   :  { %v3365_v44 = vadd.f32 %v3364_v37, %v12905_v43  ;;  %v3679_v37 = vld [vmem:[#allocation9 + $0x88] sm:$0xff] }
 0x7e3   :  { %v3437_v46 = vadd.f32 %v3363_v35, %v3295_v29  ;;  %v3676_v29 = vld [vmem:[#allocation9 + $0x70] sm:$0xff]  ;;  %v13217_v35 = vpack.c.bf16 %v3677_v28, %v3674_v26 }
 0x7e4   :  { %v3447_v55 = vadd.f32 %v3445_v47, %v3365_v44  ;;  %v13220_v38 = vpack.c.bf16 %v3679_v37, %v3676_v29  ;;  %v3681_v44 = vld [vmem:[#allocation9 + $0x98] sm:$0xff]  ;;  %v3704_v28 = vld [vmem:[#allocation9 + $0x150] sm:$0xff]  ;;  %v3707_v29 = vld [vmem:[#allocation9 + $0x168] sm:$0xff] }
 0x7e5   :  { %v8173_v53 = vmul.f32 -1.442695, %v3437_v46  ;;  %v3684_v46 = vld [vmem:[#allocation9 + $0xb0] sm:$0xff]  ;;  %v3706_v37 = vld [vmem:[#allocation9 + $0x160] sm:$0xff] }
 0x7e6   :  { %v8174_v56 = vmul.f32 -1.442695, %v3447_v55  ;;  %v13224_v47 = vpack.c.bf16 %v3684_v46, %v3681_v44  ;;  %v3683_v55 = vld [vmem:[#allocation9 + $0xa8] sm:$0xff]  ;;  %v13265_v44 = vpack.c.bf16 %v3707_v29, %v3704_v28  ;;  %v3709_v46 = vld [vmem:[#allocation9 + $0x178] sm:$0xff] }
 0x7e7   :  { %11932 = vpow2.f32 %v8173_v53  ;;  %v3680_v53 = vld [vmem:[#allocation9 + $0x90] sm:$0xff] }
 0x7e8   :  { %11934 = vpow2.f32 %v8174_v56  ;;  %v3682_v56 = vld [vmem:[#allocation9 + $0xa0] sm:$0xff] }
 0x7f1   :  { %v11933_v62 = vpop.eup %11932 }
 0x7f2   :  { %v3441_v2 = vadd.f32 1.0, %v11933_v62  ;;  %v11935_v3 = vpop.eup %11934  ;;  %v13227_v62 = vpack.c.bf16 %v3683_v55, %v3680_v53  ;;  %v13269_v53 = vpack.c.bf16 %v3709_v46, %v3706_v37  ;;  %v3635_v37 = vld [vmem:[#allocation3] sm:$0x3] }
 0x7f3   :  { %v3451_v9 = vadd.f32 1.0, %v11935_v3 }
 0x7f4   :  { %11936 = vrcp.f32 %v3441_v2  ;;  %v3685_v2 = vld [vmem:[#allocation9 + $0xb8] sm:$0xff] }
 0x7f5   :  { %11938 = vrcp.f32 %v3451_v9  ;;  %v13230_v3 = vpack.c.bf16 %v3685_v2, %v3682_v56  ;;  %v3687_v9 = vld [vmem:[#allocation9 + $0xc8] sm:$0xff] }
 0x7f6   :  { %v3465_v2 = vld [vmem:[#allocation2 + $0x2a] sm:$0x3f] }
 0x7f7   :  { %v3625_v5 = vrot.slane %v3465_v2, 4 }
 0x7fe   :  { %v11937_v13 = vpop.eup %11936 }
 0x7ff   :  { %v3454_v18 = vmul.f32 %v11937_v13, %v3434_v12  ;;  %v11939_v16 = vpop.eup %11938  ;;  %v3690_v12 = vld [vmem:[#allocation9 + $0xe0] sm:$0xff] }
 0x800   :  { %v3459_v34 = vsub.f32 1.0, %v11939_v16  ;;  %v3461_v40 = vmul.f32 %v11939_v16, %v13136_v23  ;;  %v3673_v23 = vld [vmem:[#allocation9 + $0x58] sm:$0xff]  ;;  %v13234_v13 = vpack.c.bf16 %v3690_v12, %v3687_v9 }
 0x801   :  { %v3457_v31 = vadd.f32 %v3455_v21, %v3454_v18  ;;  %v13210_v17 = vpack.c.bf16 %v3673_v23, %v3670_v14  ;;  %v3686_v18 = vld [vmem:[#allocation9 + $0xc0] sm:$0xff]  ;;  %v3689_v21 = vld [vmem:[#allocation9 + $0xd8] sm:$0xff]  ;;  %v3703_v14 = vld [vmem:[#allocation9 + $0x148] sm:$0xff] }
 0x802   :  { %v13237_v16 = vpack.c.bf16 %v3689_v21, %v3686_v18  ;;  %v3705_v23 = vld [vmem:[#allocation9 + $0x158] sm:$0xff]  ;;  %v13260_v19 = vpack.c.bf16 %v3703_v14, %v3700_v7 }
 0x803   :  { %11940 = vtanh.f32 %v3457_v31  ;;  %v3688_v31 = vld [vmem:[#allocation9 + $0xd0] sm:$0xff]  ;;  %v13262_v26 = vpack.c.bf16 %v3708_v10, %v3705_v23 }
 0x80d   :  { %v11941_v36 = vpop.eup %11940 }
 0x80e   :  { %v3460_v39 = vmul.f32 %v11941_v36, %v3459_v34  ;;  %v3691_v34 = vld [vmem:[#allocation9 + $0xe8] sm:$0xff] }
 0x80f   :  { %v13240_v36 = vpack.c.bf16 %v3691_v34, %v3688_v31  ;;  %v3615_v34 = vrot.slane %v3465_v2, 2 }
 0x810   :  { %v13183_v42 = vadd.f32 %v3461_v40, %v3460_v39  ;;  %v3693_v39 = vld [vmem:[#allocation9 + $0xf8] sm:$0xff]  ;;  %v3696_v40 = vld [vmem:[#allocation9 + $0x110] sm:$0xff] }
 0x812   :  { %3464 = vst [vmem:[#allocation3 + $0xc] sm:$0x3] %v13183_v42  ;;  %3531 = vmatmul.mubr.f32.vlgmr.msra.gmra.mrb[30].mxu0 %v13183_v42  ;;  %9243 = vmatmul.mubr.f32.vlgmr.msra.gmra.mrb[30].mxu1 %v13183_v42 }
 0x813   :  { %3791 = vmatprep.mubr.f32.mxu0 %v12207_v1  ;;  %9277 = vmatprep.mubr.msk.f32.mxu1 %vm12208_vm0, %v12207_v1 }
 0x814   :  { %10760 = vmatpush1.bf16.msra.mxu0 %v13197_v22  ;;  %10791 = vmatpush3.bf16.msra.mxu1 %v13200_v63 }
 0x815   :  { %10792 = vmatprep.subr.bf16.mxu1 %v12206_v0  ;;  %10762 = vmatprep.subr.bf16.mxu0 %v13204_v6 }
 0x818   :  { %10764 = vmatpush1.bf16.msra.mxu0 %v13207_v15  ;;  %10794 = vmatpush3.bf16.msra.mxu1 %v13210_v17 }
 0x819   :  { %v3644_v49 = vld [vmem:[#allocation3 + $0xc] sm:$0x3]  ;;  %10795 = vmatprep.subr.bf16.mxu1 %v12206_v0  ;;  %10766 = vmatprep.subr.bf16.mxu0 %v13214_v20 }
 0x81a   :  { %v3645_v50 = vsel %vm143_vm3, %v3643_v45, %v3644_v49  ;;  %v3647_v51 = vsel %vm143_vm3, %v3644_v49, %v3643_v45  ;;  %v13244_v45 = vpack.c.bf16 %v3696_v40, %v3693_v39  ;;  %v3692_v49 = vld [vmem:[#allocation9 + $0xf0] sm:$0xff] }
 0x81b   :  { %3648 = vst [vmem:[#allocation3 + $0xc] sm:$0x3] %v3647_v51  ;;  %3646 = vst [vmem:[#allocation3 + $0x2] sm:$0x3] %v3645_v50  ;;  %v3695_v50 = vld [vmem:[#allocation9 + $0x108] sm:$0xff]  ;;  %v3694_v51 = vld [vmem:[#allocation9 + $0x100] sm:$0xff] }
 0x81c   :  { %10768 = vmatpush1.bf16.msra.mxu0 %v13217_v35  ;;  %10797 = vmatpush3.bf16.msra.mxu1 %v13220_v38  ;;  %v13247_v52 = vpack.c.bf16 %v3695_v50, %v3692_v49  ;;  %v13250_v11 = vpack.c.bf16 %v3697_v54, %v3694_v51 }
 0x81d   :  { %10798 = vmatprep.subr.bf16.mxu1 %v12206_v0  ;;  %10770 = vmatprep.subr.bf16.mxu0 %v13224_v47 }
 0x820   :  { %10772 = vmatpush1.bf16.msra.mxu0 %v13227_v62  ;;  %10800 = vmatpush3.bf16.msra.mxu1 %v13230_v3 }
 0x821   :  { %10801 = vmatprep.subr.bf16.mxu1 %v12206_v0  ;;  %10774 = vmatprep.subr.bf16.mxu0 %v13234_v13 }
 0x824   :  { %10776 = vmatpush1.bf16.msra.mxu0 %v13237_v16  ;;  %10803 = vmatpush3.bf16.msra.mxu1 %v13240_v36 }
 0x825   :  { %10804 = vmatprep.subr.bf16.mxu1 %v12206_v0  ;;  %10778 = vmatprep.subr.bf16.mxu0 %v13244_v45 }
 0x828   :  { %10780 = vmatpush1.bf16.msra.mxu0 %v13247_v52  ;;  %10806 = vmatpush3.bf16.msra.mxu1 %v13250_v11 }
 0x829   :  { %10807 = vmatprep.subr.bf16.mxu1 %v12206_v0  ;;  %10782 = vmatprep.subr.bf16.mxu0 %v13254_v61 }
 0x82c   :  { %10784 = vmatpush1.bf16.msra.mxu0 %v13257_v8  ;;  %10809 = vmatpush3.bf16.msra.mxu1 %v13260_v19 }
 0x82d   :  { %10786 = vmatprep.subr.bf16.mxu0 %v13262_v26  ;;  %10810 = vmatprep.subr.bf16.mxu1 %v12206_v0 }
 0x830   :  { %10788 = vmatpush1.bf16.msra.mxu0 %v13265_v44  ;;  %10812 = vmatpush3.bf16.msra.mxu1 %v13269_v53 }
 0x831   :  { %10814 = vmatprep.subr.bf16.mxu0 %v13195_v57  ;;  %10845 = vmatprep.subr.bf16.mxu1 %v12206_v0 }
 0x8e5   :  { %v3532_v55 = vpop.f32.mrb[30].mxu0  ;;  %v3603_v56 = vpop.f32.mrb[30].mxu1 }
 0x8e6   :  { %v3533_v9 = vadd.f32 %v3532_v55, %v12901_v33  ;;  %v3534_v12 = vpop.f32.mrb[31].mxu0  ;;  %v9244_v18 = vpop.f32.mrb[31].mxu1  ;;  %v3604_v59 = vadd.f32 %v3603_v56, %v12909_v60 }
 0x8e7   :  { %v3535_v21 = vadd.f32 %v3534_v12, %v12905_v43  ;;  %v4816_v12 = vld [vmem:[#allocation9 + $0x70] sm:$0xff]  ;;  %v4819_v18 = vld [vmem:[#allocation9 + $0x88] sm:$0xff] }
 0x8e8   :  { %v3607_v31 = vadd.f32 %v3533_v9, %v3465_v2  ;;  %v4117_v2 = vld [vmem:[#allocation3 + $0x4] sm:$0x3]  ;;  %v4345_v9 = vld [vmem:[#allocation3 + $0x6] sm:$0x3] }
 0x8e9   :  { %v3617_v40 = vadd.f32 %v3615_v34, %v3535_v21  ;;  %v4821_v21 = vld [vmem:[#allocation9 + $0x98] sm:$0xff] }
 0x8ea   :  { %v8175_v39 = vmul.f32 -1.442695, %v3607_v31  ;;  %v4824_v31 = vld [vmem:[#allocation9 + $0xb0] sm:$0xff] }
 0x8eb   :  { %v8176_v49 = vmul.f32 -1.442695, %v3617_v40  ;;  %v4820_v40 = vld [vmem:[#allocation9 + $0x90] sm:$0xff] }
 0x8ec   :  { %11942 = vpow2.f32 %v8175_v39  ;;  %v13449_v39 = vpack.c.bf16 %v4819_v18, %v4816_v12  ;;  %v4801_v18 = vld [vmem:[#allocation3 + $0xa] sm:$0x3] }
 0x8ed   :  { %11944 = vpow2.f32 %v8176_v49  ;;  %v13453_v49 = vpack.c.bf16 %v4824_v31, %v4821_v21  ;;  %v5029_v21 = vld [vmem:[#allocation3 + $0xc] sm:$0x3] }
 0x8f6   :  { %v11943_v50 = vpop.eup %11942 }
 0x8f7   :  { %v3611_v51 = vadd.f32 1.0, %v11943_v50  ;;  %v11945_v54 = vpop.eup %11944  ;;  %v4823_v50 = vld [vmem:[#allocation9 + $0xa8] sm:$0xff] }
 0x8f8   :  { %v3621_v58 = vadd.f32 1.0, %v11945_v54  ;;  %v4825_v54 = vld [vmem:[#allocation9 + $0xb8] sm:$0xff] }
 0x8f9   :  { %11946 = vrcp.f32 %v3611_v51  ;;  %v4822_v51 = vld [vmem:[#allocation9 + $0xa0] sm:$0xff] }
 0x8fa   :  { %11948 = vrcp.f32 %v3621_v58  ;;  %v4827_v58 = vld [vmem:[#allocation9 + $0xc8] sm:$0xff] }
 0x903   :  { %v11947_v4 = vpop.eup %11946 }
 0x904   :  { %v3624_v33 = vmul.f32 %v11947_v4, %v3604_v59  ;;  %v11949_v43 = vpop.eup %11948  ;;  %v4830_v59 = vld [vmem:[#allocation9 + $0xe0] sm:$0xff]  ;;  %v13457_v4 = vpack.c.bf16 %v4823_v50, %v4820_v40  ;;  %v5846_v50 = vld [vmem:[#allocation10 + $0x8] sm:$0xff] }
 0x905   :  { %v3629_v14 = vsub.f32 1.0, %v11949_v43  ;;  %v3631_v28 = vmul.f32 %v11949_v43, %v13183_v42  ;;  %v3889_v42 = vld [vmem:[#allocation3 + $0x2] sm:$0x3]  ;;  %v4829_v43 = vld [vmem:[#allocation9 + $0xd8] sm:$0xff] }
 0x906   :  { %v3627_v7 = vadd.f32 %v3625_v5, %v3624_v33  ;;  %v13459_v33 = vpack.c.bf16 %v4825_v54, %v4822_v51  ;;  %v4826_v5 = vld [vmem:[#allocation9 + $0xc0] sm:$0xff] }
 0x907   :  { %v5849_v51 = vld [vmem:[#allocation10 + $0x20] sm:$0xff] }
 0x908   :  { %11950 = vtanh.f32 %v3627_v7  ;;  %v13463_v7 = vpack.c.bf16 %v4830_v59, %v4827_v58  ;;  %v5845_v59 = vld [vmem:[#allocation10] sm:$0xff] }
 0x912   :  { %v11951_v23 = vpop.eup %11950 }
 0x913   :  { %v3630_v10 = vmul.f32 %v11951_v23, %v3629_v14  ;;  %v4828_v14 = vld [vmem:[#allocation9 + $0xd0] sm:$0xff]  ;;  %v4831_v23 = vld [vmem:[#allocation9 + $0xe8] sm:$0xff] }
 0x915   :  { %v3632_v29 = vadd.f32 %v3631_v28, %v3630_v10  ;;  %v4833_v10 = vld [vmem:[#allocation9 + $0xf8] sm:$0xff]  ;;  %v4836_v28 = vld [vmem:[#allocation9 + $0x110] sm:$0xff] }
 0x917   :  { %3634 = vst [vmem:[#allocation3 + $0xe] sm:$0x3] %v3632_v29  ;;  %v13467_v29 = vpack.c.bf16 %v4829_v43, %v4826_v5  ;;  %v5847_v5 = vld [vmem:[#allocation10 + $0x10] sm:$0xff] }
 0x91e   :  { %v3636_v46 = vld [vmem:[#allocation3 + $0xe] sm:$0x3] }
 0x91f   :  { %v3639_v55 = vsel %vm143_vm3, %v3635_v37, %v3636_v46  ;;  %v3641_v60 = vsel %vm143_vm3, %v3636_v46, %v3635_v37  ;;  %v13469_v37 = vpack.c.bf16 %v4831_v23, %v4828_v14  ;;  %v4832_v46 = vld [vmem:[#allocation9 + $0xf0] sm:$0xff]  ;;  %v5852_v14 = vld [vmem:[#allocation10 + $0x38] sm:$0xff] }
 0x920   :  { %3642 = vst [vmem:[#allocation3 + $0xe] sm:$0x3] %v3641_v60  ;;  %3640 = vst [vmem:[#allocation3] sm:$0x3] %v3639_v55  ;;  %v13473_v55 = vpack.c.bf16 %v4836_v28, %v4833_v10  ;;  %v4835_v60 = vld [vmem:[#allocation9 + $0x108] sm:$0xff]  ;;  %v5855_v23 = vld [vmem:[#allocation10 + $0x50] sm:$0xff] }
 0x921   :  { %v5851_v28 = vld [vmem:[#allocation10 + $0x30] sm:$0xff] }
 0x927   :  { %v3661_v56 = vld [vmem:[#allocation3] sm:$0x3] }
 0x928   :  { %3792 = vmatmul.mubr.f32.vlgmr.msra.gmra.mrb[32].mxu0 %v3661_v56  ;;  %9278 = vmatmul.mubr.f32.vlgmr.msra.gmra.mrb[32].mxu1 %v3661_v56  ;;  %v4834_v56 = vld [vmem:[#allocation9 + $0x100] sm:$0xff] }
 0x929   :  { %10816 = vmatpush1.bf16.msra.mxu0 %v13197_v22  ;;  %10847 = vmatpush3.bf16.msra.mxu1 %v13200_v63 }
 0x92a   :  { %10818 = vmatprep.subr.bf16.mxu0 %v13204_v6  ;;  %10848 = vmatprep.subr.bf16.mxu1 %v12206_v0 }
 0x92b   :  { %4019 = vmatprep.mubr.f32.mxu0 %v12207_v1  ;;  %9312 = vmatprep.mubr.msk.f32.mxu1 %vm12208_vm0, %v12207_v1 }
 0x92d   :  { %10820 = vmatpush1.bf16.msra.mxu0 %v13207_v15  ;;  %10850 = vmatpush3.bf16.msra.mxu1 %v13210_v17 }
 0x92e   :  { %10822 = vmatprep.subr.bf16.mxu0 %v13214_v20  ;;  %10851 = vmatprep.subr.bf16.mxu1 %v12206_v0 }
 0x931   :  { %10824 = vmatpush1.bf16.msra.mxu0 %v13217_v35  ;;  %10853 = vmatpush3.bf16.msra.mxu1 %v13220_v38 }
 0x932   :  { %10826 = vmatprep.subr.bf16.mxu0 %v13224_v47  ;;  %10854 = vmatprep.subr.bf16.mxu1 %v12206_v0 }
 0x935   :  { %10828 = vmatpush1.bf16.msra.mxu0 %v13227_v62  ;;  %10856 = vmatpush3.bf16.msra.mxu1 %v13230_v3 }
 0x936   :  { %10830 = vmatprep.subr.bf16.mxu0 %v13234_v13  ;;  %10857 = vmatprep.subr.bf16.mxu1 %v12206_v0 }
 0x939   :  { %10832 = vmatpush1.bf16.msra.mxu0 %v13237_v16  ;;  %10859 = vmatpush3.bf16.msra.mxu1 %v13240_v36 }
 0x93a   :  { %10834 = vmatprep.subr.bf16.mxu0 %v13244_v45  ;;  %10860 = vmatprep.subr.bf16.mxu1 %v12206_v0 }
 0x93d   :  { %10836 = vmatpush1.bf16.msra.mxu0 %v13247_v52  ;;  %10862 = vmatpush3.bf16.msra.mxu1 %v13250_v11 }
 0x93e   :  { %10838 = vmatprep.subr.bf16.mxu0 %v13254_v61  ;;  %10863 = vmatprep.subr.bf16.mxu1 %v12206_v0 }
 0x941   :  { %10840 = vmatpush1.bf16.msra.mxu0 %v13257_v8  ;;  %10865 = vmatpush3.bf16.msra.mxu1 %v13260_v19 }
 0x942   :  { %10842 = vmatprep.subr.bf16.mxu0 %v13262_v26  ;;  %10866 = vmatprep.subr.bf16.mxu1 %v12206_v0 }
 0x945   :  { %10844 = vmatpush1.bf16.msra.mxu0 %v13265_v44  ;;  %10868 = vmatpush3.bf16.msra.mxu1 %v13269_v53 }
 0x946   :  { %10870 = vmatprep.subr.bf16.mxu0 %v13195_v57  ;;  %10901 = vmatprep.subr.bf16.mxu1 %v12206_v0 }
 0x948   :  { %4020 = vmatmul.mubr.f32.vlgmr.msra.gmra.mrb[34].mxu0 %v3889_v42  ;;  %9313 = vmatmul.mubr.f32.vlgmr.msra.gmra.mrb[34].mxu1 %v3889_v42  ;;  %v4837_v42 = vld [vmem:[#allocation9 + $0x118] sm:$0xff] }
 0x949   :  { %10872 = vmatpush1.bf16.msra.mxu0 %v13197_v22  ;;  %10903 = vmatpush3.bf16.msra.mxu1 %v13200_v63 }
 0x94a   :  { %10874 = vmatprep.subr.bf16.mxu0 %v13204_v6  ;;  %10904 = vmatprep.subr.bf16.mxu1 %v12206_v0 }
 0x94b   :  { %4247 = vmatprep.mubr.f32.mxu0 %v12207_v1  ;;  %9347 = vmatprep.mubr.msk.f32.mxu1 %vm12208_vm0, %v12207_v1 }
 0x94d   :  { %10876 = vmatpush1.bf16.msra.mxu0 %v13207_v15  ;;  %10906 = vmatpush3.bf16.msra.mxu1 %v13210_v17 }
 0x94e   :  { %10878 = vmatprep.subr.bf16.mxu0 %v13214_v20  ;;  %10907 = vmatprep.subr.bf16.mxu1 %v12206_v0 }
 0x951   :  { %10880 = vmatpush1.bf16.msra.mxu0 %v13217_v35  ;;  %10909 = vmatpush3.bf16.msra.mxu1 %v13220_v38 }
 0x952   :  { %10882 = vmatprep.subr.bf16.mxu0 %v13224_v47  ;;  %10910 = vmatprep.subr.bf16.mxu1 %v12206_v0 }
 0x955   :  { %10884 = vmatpush1.bf16.msra.mxu0 %v13227_v62  ;;  %10912 = vmatpush3.bf16.msra.mxu1 %v13230_v3 }
 0x956   :  { %10886 = vmatprep.subr.bf16.mxu0 %v13234_v13  ;;  %10913 = vmatprep.subr.bf16.mxu1 %v12206_v0 }
 0x959   :  { %10888 = vmatpush1.bf16.msra.mxu0 %v13237_v16  ;;  %10915 = vmatpush3.bf16.msra.mxu1 %v13240_v36 }
 0x95a   :  { %10890 = vmatprep.subr.bf16.mxu0 %v13244_v45  ;;  %10916 = vmatprep.subr.bf16.mxu1 %v12206_v0 }
 0x95d   :  { %10892 = vmatpush1.bf16.msra.mxu0 %v13247_v52  ;;  %10918 = vmatpush3.bf16.msra.mxu1 %v13250_v11 }
 0x95e   :  { %10894 = vmatprep.subr.bf16.mxu0 %v13254_v61  ;;  %10919 = vmatprep.subr.bf16.mxu1 %v12206_v0 }
 0x961   :  { %10896 = vmatpush1.bf16.msra.mxu0 %v13257_v8  ;;  %10921 = vmatpush3.bf16.msra.mxu1 %v13260_v19 }
 0x962   :  { %10898 = vmatprep.subr.bf16.mxu0 %v13262_v26  ;;  %10922 = vmatprep.subr.bf16.mxu1 %v12206_v0 }
 0x965   :  { %10900 = vmatpush1.bf16.msra.mxu0 %v13265_v44  ;;  %10924 = vmatpush3.bf16.msra.mxu1 %v13269_v53 }
 0x966   :  { %10926 = vmatprep.subr.bf16.mxu0 %v13195_v57  ;;  %10957 = vmatprep.subr.bf16.mxu1 %v12206_v0 }
 0x968   :  { %4248 = vmatmul.mubr.f32.vlgmr.msra.gmra.mrb[36].mxu0 %v4117_v2  ;;  %9348 = vmatmul.mubr.f32.vlgmr.msra.gmra.mrb[36].mxu1 %v4117_v2  ;;  %v4839_v2 = vld [vmem:[#allocation9 + $0x128] sm:$0xff] }
 0x969   :  { %10928 = vmatpush1.bf16.msra.mxu0 %v13197_v22  ;;  %10959 = vmatpush3.bf16.msra.mxu1 %v13200_v63 }
 0x96a   :  { %10930 = vmatprep.subr.bf16.mxu0 %v13204_v6  ;;  %10960 = vmatprep.subr.bf16.mxu1 %v12206_v0 }
 0x96b   :  { %4475 = vmatprep.mubr.f32.mxu0 %v12207_v1  ;;  %9382 = vmatprep.mubr.msk.f32.mxu1 %vm12208_vm0, %v12207_v1 }
 0x96d   :  { %10932 = vmatpush1.bf16.msra.mxu0 %v13207_v15  ;;  %10962 = vmatpush3.bf16.msra.mxu1 %v13210_v17 }
 0x96e   :  { %10934 = vmatprep.subr.bf16.mxu0 %v13214_v20  ;;  %10963 = vmatprep.subr.bf16.mxu1 %v12206_v0 }
 0x971   :  { %10936 = vmatpush1.bf16.msra.mxu0 %v13217_v35  ;;  %10965 = vmatpush3.bf16.msra.mxu1 %v13220_v38 }
 0x972   :  { %10938 = vmatprep.subr.bf16.mxu0 %v13224_v47  ;;  %10966 = vmatprep.subr.bf16.mxu1 %v12206_v0 }
 0x975   :  { %10940 = vmatpush1.bf16.msra.mxu0 %v13227_v62  ;;  %10968 = vmatpush3.bf16.msra.mxu1 %v13230_v3 }
 0x976   :  { %10942 = vmatprep.subr.bf16.mxu0 %v13234_v13  ;;  %10969 = vmatprep.subr.bf16.mxu1 %v12206_v0 }
 0x979   :  { %10944 = vmatpush1.bf16.msra.mxu0 %v13237_v16  ;;  %10971 = vmatpush3.bf16.msra.mxu1 %v13240_v36 }
 0x97a   :  { %10946 = vmatprep.subr.bf16.mxu0 %v13244_v45  ;;  %10972 = vmatprep.subr.bf16.mxu1 %v12206_v0 }
 0x97d   :  { %10948 = vmatpush1.bf16.msra.mxu0 %v13247_v52  ;;  %10974 = vmatpush3.bf16.msra.mxu1 %v13250_v11 }
 0x97e   :  { %10950 = vmatprep.subr.bf16.mxu0 %v13254_v61  ;;  %10975 = vmatprep.subr.bf16.mxu1 %v12206_v0 }
 0x981   :  { %10952 = vmatpush1.bf16.msra.mxu0 %v13257_v8  ;;  %10977 = vmatpush3.bf16.msra.mxu1 %v13260_v19 }
 0x982   :  { %10954 = vmatprep.subr.bf16.mxu0 %v13262_v26  ;;  %10978 = vmatprep.subr.bf16.mxu1 %v12206_v0 }
 0x985   :  { %10956 = vmatpush1.bf16.msra.mxu0 %v13265_v44  ;;  %10980 = vmatpush3.bf16.msra.mxu1 %v13269_v53 }
 0x986   :  { %10982 = vmatprep.subr.bf16.mxu0 %v13195_v57  ;;  %11013 = vmatprep.subr.bf16.mxu1 %v12206_v0  ;;  %v4803_v57 = vld [vmem:[#allocation9 + $0x8] sm:$0xff] }
 0x988   :  { %4476 = vmatmul.mubr.f32.vlgmr.msra.gmra.mrb[38].mxu0 %v4345_v9  ;;  %9383 = vmatmul.mubr.f32.vlgmr.msra.gmra.mrb[38].mxu1 %v4345_v9  ;;  %v4842_v9 = vld [vmem:[#allocation9 + $0x140] sm:$0xff] }
 0x989   :  { %10984 = vmatpush1.bf16.msra.mxu0 %v13197_v22  ;;  %11015 = vmatpush3.bf16.msra.mxu1 %v13200_v63  ;;  %v4806_v22 = vld [vmem:[#allocation9 + $0x20] sm:$0xff] }
 0x98a   :  { %10986 = vmatprep.subr.bf16.mxu0 %v13204_v6  ;;  %11016 = vmatprep.subr.bf16.mxu1 %v12206_v0  ;;  %v4802_v63 = vld [vmem:[#allocation9] sm:$0xff]  ;;  %v13420_v6 = vpack.c.bf16 %v4806_v22, %v4803_v57  ;;  %v13477_v57 = vpack.c.bf16 %v4835_v60, %v4832_v46  ;;  %v13479_v22 = vpack.c.bf16 %v4837_v42, %v4834_v56  ;;  %v5854_v46 = vld [vmem:[#allocation10 + $0x48] sm:$0xff]  ;;  %v5856_v60 = vld [vmem:[#allocation10 + $0x58] sm:$0xff] }
 0x98b   :  { %4703 = vmatprep.mubr.f32.mxu0 %v12207_v1  ;;  %9417 = vmatprep.mubr.msk.f32.mxu1 %vm12208_vm0, %v12207_v1  ;;  %v5257_v56 = vld [vmem:[#allocation3 + $0xe] sm:$0x3]  ;;  %v5858_v42 = vld [vmem:[#allocation10 + $0x68] sm:$0xff] }
 0x98d   :  { %10988 = vmatpush1.bf16.msra.mxu0 %v13207_v15  ;;  %11018 = vmatpush3.bf16.msra.mxu1 %v13210_v17  ;;  %v4805_v15 = vld [vmem:[#allocation9 + $0x18] sm:$0xff]  ;;  %v4804_v17 = vld [vmem:[#allocation9 + $0x10] sm:$0xff] }
 0x98e   :  { %10990 = vmatprep.subr.bf16.mxu0 %v13214_v20  ;;  %11019 = vmatprep.subr.bf16.mxu1 %v12206_v0  ;;  %v4807_v20 = vld [vmem:[#allocation9 + $0x28] sm:$0xff] }
 0x991   :  { %10992 = vmatpush1.bf16.msra.mxu0 %v13217_v35  ;;  %11021 = vmatpush3.bf16.msra.mxu1 %v13220_v38  ;;  %v4809_v35 = vld [vmem:[#allocation9 + $0x38] sm:$0xff]  ;;  %v4812_v38 = vld [vmem:[#allocation9 + $0x50] sm:$0xff] }
 0x992   :  { %10994 = vmatprep.subr.bf16.mxu0 %v13224_v47  ;;  %11022 = vmatprep.subr.bf16.mxu1 %v12206_v0  ;;  %v13424_v47 = vpack.c.bf16 %v4805_v15, %v4802_v63  ;;  %v4838_v63 = vld [vmem:[#allocation9 + $0x120] sm:$0xff]  ;;  %v13483_v15 = vpack.c.bf16 %v4842_v9, %v4839_v2  ;;  %v13594_v9 = vpack.c.bf16 %v5854_v46, %v5851_v28  ;;  %v5883_v46 = vld [vmem:[#allocation10 + $0x130] sm:$0xff] }
 0x993   :  { %v5861_v2 = vld [vmem:[#allocation10 + $0x80] sm:$0xff] }
 0x995   :  { %10996 = vmatpush1.bf16.msra.mxu0 %v13227_v62  ;;  %11024 = vmatpush3.bf16.msra.mxu1 %v13230_v3  ;;  %v13426_v62 = vpack.c.bf16 %v4807_v20, %v4804_v17  ;;  %v4808_v3 = vld [vmem:[#allocation9 + $0x30] sm:$0xff]  ;;  %v4841_v17 = vld [vmem:[#allocation9 + $0x138] sm:$0xff] }
 0x996   :  { %10998 = vmatprep.subr.bf16.mxu0 %v13234_v13  ;;  %11025 = vmatprep.subr.bf16.mxu1 %v12206_v0  ;;  %v13430_v13 = vpack.c.bf16 %v4812_v38, %v4809_v35  ;;  %v4840_v20 = vld [vmem:[#allocation9 + $0x130] sm:$0xff]  ;;  %v4843_v35 = vld [vmem:[#allocation9 + $0x148] sm:$0xff]  ;;  %v4845_v38 = vld [vmem:[#allocation9 + $0x158] sm:$0xff] }
 0x999   :  { %11000 = vmatpush1.bf16.msra.mxu0 %v13237_v16  ;;  %11027 = vmatpush3.bf16.msra.mxu1 %v13240_v36  ;;  %v4811_v16 = vld [vmem:[#allocation9 + $0x48] sm:$0xff]  ;;  %v4810_v36 = vld [vmem:[#allocation9 + $0x40] sm:$0xff] }
 0x99a   :  { %11002 = vmatprep.subr.bf16.mxu0 %v13244_v45  ;;  %11028 = vmatprep.subr.bf16.mxu1 %v12206_v0  ;;  %v4813_v45 = vld [vmem:[#allocation9 + $0x58] sm:$0xff] }
 0x99d   :  { %11004 = vmatpush1.bf16.msra.mxu0 %v13247_v52  ;;  %11030 = vmatpush3.bf16.msra.mxu1 %v13250_v11  ;;  %v4573_v52 = vld [vmem:[#allocation3 + $0x8] sm:$0x3]  ;;  %v4815_v11 = vld [vmem:[#allocation9 + $0x68] sm:$0xff] }
 0x99e   :  { %11006 = vmatprep.subr.bf16.mxu0 %v13254_v61  ;;  %11031 = vmatprep.subr.bf16.mxu1 %v12206_v0  ;;  %v4818_v61 = vld [vmem:[#allocation9 + $0x80] sm:$0xff] }
 0x9a1   :  { %11008 = vmatpush1.bf16.msra.mxu0 %v13257_v8  ;;  %11033 = vmatpush3.bf16.msra.mxu1 %v13260_v19  ;;  %v13434_v8 = vpack.c.bf16 %v4811_v16, %v4808_v3  ;;  %v13436_v19 = vpack.c.bf16 %v4813_v45, %v4810_v36  ;;  %v4848_v3 = vld [vmem:[#allocation9 + $0x170] sm:$0xff]  ;;  %v13487_v16 = vpack.c.bf16 %v4841_v17, %v4838_v63 }
 0x9a2   :  { %11010 = vmatprep.subr.bf16.mxu0 %v13262_v26  ;;  %11034 = vmatprep.subr.bf16.mxu1 %v12206_v0  ;;  %v4814_v26 = vld [vmem:[#allocation9 + $0x60] sm:$0xff]  ;;  %v13489_v36 = vpack.c.bf16 %v4843_v35, %v4840_v20  ;;  %v4844_v45 = vld [vmem:[#allocation9 + $0x150] sm:$0xff]  ;;  %v13600_v63 = vpack.c.bf16 %v5861_v2, %v5858_v42  ;;  %v5862_v20 = vld [vmem:[#allocation10 + $0x88] sm:$0xff] }
 0x9a3   :  { %v5859_v17 = vld [vmem:[#allocation10 + $0x70] sm:$0xff]  ;;  %v5864_v35 = vld [vmem:[#allocation10 + $0x98] sm:$0xff] }
 0x9a4   :  { %v5888_v42 = vld [vmem:[#allocation10 + $0x158] sm:$0xff]  ;;  %v5891_v2 = vld [vmem:[#allocation10 + $0x170] sm:$0xff] }
 0x9a5   :  { %11012 = vmatpush1.bf16.msra.mxu0 %v13265_v44  ;;  %11036 = vmatpush3.bf16.msra.mxu1 %v13269_v53  ;;  %v13440_v44 = vpack.c.bf16 %v4818_v61, %v4815_v11  ;;  %v4817_v53 = vld [vmem:[#allocation9 + $0x78] sm:$0xff]  ;;  %v4847_v11 = vld [vmem:[#allocation9 + $0x168] sm:$0xff]  ;;  %v4846_v61 = vld [vmem:[#allocation9 + $0x160] sm:$0xff] }
 0x9a6   :  { %11038 = vmatprep.subr.bf16.mxu0 %v13420_v6  ;;  %11069 = vmatprep.subr.bf16.mxu1 %v12206_v0  ;;  %v13447_v34 = vpack.c.bf16 %v4817_v53, %v4814_v26  ;;  %v4849_v26 = vld [vmem:[#allocation9 + $0x178] sm:$0xff]  ;;  %v13497_v53 = vpack.c.bf16 %v4847_v11, %v4844_v45  ;;  %v5865_v11 = vld [vmem:[#allocation10 + $0xa0] sm:$0xff] }
 0x9a7   :  { %v13499_v12 = vpack.c.bf16 %v4849_v26, %v4846_v61  ;;  %v5868_v61 = vld [vmem:[#allocation10 + $0xb8] sm:$0xff]  ;;  %v5870_v26 = vld [vmem:[#allocation10 + $0xc8] sm:$0xff] }
 0x9a8   :  { %4704 = vmatmul.mubr.f32.vlgmr.msra.gmra.mrb[40].mxu0 %v4573_v52  ;;  %9418 = vmatmul.mubr.f32.vlgmr.msra.gmra.mrb[40].mxu1 %v4573_v52  ;;  %v13493_v52 = vpack.c.bf16 %v4848_v3, %v4845_v38  ;;  %v5867_v38 = vld [vmem:[#allocation10 + $0xb0] sm:$0xff] }
 0x9a9   :  { %11040 = vmatpush1.bf16.msra.mxu0 %v13424_v47  ;;  %11071 = vmatpush3.bf16.msra.mxu1 %v13426_v62  ;;  %v13613_v45 = vpack.c.bf16 %v5867_v38, %v5864_v35 }
 0x9aa   :  { %11042 = vmatprep.subr.bf16.mxu0 %v13430_v13  ;;  %11072 = vmatprep.subr.bf16.mxu1 %v12206_v0 }
 0x9ab   :  { %4931 = vmatprep.mubr.f32.mxu0 %v12207_v1  ;;  %9452 = vmatprep.mubr.msk.f32.mxu1 %vm12208_vm0, %v12207_v1 }
 0x9ad   :  { %11044 = vmatpush1.bf16.msra.mxu0 %v13434_v8  ;;  %11074 = vmatpush3.bf16.msra.mxu1 %v13436_v19 }
 0x9ae   :  { %11046 = vmatprep.subr.bf16.mxu0 %v13440_v44  ;;  %11075 = vmatprep.subr.bf16.mxu1 %v12206_v0 }
 0x9b1   :  { %11048 = vmatpush1.bf16.msra.mxu0 %v13447_v34  ;;  %11077 = vmatpush3.bf16.msra.mxu1 %v13449_v39 }
 0x9b2   :  { %11050 = vmatprep.subr.bf16.mxu0 %v13453_v49  ;;  %11078 = vmatprep.subr.bf16.mxu1 %v12206_v0 }
 0x9b5   :  { %11052 = vmatpush1.bf16.msra.mxu0 %v13457_v4  ;;  %11080 = vmatpush3.bf16.msra.mxu1 %v13459_v33 }
 0x9b6   :  { %11054 = vmatprep.subr.bf16.mxu0 %v13463_v7  ;;  %11081 = vmatprep.subr.bf16.mxu1 %v12206_v0 }
 0x9b9   :  { %11056 = vmatpush1.bf16.msra.mxu0 %v13467_v29  ;;  %11083 = vmatpush3.bf16.msra.mxu1 %v13469_v37 }
 0x9ba   :  { %11058 = vmatprep.subr.bf16.mxu0 %v13473_v55  ;;  %11084 = vmatprep.subr.bf16.mxu1 %v12206_v0 }
 0x9bd   :  { %11060 = vmatpush1.bf16.msra.mxu0 %v13477_v57  ;;  %11086 = vmatpush3.bf16.msra.mxu1 %v13479_v22 }
 0x9be   :  { %11062 = vmatprep.subr.bf16.mxu0 %v13483_v15  ;;  %11087 = vmatprep.subr.bf16.mxu1 %v12206_v0 }
 0x9c1   :  { %11064 = vmatpush1.bf16.msra.mxu0 %v13487_v16  ;;  %11089 = vmatpush3.bf16.msra.mxu1 %v13489_v36 }
 0x9c2   :  { %11066 = vmatprep.subr.bf16.mxu0 %v13493_v52  ;;  %11090 = vmatprep.subr.bf16.mxu1 %v12206_v0 }
 0x9c5   :  { %11068 = vmatpush1.bf16.msra.mxu0 %v13497_v53  ;;  %11092 = vmatpush3.bf16.msra.mxu1 %v13499_v12 }
 0x9c6   :  { %11094 = vmatprep.subr.bf16.mxu0 %v13420_v6  ;;  %11125 = vmatprep.subr.bf16.mxu1 %v12206_v0 }
 0x9c8   :  { %4932 = vmatmul.mubr.f32.vlgmr.msra.gmra.mrb[42].mxu0 %v4801_v18  ;;  %9453 = vmatmul.mubr.f32.vlgmr.msra.gmra.mrb[42].mxu1 %v4801_v18  ;;  %v5869_v18 = vld [vmem:[#allocation10 + $0xc0] sm:$0xff] }
 0x9c9   :  { %11096 = vmatpush1.bf16.msra.mxu0 %v13424_v47  ;;  %11127 = vmatpush3.bf16.msra.mxu1 %v13426_v62 }
 0x9ca   :  { %11098 = vmatprep.subr.bf16.mxu0 %v13430_v13  ;;  %11128 = vmatprep.subr.bf16.mxu1 %v12206_v0 }
 0x9cb   :  { %5159 = vmatprep.mubr.f32.mxu0 %v12207_v1  ;;  %9487 = vmatprep.mubr.msk.f32.mxu1 %vm12208_vm0, %v12207_v1 }
 0x9cd   :  { %11100 = vmatpush1.bf16.msra.mxu0 %v13434_v8  ;;  %11130 = vmatpush3.bf16.msra.mxu1 %v13436_v19 }
 0x9ce   :  { %11102 = vmatprep.subr.bf16.mxu0 %v13440_v44  ;;  %11131 = vmatprep.subr.bf16.mxu1 %v12206_v0 }
 0x9d1   :  { %11104 = vmatpush1.bf16.msra.mxu0 %v13447_v34  ;;  %11133 = vmatpush3.bf16.msra.mxu1 %v13449_v39 }
 0x9d2   :  { %11106 = vmatprep.subr.bf16.mxu0 %v13453_v49  ;;  %11134 = vmatprep.subr.bf16.mxu1 %v12206_v0 }
 0x9d5   :  { %11108 = vmatpush1.bf16.msra.mxu0 %v13457_v4  ;;  %11136 = vmatpush3.bf16.msra.mxu1 %v13459_v33 }
 0x9d6   :  { %11110 = vmatprep.subr.bf16.mxu0 %v13463_v7  ;;  %11137 = vmatprep.subr.bf16.mxu1 %v12206_v0 }
 0x9d9   :  { %11112 = vmatpush1.bf16.msra.mxu0 %v13467_v29  ;;  %11139 = vmatpush3.bf16.msra.mxu1 %v13469_v37 }
 0x9da   :  { %11114 = vmatprep.subr.bf16.mxu0 %v13473_v55  ;;  %11140 = vmatprep.subr.bf16.mxu1 %v12206_v0 }
 0x9dd   :  { %11116 = vmatpush1.bf16.msra.mxu0 %v13477_v57  ;;  %11142 = vmatpush3.bf16.msra.mxu1 %v13479_v22 }
 0x9de   :  { %11118 = vmatprep.subr.bf16.mxu0 %v13483_v15  ;;  %11143 = vmatprep.subr.bf16.mxu1 %v12206_v0 }
 0x9e1   :  { %11120 = vmatpush1.bf16.msra.mxu0 %v13487_v16  ;;  %11145 = vmatpush3.bf16.msra.mxu1 %v13489_v36 }
 0x9e2   :  { %11122 = vmatprep.subr.bf16.mxu0 %v13493_v52  ;;  %11146 = vmatprep.subr.bf16.mxu1 %v12206_v0 }
 0x9e5   :  { %11124 = vmatpush1.bf16.msra.mxu0 %v13497_v53  ;;  %11148 = vmatpush3.bf16.msra.mxu1 %v13499_v12 }
 0x9e6   :  { %11150 = vmatprep.subr.bf16.mxu0 %v13420_v6  ;;  %11181 = vmatprep.subr.bf16.mxu1 %v12206_v0  ;;  %v3710_v6 = vld [vmem:[%s14529_s7] sm:$0x7] }
 0x9e8   :  { %5160 = vmatmul.mubr.f32.vlgmr.msra.gmra.mrb[44].mxu0 %v5029_v21  ;;  %9488 = vmatmul.mubr.f32.vlgmr.msra.gmra.mrb[44].mxu1 %v5029_v21  ;;  %v13620_v21 = vpack.c.bf16 %v5868_v61, %v5865_v11  ;;  %v13659_v61 = vpack.c.bf16 %v5891_v2, %v5888_v42 }
 0x9e9   :  { %11152 = vmatpush1.bf16.msra.mxu0 %v13424_v47  ;;  %11183 = vmatpush3.bf16.msra.mxu1 %v13426_v62  ;;  %v3715_v47 = vrot.slane %v3710_v6, %v12731_v27  ;;  %v3723_v62 = vrot.slane %v3710_v6, %v12733_v30 }
 0x9ea   :  { %11154 = vmatprep.subr.bf16.mxu0 %v13430_v13  ;;  %11184 = vmatprep.subr.bf16.mxu1 %v12206_v0  ;;  %v3719_v13 = vrot.slane %v3710_v6, %v12738_v32 }
 0x9eb   :  { %5387 = vmatprep.mubr.f32.mxu0 %v12207_v1  ;;  %9522 = vmatprep.mubr.msk.f32.mxu1 %vm12208_vm0, %v12207_v1 }
 0x9ed   :  { %11156 = vmatpush1.bf16.msra.mxu0 %v13434_v8  ;;  %11186 = vmatpush3.bf16.msra.mxu1 %v13436_v19 }
 0x9ee   :  { %11158 = vmatprep.subr.bf16.mxu0 %v13440_v44  ;;  %11187 = vmatprep.subr.bf16.mxu1 %v12206_v0 }
 0x9f1   :  { %11160 = vmatpush1.bf16.msra.mxu0 %v13447_v34  ;;  %11189 = vmatpush3.bf16.msra.mxu1 %v13449_v39 }
 0x9f2   :  { %11162 = vmatprep.subr.bf16.mxu0 %v13453_v49  ;;  %11190 = vmatprep.subr.bf16.mxu1 %v12206_v0 }
 0x9f5   :  { %11164 = vmatpush1.bf16.msra.mxu0 %v13457_v4  ;;  %11192 = vmatpush3.bf16.msra.mxu1 %v13459_v33  ;;  %v13581_v4 = vpack.c.bf16 %v5849_v51, %v5846_v50  ;;  %v5848_v33 = vld [vmem:[#allocation10 + $0x18] sm:$0xff]  ;;  %v5877_v50 = vld [vmem:[#allocation10 + $0x100] sm:$0xff] }
 0x9f6   :  { %11166 = vmatprep.subr.bf16.mxu0 %v13463_v7  ;;  %11193 = vmatprep.subr.bf16.mxu1 %v12206_v0  ;;  %v5850_v7 = vld [vmem:[#allocation10 + $0x28] sm:$0xff]  ;;  %v13585_v10 = vpack.c.bf16 %v5848_v33, %v5845_v59  ;;  %v5880_v51 = vld [vmem:[#allocation10 + $0x118] sm:$0xff] }
 0x9f9   :  { %11168 = vmatpush1.bf16.msra.mxu0 %v13467_v29  ;;  %11195 = vmatpush3.bf16.msra.mxu1 %v13469_v37  ;;  %v13587_v29 = vpack.c.bf16 %v5850_v7, %v5847_v5  ;;  %v13590_v37 = vpack.c.bf16 %v5855_v23, %v5852_v14  ;;  %v5884_v14 = vld [vmem:[#allocation10 + $0x138] sm:$0xff]  ;;  %v13646_v23 = vpack.c.bf16 %v5880_v51, %v5877_v50 }
 0x9fa   :  { %11170 = vmatprep.subr.bf16.mxu0 %v13473_v55  ;;  %11196 = vmatprep.subr.bf16.mxu1 %v12206_v0  ;;  %v5853_v55 = vld [vmem:[#allocation10 + $0x40] sm:$0xff] }
 0x9fb   :  { %v3793_v8 = vpop.f32.mrb[32].mxu0  ;;  %v3864_v19 = vpop.f32.mrb[32].mxu1 }
 0x9fc   :  { %v3794_v44 = vadd.f32 %v3793_v8, %v3715_v47  ;;  %v3795_v31 = vpop.f32.mrb[33].mxu0  ;;  %v9279_v34 = vpop.f32.mrb[33].mxu1  ;;  %v3865_v39 = vadd.f32 %v3864_v19, %v3723_v62  ;;  %v5872_v47 = vld [vmem:[#allocation10 + $0xd8] sm:$0xff]  ;;  %v5871_v62 = vld [vmem:[#allocation10 + $0xd0] sm:$0xff] }
 0x9fd   :  { %v3796_v40 = vadd.f32 %v3795_v31, %v3719_v13  ;;  %11172 = vmatpush1.bf16.msra.mxu0 %v13477_v57  ;;  %11198 = vmatpush3.bf16.msra.mxu1 %v13479_v22  ;;  %v5857_v57 = vld [vmem:[#allocation10 + $0x60] sm:$0xff]  ;;  %v13597_v22 = vpack.c.bf16 %v5856_v60, %v5853_v55  ;;  %v5874_v13 = vld [vmem:[#allocation10 + $0xe8] sm:$0xff]  ;;  %v5876_v8 = vld [vmem:[#allocation10 + $0xf8] sm:$0xff] }
 0x9fe   :  { %11174 = vmatprep.subr.bf16.mxu0 %v13483_v15  ;;  %11199 = vmatprep.subr.bf16.mxu1 %v12206_v0  ;;  %v3885_v54 = vrot.slane %v3865_v39, %v12743_v41  ;;  %v5860_v15 = vld [vmem:[#allocation10 + $0x78] sm:$0xff]  ;;  %v5879_v19 = vld [vmem:[#allocation10 + $0x110] sm:$0xff]  ;;  %v3938_v31 = vld [vmem:[%s14529_s7] sm:$0x7]  ;;  %v13633_v39 = vpack.c.bf16 %v5874_v13, %v5871_v62 }
 0x9ff   :  { %v3871_v49 = vcombine.low %v3794_v44, %v3796_v40  ;;  %v13607_v3 = vpack.c.bf16 %v5860_v15, %v5857_v57  ;;  %v13627_v44 = vpack.c.bf16 %v5872_v47, %v5869_v18  ;;  %v5875_v34 = vld [vmem:[#allocation10 + $0xf0] sm:$0xff]  ;;  %v13636_v40 = vpack.c.bf16 %v5879_v19, %v5876_v8  ;;  %v5886_v55 = vld [vmem:[#allocation10 + $0x148] sm:$0xff] }
 0xa00   :  { %v3943_v59 = vrot.slane %v3938_v31, %v12731_v27  ;;  %v3951_v33 = vrot.slane %v3938_v31, %v12733_v30  ;;  %v3947_v5 = vrot.slane %v3938_v31, %v12738_v32  ;;  %v13656_v11 = vpack.c.bf16 %v5886_v55, %v5883_v46  ;;  %v4166_v31 = vld [vmem:[%s14529_s7] sm:$0x7] }
 0xa01   :  { %v3878_v58 = vrot.slane %v3871_v49, %v12743_v41  ;;  %11176 = vmatpush1.bf16.msra.mxu0 %v13487_v16  ;;  %11201 = vmatpush3.bf16.msra.mxu1 %v13489_v36  ;;  %v5863_v16 = vld [vmem:[#allocation10 + $0x90] sm:$0xff]  ;;  %v13610_v36 = vpack.c.bf16 %v5862_v20, %v5859_v17  ;;  %v5878_v49 = vld [vmem:[#allocation10 + $0x108] sm:$0xff]  ;;  %v4175_v50 = vrot.slane %v4166_v31, %v12738_v32 }
 0xa02   :  { %11178 = vmatprep.subr.bf16.mxu0 %v13493_v52  ;;  %11202 = vmatprep.subr.bf16.mxu1 %v12206_v0  ;;  %v5866_v52 = vld [vmem:[#allocation10 + $0xa8] sm:$0xff]  ;;  %v13643_v7 = vpack.c.bf16 %v5878_v49, %v5875_v34  ;;  %v4171_v34 = vrot.slane %v4166_v31, %v12731_v27  ;;  %v4179_v49 = vrot.slane %v4166_v31, %v12733_v30 }
 0xa03   :  { %v3886_v43 = vcombine.low %v3878_v58, %v3885_v54  ;;  %v5882_v54 = vld [vmem:[#allocation10 + $0x128] sm:$0xff]  ;;  %v5885_v58 = vld [vmem:[#allocation10 + $0x140] sm:$0xff] }
 0xa04   :  { %v13649_v28 = vpack.c.bf16 %v5885_v58, %v5882_v54 }
 0xa05   :  { %3888 = vst [vmem:[#allocation2] sm:$0x3f] %v3886_v43  ;;  %11180 = vmatpush1.bf16.msra.mxu0 %v13497_v53  ;;  %11204 = vmatpush3.bf16.msra.mxu1 %v13499_v12  ;;  %v5873_v53 = vld [vmem:[#allocation10 + $0xe0] sm:$0xff]  ;;  %v13617_v12 = vpack.c.bf16 %v5866_v52, %v5863_v16  ;;  %v5887_v16 = vld [vmem:[#allocation10 + $0x150] sm:$0xff]  ;;  %v5890_v52 = vld [vmem:[#allocation10 + $0x168] sm:$0xff] }
 0xa06   :  { %11206 = vmatprep.subr.bf16.mxu0 %v13581_v4  ;;  %11237 = vmatprep.subr.bf16.mxu1 %v12206_v0  ;;  %v13623_v6 = vpack.c.bf16 %v5873_v53, %v5870_v26  ;;  %v5881_v43 = vld [vmem:[#allocation10 + $0x120] sm:$0xff]  ;;  %v5892_v53 = vld [vmem:[#allocation10 + $0x178] sm:$0xff]  ;;  %v13662_v47 = vpack.c.bf16 %v5890_v52, %v5887_v16 }
 0xa07   :  { %v13652_v20 = vpack.c.bf16 %v5884_v14, %v5881_v43  ;;  %v5889_v26 = vld [vmem:[#allocation10 + $0x160] sm:$0xff] }
 0xa08   :  { %5388 = vmatmul.mubr.f32.vlgmr.msra.gmra.mrb[46].mxu0 %v5257_v56  ;;  %9523 = vmatmul.mubr.f32.vlgmr.msra.gmra.mrb[46].mxu1 %v5257_v56  ;;  %v13668_v8 = vpack.c.bf16 %v5892_v53, %v5889_v26 }
 0xa09   :  { %11208 = vmatpush1.bf16.msra.mxu0 %v13585_v10  ;;  %11239 = vmatpush3.bf16.msra.mxu1 %v13587_v29 }
 0xa0a   :  { %11210 = vmatprep.subr.bf16.mxu0 %v13590_v37  ;;  %5975 = vmatprep.mubr.f32.mxu0 %v12207_v1 }
 0xa0b   :  { %11240 = vmatprep.subr.bf16.mxu1 %v12206_v0  ;;  %9557 = vmatprep.mubr.msk.f32.mxu1 %vm12208_vm0, %v12207_v1 }
 0xa0d   :  { %11212 = vmatpush1.bf16.msra.mxu0 %v13594_v9  ;;  %11242 = vmatpush3.bf16.msra.mxu1 %v13597_v22 }
 0xa0e   :  { %11214 = vmatprep.subr.bf16.mxu0 %v13600_v63  ;;  %11243 = vmatprep.subr.bf16.mxu1 %v12206_v0 }
 0xa11   :  { %11216 = vmatpush1.bf16.msra.mxu0 %v13607_v3  ;;  %11245 = vmatpush3.bf16.msra.mxu1 %v13610_v36 }
 0xa12   :  { %11218 = vmatprep.subr.bf16.mxu0 %v13613_v45  ;;  %11246 = vmatprep.subr.bf16.mxu1 %v12206_v0 }
 0xa15   :  { %11220 = vmatpush1.bf16.msra.mxu0 %v13617_v12  ;;  %11248 = vmatpush3.bf16.msra.mxu1 %v13620_v21 }
 0xa16   :  { %11222 = vmatprep.subr.bf16.mxu0 %v13623_v6  ;;  %11249 = vmatprep.subr.bf16.mxu1 %v12206_v0 }
 0xa19   :  { %11224 = vmatpush1.bf16.msra.mxu0 %v13627_v44  ;;  %11251 = vmatpush3.bf16.msra.mxu1 %v13633_v39 }
 0xa1a   :  { %11226 = vmatprep.subr.bf16.mxu0 %v13636_v40  ;;  %11252 = vmatprep.subr.bf16.mxu1 %v12206_v0 }
 0xa1b   :  { %v4021_v60 = vpop.f32.mrb[34].mxu0  ;;  %v4092_v56 = vpop.f32.mrb[34].mxu1 }
 0xa1c   :  { %v4022_v57 = vadd.f32 %v4021_v60, %v3943_v59  ;;  %v4023_v15 = vpop.f32.mrb[35].mxu0  ;;  %v9314_v17 = vpop.f32.mrb[35].mxu1  ;;  %v4093_v35 = vadd.f32 %v4092_v56, %v3951_v33  ;;  %v4394_v56 = vld [vmem:[%s14529_s7] sm:$0x7] }
 0xa1d   :  { %v4024_v38 = vadd.f32 %v4023_v15, %v3947_v5  ;;  %11228 = vmatpush1.bf16.msra.mxu0 %v13643_v7  ;;  %11254 = vmatpush3.bf16.msra.mxu1 %v13646_v23  ;;  %v4399_v42 = vrot.slane %v4394_v56, %v12731_v27  ;;  %v4407_v2 = vrot.slane %v4394_v56, %v12733_v30 }
 0xa1e   :  { %11230 = vmatprep.subr.bf16.mxu0 %v13649_v28  ;;  %11255 = vmatprep.subr.bf16.mxu1 %v12206_v0  ;;  %v4113_v62 = vrot.slane %v4093_v35, %v12743_v41 }
 0xa1f   :  { %v4099_v18 = vcombine.low %v4022_v57, %v4024_v38  ;;  %v4403_v57 = vrot.slane %v4394_v56, %v12738_v32 }
 0xa21   :  { %v4106_v13 = vrot.slane %v4099_v18, %v12743_v41  ;;  %11232 = vmatpush1.bf16.msra.mxu0 %v13652_v20  ;;  %11257 = vmatpush3.bf16.msra.mxu1 %v13656_v11 }
 0xa22   :  { %11234 = vmatprep.subr.bf16.mxu0 %v13659_v61  ;;  %11258 = vmatprep.subr.bf16.mxu1 %v12206_v0 }
 0xa23   :  { %v4114_v19 = vcombine.low %v4106_v13, %v4113_v62 }
 0xa25   :  { %4116 = vst [vmem:[#allocation2 + $0x6] sm:$0x3f] %v4114_v19  ;;  %11236 = vmatpush1.bf16.msra.mxu0 %v13662_v47  ;;  %11260 = vmatpush3.bf16.msra.mxu1 %v13668_v8  ;;  %v4622_v19 = vld [vmem:[%s14529_s7] sm:$0x7] }
 0xa26   :  { %11262 = vmatprep.subr.bf16.mxu0 %v13581_v4  ;;  %11293 = vmatprep.subr.bf16.mxu1 %v12206_v0  ;;  %v4627_v31 = vrot.slane %v4622_v19, %v12731_v27 }
 0xa28   :  { %5976 = vmatmul.mubr.f32.vlgmr.msra.gmra.mrb[48].mxu0 %v12207_v1  ;;  %9558 = vmatmul.mubr.f32.vlgmr.msra.gmra.mrb[48].mxu1 %v12207_v1 }
 0xa29   :  { %11264 = vmatpush1.bf16.msra.mxu0 %v13585_v10  ;;  %11295 = vmatpush3.bf16.msra.mxu1 %v13587_v29 }
 0xa2a   :  { %11266 = vmatprep.subr.bf16.mxu0 %v13590_v37  ;;  %11296 = vmatprep.subr.bf16.mxu1 %v12206_v0 }
 0xa2b   :  { %6144 = vmatprep.mubr.f32.mxu0 %v12207_v1  ;;  %9592 = vmatprep.mubr.msk.f32.mxu1 %vm12208_vm0, %v12207_v1 }
 0xa2d   :  { %11268 = vmatpush1.bf16.msra.mxu0 %v13594_v9  ;;  %11298 = vmatpush3.bf16.msra.mxu1 %v13597_v22 }
 0xa2e   :  { %11270 = vmatprep.subr.bf16.mxu0 %v13600_v63  ;;  %11299 = vmatprep.subr.bf16.mxu1 %v12206_v0 }
 0xa31   :  { %11272 = vmatpush1.bf16.msra.mxu0 %v13607_v3  ;;  %11301 = vmatpush3.bf16.msra.mxu1 %v13610_v36 }
 0xa32   :  { %11274 = vmatprep.subr.bf16.mxu0 %v13613_v45  ;;  %11302 = vmatprep.subr.bf16.mxu1 %v12206_v0 }
 0xa35   :  { %11276 = vmatpush1.bf16.msra.mxu0 %v13617_v12  ;;  %11304 = vmatpush3.bf16.msra.mxu1 %v13620_v21 }
 0xa36   :  { %11278 = vmatprep.subr.bf16.mxu0 %v13623_v6  ;;  %11305 = vmatprep.subr.bf16.mxu1 %v12206_v0 }
 0xa39   :  { %11280 = vmatpush1.bf16.msra.mxu0 %v13627_v44  ;;  %11307 = vmatpush3.bf16.msra.mxu1 %v13633_v39 }
 0xa3a   :  { %11282 = vmatprep.subr.bf16.mxu0 %v13636_v40  ;;  %11308 = vmatprep.subr.bf16.mxu1 %v12206_v0 }
 0xa3b   :  { %v4249_v51 = vpop.f32.mrb[36].mxu0  ;;  %v4320_v54 = vpop.f32.mrb[36].mxu1 }
 0xa3c   :  { %v4250_v58 = vadd.f32 %v4249_v51, %v4171_v34  ;;  %v4251_v59 = vpop.f32.mrb[37].mxu0  ;;  %v9349_v33 = vpop.f32.mrb[37].mxu1  ;;  %v4321_v5 = vadd.f32 %v4320_v54, %v4179_v49  ;;  %v4635_v34 = vrot.slane %v4622_v19, %v12733_v30  ;;  %v4631_v49 = vrot.slane %v4622_v19, %v12738_v32 }
 0xa3d   :  { %v4252_v43 = vadd.f32 %v4251_v59, %v4175_v50  ;;  %11284 = vmatpush1.bf16.msra.mxu0 %v13643_v7  ;;  %11310 = vmatpush3.bf16.msra.mxu1 %v13646_v23 }
 0xa3e   :  { %11286 = vmatprep.subr.bf16.mxu0 %v13649_v28  ;;  %11311 = vmatprep.subr.bf16.mxu1 %v12206_v0  ;;  %v4341_v46 = vrot.slane %v4321_v5, %v12743_v41 }
 0xa3f   :  { %v4327_v14 = vcombine.low %v4250_v58, %v4252_v43 }
 0xa41   :  { %v4334_v55 = vrot.slane %v4327_v14, %v12743_v41  ;;  %11288 = vmatpush1.bf16.msra.mxu0 %v13652_v20  ;;  %11313 = vmatpush3.bf16.msra.mxu1 %v13656_v11 }
 0xa42   :  { %11290 = vmatprep.subr.bf16.mxu0 %v13659_v61  ;;  %11314 = vmatprep.subr.bf16.mxu1 %v12206_v0 }
 0xa43   :  { %v4342_v60 = vcombine.low %v4334_v55, %v4341_v46 }
 0xa45   :  { %4344 = vst [vmem:[#allocation2 + $0xc] sm:$0x3f] %v4342_v60  ;;  %11292 = vmatpush1.bf16.msra.mxu0 %v13662_v47  ;;  %11316 = vmatpush3.bf16.msra.mxu1 %v13668_v8 }
 0xa46   :  { %11318 = vmatprep.subr.bf16.mxu0 %v13581_v4  ;;  %11349 = vmatprep.subr.bf16.mxu1 %v12206_v0 }
 0xa5b   :  { %v4477_v15 = vpop.f32.mrb[38].mxu0  ;;  %v4548_v17 = vpop.f32.mrb[38].mxu1 }
 0xa5c   :  { %v4478_v35 = vadd.f32 %v4477_v15, %v4399_v42  ;;  %v4479_v38 = vpop.f32.mrb[39].mxu0  ;;  %v9384_v16 = vpop.f32.mrb[39].mxu1  ;;  %v4549_v52 = vadd.f32 %v4548_v17, %v4407_v2 }
 0xa5d   :  { %v4480_v26 = vadd.f32 %v4479_v38, %v4403_v57 }
 0xa5e   :  { %v4569_v18 = vrot.slane %v4549_v52, %v12743_v41 }
 0xa5f   :  { %v4555_v53 = vcombine.low %v4478_v35, %v4480_v26 }
 0xa61   :  { %v4562_v62 = vrot.slane %v4555_v53, %v12743_v41 }
 0xa63   :  { %v4570_v13 = vcombine.low %v4562_v62, %v4569_v18 }
 0xa65   :  { %4572 = vst [vmem:[#allocation2 + $0x12] sm:$0x3f] %v4570_v13 }
 0xa6c   :  { %v5755_v60 = vld [vmem:[#allocation2 + $0x12] sm:$0x3f] }
 0xa6d   :  { %v5758_v56 = vcombine.high %v5755_v60, %v5755_v60  ;;  %v5765_v42 = vrot.slane %v5755_v60, %v12743_v41 }
 0xa6f   :  { %v5772_v17 = vrot.slane %v5758_v56, %v12743_v41  ;;  %v5773_v35 = vcombine.high %v5765_v42, %v5765_v42 }
 0xa7b   :  { %v4705_v50 = vpop.f32.mrb[40].mxu0  ;;  %v4776_v51 = vpop.f32.mrb[40].mxu1 }
 0xa7c   :  { %v4706_v54 = vadd.f32 %v4705_v50, %v4627_v31  ;;  %v4707_v58 = vpop.f32.mrb[41].mxu0  ;;  %v9419_v59 = vpop.f32.mrb[41].mxu1  ;;  %v4777_v33 = vadd.f32 %v4776_v51, %v4635_v34 }
 0xa7d   :  { %v4708_v5 = vadd.f32 %v4707_v58, %v4631_v49 }
 0xa7e   :  { %v4797_v14 = vrot.slane %v4777_v33, %v12743_v41 }
 0xa7f   :  { %v4783_v43 = vcombine.low %v4706_v54, %v4708_v5  ;;  %v4850_v54 = vld [vmem:[%s14529_s7] sm:$0x7] }
 0xa80   :  { %v4855_v33 = vrot.slane %v4850_v54, %v12731_v27  ;;  %v4863_v5 = vrot.slane %v4850_v54, %v12733_v30 }
 0xa81   :  { %v4790_v46 = vrot.slane %v4783_v43, %v12743_v41  ;;  %v4859_v43 = vrot.slane %v4850_v54, %v12738_v32 }
 0xa83   :  { %v4798_v55 = vcombine.low %v4790_v46, %v4797_v14 }
 0xa85   :  { %4800 = vst [vmem:[#allocation2 + $0x18] sm:$0x3f] %v4798_v55 }
 0xa8c   :  { %v5756_v2 = vld [vmem:[#allocation2 + $0x18] sm:$0x3f] }
 0xa8d   :  { %v5778_v57 = vcombine.high %v5756_v2, %v5756_v2  ;;  %v5785_v15 = vrot.slane %v5756_v2, %v12743_v41 }
 0xa8f   :  { %v5792_v38 = vrot.slane %v5778_v57, %v12743_v41  ;;  %v5793_v16 = vcombine.high %v5785_v15, %v5785_v15  ;;  %v5797_v52 = vsel %vm143_vm3, %v5765_v42, %v5785_v15  ;;  %v5821_v26 = vsel %vm143_vm3, %v5785_v15, %v5765_v42 }
 0xa91   :  { %v5798_v53 = vsel %vm12793_vm4, %v5773_v35, %v5793_v16  ;;  %v5799_v18 = vsel %vm12797_vm5, %v5772_v17, %v5792_v38  ;;  %v5822_v62 = vsel %vm12793_vm4, %v5793_v16, %v5773_v35  ;;  %v5823_v13 = vsel %vm12797_vm5, %v5792_v38, %v5772_v17  ;;  %v5665_v38 = vld [vmem:[#allocation2 + $0xc] sm:$0x3f] }
 0xa92   :  { %v5803_v19 = vcombine.low %v5797_v52, %v5798_v53  ;;  %v5827_v31 = vcombine.low %v5821_v26, %v5822_v62  ;;  %v5817_v49 = vrot.slane %v5799_v18, %v12743_v41  ;;  %v5841_v51 = vrot.slane %v5823_v13, %v12743_v41 }
 0xa93   :  { %v5668_v16 = vcombine.high %v5665_v38, %v5665_v38  ;;  %v5675_v52 = vrot.slane %v5665_v38, %v12743_v41 }
 0xa94   :  { %v5810_v34 = vrot.slane %v5803_v19, %v12743_v41  ;;  %v5834_v50 = vrot.slane %v5827_v31, %v12743_v41 }
 0xa95   :  { %v5682_v62 = vrot.slane %v5668_v16, %v12743_v41  ;;  %v5683_v13 = vcombine.high %v5675_v52, %v5675_v52 }
 0xa96   :  { %v5818_v58 = vcombine.low %v5810_v34, %v5817_v49  ;;  %v5842_v59 = vcombine.low %v5834_v50, %v5841_v51 }
 0xa98   :  { %5844 = vst [vmem:[#allocation2 + $0x18] sm:$0x3f] %v5842_v59  ;;  %5820 = vst [vmem:[#allocation2 + $0x12] sm:$0x3f] %v5818_v58 }
 0xa9b   :  { %v4933_v14 = vpop.f32.mrb[42].mxu0  ;;  %v5004_v46 = vpop.f32.mrb[42].mxu1 }
 0xa9c   :  { %v4934_v55 = vadd.f32 %v4933_v14, %v4855_v33  ;;  %v4935_v60 = vpop.f32.mrb[43].mxu0  ;;  %v9454_v56 = vpop.f32.mrb[43].mxu1  ;;  %v5005_v42 = vadd.f32 %v5004_v46, %v4863_v5 }
 0xa9d   :  { %v4936_v2 = vadd.f32 %v4935_v60, %v4859_v43 }
 0xa9e   :  { %v5025_v15 = vrot.slane %v5005_v42, %v12743_v41 }
 0xa9f   :  { %v5011_v57 = vcombine.low %v4934_v55, %v4936_v2  ;;  %v5078_v55 = vld [vmem:[%s14529_s7] sm:$0x7] }
 0xaa0   :  { %v5083_v42 = vrot.slane %v5078_v55, %v12731_v27  ;;  %v5091_v2 = vrot.slane %v5078_v55, %v12733_v30 }
 0xaa1   :  { %v5018_v17 = vrot.slane %v5011_v57, %v12743_v41  ;;  %v5087_v57 = vrot.slane %v5078_v55, %v12738_v32 }
 0xaa3   :  { %v5026_v35 = vcombine.low %v5018_v17, %v5025_v15 }
 0xaa5   :  { %5028 = vst [vmem:[#allocation2 + $0x1e] sm:$0x3f] %v5026_v35 }
 0xaac   :  { %v5666_v26 = vld [vmem:[#allocation2 + $0x1e] sm:$0x3f] }
 0xaad   :  { %v5688_v53 = vcombine.high %v5666_v26, %v5666_v26  ;;  %v5695_v18 = vrot.slane %v5666_v26, %v12743_v41 }
 0xaaf   :  { %v5702_v19 = vrot.slane %v5688_v53, %v12743_v41  ;;  %v5703_v31 = vcombine.high %v5695_v18, %v5695_v18  ;;  %v5707_v34 = vsel %vm143_vm3, %v5675_v52, %v5695_v18  ;;  %v5731_v49 = vsel %vm143_vm3, %v5695_v18, %v5675_v52 }
 0xab1   :  { %v5708_v50 = vsel %vm12793_vm4, %v5683_v13, %v5703_v31  ;;  %v5709_v51 = vsel %vm12797_vm5, %v5682_v62, %v5702_v19  ;;  %v5732_v54 = vsel %vm12793_vm4, %v5703_v31, %v5683_v13  ;;  %v5733_v58 = vsel %vm12797_vm5, %v5702_v19, %v5682_v62  ;;  %v5575_v19 = vld [vmem:[#allocation2 + $0x6] sm:$0x3f] }
 0xab2   :  { %v5713_v59 = vcombine.low %v5707_v34, %v5708_v50  ;;  %v5737_v33 = vcombine.low %v5731_v49, %v5732_v54  ;;  %v5727_v43 = vrot.slane %v5709_v51, %v12743_v41  ;;  %v5751_v46 = vrot.slane %v5733_v58, %v12743_v41 }
 0xab3   :  { %v5578_v31 = vcombine.high %v5575_v19, %v5575_v19  ;;  %v5585_v34 = vrot.slane %v5575_v19, %v12743_v41 }
 0xab4   :  { %v5720_v5 = vrot.slane %v5713_v59, %v12743_v41  ;;  %v5744_v14 = vrot.slane %v5737_v33, %v12743_v41 }
 0xab5   :  { %v5592_v54 = vrot.slane %v5578_v31, %v12743_v41  ;;  %v5593_v58 = vcombine.high %v5585_v34, %v5585_v34 }
 0xab6   :  { %v5728_v60 = vcombine.low %v5720_v5, %v5727_v43  ;;  %v5752_v56 = vcombine.low %v5744_v14, %v5751_v46 }
 0xab8   :  { %5754 = vst [vmem:[#allocation2 + $0x1e] sm:$0x3f] %v5752_v56  ;;  %5730 = vst [vmem:[#allocation2 + $0xc] sm:$0x3f] %v5728_v60 }
 0xabb   :  { %v5161_v15 = vpop.f32.mrb[44].mxu0  ;;  %v5232_v17 = vpop.f32.mrb[44].mxu1 }
 0xabc   :  { %v5162_v35 = vadd.f32 %v5161_v15, %v5083_v42  ;;  %v5163_v38 = vpop.f32.mrb[45].mxu0  ;;  %v9489_v16 = vpop.f32.mrb[45].mxu1  ;;  %v5233_v52 = vadd.f32 %v5232_v17, %v5091_v2 }
 0xabd   :  { %v5164_v26 = vadd.f32 %v5163_v38, %v5087_v57 }
 0xabe   :  { %v5253_v18 = vrot.slane %v5233_v52, %v12743_v41 }
 0xabf   :  { %v5239_v53 = vcombine.low %v5162_v35, %v5164_v26  ;;  %v5306_v35 = vld [vmem:[%s14529_s7] sm:$0x7] }
 0xac0   :  { %v5311_v52 = vrot.slane %v5306_v35, %v12731_v27  ;;  %v5319_v26 = vrot.slane %v5306_v35, %v12733_v30 }
 0xac1   :  { %v5246_v62 = vrot.slane %v5239_v53, %v12743_v41  ;;  %v5315_v53 = vrot.slane %v5306_v35, %v12738_v32 }
 0xac3   :  { %v5254_v13 = vcombine.low %v5246_v62, %v5253_v18 }
 0xac5   :  { %5256 = vst [vmem:[#allocation2 + $0x24] sm:$0x3f] %v5254_v13 }
 0xacc   :  { %v5576_v49 = vld [vmem:[#allocation2 + $0x24] sm:$0x3f] }
 0xacd   :  { %v5598_v50 = vcombine.high %v5576_v49, %v5576_v49  ;;  %v5605_v51 = vrot.slane %v5576_v49, %v12743_v41 }
 0xacf   :  { %v5612_v59 = vrot.slane %v5598_v50, %v12743_v41  ;;  %v5613_v33 = vcombine.high %v5605_v51, %v5605_v51  ;;  %v5617_v5 = vsel %vm143_vm3, %v5585_v34, %v5605_v51  ;;  %v5641_v43 = vsel %vm143_vm3, %v5605_v51, %v5585_v34 }
 0xad1   :  { %v5618_v14 = vsel %vm12793_vm4, %v5593_v58, %v5613_v33  ;;  %v5619_v46 = vsel %vm12797_vm5, %v5592_v54, %v5612_v59  ;;  %v5642_v55 = vsel %vm12793_vm4, %v5613_v33, %v5593_v58  ;;  %v5643_v60 = vsel %vm12797_vm5, %v5612_v59, %v5592_v54  ;;  %v5485_v59 = vld [vmem:[#allocation2] sm:$0x3f] }
 0xad2   :  { %v5623_v56 = vcombine.low %v5617_v5, %v5618_v14  ;;  %v5647_v42 = vcombine.low %v5641_v43, %v5642_v55  ;;  %v5637_v57 = vrot.slane %v5619_v46, %v12743_v41  ;;  %v5661_v17 = vrot.slane %v5643_v60, %v12743_v41 }
 0xad3   :  { %v5488_v33 = vcombine.high %v5485_v59, %v5485_v59  ;;  %v5495_v5 = vrot.slane %v5485_v59, %v12743_v41 }
 0xad4   :  { %v5630_v2 = vrot.slane %v5623_v56, %v12743_v41  ;;  %v5654_v15 = vrot.slane %v5647_v42, %v12743_v41 }
 0xad5   :  { %v5502_v55 = vrot.slane %v5488_v33, %v12743_v41  ;;  %v5503_v60 = vcombine.high %v5495_v5, %v5495_v5 }
 0xad6   :  { %v5638_v38 = vcombine.low %v5630_v2, %v5637_v57  ;;  %v5662_v16 = vcombine.low %v5654_v15, %v5661_v17 }
 0xad8   :  { %5664 = vst [vmem:[#allocation2 + $0x24] sm:$0x3f] %v5662_v16  ;;  %5640 = vst [vmem:[#allocation2 + $0x6] sm:$0x3f] %v5638_v38 }
 0xadb   :  { %v5389_v18 = vpop.f32.mrb[46].mxu0  ;;  %v5460_v62 = vpop.f32.mrb[46].mxu1 }
 0xadc   :  { %v5390_v13 = vadd.f32 %v5389_v18, %v5311_v52  ;;  %v5391_v19 = vpop.f32.mrb[47].mxu0  ;;  %v9524_v31 = vpop.f32.mrb[47].mxu1  ;;  %v5461_v34 = vadd.f32 %v5460_v62, %v5319_v26 }
 0xadd   :  { %v5392_v49 = vadd.f32 %v5391_v19, %v5315_v53 }
 0xade   :  { %v5481_v51 = vrot.slane %v5461_v34, %v12743_v41 }
 0xadf   :  { %v5467_v50 = vcombine.low %v5390_v13, %v5392_v49  ;;  %v5893_v13 = vld [vmem:[%s14530_s8] sm:$0x7] }
 0xae0   :  { %v13845_v25 = vrot.slane %v5893_v13, %v12731_v27 }
 0xae1   :  { %v5474_v54 = vrot.slane %v5467_v50, %v12743_v41 }
 0xae3   :  { %v5482_v58 = vcombine.low %v5474_v54, %v5481_v51  ;;  %v13849_v54 = vrot.slane %v5893_v13, %v12738_v32 }
 0xae5   :  { %5484 = vst [vmem:[#allocation2 + $0x2a] sm:$0x3f] %v5482_v58 }
 0xaec   :  { %v5486_v43 = vld [vmem:[#allocation2 + $0x2a] sm:$0x3f] }
 0xaed   :  { %v5508_v14 = vcombine.high %v5486_v43, %v5486_v43  ;;  %v5515_v46 = vrot.slane %v5486_v43, %v12743_v41 }
 0xaef   :  { %v5522_v56 = vrot.slane %v5508_v14, %v12743_v41  ;;  %v5523_v42 = vcombine.high %v5515_v46, %v5515_v46  ;;  %v5527_v2 = vsel %vm143_vm3, %v5495_v5, %v5515_v46  ;;  %v5551_v57 = vsel %vm143_vm3, %v5515_v46, %v5495_v5 }
 0xaf1   :  { %v5528_v15 = vsel %vm12793_vm4, %v5503_v60, %v5523_v42  ;;  %v5529_v17 = vsel %vm12797_vm5, %v5502_v55, %v5522_v56  ;;  %v5552_v35 = vsel %vm12793_vm4, %v5523_v42, %v5503_v60  ;;  %v5553_v38 = vsel %vm12797_vm5, %v5522_v56, %v5502_v55 }
 0xaf2   :  { %v5533_v16 = vcombine.low %v5527_v2, %v5528_v15  ;;  %v5557_v52 = vcombine.low %v5551_v57, %v5552_v35  ;;  %v5547_v53 = vrot.slane %v5529_v17, %v12743_v41  ;;  %v5571_v62 = vrot.slane %v5553_v38, %v12743_v41 }
 0xaf3   :  { %v13853_v55 = vrot.slane %v5893_v13, %v12733_v30 }
 0xaf4   :  { %v5540_v26 = vrot.slane %v5533_v16, %v12743_v41  ;;  %v5564_v18 = vrot.slane %v5557_v52, %v12743_v41 }
 0xaf6   :  { %v5548_v19 = vcombine.low %v5540_v26, %v5547_v53  ;;  %v5572_v24 = vcombine.low %v5564_v18, %v5571_v62  ;;  %v6079_v18 = vld [vmem:[#allocation2 + $0x6] sm:$0x3f] }
 0xaf8   :  { %5574 = vst [vmem:[#allocation2 + $0x2a] sm:$0x3f] %v5572_v24  ;;  %5550 = vst [vmem:[#allocation2] sm:$0x3f] %v5548_v19 }
 0xafb   :  { %v5977_v31 = vpop.f32.mrb[48].mxu0  ;;  %v6048_v34 = vpop.f32.mrb[48].mxu1 }
 0xafc   :  { %v5978_v49 = vadd.f32 %v5977_v31, %v13845_v25  ;;  %v5979_v50 = vpop.f32.mrb[49].mxu0  ;;  %v9559_v51 = vpop.f32.mrb[49].mxu1  ;;  %v6049_v32 = vadd.f32 %v6048_v34, %v13853_v55  ;;  %v6229_v34 = vrot.slane %v6079_v18, 2 }
 0xafd   :  { %v5980_v33 = vadd.f32 %v5979_v50, %v13849_v54 }
 0xaff   :  { %v5910_v41 = vld [vmem:[#allocation2] sm:$0x3f] }
 0xb00   :  { %v6052_v58 = vadd.f32 %v5978_v49, %v5910_v41  ;;  %v6060_v59 = vrot.slane %v5910_v41, 2  ;;  %v6070_v57 = vrot.slane %v5910_v41, 4 }
 0xb02   :  { %v8177_v5 = vmul.f32 -1.442695, %v6052_v58  ;;  %v6062_v43 = vadd.f32 %v6060_v59, %v5980_v33 }
 0xb04   :  { %11952 = vpow2.f32 %v8177_v5  ;;  %v8178_v14 = vmul.f32 -1.442695, %v6062_v43 }
 0xb06   :  { %11954 = vpow2.f32 %v8178_v14 }
 0xb0e   :  { %v11953_v27 = vpop.eup %11952 }
 0xb0f   :  { %v6056_v46 = vadd.f32 1.0, %v11953_v27  ;;  %v6239_v27 = vrot.slane %v6079_v18, 4 }
 0xb10   :  { %v11955_v60 = vpop.eup %11954 }
 0xb11   :  { %11956 = vrcp.f32 %v6056_v46  ;;  %v6066_v56 = vadd.f32 1.0, %v11955_v60 }
 0xb13   :  { %11958 = vrcp.f32 %v6066_v56 }
 0xb1b   :  { %v11957_v42 = vpop.eup %11956 }
 0xb1c   :  { %v6069_v2 = vmul.f32 %v11957_v42, %v6049_v32 }
 0xb1d   :  { %v11959_v17 = vpop.eup %11958 }
 0xb1e   :  { %v6072_v15 = vadd.f32 %v6070_v57, %v6069_v2  ;;  %v6074_v35 = vsub.f32 1.0, %v11959_v17  ;;  %v6076_v52 = vmul.f32 0.0, %v11959_v17 }
 0xb20   :  { %11960 = vtanh.f32 %v6072_v15 }
 0xb2a   :  { %v11961_v38 = vpop.eup %11960 }
 0xb2b   :  { %v6075_v16 = vmul.f32 %v11961_v38, %v6074_v35  ;;  %v6248_v35 = vld [vmem:[#allocation2 + $0xc] sm:$0x3f] }
 0xb2d   :  { %v13856_v26 = vadd.f32 %v6076_v52, %v6075_v16 }
 0xb2f   :  { %6078 = vst [vmem:[#allocation3] sm:$0x3] %v13856_v26  ;;  %6145 = vmatmul.mubr.f32.vlgmr.msra.gmra.mrb[50].mxu0 %v13856_v26  ;;  %9593 = vmatmul.mubr.f32.vlgmr.msra.gmra.mrb[50].mxu1 %v13856_v26 }
 0xb30   :  { %11320 = vmatpush1.bf16.msra.mxu0 %v13585_v10  ;;  %11351 = vmatpush3.bf16.msra.mxu1 %v13587_v29 }
 0xb31   :  { %11322 = vmatprep.subr.bf16.mxu0 %v13590_v37  ;;  %11352 = vmatprep.subr.bf16.mxu1 %v12206_v0 }
 0xb32   :  { %6313 = vmatprep.mubr.f32.mxu0 %v12207_v1  ;;  %9627 = vmatprep.mubr.msk.f32.mxu1 %vm12208_vm0, %v12207_v1 }
 0xb34   :  { %11324 = vmatpush1.bf16.msra.mxu0 %v13594_v9  ;;  %11354 = vmatpush3.bf16.msra.mxu1 %v13597_v22 }
 0xb35   :  { %11326 = vmatprep.subr.bf16.mxu0 %v13600_v63  ;;  %11355 = vmatprep.subr.bf16.mxu1 %v12206_v0 }
 0xb38   :  { %11328 = vmatpush1.bf16.msra.mxu0 %v13607_v3  ;;  %11357 = vmatpush3.bf16.msra.mxu1 %v13610_v36 }
 0xb39   :  { %11330 = vmatprep.subr.bf16.mxu0 %v13613_v45  ;;  %11358 = vmatprep.subr.bf16.mxu1 %v12206_v0 }
 0xb3c   :  { %11332 = vmatpush1.bf16.msra.mxu0 %v13617_v12  ;;  %11360 = vmatpush3.bf16.msra.mxu1 %v13620_v21 }
 0xb3d   :  { %11334 = vmatprep.subr.bf16.mxu0 %v13623_v6  ;;  %11361 = vmatprep.subr.bf16.mxu1 %v12206_v0 }
 0xb40   :  { %11336 = vmatpush1.bf16.msra.mxu0 %v13627_v44  ;;  %11363 = vmatpush3.bf16.msra.mxu1 %v13633_v39 }
 0xb41   :  { %11338 = vmatprep.subr.bf16.mxu0 %v13636_v40  ;;  %11364 = vmatprep.subr.bf16.mxu1 %v12206_v0 }
 0xb44   :  { %11340 = vmatpush1.bf16.msra.mxu0 %v13643_v7  ;;  %11366 = vmatpush3.bf16.msra.mxu1 %v13646_v23 }
 0xb45   :  { %11342 = vmatprep.subr.bf16.mxu0 %v13649_v28  ;;  %11367 = vmatprep.subr.bf16.mxu1 %v12206_v0 }
 0xb48   :  { %11344 = vmatpush1.bf16.msra.mxu0 %v13652_v20  ;;  %11369 = vmatpush3.bf16.msra.mxu1 %v13656_v11 }
 0xb49   :  { %11346 = vmatprep.subr.bf16.mxu0 %v13659_v61  ;;  %11370 = vmatprep.subr.bf16.mxu1 %v12206_v0 }
 0xb4c   :  { %11348 = vmatpush1.bf16.msra.mxu0 %v13662_v47  ;;  %11372 = vmatpush3.bf16.msra.mxu1 %v13668_v8 }
 0xb4d   :  { %11374 = vmatprep.subr.bf16.mxu0 %v13581_v4  ;;  %11405 = vmatprep.subr.bf16.mxu1 %v12206_v0 }
 0xc02   :  { %v6146_v30 = vpop.f32.mrb[50].mxu0  ;;  %v6217_v53 = vpop.f32.mrb[50].mxu1 }
 0xc03   :  { %v6147_v62 = vadd.f32 %v6146_v30, %v13845_v25  ;;  %v6148_v13 = vpop.f32.mrb[51].mxu0  ;;  %v9594_v19 = vpop.f32.mrb[51].mxu1  ;;  %v6218_v5 = vadd.f32 %v6217_v53, %v13853_v55  ;;  %v6398_v53 = vrot.slane %v6248_v35, 2 }
 0xc04   :  { %v6149_v24 = vadd.f32 %v6148_v13, %v13849_v54 }
 0xc05   :  { %v6221_v31 = vadd.f32 %v6147_v62, %v6079_v18 }
 0xc06   :  { %v6231_v50 = vadd.f32 %v6229_v34, %v6149_v24 }
 0xc07   :  { %v8179_v49 = vmul.f32 -1.442695, %v6221_v31 }
 0xc08   :  { %v8180_v51 = vmul.f32 -1.442695, %v6231_v50 }
 0xc09   :  { %11962 = vpow2.f32 %v8179_v49 }
 0xc0a   :  { %11964 = vpow2.f32 %v8180_v51 }
 0xc13   :  { %v11963_v41 = vpop.eup %11962 }
 0xc14   :  { %v6225_v58 = vadd.f32 1.0, %v11963_v41  ;;  %v11965_v59 = vpop.eup %11964  ;;  %v6408_v41 = vrot.slane %v6248_v35, 4 }
 0xc15   :  { %v6235_v33 = vadd.f32 1.0, %v11965_v59 }
 0xc16   :  { %11966 = vrcp.f32 %v6225_v58 }
 0xc17   :  { %11968 = vrcp.f32 %v6235_v33 }
 0xc20   :  { %v11967_v43 = vpop.eup %11966 }
 0xc21   :  { %v6238_v14 = vmul.f32 %v11967_v43, %v6218_v5  ;;  %v11969_v60 = vpop.eup %11968 }
 0xc22   :  { %v6243_v56 = vsub.f32 1.0, %v11969_v60  ;;  %v6245_v2 = vmul.f32 %v11969_v60, %v13856_v26 }
 0xc23   :  { %v6241_v46 = vadd.f32 %v6239_v27, %v6238_v14 }
 0xc25   :  { %11970 = vtanh.f32 %v6241_v46 }
 0xc2f   :  { %v11971_v32 = vpop.eup %11970 }
 0xc30   :  { %v6244_v42 = vmul.f32 %v11971_v32, %v6243_v56  ;;  %v6417_v56 = vld [vmem:[#allocation2 + $0x12] sm:$0x3f] }
 0xc32   :  { %v13900_v57 = vadd.f32 %v6245_v2, %v6244_v42 }
 0xc34   :  { %6247 = vst [vmem:[#allocation3 + $0x2] sm:$0x3] %v13900_v57  ;;  %6314 = vmatmul.mubr.f32.vlgmr.msra.gmra.mrb[52].mxu0 %v13900_v57  ;;  %9628 = vmatmul.mubr.f32.vlgmr.msra.gmra.mrb[52].mxu1 %v13900_v57 }
 0xc35   :  { %11376 = vmatpush1.bf16.msra.mxu0 %v13585_v10  ;;  %11407 = vmatpush3.bf16.msra.mxu1 %v13587_v29 }
 0xc36   :  { %11378 = vmatprep.subr.bf16.mxu0 %v13590_v37  ;;  %11408 = vmatprep.subr.bf16.mxu1 %v12206_v0 }
 0xc37   :  { %6482 = vmatprep.mubr.f32.mxu0 %v12207_v1  ;;  %9662 = vmatprep.mubr.msk.f32.mxu1 %vm12208_vm0, %v12207_v1 }
 0xc39   :  { %11380 = vmatpush1.bf16.msra.mxu0 %v13594_v9  ;;  %11410 = vmatpush3.bf16.msra.mxu1 %v13597_v22 }
 0xc3a   :  { %11382 = vmatprep.subr.bf16.mxu0 %v13600_v63  ;;  %11411 = vmatprep.subr.bf16.mxu1 %v12206_v0 }
 0xc3d   :  { %11384 = vmatpush1.bf16.msra.mxu0 %v13607_v3  ;;  %11413 = vmatpush3.bf16.msra.mxu1 %v13610_v36 }
 0xc3e   :  { %11386 = vmatprep.subr.bf16.mxu0 %v13613_v45  ;;  %11414 = vmatprep.subr.bf16.mxu1 %v12206_v0 }
 0xc41   :  { %11388 = vmatpush1.bf16.msra.mxu0 %v13617_v12  ;;  %11416 = vmatpush3.bf16.msra.mxu1 %v13620_v21 }
 0xc42   :  { %11390 = vmatprep.subr.bf16.mxu0 %v13623_v6  ;;  %11417 = vmatprep.subr.bf16.mxu1 %v12206_v0 }
 0xc45   :  { %11392 = vmatpush1.bf16.msra.mxu0 %v13627_v44  ;;  %11419 = vmatpush3.bf16.msra.mxu1 %v13633_v39 }
 0xc46   :  { %11394 = vmatprep.subr.bf16.mxu0 %v13636_v40  ;;  %11420 = vmatprep.subr.bf16.mxu1 %v12206_v0 }
 0xc49   :  { %11396 = vmatpush1.bf16.msra.mxu0 %v13643_v7  ;;  %11422 = vmatpush3.bf16.msra.mxu1 %v13646_v23 }
 0xc4a   :  { %11398 = vmatprep.subr.bf16.mxu0 %v13649_v28  ;;  %11423 = vmatprep.subr.bf16.mxu1 %v12206_v0 }
 0xc4d   :  { %11400 = vmatpush1.bf16.msra.mxu0 %v13652_v20  ;;  %11425 = vmatpush3.bf16.msra.mxu1 %v13656_v11 }
 0xc4e   :  { %11402 = vmatprep.subr.bf16.mxu0 %v13659_v61  ;;  %11426 = vmatprep.subr.bf16.mxu1 %v12206_v0 }
 0xc51   :  { %11404 = vmatpush1.bf16.msra.mxu0 %v13662_v47  ;;  %11428 = vmatpush3.bf16.msra.mxu1 %v13668_v8 }
 0xc52   :  { %11430 = vmatprep.subr.bf16.mxu0 %v13581_v4  ;;  %11461 = vmatprep.subr.bf16.mxu1 %v12206_v0 }
 0xd07   :  { %v6315_v15 = vpop.f32.mrb[52].mxu0  ;;  %v6386_v17 = vpop.f32.mrb[52].mxu1 }
 0xd08   :  { %v6316_v38 = vadd.f32 %v6315_v15, %v13845_v25  ;;  %v6317_v16 = vpop.f32.mrb[53].mxu0  ;;  %v9629_v52 = vpop.f32.mrb[53].mxu1  ;;  %v6387_v49 = vadd.f32 %v6386_v17, %v13853_v55  ;;  %v6567_v17 = vrot.slane %v6417_v56, 2 }
 0xd09   :  { %v6318_v26 = vadd.f32 %v6317_v16, %v13849_v54 }
 0xd0a   :  { %v6390_v30 = vadd.f32 %v6316_v38, %v6248_v35 }
 0xd0b   :  { %v6400_v62 = vadd.f32 %v6398_v53, %v6318_v26 }
 0xd0c   :  { %v8181_v18 = vmul.f32 -1.442695, %v6390_v30 }
 0xd0d   :  { %v8182_v13 = vmul.f32 -1.442695, %v6400_v62 }
 0xd0e   :  { %11972 = vpow2.f32 %v8181_v18 }
 0xd0f   :  { %11974 = vpow2.f32 %v8182_v13 }
 0xd18   :  { %v11973_v19 = vpop.eup %11972 }
 0xd19   :  { %v6394_v24 = vadd.f32 1.0, %v11973_v19  ;;  %v11975_v31 = vpop.eup %11974  ;;  %v6577_v19 = vrot.slane %v6417_v56, 4 }
 0xd1a   :  { %v6404_v34 = vadd.f32 1.0, %v11975_v31 }
 0xd1b   :  { %11976 = vrcp.f32 %v6394_v24 }
 0xd1c   :  { %11978 = vrcp.f32 %v6404_v34 }
 0xd25   :  { %v11977_v50 = vpop.eup %11976 }
 0xd26   :  { %v6407_v51 = vmul.f32 %v11977_v50, %v6387_v49  ;;  %v11979_v59 = vpop.eup %11978 }
 0xd27   :  { %v6412_v33 = vsub.f32 1.0, %v11979_v59  ;;  %v6414_v14 = vmul.f32 %v11979_v59, %v13900_v57 }
 0xd28   :  { %v6410_v58 = vadd.f32 %v6408_v41, %v6407_v51 }
 0xd2a   :  { %11980 = vtanh.f32 %v6410_v58 }
 0xd34   :  { %v11981_v5 = vpop.eup %11980 }
 0xd35   :  { %v6413_v43 = vmul.f32 %v11981_v5, %v6412_v33  ;;  %v6586_v33 = vld [vmem:[#allocation2 + $0x18] sm:$0x3f] }
 0xd37   :  { %v13944_v27 = vadd.f32 %v6414_v14, %v6413_v43 }
 0xd39   :  { %6416 = vst [vmem:[#allocation3 + $0x4] sm:$0x3] %v13944_v27  ;;  %6483 = vmatmul.mubr.f32.vlgmr.msra.gmra.mrb[54].mxu0 %v13944_v27  ;;  %9663 = vmatmul.mubr.f32.vlgmr.msra.gmra.mrb[54].mxu1 %v13944_v27 }
 0xd3a   :  { %11432 = vmatpush1.bf16.msra.mxu0 %v13585_v10  ;;  %11463 = vmatpush3.bf16.msra.mxu1 %v13587_v29 }
 0xd3b   :  { %11434 = vmatprep.subr.bf16.mxu0 %v13590_v37  ;;  %11464 = vmatprep.subr.bf16.mxu1 %v12206_v0 }
 0xd3c   :  { %6651 = vmatprep.mubr.f32.mxu0 %v12207_v1  ;;  %9697 = vmatprep.mubr.msk.f32.mxu1 %vm12208_vm0, %v12207_v1 }
 0xd3e   :  { %11436 = vmatpush1.bf16.msra.mxu0 %v13594_v9  ;;  %11466 = vmatpush3.bf16.msra.mxu1 %v13597_v22 }
 0xd3f   :  { %11438 = vmatprep.subr.bf16.mxu0 %v13600_v63  ;;  %11467 = vmatprep.subr.bf16.mxu1 %v12206_v0 }
 0xd42   :  { %11440 = vmatpush1.bf16.msra.mxu0 %v13607_v3  ;;  %11469 = vmatpush3.bf16.msra.mxu1 %v13610_v36 }
 0xd43   :  { %11442 = vmatprep.subr.bf16.mxu0 %v13613_v45  ;;  %11470 = vmatprep.subr.bf16.mxu1 %v12206_v0 }
 0xd46   :  { %11444 = vmatpush1.bf16.msra.mxu0 %v13617_v12  ;;  %11472 = vmatpush3.bf16.msra.mxu1 %v13620_v21 }
 0xd47   :  { %11446 = vmatprep.subr.bf16.mxu0 %v13623_v6  ;;  %11473 = vmatprep.subr.bf16.mxu1 %v12206_v0 }
 0xd4a   :  { %11448 = vmatpush1.bf16.msra.mxu0 %v13627_v44  ;;  %11475 = vmatpush3.bf16.msra.mxu1 %v13633_v39 }
 0xd4b   :  { %11450 = vmatprep.subr.bf16.mxu0 %v13636_v40  ;;  %11476 = vmatprep.subr.bf16.mxu1 %v12206_v0 }
 0xd4e   :  { %11452 = vmatpush1.bf16.msra.mxu0 %v13643_v7  ;;  %11478 = vmatpush3.bf16.msra.mxu1 %v13646_v23 }
 0xd4f   :  { %11454 = vmatprep.subr.bf16.mxu0 %v13649_v28  ;;  %11479 = vmatprep.subr.bf16.mxu1 %v12206_v0 }
 0xd52   :  { %11456 = vmatpush1.bf16.msra.mxu0 %v13652_v20  ;;  %11481 = vmatpush3.bf16.msra.mxu1 %v13656_v11 }
 0xd53   :  { %11458 = vmatprep.subr.bf16.mxu0 %v13659_v61  ;;  %11482 = vmatprep.subr.bf16.mxu1 %v12206_v0 }
 0xd56   :  { %11460 = vmatpush1.bf16.msra.mxu0 %v13662_v47  ;;  %11484 = vmatpush3.bf16.msra.mxu1 %v13668_v8 }
 0xd57   :  { %11486 = vmatprep.subr.bf16.mxu0 %v13581_v4  ;;  %11517 = vmatprep.subr.bf16.mxu1 %v12206_v0 }
 0xe0c   :  { %v6484_v46 = vpop.f32.mrb[54].mxu0  ;;  %v6555_v60 = vpop.f32.mrb[54].mxu1 }
 0xe0d   :  { %v6485_v32 = vadd.f32 %v6484_v46, %v13845_v25  ;;  %v6486_v42 = vpop.f32.mrb[55].mxu0  ;;  %v9664_v2 = vpop.f32.mrb[55].mxu1  ;;  %v6556_v18 = vadd.f32 %v6555_v60, %v13853_v55  ;;  %v6736_v60 = vrot.slane %v6586_v33, 2 }
 0xe0e   :  { %v6487_v57 = vadd.f32 %v6486_v42, %v13849_v54 }
 0xe0f   :  { %v6559_v15 = vadd.f32 %v6485_v32, %v6417_v56 }
 0xe10   :  { %v6569_v38 = vadd.f32 %v6567_v17, %v6487_v57 }
 0xe11   :  { %v8183_v35 = vmul.f32 -1.442695, %v6559_v15 }
 0xe12   :  { %v8184_v16 = vmul.f32 -1.442695, %v6569_v38 }
 0xe13   :  { %11982 = vpow2.f32 %v8183_v35 }
 0xe14   :  { %11984 = vpow2.f32 %v8184_v16 }
 0xe1d   :  { %v11983_v52 = vpop.eup %11982 }
 0xe1e   :  { %v6563_v26 = vadd.f32 1.0, %v11983_v52  ;;  %v11985_v30 = vpop.eup %11984  ;;  %v6746_v52 = vrot.slane %v6586_v33, 4 }
 0xe1f   :  { %v6573_v53 = vadd.f32 1.0, %v11985_v30 }
 0xe20   :  { %11986 = vrcp.f32 %v6563_v26 }
 0xe21   :  { %11988 = vrcp.f32 %v6573_v53 }
 0xe2a   :  { %v11987_v62 = vpop.eup %11986 }
 0xe2b   :  { %v6576_v13 = vmul.f32 %v11987_v62, %v6556_v18  ;;  %v11989_v31 = vpop.eup %11988 }
 0xe2c   :  { %v6581_v34 = vsub.f32 1.0, %v11989_v31  ;;  %v6583_v51 = vmul.f32 %v11989_v31, %v13944_v27 }
 0xe2d   :  { %v6579_v24 = vadd.f32 %v6577_v19, %v6576_v13 }
 0xe2f   :  { %11990 = vtanh.f32 %v6579_v24 }
 0xe39   :  { %v11991_v49 = vpop.eup %11990 }
 0xe3a   :  { %v6582_v50 = vmul.f32 %v11991_v49, %v6581_v34 }
 0xe3c   :  { %v13988_v41 = vadd.f32 %v6583_v51, %v6582_v50 }
 0xe3e   :  { %6585 = vst [vmem:[#allocation3 + $0x6] sm:$0x3] %v13988_v41  ;;  %6652 = vmatmul.mubr.f32.vlgmr.msra.gmra.mrb[56].mxu0 %v13988_v41  ;;  %9698 = vmatmul.mubr.f32.vlgmr.msra.gmra.mrb[56].mxu1 %v13988_v41 }
 0xe3f   :  { %11488 = vmatpush1.bf16.msra.mxu0 %v13585_v10  ;;  %11519 = vmatpush3.bf16.msra.mxu1 %v13587_v29 }
 0xe40   :  { %11490 = vmatprep.subr.bf16.mxu0 %v13590_v37  ;;  %11520 = vmatprep.subr.bf16.mxu1 %v12206_v0 }
 0xe41   :  { %6820 = vmatprep.mubr.f32.mxu0 %v12207_v1  ;;  %9732 = vmatprep.mubr.msk.f32.mxu1 %vm12208_vm0, %v12207_v1 }
 0xe43   :  { %11492 = vmatpush1.bf16.msra.mxu0 %v13594_v9  ;;  %11522 = vmatpush3.bf16.msra.mxu1 %v13597_v22 }
 0xe44   :  { %11494 = vmatprep.subr.bf16.mxu0 %v13600_v63  ;;  %11523 = vmatprep.subr.bf16.mxu1 %v12206_v0 }
 0xe45   :  { %v7280_v24 = vld [vmem:[#allocation3 + $0x6] sm:$0x3] }
 0xe47   :  { %11496 = vmatpush1.bf16.msra.mxu0 %v13607_v3  ;;  %11525 = vmatpush3.bf16.msra.mxu1 %v13610_v36 }
 0xe48   :  { %11498 = vmatprep.subr.bf16.mxu0 %v13613_v45  ;;  %11526 = vmatprep.subr.bf16.mxu1 %v12206_v0 }
 0xe4b   :  { %11500 = vmatpush1.bf16.msra.mxu0 %v13617_v12  ;;  %11528 = vmatpush3.bf16.msra.mxu1 %v13620_v21 }
 0xe4c   :  { %11502 = vmatprep.subr.bf16.mxu0 %v13623_v6  ;;  %11529 = vmatprep.subr.bf16.mxu1 %v12206_v0 }
 0xe4f   :  { %11504 = vmatpush1.bf16.msra.mxu0 %v13627_v44  ;;  %11531 = vmatpush3.bf16.msra.mxu1 %v13633_v39 }
 0xe50   :  { %11506 = vmatprep.subr.bf16.mxu0 %v13636_v40  ;;  %11532 = vmatprep.subr.bf16.mxu1 %v12206_v0 }
 0xe53   :  { %11508 = vmatpush1.bf16.msra.mxu0 %v13643_v7  ;;  %11534 = vmatpush3.bf16.msra.mxu1 %v13646_v23 }
 0xe54   :  { %11510 = vmatprep.subr.bf16.mxu0 %v13649_v28  ;;  %11535 = vmatprep.subr.bf16.mxu1 %v12206_v0 }
 0xe57   :  { %11512 = vmatpush1.bf16.msra.mxu0 %v13652_v20  ;;  %11537 = vmatpush3.bf16.msra.mxu1 %v13656_v11 }
 0xe58   :  { %11514 = vmatprep.subr.bf16.mxu0 %v13659_v61  ;;  %11538 = vmatprep.subr.bf16.mxu1 %v12206_v0 }
 0xe5b   :  { %11516 = vmatpush1.bf16.msra.mxu0 %v13662_v47  ;;  %11540 = vmatpush3.bf16.msra.mxu1 %v13668_v8 }
 0xe5c   :  { %11542 = vmatprep.subr.bf16.mxu0 %v13581_v4  ;;  %11573 = vmatprep.subr.bf16.mxu1 %v12206_v0 }
 0xf11   :  { %v6653_v58 = vpop.f32.mrb[56].mxu0  ;;  %v6724_v59 = vpop.f32.mrb[56].mxu1 }
 0xf12   :  { %v6654_v5 = vadd.f32 %v6653_v58, %v13845_v25  ;;  %v6655_v43 = vpop.f32.mrb[57].mxu0  ;;  %v9699_v14 = vpop.f32.mrb[57].mxu1  ;;  %v6725_v35 = vadd.f32 %v6724_v59, %v13853_v55 }
 0xf13   :  { %v6656_v27 = vadd.f32 %v6655_v43, %v13849_v54 }
 0xf14   :  { %v6728_v46 = vadd.f32 %v6654_v5, %v6586_v33 }
 0xf15   :  { %v6738_v32 = vadd.f32 %v6736_v60, %v6656_v27 }
 0xf16   :  { %v8185_v56 = vmul.f32 -1.442695, %v6728_v46 }
 0xf17   :  { %v8186_v42 = vmul.f32 -1.442695, %v6738_v32 }
 0xf18   :  { %11992 = vpow2.f32 %v8185_v56 }
 0xf19   :  { %11994 = vpow2.f32 %v8186_v42 }
 0xf22   :  { %v11993_v2 = vpop.eup %11992 }
 0xf23   :  { %v6732_v57 = vadd.f32 1.0, %v11993_v2  ;;  %v11995_v15 = vpop.eup %11994 }
 0xf24   :  { %v6742_v17 = vadd.f32 1.0, %v11995_v15 }
 0xf25   :  { %11996 = vrcp.f32 %v6732_v57 }
 0xf26   :  { %11998 = vrcp.f32 %v6742_v17 }
 0xf2f   :  { %v11997_v38 = vpop.eup %11996 }
 0xf30   :  { %v6745_v16 = vmul.f32 %v11997_v38, %v6725_v35  ;;  %v11999_v30 = vpop.eup %11998 }
 0xf31   :  { %v6750_v53 = vsub.f32 1.0, %v11999_v30  ;;  %v6752_v13 = vmul.f32 %v11999_v30, %v13988_v41  ;;  %v6755_v41 = vld [vmem:[#allocation2 + $0x1e] sm:$0x3f] }
 0xf32   :  { %v6748_v26 = vadd.f32 %v6746_v52, %v6745_v16  ;;  %v6905_v14 = vrot.slane %v6755_v41, 2  ;;  %v6915_v17 = vrot.slane %v6755_v41, 4 }
 0xf34   :  { %12000 = vtanh.f32 %v6748_v26 }
 0xf3e   :  { %v12001_v18 = vpop.eup %12000 }
 0xf3f   :  { %v6751_v62 = vmul.f32 %v12001_v18, %v6750_v53 }
 0xf41   :  { %v14032_v19 = vadd.f32 %v6752_v13, %v6751_v62 }
 0xf43   :  { %6754 = vst [vmem:[#allocation3 + $0x8] sm:$0x3] %v14032_v19  ;;  %6821 = vmatmul.mubr.f32.vlgmr.msra.gmra.mrb[58].mxu0 %v14032_v19  ;;  %9733 = vmatmul.mubr.f32.vlgmr.msra.gmra.mrb[58].mxu1 %v14032_v19 }
 0xf44   :  { %11544 = vmatpush1.bf16.msra.mxu0 %v13585_v10  ;;  %11575 = vmatpush3.bf16.msra.mxu1 %v13587_v29 }
 0xf45   :  { %11546 = vmatprep.subr.bf16.mxu0 %v13590_v37  ;;  %11576 = vmatprep.subr.bf16.mxu1 %v12206_v0 }
 0xf46   :  { %6989 = vmatprep.mubr.f32.mxu0 %v12207_v1  ;;  %9767 = vmatprep.mubr.msk.f32.mxu1 %vm12208_vm0, %v12207_v1 }
 0xf48   :  { %11548 = vmatpush1.bf16.msra.mxu0 %v13594_v9  ;;  %11578 = vmatpush3.bf16.msra.mxu1 %v13597_v22 }
 0xf49   :  { %11550 = vmatprep.subr.bf16.mxu0 %v13600_v63  ;;  %11579 = vmatprep.subr.bf16.mxu1 %v12206_v0 }
 0xf4a   :  { %v7281_v31 = vld [vmem:[#allocation3 + $0x8] sm:$0x3] }
 0xf4b   :  { %v7282_v34 = vsel %vm143_vm3, %v7280_v24, %v7281_v31  ;;  %v7284_v49 = vsel %vm143_vm3, %v7281_v31, %v7280_v24 }
 0xf4c   :  { %7285 = vst [vmem:[#allocation3 + $0x8] sm:$0x3] %v7284_v49  ;;  %7283 = vst [vmem:[#allocation3 + $0x6] sm:$0x3] %v7282_v34  ;;  %11552 = vmatpush1.bf16.msra.mxu0 %v13607_v3  ;;  %11581 = vmatpush3.bf16.msra.mxu1 %v13610_v36 }
 0xf4d   :  { %11554 = vmatprep.subr.bf16.mxu0 %v13613_v45  ;;  %11582 = vmatprep.subr.bf16.mxu1 %v12206_v0 }
 0xf50   :  { %11556 = vmatpush1.bf16.msra.mxu0 %v13617_v12  ;;  %11584 = vmatpush3.bf16.msra.mxu1 %v13620_v21 }
 0xf51   :  { %11558 = vmatprep.subr.bf16.mxu0 %v13623_v6  ;;  %11585 = vmatprep.subr.bf16.mxu1 %v12206_v0 }
 0xf54   :  { %11560 = vmatpush1.bf16.msra.mxu0 %v13627_v44  ;;  %11587 = vmatpush3.bf16.msra.mxu1 %v13633_v39 }
 0xf55   :  { %11562 = vmatprep.subr.bf16.mxu0 %v13636_v40  ;;  %11588 = vmatprep.subr.bf16.mxu1 %v12206_v0 }
 0xf58   :  { %11564 = vmatpush1.bf16.msra.mxu0 %v13643_v7  ;;  %11590 = vmatpush3.bf16.msra.mxu1 %v13646_v23 }
 0xf59   :  { %11566 = vmatprep.subr.bf16.mxu0 %v13649_v28  ;;  %11591 = vmatprep.subr.bf16.mxu1 %v12206_v0 }
 0xf5c   :  { %11568 = vmatpush1.bf16.msra.mxu0 %v13652_v20  ;;  %11593 = vmatpush3.bf16.msra.mxu1 %v13656_v11 }
 0xf5d   :  { %11570 = vmatprep.subr.bf16.mxu0 %v13659_v61  ;;  %11594 = vmatprep.subr.bf16.mxu1 %v12206_v0 }
 0xf60   :  { %11572 = vmatpush1.bf16.msra.mxu0 %v13662_v47  ;;  %11596 = vmatpush3.bf16.msra.mxu1 %v13668_v8 }
 0xf61   :  { %11598 = vmatprep.subr.bf16.mxu0 %v13581_v4  ;;  %11629 = vmatprep.subr.bf16.mxu1 %v12206_v0 }
0x1016   :  { %v6822_v50 = vpop.f32.mrb[58].mxu0  ;;  %v6893_v51 = vpop.f32.mrb[58].mxu1 }
0x1017   :  { %v6823_v58 = vadd.f32 %v6822_v50, %v13845_v25  ;;  %v6824_v59 = vpop.f32.mrb[59].mxu0  ;;  %v9734_v33 = vpop.f32.mrb[59].mxu1  ;;  %v6894_v2 = vadd.f32 %v6893_v51, %v13853_v55 }
0x1018   :  { %v6825_v5 = vadd.f32 %v6824_v59, %v13849_v54 }
0x1019   :  { %v6897_v43 = vadd.f32 %v6823_v58, %v6755_v41 }
0x101a   :  { %v6907_v46 = vadd.f32 %v6905_v14, %v6825_v5  ;;  %v7268_v5 = vld [vmem:[#allocation3 + $0x2] sm:$0x3] }
0x101b   :  { %v8187_v27 = vmul.f32 -1.442695, %v6897_v43 }
0x101c   :  { %v8188_v60 = vmul.f32 -1.442695, %v6907_v46 }
0x101d   :  { %12002 = vpow2.f32 %v8187_v27 }
0x101e   :  { %12004 = vpow2.f32 %v8188_v60 }
0x1027   :  { %v12003_v56 = vpop.eup %12002 }
0x1028   :  { %v6901_v4 = vadd.f32 1.0, %v12003_v56  ;;  %v12005_v32 = vpop.eup %12004  ;;  %v7093_v56 = vld [vmem:[#allocation2 + $0x2a] sm:$0x3f] }
0x1029   :  { %v6911_v42 = vadd.f32 1.0, %v12005_v32 }
0x102a   :  { %12006 = vrcp.f32 %v6901_v4 }
0x102b   :  { %12008 = vrcp.f32 %v6911_v42 }
0x1034   :  { %v12007_v57 = vpop.eup %12006 }
0x1035   :  { %v6914_v15 = vmul.f32 %v12007_v57, %v6894_v2  ;;  %v12009_v38 = vpop.eup %12008 }
0x1036   :  { %v6919_v16 = vsub.f32 1.0, %v12009_v38  ;;  %v6921_v30 = vmul.f32 %v12009_v38, %v14032_v19 }
0x1037   :  { %v6917_v35 = vadd.f32 %v6915_v17, %v6914_v15  ;;  %v7243_v15 = vrot.slane %v7093_v56, 2 }
0x1039   :  { %12010 = vtanh.f32 %v6917_v35 }
0x1043   :  { %v12011_v52 = vpop.eup %12010 }
0x1044   :  { %v6920_v26 = vmul.f32 %v12011_v52, %v6919_v16 }
0x1046   :  { %v14080_v53 = vadd.f32 %v6921_v30, %v6920_v26 }
0x1048   :  { %6923 = vst [vmem:[#allocation3 + $0xa] sm:$0x3] %v14080_v53  ;;  %6990 = vmatmul.mubr.f32.vlgmr.msra.gmra.mrb[60].mxu0 %v14080_v53  ;;  %9768 = vmatmul.mubr.f32.vlgmr.msra.gmra.mrb[60].mxu1 %v14080_v53 }
0x1049   :  { %11600 = vmatpush1.bf16.msra.mxu0 %v13585_v10  ;;  %11631 = vmatpush3.bf16.msra.mxu1 %v13587_v29  ;;  %v7274_v10 = vld [vmem:[#allocation3 + $0x4] sm:$0x3] }
0x104a   :  { %11602 = vmatprep.subr.bf16.mxu0 %v13590_v37  ;;  %11632 = vmatprep.subr.bf16.mxu1 %v12206_v0 }
0x104b   :  { %7158 = vmatprep.mubr.f32.mxu0 %v12207_v1  ;;  %9802 = vmatprep.mubr.msk.f32.mxu1 %vm12208_vm0, %v12207_v1 }
0x104d   :  { %11604 = vmatpush1.bf16.msra.mxu0 %v13594_v9  ;;  %11634 = vmatpush3.bf16.msra.mxu1 %v13597_v22 }
0x104e   :  { %11606 = vmatprep.subr.bf16.mxu0 %v13600_v63  ;;  %11635 = vmatprep.subr.bf16.mxu1 %v12206_v0  ;;  %v14114_v63 = vld [vmem:[#allocation3 + $0x6] sm:$0x3] }
0x104f   :  { %v7275_v18 = vld [vmem:[#allocation3 + $0xa] sm:$0x3] }
0x1050   :  { %v7276_v29 = vsel %vm143_vm3, %v7274_v10, %v7275_v18  ;;  %v7278_v37 = vsel %vm143_vm3, %v7275_v18, %v7274_v10  ;;  %v7253_v18 = vrot.slane %v7093_v56, 4 }
0x1051   :  { %7279 = vst [vmem:[#allocation3 + $0xa] sm:$0x3] %v7278_v37  ;;  %7277 = vst [vmem:[#allocation3 + $0x4] sm:$0x3] %v7276_v29  ;;  %11608 = vmatpush1.bf16.msra.mxu0 %v13607_v3  ;;  %11637 = vmatpush3.bf16.msra.mxu1 %v13610_v36  ;;  %v7304_v3 = vsel %vm7294_vm6, %v14114_v63, 0.0 }
0x1052   :  { %11610 = vmatprep.subr.bf16.mxu0 %v13613_v45  ;;  %11638 = vmatprep.subr.bf16.mxu1 %v12206_v0 }
0x1055   :  { %11612 = vmatpush1.bf16.msra.mxu0 %v13617_v12  ;;  %11640 = vmatpush3.bf16.msra.mxu1 %v13620_v21 }
0x1056   :  { %11614 = vmatprep.subr.bf16.mxu0 %v13623_v6  ;;  %11641 = vmatprep.subr.bf16.mxu1 %v12206_v0  ;;  %v6924_v6 = vld [vmem:[#allocation2 + $0x24] sm:$0x3f] }
0x1057   :  { %v7084_v34 = vrot.slane %v6924_v6, 4 }
0x1058   :  { %v14108_v9 = vld [vmem:[#allocation3 + $0x4] sm:$0x3]  ;;  %v14122_v36 = vld [vmem:[#allocation3 + $0xa] sm:$0x3] }
0x1059   :  { %v7301_v22 = vsel %vm7294_vm6, %v14108_v9, 0.0  ;;  %11616 = vmatpush1.bf16.msra.mxu0 %v13627_v44  ;;  %11643 = vmatpush3.bf16.msra.mxu1 %v13633_v39  ;;  %v7310_v45 = vsel %vm7294_vm6, %v14122_v36, 0.0 }
0x105a   :  { %7302 = vadd.xlane.f32.xlu1 %v7301_v22  ;;  %11618 = vmatprep.subr.bf16.mxu0 %v13636_v40 }
0x105b   :  { %11644 = vmatprep.subr.bf16.mxu1 %v12206_v0 }
0x105d   :  { %11620 = vmatpush1.bf16.msra.mxu0 %v13643_v7  ;;  %11646 = vmatpush3.bf16.msra.mxu1 %v13646_v23 }
0x105e   :  { %7305 = vadd.xlane.f32.xlu1 %v7304_v3  ;;  %11622 = vmatprep.subr.bf16.mxu0 %v13649_v28  ;;  %v7074_v28 = vrot.slane %v6924_v6, 2 }
0x105f   :  { %11647 = vmatprep.subr.bf16.mxu1 %v12206_v0 }
0x1061   :  { %11624 = vmatpush1.bf16.msra.mxu0 %v13652_v20  ;;  %11649 = vmatpush3.bf16.msra.mxu1 %v13656_v11 }
0x1062   :  { %7311 = vadd.xlane.f32.xlu1 %v7310_v45  ;;  %11626 = vmatprep.subr.bf16.mxu0 %v13659_v61 }
0x1063   :  { %11650 = vmatprep.subr.bf16.mxu1 %v12206_v0 }
0x1065   :  { %11628 = vmatpush1.bf16.msra.mxu0 %v13662_v47  ;;  %11652 = vmatpush3.bf16.msra.mxu1 %v13668_v8 }
0x1066   :  { %11653 = vmatprep.subr.bf16.mxu0 %v12206_v0  ;;  %11677 = vmatprep.subr.bf16.mxu1 %v12206_v0 }
0x111b   :  { %v6991_v12 = vpop.f32.mrb[60].mxu0  ;;  %v7062_v21 = vpop.f32.mrb[60].mxu1 }
0x111c   :  { %v6992_v44 = vadd.f32 %v6991_v12, %v13845_v25  ;;  %v6993_v39 = vpop.f32.mrb[61].mxu0  ;;  %v9769_v40 = vpop.f32.mrb[61].mxu1  ;;  %v7063_v19 = vadd.f32 %v7062_v21, %v13853_v55  ;;  %v7262_v21 = vld [vmem:[#allocation3] sm:$0x3] }
0x111d   :  { %v6994_v7 = vadd.f32 %v6993_v39, %v13849_v54 }
0x111e   :  { %v7066_v23 = vadd.f32 %v6992_v44, %v6924_v6 }
0x111f   :  { %v7076_v11 = vadd.f32 %v7074_v28, %v6994_v7  ;;  %v7290_v28 = vld [vmem:[#allocation3 + $0x8] sm:$0x3] }
0x1120   :  { %v8189_v20 = vmul.f32 -1.442695, %v7066_v23 }
0x1121   :  { %v8190_v61 = vmul.f32 -1.442695, %v7076_v11  ;;  %v7439_v11 = vld [vmem:[%s14533_s11] sm:$0xff] }
0x1122   :  { %12012 = vpow2.f32 %v8189_v20  ;;  %v7307_v20 = vsel %vm7294_vm6, %v7290_v28, 0.0 }
0x1123   :  { %12014 = vpow2.f32 %v8190_v61  ;;  %v7440_v61 = vld [vmem:[%s14533_s11 + $0x8] sm:$0xff] }
0x112c   :  { %v12013_v47 = vpop.eup %12012 }
0x112d   :  { %v7070_v8 = vadd.f32 1.0, %v12013_v47  ;;  %v12015_v62 = vpop.eup %12014  ;;  %v7441_v47 = vld [vmem:[%s14533_s11 + $0x10] sm:$0xff] }
0x112e   :  { %v7080_v13 = vadd.f32 1.0, %v12015_v62  ;;  %v7442_v62 = vld [vmem:[%s14533_s11 + $0x18] sm:$0xff] }
0x112f   :  { %12016 = vrcp.f32 %v7070_v8  ;;  %v14167_v8 = vpack.c.bf16 %v7440_v61, %v7439_v11  ;;  %v7453_v11 = vld [vmem:[%s14533_s11 + $0x70] sm:$0xff]  ;;  %v7454_v61 = vld [vmem:[%s14533_s11 + $0x78] sm:$0xff] }
0x1130   :  { %12018 = vrcp.f32 %v7080_v13  ;;  %v14173_v13 = vpack.c.bf16 %v7442_v62, %v7441_v47  ;;  %v14302_v47 = vpack.c.bf16 %v7454_v61, %v7453_v11 }
0x1139   :  { %v12017_v24 = vpop.eup %12016 }
0x113a   :  { %v7083_v31 = vmul.f32 %v12017_v24, %v7063_v19  ;;  %v12019_v50 = vpop.eup %12018  ;;  %v7443_v19 = vld [vmem:[%s14533_s11 + $0x20] sm:$0xff]  ;;  %v7444_v24 = vld [vmem:[%s14533_s11 + $0x28] sm:$0xff] }
0x113b   :  { %v7088_v51 = vsub.f32 1.0, %v12019_v50  ;;  %v7090_v59 = vmul.f32 %v12019_v50, %v14080_v53 }
0x113c   :  { %v7086_v49 = vadd.f32 %v7084_v34, %v7083_v31  ;;  %v14185_v31 = vpack.c.bf16 %v7444_v24, %v7443_v19  ;;  %v7303_v34 = vpop.xlane.xlu1 %7302 }
0x113e   :  { %12020 = vtanh.f32 %v7086_v49  ;;  %v7321_v49 = vmul.f32 0.015625, %v7303_v34 }
0x1140   :  { %v7306_v50 = vpop.xlane.xlu1 %7305 }
0x1148   :  { %v12021_v41 = vpop.eup %12020 }
0x1149   :  { %v7089_v58 = vmul.f32 %v12021_v41, %v7088_v51 }
0x114b   :  { %v7091_v33 = vadd.f32 %v7090_v59, %v7089_v58  ;;  %v7329_v59 = vsub.f32 %v14108_v9, %v7321_v49 }
0x114d   :  { %7092 = vst [vmem:[#allocation3 + $0xc] sm:$0x3] %v7091_v33  ;;  %7159 = vmatmul.mubr.f32.vlgmr.msra.gmra.mrb[62].mxu0 %v7091_v33  ;;  %9803 = vmatmul.mubr.f32.vlgmr.msra.gmra.mrb[62].mxu1 %v7091_v33  ;;  %v14205_v9 = vsel %vm147_vm7, %v7329_v59, 0.0 }
0x114e   :  { %9837 = vmatprep.mubr.msk.f32.mxu0 %vm12208_vm0, %v12207_v1  ;;  %9872 = vmatprep.mubr.msk.f32.mxu1 %vm12208_vm0, %v12207_v1 }
0x114f   :  { %11655 = vmatpush3.bf16.msra.mxu0 %v14167_v8  ;;  %11679 = vmatpush3.bf16.msra.mxu1 %v14167_v8 }
0x1150   :  { %11656 = vmatprep.subr.bf16.mxu0 %v12206_v0  ;;  %11680 = vmatprep.subr.bf16.mxu1 %v12206_v0 }
0x1153   :  { %11658 = vmatpush3.bf16.msra.mxu0 %v14173_v13  ;;  %11682 = vmatpush3.bf16.msra.mxu1 %v14173_v13 }
0x1154   :  { %v7269_v43 = vld [vmem:[#allocation3 + $0xc] sm:$0x3]  ;;  %11659 = vmatprep.subr.bf16.mxu0 %v12206_v0  ;;  %11683 = vmatprep.subr.bf16.mxu1 %v12206_v0 }
0x1155   :  { %v7270_v14 = vsel %vm143_vm3, %v7268_v5, %v7269_v43  ;;  %v7272_v27 = vsel %vm143_vm3, %v7269_v43, %v7268_v5  ;;  %v7322_v5 = vmul.f32 0.015625, %v7306_v50 }
0x1156   :  { %7273 = vst [vmem:[#allocation3 + $0xc] sm:$0x3] %v7272_v27  ;;  %7271 = vst [vmem:[#allocation3 + $0x2] sm:$0x3] %v7270_v14  ;;  %v7312_v27 = vpop.xlane.xlu1 %7311 }
0x1157   :  { %11661 = vmatpush3.bf16.msra.mxu0 %v14185_v31  ;;  %11685 = vmatpush3.bf16.msra.mxu1 %v14185_v31 }
0x1158   :  { %11662 = vmatprep.subr.bf16.mxu0 %v12206_v0  ;;  %11686 = vmatprep.subr.bf16.mxu1 %v12206_v0 }
0x115d   :  { %v7287_v7 = vld [vmem:[#allocation3 + $0x2] sm:$0x3] }
0x115e   :  { %v7298_v23 = vsel %vm7294_vm6, %v7287_v7, 0.0 }
0x1220   :  { %v7160_v46 = vpop.f32.mrb[62].mxu0  ;;  %v7231_v60 = vpop.f32.mrb[62].mxu1 }
0x1221   :  { %v7161_v4 = vadd.f32 %v7160_v46, %v13845_v25  ;;  %v7162_v32 = vpop.f32.mrb[63].mxu0  ;;  %v9804_v42 = vpop.f32.mrb[63].mxu1  ;;  %v7232_v53 = vadd.f32 %v7231_v60, %v13853_v55 }
0x1222   :  { %v7163_v2 = vadd.f32 %v7162_v32, %v13849_v54  ;;  %v7330_v32 = vsub.f32 %v14114_v63, %v7322_v5  ;;  %v7324_v42 = vmul.f32 0.015625, %v7312_v27  ;;  %v7347_v63 = vmul.f32 %v14205_v9, %v14205_v9 }
0x1223   :  { %v7235_v57 = vadd.f32 %v7161_v4, %v7093_v56 }
0x1224   :  { %v7245_v35 = vadd.f32 %v7243_v15, %v7163_v2 }
0x1225   :  { %v8191_v17 = vmul.f32 -1.442695, %v7235_v57  ;;  %v14208_v57 = vld [vmem:[#allocation3 + $0xc] sm:$0x3] }
0x1226   :  { %v8192_v38 = vmul.f32 -1.442695, %v7245_v35 }
0x1227   :  { %12022 = vpow2.f32 %v8191_v17 }
0x1228   :  { %12024 = vpow2.f32 %v8192_v38  ;;  %v7313_v38 = vsel %vm7294_vm6, %v14208_v57, 0.0 }
0x1231   :  { %v12023_v16 = vpop.eup %12022 }
0x1232   :  { %v7239_v52 = vadd.f32 1.0, %v12023_v16  ;;  %v12025_v26 = vpop.eup %12024 }
0x1233   :  { %v7249_v30 = vadd.f32 1.0, %v12025_v26 }
0x1234   :  { %12026 = vrcp.f32 %v7239_v52  ;;  %v7332_v52 = vsub.f32 %v14122_v36, %v7324_v42 }
0x1235   :  { %12028 = vrcp.f32 %v7249_v30  ;;  %v14226_v30 = vsel %vm147_vm7, %v7330_v32, 0.0  ;;  %v14326_v32 = vld [vmem:[%s14531_s9] ss:$0 sm:$0xff] }
0x1236   :  { %v7348_v36 = vmul.f32 %v14226_v30, %v14226_v30 }
0x123e   :  { %v12027_v10 = vpop.eup %12026 }
0x123f   :  { %v7252_v25 = vmul.f32 %v12027_v10, %v7232_v53  ;;  %v12029_v54 = vpop.eup %12028  ;;  %v7359_v10 = vsel %vm7294_vm6, %v7347_v63, 0.0 }
0x1240   :  { %v7257_v37 = vsub.f32 1.0, %v12029_v54  ;;  %v7259_v45 = vmul.f32 %v12029_v54, %v7091_v33  ;;  %v7362_v54 = vsel %vm7294_vm6, %v7348_v36, 0.0 }
0x1241   :  { %v7255_v29 = vadd.f32 %v7253_v18, %v7252_v25 }
0x1243   :  { %12030 = vtanh.f32 %v7255_v29  ;;  %v14241_v29 = vsel %vm147_vm7, %v7332_v52, 0.0 }
0x124d   :  { %v12031_v22 = vpop.eup %12030 }
0x124e   :  { %v7258_v3 = vmul.f32 %v12031_v22, %v7257_v37  ;;  %v7350_v22 = vmul.f32 %v14241_v29, %v14241_v29 }
0x1250   :  { %v7260_v12 = vadd.f32 %v7259_v45, %v7258_v3  ;;  %v7445_v3 = vld [vmem:[%s14533_s11 + $0x30] sm:$0xff]  ;;  %v7446_v45 = vld [vmem:[%s14533_s11 + $0x38] sm:$0xff] }
0x1252   :  { %7261 = vst [vmem:[#allocation3 + $0xe] sm:$0x3] %v7260_v12  ;;  %v7368_v12 = vsel %vm7294_vm6, %v7350_v22, 0.0 }
0x1259   :  { %v7263_v6 = vld [vmem:[#allocation3 + $0xe] sm:$0x3] }
0x125a   :  { %v7264_v44 = vsel %vm143_vm3, %v7262_v21, %v7263_v6  ;;  %v7266_v55 = vsel %vm143_vm3, %v7263_v6, %v7262_v21  ;;  %v14254_v21 = vpack.c.bf16 %v7446_v45, %v7445_v3  ;;  %v7447_v6 = vld [vmem:[%s14533_s11 + $0x40] sm:$0xff] }
0x125b   :  { %7265 = vst [vmem:[#allocation3] sm:$0x3] %v7264_v44  ;;  %7267 = vst [vmem:[#allocation3 + $0xe] sm:$0x3] %v7266_v55  ;;  %v7448_v44 = vld [vmem:[%s14533_s11 + $0x48] sm:$0xff] }
0x125c   :  { %11664 = vmatpush3.bf16.msra.mxu0 %v14254_v21  ;;  %11688 = vmatpush3.bf16.msra.mxu1 %v14254_v21  ;;  %v14266_v55 = vpack.c.bf16 %v7448_v44, %v7447_v6 }
0x125d   :  { %11665 = vmatprep.subr.bf16.mxu0 %v12206_v0  ;;  %11689 = vmatprep.subr.bf16.mxu1 %v12206_v0 }
0x1260   :  { %11667 = vmatpush3.bf16.msra.mxu0 %v14266_v55  ;;  %11691 = vmatpush3.bf16.msra.mxu1 %v14266_v55 }
0x1261   :  { %11668 = vmatprep.subr.bf16.mxu0 %v12206_v0  ;;  %11692 = vmatprep.subr.bf16.mxu1 %v12206_v0 }
0x1262   :  { %v7286_v39 = vld [vmem:[#allocation3] sm:$0x3]  ;;  %v14222_v26 = vld [vmem:[#allocation3 + $0xe] sm:$0x3] }
0x1263   :  { %v7295_v40 = vsel %vm7294_vm6, %v7286_v39, 0.0  ;;  %v7316_v25 = vsel %vm7294_vm6, %v14222_v26, 0.0 }
0x1264   :  { %7296 = vadd.xlane.f32.xlu0 %v7295_v40  ;;  %v7450_v40 = vld [vmem:[%s14533_s11 + $0x58] sm:$0xff] }
0x1268   :  { %7299 = vadd.xlane.f32.xlu0 %v7298_v23  ;;  %v7451_v23 = vld [vmem:[%s14533_s11 + $0x60] sm:$0xff] }
0x126c   :  { %7308 = vadd.xlane.f32.xlu0 %v7307_v20 }
0x12f1   :  { %v7297_v51 = vpop.xlane.xlu0 %7296 }
0x12f2   :  { %v7319_v41 = vmul.f32 0.015625, %v7297_v51 }
0x12f4   :  { %v7327_v58 = vsub.f32 %v7286_v39, %v7319_v41  ;;  %v7449_v39 = vld [vmem:[%s14533_s11 + $0x50] sm:$0xff] }
0x12f5   :  { %v7300_v33 = vpop.xlane.xlu0 %7299 }
0x12f6   :  { %v7320_v43 = vmul.f32 0.015625, %v7300_v33  ;;  %v14198_v14 = vsel %vm147_vm7, %v7327_v58, 0.0 }
0x12f7   :  { %v7345_v46 = vmul.f32 %v14198_v14, %v14198_v14 }
0x12f8   :  { %v7328_v60 = vsub.f32 %v7287_v7, %v7320_v43  ;;  %v14278_v7 = vpack.c.bf16 %v7450_v40, %v7449_v39 }
0x12f9   :  { %v7309_v56 = vpop.xlane.xlu0 %7308  ;;  %v7353_v4 = vsel %vm7294_vm6, %v7345_v46, 0.0 }
0x12fa   :  { %v7323_v2 = vmul.f32 0.015625, %v7309_v56  ;;  %7354 = vadd.xlane.f32.xlu0 %v7353_v4  ;;  %v14212_v15 = vsel %vm147_vm7, %v7328_v60, 0.0  ;;  %11670 = vmatpush3.bf16.msra.mxu0 %v14278_v7 }
0x12fb   :  { %v7346_v17 = vmul.f32 %v14212_v15, %v14212_v15  ;;  %11694 = vmatpush3.bf16.msra.mxu1 %v14278_v7  ;;  %11671 = vmatprep.subr.bf16.mxu0 %v12206_v0 }
0x12fc   :  { %v7331_v35 = vsub.f32 %v7290_v28, %v7323_v2  ;;  %v7452_v28 = vld [vmem:[%s14533_s11 + $0x68] sm:$0xff]  ;;  %11695 = vmatprep.subr.bf16.mxu1 %v12206_v0 }
0x12fd   :  { %v7356_v16 = vsel %vm7294_vm6, %v7346_v17, 0.0  ;;  %v14290_v20 = vpack.c.bf16 %v7452_v28, %v7451_v23 }
0x12fe   :  { %7314 = vadd.xlane.f32.xlu0 %v7313_v38  ;;  %7357 = vadd.xlane.f32.xlu1 %v7356_v16  ;;  %v14230_v53 = vsel %vm147_vm7, %v7331_v35, 0.0 }
0x12ff   :  { %v7349_v18 = vmul.f32 %v14230_v53, %v14230_v53  ;;  %11673 = vmatpush3.bf16.msra.mxu0 %v14290_v20  ;;  %11697 = vmatpush3.bf16.msra.mxu1 %v14290_v20 }
0x1300   :  { %11674 = vmatprep.subr.bf16.mxu0 %v12206_v0  ;;  %11698 = vmatprep.subr.bf16.mxu1 %v12206_v0 }
0x1301   :  { %v7365_v37 = vsel %vm7294_vm6, %v7349_v18, 0.0 }
0x1302   :  { %7360 = vadd.xlane.f32.xlu0 %v7359_v10  ;;  %7317 = vadd.xlane.f32.xlu1 %v7316_v25 }
0x1303   :  { %11676 = vmatpush3.bf16.msra.mxu0 %v14302_v47  ;;  %11700 = vmatpush3.bf16.msra.mxu1 %v14302_v47 }
0x1304   :  { %11701 = vmatprep.subr.bf16.mxu0 %v12206_v0  ;;  %11725 = vmatprep.subr.bf16.mxu1 %v12206_v0 }
0x1306   :  { %7363 = vadd.xlane.f32.xlu1 %v7362_v54  ;;  %7366 = vadd.xlane.f32.xlu0 %v7365_v37 }
0x130a   :  { %7369 = vadd.xlane.f32.xlu1 %v7368_v12 }
0x1387   :  { %v7355_v62 = vpop.xlane.xlu0 %7354 }
0x1388   :  { %v7377_v19 = vmul.f32 0.015625, %v7355_v62 }
0x138a   :  { %v7385_v24 = vadd.f32 1e-05, %v7377_v19 }
0x138b   :  { %v7358_v34 = vpop.xlane.xlu1 %7357  ;;  %v7315_v49 = vpop.xlane.xlu0 %7314 }
0x138c   :  { %12032 = vrsqrt.f32 %v7385_v24  ;;  %v7378_v50 = vmul.f32 0.015625, %v7358_v34  ;;  %v7325_v51 = vmul.f32 0.015625, %v7315_v49 }
0x138e   :  { %v7386_v41 = vadd.f32 1e-05, %v7378_v50  ;;  %v7333_v58 = vsub.f32 %v14208_v57, %v7325_v51  ;;  %v8195_v51 = vld [vmem:[%s14534_s12] ss:$0 sm:$0xff]  ;;  %s12210_s12 = smov [#allocation12]  }
0x138f   :  { %v7318_v59 = vpop.xlane.xlu1 %7317  ;;  %v7361_v35 = vpop.xlane.xlu0 %7360 }
0x1390   :  { %12034 = vrsqrt.f32 %v7386_v41  ;;  %v7326_v33 = vmul.f32 0.015625, %v7318_v59  ;;  %v14311_v5 = vsel %vm147_vm7, %v7333_v58, 0.0 }
0x1391   :  { %v7351_v43 = vmul.f32 %v14311_v5, %v14311_v5 }
0x1392   :  { %v7334_v27 = vsub.f32 %v14222_v26, %v7326_v33 }
0x1393   :  { %v7371_v46 = vsel %vm7294_vm6, %v7351_v43, 0.0  ;;  %v7364_v52 = vpop.xlane.xlu1 %7363  ;;  %v7367_v3 = vpop.xlane.xlu0 %7366 }
0x1394   :  { %7372 = vadd.xlane.f32.xlu0 %v7371_v46  ;;  %v14319_v60 = vsel %vm147_vm7, %v7334_v27, 0.0  ;;  %v7381_v12 = vmul.f32 0.015625, %v7367_v3  ;;  %v8196_v27 = vld [vmem:[%s14535_s13] ss:$0 sm:$0xff]  ;;  %s8134_s13 = sshll.u32 %s12210_s12, 4  ;;  %s8135_s13 = int_to_ptr.vmem [resolvable:$true] %s8134_s13 }
0x1395   :  { %v7352_v56 = vmul.f32 %v14319_v60, %v14319_v60  ;;  %s12170_s0 = scalar_lea.vmem %s8135_s13, 32  ;;  %p12175_p5 = scmp.lt.s32.totalorder %s8135_s13, %s8135_s13 }
0x1396   :  { %v12033_v4 = vpop.eup %12032  ;;  %v7389_v44 = vadd.f32 1e-05, %v7381_v12  ;;  %p12171_p4 = scmp.ne.s32.totalorder %s8135_s13, %s12170_s0  ;;  %p12176_p6 = scmp.lt.s32.totalorder %s12170_s0, %s12170_s0 }
0x1397   :  { %v7374_v42 = vsel %vm7294_vm6, %v7352_v56, 0.0  ;;  %v7401_v2 = vmul.f32 %v12033_v4, %v14198_v14  ;;  %v7379_v14 = vmul.f32 0.015625, %v7361_v35 }
0x1398   :  { %7375 = vadd.xlane.f32.xlu1 %v7374_v42  ;;  %p12177_p7 = por %p12176_p6, %p12175_p5 }
0x1399   :  { %v7416_v57 = vmul.f32 %v14326_v32, %v7401_v2  ;;  %v7387_v10 = vadd.f32 1e-05, %v7379_v14 }
0x139a   :  { %v12035_v17 = vpop.eup %12034  ;;  %p12178_p8 = pnand %p12177_p7, %p12171_p4 }
0x139b   :  { %v14337_v38 = vadd.f32 %v14333_v48, %v7416_v57  ;;  %v7402_v16 = vmul.f32 %v12035_v17, %v14212_v15  ;;  %v7380_v15 = vmul.f32 0.015625, %v7364_v52  ;;  %12036 = vrsqrt.f32 %v7387_v10 }
0x139d   :  { %9838 = vmatmul.mubr.f32.vlgmr.msra.gmra.mrb[64].mxu0 %v14337_v38  ;;  %v7417_v63 = vmul.f32 %v14326_v32, %v7402_v16  ;;  %v7388_v25 = vadd.f32 1e-05, %v7380_v15 }
0x139e   :  { %11703 = vmatpush3.bf16.msra.mxu0 %v14167_v8  ;;  %9907 = vmatprep.mubr.msk.f32.mxu0 %vm12208_vm0, %v12207_v1 }
0x139f   :  { %11704 = vmatprep.subr.bf16.mxu0 %v12206_v0  ;;  %v14347_v26 = vadd.f32 %v14333_v48, %v7417_v63  ;;  %12038 = vrsqrt.f32 %v7388_v25 }
0x13a0   :  { %12040 = vrsqrt.f32 %v7389_v44 }
0x13a1   :  { %9873 = vmatmul.mubr.f32.vlgmr.msra.gmra.mrb[64].mxu1 %v14347_v26 }
0x13a2   :  { %11706 = vmatpush3.bf16.msra.mxu0 %v14173_v13  ;;  %11727 = vmatpush3.bf16.msra.mxu1 %v14167_v8 }
0x13a3   :  { %11707 = vmatprep.subr.bf16.mxu0 %v12206_v0  ;;  %11728 = vmatprep.subr.bf16.mxu1 %v12206_v0 }
0x13a4   :  { %9942 = vmatprep.mubr.msk.f32.mxu1 %vm12208_vm0, %v12207_v1 }
0x13a5   :  { %v12037_v36 = vpop.eup %12036 }
0x13a6   :  { %11709 = vmatpush3.bf16.msra.mxu0 %v14185_v31  ;;  %11730 = vmatpush3.bf16.msra.mxu1 %v14173_v13  ;;  %v7403_v18 = vmul.f32 %v12037_v36, %v14205_v9 }
0x13a7   :  { %11710 = vmatprep.subr.bf16.mxu0 %v12206_v0  ;;  %11731 = vmatprep.subr.bf16.mxu1 %v12206_v0 }
0x13a8   :  { %v7418_v37 = vmul.f32 %v14326_v32, %v7403_v18 }
0x13a9   :  { %v12039_v54 = vpop.eup %12038 }
0x13aa   :  { %11712 = vmatpush3.bf16.msra.mxu0 %v14254_v21  ;;  %11733 = vmatpush3.bf16.msra.mxu1 %v14185_v31  ;;  %v7404_v22 = vmul.f32 %v12039_v54, %v14226_v30  ;;  %v14382_v9 = vadd.f32 %v14333_v48, %v7418_v37  ;;  %v7370_v30 = vpop.xlane.xlu1 %7369  ;;  %v12041_v23 = vpop.eup %12040 }
0x13ab   :  { %11713 = vmatprep.subr.bf16.mxu0 %v12206_v0  ;;  %11734 = vmatprep.subr.bf16.mxu1 %v12206_v0  ;;  %v7382_v39 = vmul.f32 0.015625, %v7370_v30  ;;  %v7405_v28 = vmul.f32 %v12041_v23, %v14230_v53 }
0x13ac   :  { %v7419_v45 = vmul.f32 %v14326_v32, %v7404_v22 }
0x13ad   :  { %v7390_v40 = vadd.f32 1e-05, %v7382_v39  ;;  %v7420_v61 = vmul.f32 %v14326_v32, %v7405_v28 }
0x13ae   :  { %11715 = vmatpush3.bf16.msra.mxu0 %v14266_v55  ;;  %11736 = vmatpush3.bf16.msra.mxu1 %v14254_v21  ;;  %v14391_v6 = vadd.f32 %v14333_v48, %v7419_v45 }
0x13af   :  { %11716 = vmatprep.subr.bf16.mxu0 %v12206_v0  ;;  %11737 = vmatprep.subr.bf16.mxu1 %v12206_v0  ;;  %12042 = vrsqrt.f32 %v7390_v40  ;;  %v14430_v19 = vadd.f32 %v14333_v48, %v7420_v61 }
0x13b2   :  { %11718 = vmatpush3.bf16.msra.mxu0 %v14278_v7  ;;  %11739 = vmatpush3.bf16.msra.mxu1 %v14266_v55 }
0x13b3   :  { %11719 = vmatprep.subr.bf16.mxu0 %v12206_v0  ;;  %11740 = vmatprep.subr.bf16.mxu1 %v12206_v0 }
0x13b6   :  { %11721 = vmatpush3.bf16.msra.mxu0 %v14290_v20  ;;  %11742 = vmatpush3.bf16.msra.mxu1 %v14278_v7 }
0x13b7   :  { %11722 = vmatprep.subr.bf16.mxu0 %v12206_v0  ;;  %11743 = vmatprep.subr.bf16.mxu1 %v12206_v0 }
0x13b9   :  { %v12043_v11 = vpop.eup %12042 }
0x13ba   :  { %11724 = vmatpush3.bf16.msra.mxu0 %v14302_v47  ;;  %11745 = vmatpush3.bf16.msra.mxu1 %v14290_v20  ;;  %v7406_v62 = vmul.f32 %v12043_v11, %v14241_v29 }
0x13bb   :  { %11746 = vmatprep.subr.bf16.mxu1 %v12206_v0  ;;  %11749 = vmatprep.subr.bf16.mxu0 %v12206_v0 }
0x13bc   :  { %v7421_v53 = vmul.f32 %v14326_v32, %v7406_v62 }
0x13bd   :  { %9908 = vmatmul.mubr.f32.vlgmr.msra.gmra.mrb[66].mxu0 %v14382_v9 }
0x13be   :  { %11748 = vmatpush3.bf16.msra.mxu1 %v14302_v47  ;;  %11751 = vmatpush3.bf16.msra.mxu0 %v14167_v8  ;;  %v14439_v29 = vadd.f32 %v14333_v48, %v7421_v53 }
0x13bf   :  { %11752 = vmatprep.subr.bf16.mxu0 %v12206_v0  ;;  %11773 = vmatprep.subr.bf16.mxu1 %v12206_v0 }
0x13c0   :  { %9977 = vmatprep.mubr.msk.f32.mxu0 %vm12208_vm0, %v12207_v1 }
0x13c1   :  { %9943 = vmatmul.mubr.f32.vlgmr.msra.gmra.mrb[66].mxu1 %v14391_v6 }
0x13c2   :  { %11754 = vmatpush3.bf16.msra.mxu0 %v14173_v13  ;;  %11775 = vmatpush3.bf16.msra.mxu1 %v14167_v8 }
0x13c3   :  { %11755 = vmatprep.subr.bf16.mxu0 %v12206_v0  ;;  %11776 = vmatprep.subr.bf16.mxu1 %v12206_v0 }
0x13c4   :  { %10012 = vmatprep.mubr.msk.f32.mxu1 %vm12208_vm0, %v12207_v1 }
0x13c6   :  { %11757 = vmatpush3.bf16.msra.mxu0 %v14185_v31  ;;  %11778 = vmatpush3.bf16.msra.mxu1 %v14173_v13 }
0x13c7   :  { %11758 = vmatprep.subr.bf16.mxu0 %v12206_v0  ;;  %11779 = vmatprep.subr.bf16.mxu1 %v12206_v0 }
0x13ca   :  { %11760 = vmatpush3.bf16.msra.mxu0 %v14254_v21  ;;  %11781 = vmatpush3.bf16.msra.mxu1 %v14185_v31 }
0x13cb   :  { %11761 = vmatprep.subr.bf16.mxu0 %v12206_v0  ;;  %11782 = vmatprep.subr.bf16.mxu1 %v12206_v0 }
0x13ce   :  { %11763 = vmatpush3.bf16.msra.mxu0 %v14266_v55  ;;  %11784 = vmatpush3.bf16.msra.mxu1 %v14254_v21 }
0x13cf   :  { %11764 = vmatprep.subr.bf16.mxu0 %v12206_v0  ;;  %11785 = vmatprep.subr.bf16.mxu1 %v12206_v0 }
0x13d2   :  { %11766 = vmatpush3.bf16.msra.mxu0 %v14278_v7  ;;  %11787 = vmatpush3.bf16.msra.mxu1 %v14266_v55 }
0x13d3   :  { %11767 = vmatprep.subr.bf16.mxu0 %v12206_v0  ;;  %11788 = vmatprep.subr.bf16.mxu1 %v12206_v0 }
0x13d6   :  { %11769 = vmatpush3.bf16.msra.mxu0 %v14290_v20  ;;  %11790 = vmatpush3.bf16.msra.mxu1 %v14278_v7 }
0x13d7   :  { %11770 = vmatprep.subr.bf16.mxu0 %v12206_v0  ;;  %11791 = vmatprep.subr.bf16.mxu1 %v12206_v0 }
0x13da   :  { %11772 = vmatpush3.bf16.msra.mxu0 %v14302_v47  ;;  %11793 = vmatpush3.bf16.msra.mxu1 %v14290_v20 }
0x13db   :  { %11794 = vmatprep.subr.bf16.mxu1 %v12206_v0  ;;  %11797 = vmatprep.subr.bf16.mxu0 %v12206_v0 }
0x13dd   :  { %9978 = vmatmul.mubr.f32.vlgmr.msra.gmra.mrb[68].mxu0 %v14430_v19 }
0x13de   :  { %11796 = vmatpush3.bf16.msra.mxu1 %v14302_v47  ;;  %11799 = vmatpush3.bf16.msra.mxu0 %v14167_v8 }
0x13df   :  { %11800 = vmatprep.subr.bf16.mxu0 %v12206_v0  ;;  %11821 = vmatprep.subr.bf16.mxu1 %v12206_v0 }
0x13e0   :  { %10047 = vmatprep.mubr.msk.f32.mxu0 %vm12208_vm0, %v12207_v1 }
0x13e1   :  { %10013 = vmatmul.mubr.f32.vlgmr.msra.gmra.mrb[68].mxu1 %v14439_v29 }
0x13e2   :  { %11802 = vmatpush3.bf16.msra.mxu0 %v14173_v13  ;;  %11823 = vmatpush3.bf16.msra.mxu1 %v14167_v8 }
0x13e3   :  { %11803 = vmatprep.subr.bf16.mxu0 %v12206_v0  ;;  %11824 = vmatprep.subr.bf16.mxu1 %v12206_v0 }
0x13e4   :  { %10082 = vmatprep.mubr.msk.f32.mxu1 %vm12208_vm0, %v12207_v1 }
0x13e6   :  { %11805 = vmatpush3.bf16.msra.mxu0 %v14185_v31  ;;  %11826 = vmatpush3.bf16.msra.mxu1 %v14173_v13 }
0x13e7   :  { %11806 = vmatprep.subr.bf16.mxu0 %v12206_v0  ;;  %11827 = vmatprep.subr.bf16.mxu1 %v12206_v0 }
0x13ea   :  { %11808 = vmatpush3.bf16.msra.mxu0 %v14254_v21  ;;  %11829 = vmatpush3.bf16.msra.mxu1 %v14185_v31 }
0x13eb   :  { %11809 = vmatprep.subr.bf16.mxu0 %v12206_v0  ;;  %11830 = vmatprep.subr.bf16.mxu1 %v12206_v0 }
0x13ee   :  { %11811 = vmatpush3.bf16.msra.mxu0 %v14266_v55  ;;  %11832 = vmatpush3.bf16.msra.mxu1 %v14254_v21 }
0x13ef   :  { %11812 = vmatprep.subr.bf16.mxu0 %v12206_v0  ;;  %11833 = vmatprep.subr.bf16.mxu1 %v12206_v0 }
0x13f2   :  { %11814 = vmatpush3.bf16.msra.mxu0 %v14278_v7  ;;  %11835 = vmatpush3.bf16.msra.mxu1 %v14266_v55 }
0x13f3   :  { %11815 = vmatprep.subr.bf16.mxu0 %v12206_v0  ;;  %11836 = vmatprep.subr.bf16.mxu1 %v12206_v0 }
0x13f6   :  { %11817 = vmatpush3.bf16.msra.mxu0 %v14290_v20  ;;  %11838 = vmatpush3.bf16.msra.mxu1 %v14278_v7 }
0x13f7   :  { %11818 = vmatprep.subr.bf16.mxu0 %v12206_v0  ;;  %11839 = vmatprep.subr.bf16.mxu1 %v12206_v0 }
0x13fa   :  { %11820 = vmatpush3.bf16.msra.mxu0 %v14302_v47  ;;  %11841 = vmatpush3.bf16.msra.mxu1 %v14290_v20 }
0x13fb   :  { %11842 = vmatprep.subr.bf16.mxu1 %v12206_v0 }
0x13fe   :  { %11844 = vmatpush3.bf16.msra.mxu1 %v14302_v47 }
0x1421   :  { %v7373_v1 = vpop.xlane.xlu0 %7372 }
0x1422   :  { %v7383_v8 = vmul.f32 0.015625, %v7373_v1 }
0x1424   :  { %v7391_v13 = vadd.f32 1e-05, %v7383_v8 }
0x1425   :  { %v7376_v31 = vpop.xlane.xlu1 %7375 }
0x1426   :  { %12044 = vrsqrt.f32 %v7391_v13  ;;  %v7384_v21 = vmul.f32 0.015625, %v7376_v31 }
0x1428   :  { %v7392_v55 = vadd.f32 1e-05, %v7384_v21 }
0x142a   :  { %12046 = vrsqrt.f32 %v7392_v55 }
0x1430   :  { %v12045_v7 = vpop.eup %12044 }
0x1431   :  { %v7407_v24 = vmul.f32 %v12045_v7, %v14311_v5 }
0x1433   :  { %v7422_v34 = vmul.f32 %v14326_v32, %v7407_v24 }
0x1434   :  { %v12047_v49 = vpop.eup %12046 }
0x1435   :  { %v14479_v20 = vadd.f32 %v14333_v48, %v7422_v34  ;;  %v7408_v0 = vmul.f32 %v12047_v49, %v14319_v60 }
0x1437   :  { %10048 = vmatmul.mubr.f32.vlgmr.msra.gmra.mrb[70].mxu0 %v14479_v20  ;;  %v7423_v47 = vmul.f32 %v14326_v32, %v7408_v0 }
0x1439   :  { %v14485_v50 = vadd.f32 %v14333_v48, %v7423_v47 }
0x143b   :  { %10083 = vmatmul.mubr.f32.vlgmr.msra.gmra.mrb[70].mxu1 %v14485_v50 }
0x1470   :  { %v7528_v41 = vpop.f32.mrb[64].mxu0 }
0x1471   :  { %v7529_v58 = vadd.f32 %v8195_v51, %v7528_v41  ;;  %v9839_v59 = vpop.f32.mrb[65].mxu0 }
0x1473   :  { %12048 = vtanh.f32 %v7529_v58 }
0x1474   :  { %v7611_v33 = vpop.f32.mrb[64].mxu1 }
0x1475   :  { %v7612_v5 = vadd.f32 %v8195_v51, %v7611_v33  ;;  %v9874_v43 = vpop.f32.mrb[65].mxu1 }
0x1477   :  { %12050 = vtanh.f32 %v7612_v5 }
0x147d   :  { %v12049_v46 = vpop.eup %12048 }
0x147e   :  { %v7540_v60 = vmul.f32 %v12049_v46, %v8196_v27 }
0x1480   :  { %v7542_v56 = vsel %vm7541_vm8, %v7540_v60, 0.0 }
0x1481   :  { %v12051_v4 = vpop.eup %12050  ;;  %7543 = vadd.xlane.f32.xlu0 %v7542_v56 }
0x1482   :  { %v7616_v32 = vmul.f32 %v12051_v4, %v8196_v27 }
0x1484   :  { %v7617_v42 = vsel %vm7541_vm8, %v7616_v32, 0.0 }
0x1485   :  { %7618 = vadd.xlane.f32.xlu1 %v7617_v42 }
0x1490   :  { %v7686_v2 = vpop.f32.mrb[66].mxu0 }
0x1491   :  { %v7687_v48 = vadd.f32 %v8195_v51, %v7686_v2  ;;  %v9909_v57 = vpop.f32.mrb[67].mxu0 }
0x1493   :  { %12052 = vtanh.f32 %v7687_v48 }
0x1494   :  { %v7761_v17 = vpop.f32.mrb[66].mxu1 }
0x1495   :  { %v7762_v35 = vadd.f32 %v8195_v51, %v7761_v17  ;;  %v9944_v16 = vpop.f32.mrb[67].mxu1 }
0x1497   :  { %12054 = vtanh.f32 %v7762_v35 }
0x149d   :  { %v12053_v63 = vpop.eup %12052 }
0x149e   :  { %v7691_v14 = vmul.f32 %v12053_v63, %v8196_v27 }
0x14a0   :  { %v7692_v52 = vsel %vm7541_vm8, %v7691_v14, 0.0 }
0x14a1   :  { %v12055_v10 = vpop.eup %12054  ;;  %7693 = vadd.xlane.f32.xlu0 %v7692_v52 }
0x14a2   :  { %v7766_v15 = vmul.f32 %v12055_v10, %v8196_v27 }
0x14a4   :  { %v7767_v25 = vsel %vm7541_vm8, %v7766_v15, 0.0 }
0x14a5   :  { %7768 = vadd.xlane.f32.xlu1 %v7767_v25 }
0x14b0   :  { %v7836_v36 = vpop.f32.mrb[68].mxu0 }
0x14b1   :  { %v7837_v18 = vadd.f32 %v8195_v51, %v7836_v36  ;;  %v9979_v54 = vpop.f32.mrb[69].mxu0 }
0x14b3   :  { %12056 = vtanh.f32 %v7837_v18 }
0x14b4   :  { %v7911_v37 = vpop.f32.mrb[68].mxu1 }
0x14b5   :  { %v7912_v22 = vadd.f32 %v8195_v51, %v7911_v37  ;;  %v10014_v3 = vpop.f32.mrb[69].mxu1 }
0x14b7   :  { %12058 = vtanh.f32 %v7912_v22 }
0x14bd   :  { %v12057_v45 = vpop.eup %12056 }
0x14be   :  { %v7841_v12 = vmul.f32 %v12057_v45, %v8196_v27 }
0x14c0   :  { %v7842_v30 = vsel %vm7541_vm8, %v7841_v12, 0.0 }
0x14c1   :  { %v12059_v44 = vpop.eup %12058  ;;  %7843 = vadd.xlane.f32.xlu0 %v7842_v30 }
0x14c2   :  { %v7916_v39 = vmul.f32 %v12059_v44, %v8196_v27 }
0x14c4   :  { %v7917_v40 = vsel %vm7541_vm8, %v7916_v39, 0.0 }
0x14c5   :  { %7918 = vadd.xlane.f32.xlu1 %v7917_v40 }
0x150a   :  { %v7986_v23 = vpop.f32.mrb[70].mxu0 }
0x150b   :  { %v7987_v28 = vadd.f32 %v8195_v51, %v7986_v23  ;;  %v10049_v11 = vpop.f32.mrb[71].mxu0 }
0x150d   :  { %12060 = vtanh.f32 %v7987_v28 }
0x150e   :  { %v8061_v61 = vpop.f32.mrb[70].mxu1  ;;  %v7544_v7 = vpop.xlane.xlu0 %7543 }
0x150f   :  { %v8062_v62 = vadd.f32 %v8195_v51, %v8061_v61  ;;  %v10084_v53 = vpop.f32.mrb[71].mxu1 }
0x1511   :  { %12062 = vtanh.f32 %v8062_v62 }
0x1512   :  { %v7619_v24 = vpop.xlane.xlu1 %7618 }
0x1513   :  { %v8070_v49 = vmax.f32 %v7544_v7, %v7619_v24 }
0x1517   :  { %v12061_v1 = vpop.eup %12060 }
0x1518   :  { %v7991_v8 = vmul.f32 %v12061_v1, %v8196_v27 }
0x151a   :  { %v7992_v13 = vsel %vm7541_vm8, %v7991_v8, 0.0 }
0x151b   :  { %v12063_v31 = vpop.eup %12062  ;;  %7993 = vadd.xlane.f32.xlu0 %v7992_v13 }
0x151c   :  { %v8066_v21 = vmul.f32 %v12063_v31, %v8196_v27 }
0x151e   :  { %v8067_v55 = vsel %vm7541_vm8, %v8066_v21, 0.0 }
0x151f   :  { %8068 = vadd.xlane.f32.xlu1 %v8067_v55 }
0x152e   :  { %v7694_v34 = vpop.xlane.xlu0 %7693 }
0x152f   :  { %v8071_v47 = vmax.f32 %v8070_v49, %v7694_v34 }
0x1532   :  { %v7769_v0 = vpop.xlane.xlu1 %7768 }
0x1533   :  { %v8072_v51 = vmax.f32 %v8071_v47, %v7769_v0 }
0x154e   :  { %v7844_v41 = vpop.xlane.xlu0 %7843 }
0x154f   :  { %v8073_v59 = vmax.f32 %v8072_v51, %v7844_v41 }
0x1552   :  { %v7919_v58 = vpop.xlane.xlu1 %7918 }
0x1553   :  { %v8074_v5 = vmax.f32 %v8073_v59, %v7919_v58 }
0x15a8   :  { %v7994_v33 = vpop.xlane.xlu0 %7993 }
0x15a9   :  { %v8075_v43 = vmax.f32 %v8074_v5, %v7994_v33 }
0x15ac   :  { %v8069_v46 = vpop.xlane.xlu1 %8068 }
0x15ad   :  { %v8076_v60 = vmax.f32 %v8075_v43, %v8069_v46 }
0x15af   :  { %v8077_v56 = vsub.f32 %v7544_v7, %v8076_v60  ;;  %v8083_v27 = vsub.f32 %v7619_v24, %v8076_v60  ;;  %v8089_v4 = vsub.f32 %v7694_v34, %v8076_v60  ;;  %v8095_v32 = vsub.f32 %v7769_v0, %v8076_v60 }
0x15b0   :  { %v8101_v57 = vsub.f32 %v7844_v41, %v8076_v60  ;;  %v8107_v35 = vsub.f32 %v7919_v58, %v8076_v60  ;;  %v8113_v63 = vsub.f32 %v7994_v33, %v8076_v60  ;;  %v8119_v52 = vsub.f32 %v8069_v46, %v8076_v60 }
0x15b1   :  { %v8078_v42 = vmul.f32 1.442695, %v8077_v56  ;;  %v8084_v2 = vmul.f32 1.442695, %v8083_v27  ;;  %v8090_v48 = vmul.f32 1.442695, %v8089_v4 }
0x15b2   :  { %v8096_v17 = vmul.f32 1.442695, %v8095_v32  ;;  %v8102_v16 = vmul.f32 1.442695, %v8101_v57  ;;  %v8108_v14 = vmul.f32 1.442695, %v8107_v35 }
0x15b3   :  { %12064 = vpow2.f32 %v8078_v42  ;;  %v8114_v10 = vmul.f32 1.442695, %v8113_v63  ;;  %v8120_v15 = vmul.f32 1.442695, %v8119_v52 }
0x15b4   :  { %12066 = vpow2.f32 %v8084_v2 }
0x15b5   :  { %12068 = vpow2.f32 %v8090_v48 }
0x15b6   :  { %12070 = vpow2.f32 %v8096_v17 }
0x15b7   :  { %12072 = vpow2.f32 %v8102_v16 }
0x15b8   :  { %12074 = vpow2.f32 %v8108_v14 }
0x15b9   :  { %12076 = vpow2.f32 %v8114_v10 }
0x15ba   :  { %12078 = vpow2.f32 %v8120_v15 }
0x15bd   :  { %v12065_v25 = vpop.eup %12064 }
0x15be   :  { %v12067_v36 = vpop.eup %12066  ;;  %v8080_v18 = vmul.f32 %v12065_v25, %v14337_v38 }
0x15bf   :  { %v12069_v54 = vpop.eup %12068  ;;  %v8088_v37 = vadd.f32 %v12067_v36, %v12065_v25  ;;  %v8086_v22 = vmul.f32 %v12067_v36, %v14347_v26 }
0x15c0   :  { %v12071_v3 = vpop.eup %12070  ;;  %v8092_v30 = vmul.f32 %v12069_v54, %v14382_v9 }
0x15c1   :  { %v8094_v45 = vadd.f32 %v12069_v54, %v8088_v37  ;;  %v8087_v12 = vadd.f32 %v8086_v22, %v8080_v18  ;;  %v12073_v40 = vpop.eup %12072  ;;  %v8098_v23 = vmul.f32 %v12071_v3, %v14391_v6 }
0x15c2   :  { %v12075_v11 = vpop.eup %12074  ;;  %v8104_v53 = vmul.f32 %v12073_v40, %v14430_v19 }
0x15c3   :  { %v8100_v44 = vadd.f32 %v12071_v3, %v8094_v45  ;;  %v8093_v39 = vadd.f32 %v8092_v30, %v8087_v12  ;;  %v12077_v38 = vpop.eup %12076  ;;  %v8110_v31 = vmul.f32 %v12075_v11, %v14439_v29 }
0x15c4   :  { %v12079_v26 = vpop.eup %12078  ;;  %v8116_v21 = vmul.f32 %v12077_v38, %v14479_v20 }
0x15c5   :  { %v8106_v28 = vadd.f32 %v12073_v40, %v8100_v44  ;;  %v8099_v61 = vadd.f32 %v8098_v23, %v8093_v39  ;;  %v8122_v6 = vmul.f32 %v12079_v26, %v14485_v50 }
0x15c7   :  { %v8112_v62 = vadd.f32 %v12075_v11, %v8106_v28  ;;  %v8105_v8 = vadd.f32 %v8104_v53, %v8099_v61 }
0x15c9   :  { %v8118_v1 = vadd.f32 %v12077_v38, %v8112_v62  ;;  %v8111_v9 = vadd.f32 %v8110_v31, %v8105_v8 }
0x15cb   :  { %v8124_v13 = vadd.f32 %v12079_v26, %v8118_v1  ;;  %v8117_v55 = vadd.f32 %v8116_v21, %v8111_v9 }
0x15cd   :  { %12080 = vrcp.f32 %v8124_v13  ;;  %v8123_v7 = vadd.f32 %v8122_v6, %v8117_v55 }
0x15d7   :  { %v12081_v24 = vpop.eup %12080 }
0x15d8   :  { %v8126_v34 = vmul.f32 %v12081_v24, %v8123_v7 }
0x15da   :  { %8127 = vst [vmem:[#allocation12] sm:$0x3] %v8126_v34 }
0x15db   :  { %12181 = shalt.err (!%p12178_p8)
}
0x15dc   :  { %s12182_s29 = scalar_lea.hbm %s14536_s14, 32 }
0x15dd   :  { %p12183_p9 = scmp.ne.s32.totalorder %s14536_s14, %s12182_s29  ;;  %p12186_p10 = scmp.lt.u32.totalorder %s12182_s29, %s14536_s14 }
0x15df   :  { %p12188_p11 = pnand %p12186_p10, %p12183_p9 }
0x15e1   :  { %12191 = shalt.err (!%p12188_p11)
}
0x15e2   :  { %8137 = dma.vmem_to_hbm [thread:$0]  %s8135_s13, 32, %s14536_s14, [#allocation6]  }
0x15e3   :  { %12198 = dma.done.wait [#allocation6], 32  }
0x15e4   :  { %12199 = vsyncadd [#allocation6], 4294967264 }
0x15e5   :  { %8141 = vsyncpa [#allocation5], 1 }
0x15e6   :  { %8142 = vsyncpa [#allocation8], 1 }
0x15e7   :  { %8143 = vsyncpa [#allocation11], 1 }
0x15e8   :  { %8144 = vsyncpa [#allocation6], 1 }

</bundles_post_ra>
